<compile_context>
chip_gen: v5e
topology: v5e:2x2
jax: 0.10.0
libtpu: 0.0.40
codegen_flags: <defaults>
</compile_context>

<pallas_src>
import functools

import jax
import jax.numpy as jnp
from jax.experimental import pallas as pl
from jax.experimental.pallas import tpu as pltpu


def _round_up(x, m):
    return -(-x // m) * m


def _sigmoid(x):
    # exp on the EUP; approximate reciprocal also on the EUP (frees the VPU).
    return pl.reciprocal(1.0 + jnp.exp(-x), approx=True)


# ----------------------------------------------------------------------------
# Fused kernel: gather + 2-layer LSTM + final Linear, single grid step.
# ----------------------------------------------------------------------------
def _fused_kernel(ids_ref, topic_ref, table_ref, *rest, B, T, E, H, num_layers):
    S = T + 1
    nw = 3 * num_layers + 2
    w_refs = rest[:nw]                       # per layer: w_ih_T, w_hh_T, b ; then w_lin_T, b_lin
    out_ref = rest[nw]
    x_buf, g_buf, h_buf = rest[nw + 1:nw + 4]
    Bp = x_buf.shape[1]

    # ---- 1) assemble inputs in time-major, batch-padded layout --------------
    # x_buf[t=0]  <- topic_vec ;  x_buf[t=1..T, b] <- embed[captions[b, t-1]]
    x_buf[...] = jnp.zeros_like(x_buf)                       # zero padded rows
    x_buf[0, 0:B, :] = topic_ref[...]
    for b in range(B):
        for t in range(T):
            row = table_ref[pl.ds(ids_ref[b * T + t], 1), :]  # (1, E) dynamic row gather
            x_buf[1 + t, b:b + 1, :] = row

    # ---- 2) stacked LSTM layers (PyTorch gate order i, f, g, o) -------------
    h = jnp.zeros((Bp, H), jnp.float32)
    for layer in range(num_layers):
        w_ih_ref, w_hh_ref, b_ref = w_refs[3 * layer:3 * layer + 3]
        src = x_buf if layer == 0 else h_buf
        K = src.shape[-1]

        # Time-parallel input projection for all S*Bp rows in one MXU matmul.
        xin = src[...].reshape(S * Bp, K).astype(jnp.bfloat16)
        g_all = jnp.dot(xin, w_ih_ref[...],
                        preferred_element_type=jnp.float32) + b_ref[...]
        g_buf[...] = g_all.reshape(S, Bp, 4 * H)

        # Sequential recurrence, fully unrolled (S is small & static).
        h = jnp.zeros((Bp, H), jnp.float32)
        c = jnp.zeros((Bp, H), jnp.float32)
        last_layer = layer == num_layers - 1
        for t in range(S):
            g = g_buf[t] + jnp.dot(h.astype(jnp.bfloat16), w_hh_ref[...],
                                   preferred_element_type=jnp.float32)
            i_g = _sigmoid(g[:, 0 * H:1 * H])
            f_g = _sigmoid(g[:, 1 * H:2 * H])
            g_g = jnp.tanh(g[:, 2 * H:3 * H])
            o_g = _sigmoid(g[:, 3 * H:4 * H])
            c = f_g * c + i_g * g_g
            h = o_g * jnp.tanh(c)
            if not last_layer:
                h_buf[t] = h          # next layer's batched input; top layer skips

    # ---- 3) final Linear on the last-step hidden state ----------------------
    w_lin_ref, b_lin_ref = w_refs[nw - 2], w_refs[nw - 1]
    logits = jnp.dot(h.astype(jnp.bfloat16), w_lin_ref[...],
                     preferred_element_type=jnp.float32) + b_lin_ref[...]
    out_ref[...] = logits[0:B, :]


# ----------------------------------------------------------------------------
# Wrapper
# ----------------------------------------------------------------------------
def word_rnn_forward(topic_vec, captions, params, hidden_size, num_layers):
    B, T = captions.shape
    V, E = params['embed'].shape
    H = hidden_size
    S = T + 1
    Bp = _round_up(B, 8)

    ids = captions.reshape(-1).astype(jnp.int32)
    topic2d = topic_vec.reshape(B, E).astype(jnp.float32)

    weights, w_specs = [], []
    for lp in params['lstm']:
        k_in = lp['w_ih_T'].shape[0]
        weights += [lp['w_ih_T'], lp['w_hh_T'], lp['b']]
        w_specs += [pl.BlockSpec((k_in, 4 * H), lambda i, ids_ref: (0, 0)),
                    pl.BlockSpec((H, 4 * H), lambda i, ids_ref: (0, 0)),
                    pl.BlockSpec((1, 4 * H), lambda i, ids_ref: (0, 0))]
    weights += [params['w_lin_T'], params['b_lin']]
    w_specs += [pl.BlockSpec((H, V), lambda i, ids_ref: (0, 0)),
                pl.BlockSpec((1, V), lambda i, ids_ref: (0, 0))]

    kernel = functools.partial(_fused_kernel, B=B, T=T, E=E, H=H,
                               num_layers=num_layers)

    return pl.pallas_call(
        kernel,
        out_shape=jax.ShapeDtypeStruct((B, V), jnp.float32),
        grid_spec=pltpu.PrefetchScalarGridSpec(
            num_scalar_prefetch=1,            # caption ids -> SMEM
            grid=(1,),
            in_specs=[pl.BlockSpec((B, E), lambda i, ids_ref: (0, 0)),
                      pl.BlockSpec((V, E), lambda i, ids_ref: (0, 0))] + w_specs,
            out_specs=pl.BlockSpec((B, V), lambda i, ids_ref: (0, 0)),
            scratch_shapes=[pltpu.VMEM((S, Bp, E), jnp.float32),      # x (gathered)
                            pltpu.VMEM((S, Bp, 4 * H), jnp.float32),  # gate preacts
                            pltpu.VMEM((S, Bp, H), jnp.float32)]),    # layer outputs
        compiler_params=pltpu.CompilerParams(
            dimension_semantics=("arbitrary",)),
    )(ids, topic2d, params['embed'], *weights)


# ----------------------------------------------------------------------------
# Parameters (match WordRNN.__init_weights / PyTorch defaults; pre-packed)
# ----------------------------------------------------------------------------
def init_params(key, vocab_size, embed_size, hidden_size, num_layers):
    keys = iter(jax.random.split(key, 4 * num_layers + 4))

    def uni(shape, bound):
        return jax.random.uniform(next(keys), shape, jnp.float32, -bound, bound)

    params = {}
    params['embed'] = uni((vocab_size, embed_size), 0.1)          # nn.Embedding U(-.1,.1)

    bound = 1.0 / (hidden_size ** 0.5)                            # nn.LSTM default init
    lstm, k_in = [], embed_size
    for _ in range(num_layers):
        w_ih = uni((4 * hidden_size, k_in), bound)
        w_hh = uni((4 * hidden_size, hidden_size), bound)
        b_ih = uni((4 * hidden_size,), bound)
        b_hh = uni((4 * hidden_size,), bound)
        lstm.append(dict(
            w_ih_T=jnp.transpose(w_ih).astype(jnp.bfloat16),
            w_hh_T=jnp.transpose(w_hh).astype(jnp.bfloat16),
            b=(b_ih + b_hh).reshape(1, -1).astype(jnp.float32)))
        k_in = hidden_size
    params['lstm'] = lstm

    # nn.Linear(hidden, vocab): weight ~ U(-0.1, 0.1), bias = 0; pre-transposed.
    params['w_lin_T'] = jnp.transpose(
        uni((vocab_size, hidden_size), 0.1)).astype(jnp.bfloat16)
    params['b_lin'] = jnp.zeros((1, vocab_size), jnp.float32)
    return params


# ----------------------------------------------------------------------------
# Pure-JAX reference (same math as WordRNN.forward) for a sanity check.
# ----------------------------------------------------------------------------
def reference_forward(topic_vec, captions, params, hidden_size, num_layers):
    B, T = captions.shape
    H = hidden_size
    emb = params['embed'][captions]                                    # (B, T, E)
    x = jnp.concatenate(
        [topic_vec.astype(jnp.float32).reshape(B, 1, -1), emb], axis=1)
    h = jnp.zeros((B, H), jnp.float32)
    for layer in range(num_layers):
        lp = params['lstm'][layer]
        w_ih = lp['w_ih_T'].astype(jnp.float32)
        w_hh = lp['w_hh_T'].astype(jnp.float32)
        b = lp['b']
        S = x.shape[1]
        h = jnp.zeros((B, H), jnp.float32)
        c = jnp.zeros((B, H), jnp.float32)
        hs = []
        for t in range(S):
            g = x[:, t] @ w_ih + b + h @ w_hh
            i_g = jax.nn.sigmoid(g[:, 0 * H:1 * H])
            f_g = jax.nn.sigmoid(g[:, 1 * H:2 * H])
            g_g = jnp.tanh(g[:, 2 * H:3 * H])
            o_g = jax.nn.sigmoid(g[:, 3 * H:4 * H])
            c = f_g * c + i_g * g_g
            h = o_g * jnp.tanh(c)
            hs.append(h)
        x = jnp.stack(hs, axis=1)
    return h @ params['w_lin_T'].astype(jnp.float32) + params['b_lin']


# ----------------------------------------------------------------------------
if __name__ == "__main__":
    key = jax.random.PRNGKey(0)
    k_params, k_topic, k_cap = jax.random.split(key, 3)

    # Small, lane-friendly shapes consistent with the module.
    B, T = 2, 8                      # batch, n_max
    EMBED, HIDDEN, VOCAB, LAYERS = 256, 128, 1024, 2

    params = init_params(k_params, VOCAB, EMBED, HIDDEN, LAYERS)
    topic_vec = jax.random.normal(k_topic, (B, 1, EMBED), jnp.float32)
    captions = jax.random.randint(k_cap, (B, T), 0, VOCAB, jnp.int32)

    fwd = jax.jit(lambda tv, cap: word_rnn_forward(tv, cap, params, HIDDEN, LAYERS))
    out = jax.block_until_ready(fwd(topic_vec, captions))

    assert out.shape == (B, VOCAB), out.shape
    assert out.dtype == jnp.float32
    assert bool(jnp.all(jnp.isfinite(out)))

    # bf16 MXU operands + approx-reciprocal sigmoid => loose tolerance vs f32 ref.
    ref = reference_forward(topic_vec, captions, params, HIDDEN, LAYERS)
    max_err = float(jnp.max(jnp.abs(out - ref)))
    assert max_err < 7.5e-2, f"max abs err {max_err}"

    print("KERNEL_OK")
</pallas_src>

<mosaic_0001>
module attributes {stable_mosaic.version = 11 : i64} {
  func.func @_fused_kernel(%arg0: i32, %arg1: memref<16xi32, #tpu.memory_space<smem>>, %arg2: memref<2x256xf32, #tpu.memory_space<vmem>>, %arg3: memref<1024x256xf32, #tpu.memory_space<vmem>>, %arg4: memref<256x512xbf16, #tpu.memory_space<vmem>>, %arg5: memref<128x512xbf16, #tpu.memory_space<vmem>>, %arg6: memref<1x512xf32, #tpu.memory_space<vmem>>, %arg7: memref<128x512xbf16, #tpu.memory_space<vmem>>, %arg8: memref<128x512xbf16, #tpu.memory_space<vmem>>, %arg9: memref<1x512xf32, #tpu.memory_space<vmem>>, %arg10: memref<128x1024xbf16, #tpu.memory_space<vmem>>, %arg11: memref<1x1024xf32, #tpu.memory_space<vmem>>, %arg12: memref<2x1024xf32, #tpu.memory_space<vmem>>, %arg13: memref<9x8x256xf32, #tpu.memory_space<vmem>>, %arg14: memref<9x8x512xf32, #tpu.memory_space<vmem>>, %arg15: memref<9x8x128xf32, #tpu.memory_space<vmem>>) attributes {dimension_semantics = [#tpu.dimension_semantics<arbitrary>], iteration_bounds = array<i64: 1>, scalar_prefetch = 1 : i64, scratch_operands = 3 : i64, tpu.core_type = #tpu.core_type<tc>, window_params = [{pipeline_mode = #tpu.pipeline_mode<synchronous>, transform_indices = @transform_0, window_bounds = array<i64: 2, 256>}, {pipeline_mode = #tpu.pipeline_mode<synchronous>, transform_indices = @transform_1, window_bounds = array<i64: 1024, 256>}, {pipeline_mode = #tpu.pipeline_mode<synchronous>, transform_indices = @transform_2, window_bounds = array<i64: 256, 512>}, {pipeline_mode = #tpu.pipeline_mode<synchronous>, transform_indices = @transform_3, window_bounds = array<i64: 128, 512>}, {pipeline_mode = #tpu.pipeline_mode<synchronous>, transform_indices = @transform_4, window_bounds = array<i64: 1, 512>}, {pipeline_mode = #tpu.pipeline_mode<synchronous>, transform_indices = @transform_5, window_bounds = array<i64: 128, 512>}, {pipeline_mode = #tpu.pipeline_mode<synchronous>, transform_indices = @transform_6, window_bounds = array<i64: 128, 512>}, {pipeline_mode = #tpu.pipeline_mode<synchronous>, transform_indices = @transform_7, window_bounds = array<i64: 1, 512>}, {pipeline_mode = #tpu.pipeline_mode<synchronous>, transform_indices = @transform_8, window_bounds = array<i64: 128, 1024>}, {pipeline_mode = #tpu.pipeline_mode<synchronous>, transform_indices = @transform_9, window_bounds = array<i64: 1, 1024>}, {pipeline_mode = #tpu.pipeline_mode<synchronous>, transform_indices = @transform_10, window_bounds = array<i64: 2, 1024>}]} {
    %cst = arith.constant 0.000000e+00 : f32
    %0 = vector.broadcast %cst : f32 to vector<9x8x256xf32>
    %c0 = arith.constant 0 : index
    %c0_0 = arith.constant 0 : index
    %c0_1 = arith.constant 0 : index
    %1 = vector.load %arg13[%c0, %c0_0, %c0_1] : memref<9x8x256xf32, #tpu.memory_space<vmem>>, vector<9x8x256xf32>
    tpu.vector_store %arg13[%c0, %c0_0, %c0_1], %0 {strides = array<i32>} : memref<9x8x256xf32, #tpu.memory_space<vmem>>, vector<9x8x256xf32>,
    %c0_2 = arith.constant 0 : index
    %c0_3 = arith.constant 0 : index
    %2 = vector.load %arg2[%c0_2, %c0_3] : memref<2x256xf32, #tpu.memory_space<vmem>>, vector<2x256xf32>
    %c0_4 = arith.constant 0 : index
    %c0_5 = arith.constant 0 : index
    %c0_6 = arith.constant 0 : index
    %3 = vector.load %arg13[%c0_4, %c0_5, %c0_6] : memref<9x8x256xf32, #tpu.memory_space<vmem>>, vector<1x2x256xf32>
    %4 = vector.shape_cast %3 : vector<1x2x256xf32> to vector<2x256xf32>
    %5 = vector.shape_cast %2 : vector<2x256xf32> to vector<1x2x256xf32>
    tpu.vector_store %arg13[%c0_4, %c0_5, %c0_6], %5 {strides = array<i32>} : memref<9x8x256xf32, #tpu.memory_space<vmem>>, vector<1x2x256xf32>,
    %c0_7 = arith.constant 0 : index
    %6 = memref.load %arg1[%c0_7] : memref<16xi32, #tpu.memory_space<smem>>
    %7 = arith.index_cast %6 : i32 to index
    %c0_8 = arith.constant 0 : index
    %8 = vector.load %arg3[%7, %c0_8] : memref<1024x256xf32, #tpu.memory_space<vmem>>, vector<1x256xf32>
    %c1 = arith.constant 1 : index
    %c0_9 = arith.constant 0 : index
    %c0_10 = arith.constant 0 : index
    %9 = vector.load %arg13[%c1, %c0_9, %c0_10] : memref<9x8x256xf32, #tpu.memory_space<vmem>>, vector<1x1x256xf32>
    %10 = vector.shape_cast %9 : vector<1x1x256xf32> to vector<1x256xf32>
    %11 = vector.shape_cast %8 : vector<1x256xf32> to vector<1x1x256xf32>
    tpu.vector_store %arg13[%c1, %c0_9, %c0_10], %11 {strides = array<i32>} : memref<9x8x256xf32, #tpu.memory_space<vmem>>, vector<1x1x256xf32>,
    %c1_11 = arith.constant 1 : index
    %12 = memref.load %arg1[%c1_11] : memref<16xi32, #tpu.memory_space<smem>>
    %13 = arith.index_cast %12 : i32 to index
    %c0_12 = arith.constant 0 : index
    %14 = vector.load %arg3[%13, %c0_12] : memref<1024x256xf32, #tpu.memory_space<vmem>>, vector<1x256xf32>
    %c2 = arith.constant 2 : index
    %c0_13 = arith.constant 0 : index
    %c0_14 = arith.constant 0 : index
    %15 = vector.load %arg13[%c2, %c0_13, %c0_14] : memref<9x8x256xf32, #tpu.memory_space<vmem>>, vector<1x1x256xf32>
    %16 = vector.shape_cast %15 : vector<1x1x256xf32> to vector<1x256xf32>
    %17 = vector.shape_cast %14 : vector<1x256xf32> to vector<1x1x256xf32>
    tpu.vector_store %arg13[%c2, %c0_13, %c0_14], %17 {strides = array<i32>} : memref<9x8x256xf32, #tpu.memory_space<vmem>>, vector<1x1x256xf32>,
    %c2_15 = arith.constant 2 : index
    %18 = memref.load %arg1[%c2_15] : memref<16xi32, #tpu.memory_space<smem>>
    %19 = arith.index_cast %18 : i32 to index
    %c0_16 = arith.constant 0 : index
    %20 = vector.load %arg3[%19, %c0_16] : memref<1024x256xf32, #tpu.memory_space<vmem>>, vector<1x256xf32>
    %c3 = arith.constant 3 : index
    %c0_17 = arith.constant 0 : index
    %c0_18 = arith.constant 0 : index
    %21 = vector.load %arg13[%c3, %c0_17, %c0_18] : memref<9x8x256xf32, #tpu.memory_space<vmem>>, vector<1x1x256xf32>
    %22 = vector.shape_cast %21 : vector<1x1x256xf32> to vector<1x256xf32>
    %23 = vector.shape_cast %20 : vector<1x256xf32> to vector<1x1x256xf32>
    tpu.vector_store %arg13[%c3, %c0_17, %c0_18], %23 {strides = array<i32>} : memref<9x8x256xf32, #tpu.memory_space<vmem>>, vector<1x1x256xf32>,
    %c3_19 = arith.constant 3 : index
    %24 = memref.load %arg1[%c3_19] : memref<16xi32, #tpu.memory_space<smem>>
    %25 = arith.index_cast %24 : i32 to index
    %c0_20 = arith.constant 0 : index
    %26 = vector.load %arg3[%25, %c0_20] : memref<1024x256xf32, #tpu.memory_space<vmem>>, vector<1x256xf32>
    %c4 = arith.constant 4 : index
    %c0_21 = arith.constant 0 : index
    %c0_22 = arith.constant 0 : index
    %27 = vector.load %arg13[%c4, %c0_21, %c0_22] : memref<9x8x256xf32, #tpu.memory_space<vmem>>, vector<1x1x256xf32>
    %28 = vector.shape_cast %27 : vector<1x1x256xf32> to vector<1x256xf32>
    %29 = vector.shape_cast %26 : vector<1x256xf32> to vector<1x1x256xf32>
    tpu.vector_store %arg13[%c4, %c0_21, %c0_22], %29 {strides = array<i32>} : memref<9x8x256xf32, #tpu.memory_space<vmem>>, vector<1x1x256xf32>,
    %c4_23 = arith.constant 4 : index
    %30 = memref.load %arg1[%c4_23] : memref<16xi32, #tpu.memory_space<smem>>
    %31 = arith.index_cast %30 : i32 to index
    %c0_24 = arith.constant 0 : index
    %32 = vector.load %arg3[%31, %c0_24] : memref<1024x256xf32, #tpu.memory_space<vmem>>, vector<1x256xf32>
    %c5 = arith.constant 5 : index
    %c0_25 = arith.constant 0 : index
    %c0_26 = arith.constant 0 : index
    %33 = vector.load %arg13[%c5, %c0_25, %c0_26] : memref<9x8x256xf32, #tpu.memory_space<vmem>>, vector<1x1x256xf32>
    %34 = vector.shape_cast %33 : vector<1x1x256xf32> to vector<1x256xf32>
    %35 = vector.shape_cast %32 : vector<1x256xf32> to vector<1x1x256xf32>
    tpu.vector_store %arg13[%c5, %c0_25, %c0_26], %35 {strides = array<i32>} : memref<9x8x256xf32, #tpu.memory_space<vmem>>, vector<1x1x256xf32>,
    %c5_27 = arith.constant 5 : index
    %36 = memref.load %arg1[%c5_27] : memref<16xi32, #tpu.memory_space<smem>>
    %37 = arith.index_cast %36 : i32 to index
    %c0_28 = arith.constant 0 : index
    %38 = vector.load %arg3[%37, %c0_28] : memref<1024x256xf32, #tpu.memory_space<vmem>>, vector<1x256xf32>
    %c6 = arith.constant 6 : index
    %c0_29 = arith.constant 0 : index
    %c0_30 = arith.constant 0 : index
    %39 = vector.load %arg13[%c6, %c0_29, %c0_30] : memref<9x8x256xf32, #tpu.memory_space<vmem>>, vector<1x1x256xf32>
    %40 = vector.shape_cast %39 : vector<1x1x256xf32> to vector<1x256xf32>
    %41 = vector.shape_cast %38 : vector<1x256xf32> to vector<1x1x256xf32>
    tpu.vector_store %arg13[%c6, %c0_29, %c0_30], %41 {strides = array<i32>} : memref<9x8x256xf32, #tpu.memory_space<vmem>>, vector<1x1x256xf32>,
    %c6_31 = arith.constant 6 : index
    %42 = memref.load %arg1[%c6_31] : memref<16xi32, #tpu.memory_space<smem>>
    %43 = arith.index_cast %42 : i32 to index
    %c0_32 = arith.constant 0 : index
    %44 = vector.load %arg3[%43, %c0_32] : memref<1024x256xf32, #tpu.memory_space<vmem>>, vector<1x256xf32>
    %c7 = arith.constant 7 : index
    %c0_33 = arith.constant 0 : index
    %c0_34 = arith.constant 0 : index
    %45 = vector.load %arg13[%c7, %c0_33, %c0_34] : memref<9x8x256xf32, #tpu.memory_space<vmem>>, vector<1x1x256xf32>
    %46 = vector.shape_cast %45 : vector<1x1x256xf32> to vector<1x256xf32>
    %47 = vector.shape_cast %44 : vector<1x256xf32> to vector<1x1x256xf32>
    tpu.vector_store %arg13[%c7, %c0_33, %c0_34], %47 {strides = array<i32>} : memref<9x8x256xf32, #tpu.memory_space<vmem>>, vector<1x1x256xf32>,
    %c7_35 = arith.constant 7 : index
    %48 = memref.load %arg1[%c7_35] : memref<16xi32, #tpu.memory_space<smem>>
    %49 = arith.index_cast %48 : i32 to index
    %c0_36 = arith.constant 0 : index
    %50 = vector.load %arg3[%49, %c0_36] : memref<1024x256xf32, #tpu.memory_space<vmem>>, vector<1x256xf32>
    %c8 = arith.constant 8 : index
    %c0_37 = arith.constant 0 : index
    %c0_38 = arith.constant 0 : index
    %51 = vector.load %arg13[%c8, %c0_37, %c0_38] : memref<9x8x256xf32, #tpu.memory_space<vmem>>, vector<1x1x256xf32>
    %52 = vector.shape_cast %51 : vector<1x1x256xf32> to vector<1x256xf32>
    %53 = vector.shape_cast %50 : vector<1x256xf32> to vector<1x1x256xf32>
    tpu.vector_store %arg13[%c8, %c0_37, %c0_38], %53 {strides = array<i32>} : memref<9x8x256xf32, #tpu.memory_space<vmem>>, vector<1x1x256xf32>,
    %c8_39 = arith.constant 8 : index
    %54 = memref.load %arg1[%c8_39] : memref<16xi32, #tpu.memory_space<smem>>
    %55 = arith.index_cast %54 : i32 to index
    %c0_40 = arith.constant 0 : index
    %56 = vector.load %arg3[%55, %c0_40] : memref<1024x256xf32, #tpu.memory_space<vmem>>, vector<1x256xf32>
    %c1_41 = arith.constant 1 : index
    %c1_42 = arith.constant 1 : index
    %c0_43 = arith.constant 0 : index
    %57 = vector.load %arg13[%c1_41, %c1_42, %c0_43] : memref<9x8x256xf32, #tpu.memory_space<vmem>>, vector<1x1x256xf32>
    %58 = vector.shape_cast %57 : vector<1x1x256xf32> to vector<1x256xf32>
    %59 = vector.shape_cast %56 : vector<1x256xf32> to vector<1x1x256xf32>
    tpu.vector_store %arg13[%c1_41, %c1_42, %c0_43], %59 {strides = array<i32>} : memref<9x8x256xf32, #tpu.memory_space<vmem>>, vector<1x1x256xf32>,
    %c9 = arith.constant 9 : index
    %60 = memref.load %arg1[%c9] : memref<16xi32, #tpu.memory_space<smem>>
    %61 = arith.index_cast %60 : i32 to index
    %c0_44 = arith.constant 0 : index
    %62 = vector.load %arg3[%61, %c0_44] : memref<1024x256xf32, #tpu.memory_space<vmem>>, vector<1x256xf32>
    %c2_45 = arith.constant 2 : index
    %c1_46 = arith.constant 1 : index
    %c0_47 = arith.constant 0 : index
    %63 = vector.load %arg13[%c2_45, %c1_46, %c0_47] : memref<9x8x256xf32, #tpu.memory_space<vmem>>, vector<1x1x256xf32>
    %64 = vector.shape_cast %63 : vector<1x1x256xf32> to vector<1x256xf32>
    %65 = vector.shape_cast %62 : vector<1x256xf32> to vector<1x1x256xf32>
    tpu.vector_store %arg13[%c2_45, %c1_46, %c0_47], %65 {strides = array<i32>} : memref<9x8x256xf32, #tpu.memory_space<vmem>>, vector<1x1x256xf32>,
    %c10 = arith.constant 10 : index
    %66 = memref.load %arg1[%c10] : memref<16xi32, #tpu.memory_space<smem>>
    %67 = arith.index_cast %66 : i32 to index
    %c0_48 = arith.constant 0 : index
    %68 = vector.load %arg3[%67, %c0_48] : memref<1024x256xf32, #tpu.memory_space<vmem>>, vector<1x256xf32>
    %c3_49 = arith.constant 3 : index
    %c1_50 = arith.constant 1 : index
    %c0_51 = arith.constant 0 : index
    %69 = vector.load %arg13[%c3_49, %c1_50, %c0_51] : memref<9x8x256xf32, #tpu.memory_space<vmem>>, vector<1x1x256xf32>
    %70 = vector.shape_cast %69 : vector<1x1x256xf32> to vector<1x256xf32>
    %71 = vector.shape_cast %68 : vector<1x256xf32> to vector<1x1x256xf32>
    tpu.vector_store %arg13[%c3_49, %c1_50, %c0_51], %71 {strides = array<i32>} : memref<9x8x256xf32, #tpu.memory_space<vmem>>, vector<1x1x256xf32>,
    %c11 = arith.constant 11 : index
    %72 = memref.load %arg1[%c11] : memref<16xi32, #tpu.memory_space<smem>>
    %73 = arith.index_cast %72 : i32 to index
    %c0_52 = arith.constant 0 : index
    %74 = vector.load %arg3[%73, %c0_52] : memref<1024x256xf32, #tpu.memory_space<vmem>>, vector<1x256xf32>
    %c4_53 = arith.constant 4 : index
    %c1_54 = arith.constant 1 : index
    %c0_55 = arith.constant 0 : index
    %75 = vector.load %arg13[%c4_53, %c1_54, %c0_55] : memref<9x8x256xf32, #tpu.memory_space<vmem>>, vector<1x1x256xf32>
    %76 = vector.shape_cast %75 : vector<1x1x256xf32> to vector<1x256xf32>
    %77 = vector.shape_cast %74 : vector<1x256xf32> to vector<1x1x256xf32>
    tpu.vector_store %arg13[%c4_53, %c1_54, %c0_55], %77 {strides = array<i32>} : memref<9x8x256xf32, #tpu.memory_space<vmem>>, vector<1x1x256xf32>,
    %c12 = arith.constant 12 : index
    %78 = memref.load %arg1[%c12] : memref<16xi32, #tpu.memory_space<smem>>
    %79 = arith.index_cast %78 : i32 to index
    %c0_56 = arith.constant 0 : index
    %80 = vector.load %arg3[%79, %c0_56] : memref<1024x256xf32, #tpu.memory_space<vmem>>, vector<1x256xf32>
    %c5_57 = arith.constant 5 : index
    %c1_58 = arith.constant 1 : index
    %c0_59 = arith.constant 0 : index
    %81 = vector.load %arg13[%c5_57, %c1_58, %c0_59] : memref<9x8x256xf32, #tpu.memory_space<vmem>>, vector<1x1x256xf32>
    %82 = vector.shape_cast %81 : vector<1x1x256xf32> to vector<1x256xf32>
    %83 = vector.shape_cast %80 : vector<1x256xf32> to vector<1x1x256xf32>
    tpu.vector_store %arg13[%c5_57, %c1_58, %c0_59], %83 {strides = array<i32>} : memref<9x8x256xf32, #tpu.memory_space<vmem>>, vector<1x1x256xf32>,
    %c13 = arith.constant 13 : index
    %84 = memref.load %arg1[%c13] : memref<16xi32, #tpu.memory_space<smem>>
    %85 = arith.index_cast %84 : i32 to index
    %c0_60 = arith.constant 0 : index
    %86 = vector.load %arg3[%85, %c0_60] : memref<1024x256xf32, #tpu.memory_space<vmem>>, vector<1x256xf32>
    %c6_61 = arith.constant 6 : index
    %c1_62 = arith.constant 1 : index
    %c0_63 = arith.constant 0 : index
    %87 = vector.load %arg13[%c6_61, %c1_62, %c0_63] : memref<9x8x256xf32, #tpu.memory_space<vmem>>, vector<1x1x256xf32>
    %88 = vector.shape_cast %87 : vector<1x1x256xf32> to vector<1x256xf32>
    %89 = vector.shape_cast %86 : vector<1x256xf32> to vector<1x1x256xf32>
    tpu.vector_store %arg13[%c6_61, %c1_62, %c0_63], %89 {strides = array<i32>} : memref<9x8x256xf32, #tpu.memory_space<vmem>>, vector<1x1x256xf32>,
    %c14 = arith.constant 14 : index
    %90 = memref.load %arg1[%c14] : memref<16xi32, #tpu.memory_space<smem>>
    %91 = arith.index_cast %90 : i32 to index
    %c0_64 = arith.constant 0 : index
    %92 = vector.load %arg3[%91, %c0_64] : memref<1024x256xf32, #tpu.memory_space<vmem>>, vector<1x256xf32>
    %c7_65 = arith.constant 7 : index
    %c1_66 = arith.constant 1 : index
    %c0_67 = arith.constant 0 : index
    %93 = vector.load %arg13[%c7_65, %c1_66, %c0_67] : memref<9x8x256xf32, #tpu.memory_space<vmem>>, vector<1x1x256xf32>
    %94 = vector.shape_cast %93 : vector<1x1x256xf32> to vector<1x256xf32>
    %95 = vector.shape_cast %92 : vector<1x256xf32> to vector<1x1x256xf32>
    tpu.vector_store %arg13[%c7_65, %c1_66, %c0_67], %95 {strides = array<i32>} : memref<9x8x256xf32, #tpu.memory_space<vmem>>, vector<1x1x256xf32>,
    %c15 = arith.constant 15 : index
    %96 = memref.load %arg1[%c15] : memref<16xi32, #tpu.memory_space<smem>>
    %97 = arith.index_cast %96 : i32 to index
    %c0_68 = arith.constant 0 : index
    %98 = vector.load %arg3[%97, %c0_68] : memref<1024x256xf32, #tpu.memory_space<vmem>>, vector<1x256xf32>
    %c8_69 = arith.constant 8 : index
    %c1_70 = arith.constant 1 : index
    %c0_71 = arith.constant 0 : index
    %99 = vector.load %arg13[%c8_69, %c1_70, %c0_71] : memref<9x8x256xf32, #tpu.memory_space<vmem>>, vector<1x1x256xf32>
    %100 = vector.shape_cast %99 : vector<1x1x256xf32> to vector<1x256xf32>
    %101 = vector.shape_cast %98 : vector<1x256xf32> to vector<1x1x256xf32>
    tpu.vector_store %arg13[%c8_69, %c1_70, %c0_71], %101 {strides = array<i32>} : memref<9x8x256xf32, #tpu.memory_space<vmem>>, vector<1x1x256xf32>,
    %c0_72 = arith.constant 0 : index
    %c0_73 = arith.constant 0 : index
    %c0_74 = arith.constant 0 : index
    %102 = vector.load %arg13[%c0_72, %c0_73, %c0_74] : memref<9x8x256xf32, #tpu.memory_space<vmem>>, vector<9x8x256xf32>
    %103 = vector.shape_cast %102 : vector<9x8x256xf32> to vector<72x256xf32>
    %104 = arith.truncf %103 : vector<72x256xf32> to vector<72x256xbf16>
    %c0_75 = arith.constant 0 : index
    %c0_76 = arith.constant 0 : index
    %105 = vector.load %arg4[%c0_75, %c0_76] : memref<256x512xbf16, #tpu.memory_space<vmem>>, vector<256x512xbf16>
    %cst_77 = arith.constant dense<0.000000e+00> : vector<72x512xf32>
    %106 = tpu.matmul %104, %105, %cst_77 {dimension_numbers = #tpu.dot_dimension_numbers<[1], [0], [0], [1], [0, 0, 1, 1], [], []>} : vector<72x256xbf16>, vector<256x512xbf16>, vector<72x512xf32> -> vector<72x512xf32>
    %c0_78 = arith.constant 0 : index
    %c0_79 = arith.constant 0 : index
    %107 = vector.load %arg6[%c0_78, %c0_79] : memref<1x512xf32, #tpu.memory_space<vmem>>, vector<1x512xf32>
    %108 = vector.broadcast %107 : vector<1x512xf32> to vector<72x512xf32>
    %109 = arith.addf %106, %108 : vector<72x512xf32>
    %110 = vector.shape_cast %109 : vector<72x512xf32> to vector<9x8x512xf32>
    %c0_80 = arith.constant 0 : index
    %c0_81 = arith.constant 0 : index
    %c0_82 = arith.constant 0 : index
    %111 = vector.load %arg14[%c0_80, %c0_81, %c0_82] : memref<9x8x512xf32, #tpu.memory_space<vmem>>, vector<9x8x512xf32>
    tpu.vector_store %arg14[%c0_80, %c0_81, %c0_82], %110 {strides = array<i32>} : memref<9x8x512xf32, #tpu.memory_space<vmem>>, vector<9x8x512xf32>,
    %cst_83 = arith.constant 0.000000e+00 : f32
    %112 = vector.broadcast %cst_83 : f32 to vector<8x128xf32>
    %cst_84 = arith.constant 0.000000e+00 : f32
    %113 = vector.broadcast %cst_84 : f32 to vector<8x128xf32>
    %c0_85 = arith.constant 0 : index
    %c0_86 = arith.constant 0 : index
    %c0_87 = arith.constant 0 : index
    %114 = vector.load %arg14[%c0_85, %c0_86, %c0_87] : memref<9x8x512xf32, #tpu.memory_space<vmem>>, vector<1x8x512xf32>
    %115 = vector.shape_cast %114 : vector<1x8x512xf32> to vector<8x512xf32>
    %116 = arith.truncf %112 : vector<8x128xf32> to vector<8x128xbf16>
    %c0_88 = arith.constant 0 : index
    %c0_89 = arith.constant 0 : index
    %117 = vector.load %arg5[%c0_88, %c0_89] : memref<128x512xbf16, #tpu.memory_space<vmem>>, vector<128x512xbf16>
    %cst_90 = arith.constant dense<0.000000e+00> : vector<8x512xf32>
    %118 = tpu.matmul %116, %117, %cst_90 {dimension_numbers = #tpu.dot_dimension_numbers<[1], [0], [0], [1], [0, 0, 1, 1], [], []>} : vector<8x128xbf16>, vector<128x512xbf16>, vector<8x512xf32> -> vector<8x512xf32>
    %119 = arith.addf %115, %118 : vector<8x512xf32>
    %120 = vector.extract_strided_slice %119 {offsets = [0, 0], sizes = [8, 128], strides = [1, 1]} : vector<8x512xf32> to vector<8x128xf32>
    %cst_91 = arith.constant 0.000000e+00 : f32
    %121 = vector.broadcast %cst_91 : f32 to vector<8x128xf32>
    %122 = arith.subf %121, %120 : vector<8x128xf32>
    %123 = math.exp %122 : vector<8x128xf32>
    %cst_92 = arith.constant 1.000000e+00 : f32
    %124 = vector.broadcast %cst_92 : f32 to vector<8x128xf32>
    %125 = arith.addf %124, %123 : vector<8x128xf32>
    %126 = tpu.reciprocal %125 {approx = true} : vector<8x128xf32> -> vector<8x128xf32>
    %127 = vector.extract_strided_slice %119 {offsets = [0, 128], sizes = [8, 128], strides = [1, 1]} : vector<8x512xf32> to vector<8x128xf32>
    %cst_93 = arith.constant 0.000000e+00 : f32
    %128 = vector.broadcast %cst_93 : f32 to vector<8x128xf32>
    %129 = arith.subf %128, %127 : vector<8x128xf32>
    %130 = math.exp %129 : vector<8x128xf32>
    %cst_94 = arith.constant 1.000000e+00 : f32
    %131 = vector.broadcast %cst_94 : f32 to vector<8x128xf32>
    %132 = arith.addf %131, %130 : vector<8x128xf32>
    %133 = tpu.reciprocal %132 {approx = true} : vector<8x128xf32> -> vector<8x128xf32>
    %134 = vector.extract_strided_slice %119 {offsets = [0, 256], sizes = [8, 128], strides = [1, 1]} : vector<8x512xf32> to vector<8x128xf32>
    %135 = math.tanh %134 : vector<8x128xf32>
    %136 = vector.extract_strided_slice %119 {offsets = [0, 384], sizes = [8, 128], strides = [1, 1]} : vector<8x512xf32> to vector<8x128xf32>
    %cst_95 = arith.constant 0.000000e+00 : f32
    %137 = vector.broadcast %cst_95 : f32 to vector<8x128xf32>
    %138 = arith.subf %137, %136 : vector<8x128xf32>
    %139 = math.exp %138 : vector<8x128xf32>
    %cst_96 = arith.constant 1.000000e+00 : f32
    %140 = vector.broadcast %cst_96 : f32 to vector<8x128xf32>
    %141 = arith.addf %140, %139 : vector<8x128xf32>
    %142 = tpu.reciprocal %141 {approx = true} : vector<8x128xf32> -> vector<8x128xf32>
    %143 = arith.mulf %133, %113 : vector<8x128xf32>
    %144 = arith.mulf %126, %135 : vector<8x128xf32>
    %145 = arith.addf %143, %144 : vector<8x128xf32>
    %146 = math.tanh %145 : vector<8x128xf32>
    %147 = arith.mulf %142, %146 : vector<8x128xf32>
    %c0_97 = arith.constant 0 : index
    %c0_98 = arith.constant 0 : index
    %c0_99 = arith.constant 0 : index
    %148 = vector.load %arg15[%c0_97, %c0_98, %c0_99] : memref<9x8x128xf32, #tpu.memory_space<vmem>>, vector<1x8x128xf32>
    %149 = vector.shape_cast %148 : vector<1x8x128xf32> to vector<8x128xf32>
    %150 = vector.shape_cast %147 : vector<8x128xf32> to vector<1x8x128xf32>
    tpu.vector_store %arg15[%c0_97, %c0_98, %c0_99], %150 {strides = array<i32>} : memref<9x8x128xf32, #tpu.memory_space<vmem>>, vector<1x8x128xf32>,
    %c1_100 = arith.constant 1 : index
    %c0_101 = arith.constant 0 : index
    %c0_102 = arith.constant 0 : index
    %151 = vector.load %arg14[%c1_100, %c0_101, %c0_102] : memref<9x8x512xf32, #tpu.memory_space<vmem>>, vector<1x8x512xf32>
    %152 = vector.shape_cast %151 : vector<1x8x512xf32> to vector<8x512xf32>
    %153 = arith.truncf %147 : vector<8x128xf32> to vector<8x128xbf16>
    %c0_103 = arith.constant 0 : index
    %c0_104 = arith.constant 0 : index
    %154 = vector.load %arg5[%c0_103, %c0_104] : memref<128x512xbf16, #tpu.memory_space<vmem>>, vector<128x512xbf16>
    %cst_105 = arith.constant dense<0.000000e+00> : vector<8x512xf32>
    %155 = tpu.matmul %153, %154, %cst_105 {dimension_numbers = #tpu.dot_dimension_numbers<[1], [0], [0], [1], [0, 0, 1, 1], [], []>} : vector<8x128xbf16>, vector<128x512xbf16>, vector<8x512xf32> -> vector<8x512xf32>
    %156 = arith.addf %152, %155 : vector<8x512xf32>
    %157 = vector.extract_strided_slice %156 {offsets = [0, 0], sizes = [8, 128], strides = [1, 1]} : vector<8x512xf32> to vector<8x128xf32>
    %cst_106 = arith.constant 0.000000e+00 : f32
    %158 = vector.broadcast %cst_106 : f32 to vector<8x128xf32>
    %159 = arith.subf %158, %157 : vector<8x128xf32>
    %160 = math.exp %159 : vector<8x128xf32>
    %cst_107 = arith.constant 1.000000e+00 : f32
    %161 = vector.broadcast %cst_107 : f32 to vector<8x128xf32>
    %162 = arith.addf %161, %160 : vector<8x128xf32>
    %163 = tpu.reciprocal %162 {approx = true} : vector<8x128xf32> -> vector<8x128xf32>
    %164 = vector.extract_strided_slice %156 {offsets = [0, 128], sizes = [8, 128], strides = [1, 1]} : vector<8x512xf32> to vector<8x128xf32>
    %cst_108 = arith.constant 0.000000e+00 : f32
    %165 = vector.broadcast %cst_108 : f32 to vector<8x128xf32>
    %166 = arith.subf %165, %164 : vector<8x128xf32>
    %167 = math.exp %166 : vector<8x128xf32>
    %cst_109 = arith.constant 1.000000e+00 : f32
    %168 = vector.broadcast %cst_109 : f32 to vector<8x128xf32>
    %169 = arith.addf %168, %167 : vector<8x128xf32>
    %170 = tpu.reciprocal %169 {approx = true} : vector<8x128xf32> -> vector<8x128xf32>
    %171 = vector.extract_strided_slice %156 {offsets = [0, 256], sizes = [8, 128], strides = [1, 1]} : vector<8x512xf32> to vector<8x128xf32>
    %172 = math.tanh %171 : vector<8x128xf32>
    %173 = vector.extract_strided_slice %156 {offsets = [0, 384], sizes = [8, 128], strides = [1, 1]} : vector<8x512xf32> to vector<8x128xf32>
    %cst_110 = arith.constant 0.000000e+00 : f32
    %174 = vector.broadcast %cst_110 : f32 to vector<8x128xf32>
    %175 = arith.subf %174, %173 : vector<8x128xf32>
    %176 = math.exp %175 : vector<8x128xf32>
    %cst_111 = arith.constant 1.000000e+00 : f32
    %177 = vector.broadcast %cst_111 : f32 to vector<8x128xf32>
    %178 = arith.addf %177, %176 : vector<8x128xf32>
    %179 = tpu.reciprocal %178 {approx = true} : vector<8x128xf32> -> vector<8x128xf32>
    %180 = arith.mulf %170, %145 : vector<8x128xf32>
    %181 = arith.mulf %163, %172 : vector<8x128xf32>
    %182 = arith.addf %180, %181 : vector<8x128xf32>
    %183 = math.tanh %182 : vector<8x128xf32>
    %184 = arith.mulf %179, %183 : vector<8x128xf32>
    %c1_112 = arith.constant 1 : index
    %c0_113 = arith.constant 0 : index
    %c0_114 = arith.constant 0 : index
    %185 = vector.load %arg15[%c1_112, %c0_113, %c0_114] : memref<9x8x128xf32, #tpu.memory_space<vmem>>, vector<1x8x128xf32>
    %186 = vector.shape_cast %185 : vector<1x8x128xf32> to vector<8x128xf32>
    %187 = vector.shape_cast %184 : vector<8x128xf32> to vector<1x8x128xf32>
    tpu.vector_store %arg15[%c1_112, %c0_113, %c0_114], %187 {strides = array<i32>} : memref<9x8x128xf32, #tpu.memory_space<vmem>>, vector<1x8x128xf32>,
    %c2_115 = arith.constant 2 : index
    %c0_116 = arith.constant 0 : index
    %c0_117 = arith.constant 0 : index
    %188 = vector.load %arg14[%c2_115, %c0_116, %c0_117] : memref<9x8x512xf32, #tpu.memory_space<vmem>>, vector<1x8x512xf32>
    %189 = vector.shape_cast %188 : vector<1x8x512xf32> to vector<8x512xf32>
    %190 = arith.truncf %184 : vector<8x128xf32> to vector<8x128xbf16>
    %c0_118 = arith.constant 0 : index
    %c0_119 = arith.constant 0 : index
    %191 = vector.load %arg5[%c0_118, %c0_119] : memref<128x512xbf16, #tpu.memory_space<vmem>>, vector<128x512xbf16>
    %cst_120 = arith.constant dense<0.000000e+00> : vector<8x512xf32>
    %192 = tpu.matmul %190, %191, %cst_120 {dimension_numbers = #tpu.dot_dimension_numbers<[1], [0], [0], [1], [0, 0, 1, 1], [], []>} : vector<8x128xbf16>, vector<128x512xbf16>, vector<8x512xf32> -> vector<8x512xf32>
    %193 = arith.addf %189, %192 : vector<8x512xf32>
    %194 = vector.extract_strided_slice %193 {offsets = [0, 0], sizes = [8, 128], strides = [1, 1]} : vector<8x512xf32> to vector<8x128xf32>
    %cst_121 = arith.constant 0.000000e+00 : f32
    %195 = vector.broadcast %cst_121 : f32 to vector<8x128xf32>
    %196 = arith.subf %195, %194 : vector<8x128xf32>
    %197 = math.exp %196 : vector<8x128xf32>
    %cst_122 = arith.constant 1.000000e+00 : f32
    %198 = vector.broadcast %cst_122 : f32 to vector<8x128xf32>
    %199 = arith.addf %198, %197 : vector<8x128xf32>
    %200 = tpu.reciprocal %199 {approx = true} : vector<8x128xf32> -> vector<8x128xf32>
    %201 = vector.extract_strided_slice %193 {offsets = [0, 128], sizes = [8, 128], strides = [1, 1]} : vector<8x512xf32> to vector<8x128xf32>
    %cst_123 = arith.constant 0.000000e+00 : f32
    %202 = vector.broadcast %cst_123 : f32 to vector<8x128xf32>
    %203 = arith.subf %202, %201 : vector<8x128xf32>
    %204 = math.exp %203 : vector<8x128xf32>
    %cst_124 = arith.constant 1.000000e+00 : f32
    %205 = vector.broadcast %cst_124 : f32 to vector<8x128xf32>
    %206 = arith.addf %205, %204 : vector<8x128xf32>
    %207 = tpu.reciprocal %206 {approx = true} : vector<8x128xf32> -> vector<8x128xf32>
    %208 = vector.extract_strided_slice %193 {offsets = [0, 256], sizes = [8, 128], strides = [1, 1]} : vector<8x512xf32> to vector<8x128xf32>
    %209 = math.tanh %208 : vector<8x128xf32>
    %210 = vector.extract_strided_slice %193 {offsets = [0, 384], sizes = [8, 128], strides = [1, 1]} : vector<8x512xf32> to vector<8x128xf32>
    %cst_125 = arith.constant 0.000000e+00 : f32
    %211 = vector.broadcast %cst_125 : f32 to vector<8x128xf32>
    %212 = arith.subf %211, %210 : vector<8x128xf32>
    %213 = math.exp %212 : vector<8x128xf32>
    %cst_126 = arith.constant 1.000000e+00 : f32
    %214 = vector.broadcast %cst_126 : f32 to vector<8x128xf32>
    %215 = arith.addf %214, %213 : vector<8x128xf32>
    %216 = tpu.reciprocal %215 {approx = true} : vector<8x128xf32> -> vector<8x128xf32>
    %217 = arith.mulf %207, %182 : vector<8x128xf32>
    %218 = arith.mulf %200, %209 : vector<8x128xf32>
    %219 = arith.addf %217, %218 : vector<8x128xf32>
    %220 = math.tanh %219 : vector<8x128xf32>
    %221 = arith.mulf %216, %220 : vector<8x128xf32>
    %c2_127 = arith.constant 2 : index
    %c0_128 = arith.constant 0 : index
    %c0_129 = arith.constant 0 : index
    %222 = vector.load %arg15[%c2_127, %c0_128, %c0_129] : memref<9x8x128xf32, #tpu.memory_space<vmem>>, vector<1x8x128xf32>
    %223 = vector.shape_cast %222 : vector<1x8x128xf32> to vector<8x128xf32>
    %224 = vector.shape_cast %221 : vector<8x128xf32> to vector<1x8x128xf32>
    tpu.vector_store %arg15[%c2_127, %c0_128, %c0_129], %224 {strides = array<i32>} : memref<9x8x128xf32, #tpu.memory_space<vmem>>, vector<1x8x128xf32>,
    %c3_130 = arith.constant 3 : index
    %c0_131 = arith.constant 0 : index
    %c0_132 = arith.constant 0 : index
    %225 = vector.load %arg14[%c3_130, %c0_131, %c0_132] : memref<9x8x512xf32, #tpu.memory_space<vmem>>, vector<1x8x512xf32>
    %226 = vector.shape_cast %225 : vector<1x8x512xf32> to vector<8x512xf32>
    %227 = arith.truncf %221 : vector<8x128xf32> to vector<8x128xbf16>
    %c0_133 = arith.constant 0 : index
    %c0_134 = arith.constant 0 : index
    %228 = vector.load %arg5[%c0_133, %c0_134] : memref<128x512xbf16, #tpu.memory_space<vmem>>, vector<128x512xbf16>
    %cst_135 = arith.constant dense<0.000000e+00> : vector<8x512xf32>
    %229 = tpu.matmul %227, %228, %cst_135 {dimension_numbers = #tpu.dot_dimension_numbers<[1], [0], [0], [1], [0, 0, 1, 1], [], []>} : vector<8x128xbf16>, vector<128x512xbf16>, vector<8x512xf32> -> vector<8x512xf32>
    %230 = arith.addf %226, %229 : vector<8x512xf32>
    %231 = vector.extract_strided_slice %230 {offsets = [0, 0], sizes = [8, 128], strides = [1, 1]} : vector<8x512xf32> to vector<8x128xf32>
    %cst_136 = arith.constant 0.000000e+00 : f32
    %232 = vector.broadcast %cst_136 : f32 to vector<8x128xf32>
    %233 = arith.subf %232, %231 : vector<8x128xf32>
    %234 = math.exp %233 : vector<8x128xf32>
    %cst_137 = arith.constant 1.000000e+00 : f32
    %235 = vector.broadcast %cst_137 : f32 to vector<8x128xf32>
    %236 = arith.addf %235, %234 : vector<8x128xf32>
    %237 = tpu.reciprocal %236 {approx = true} : vector<8x128xf32> -> vector<8x128xf32>
    %238 = vector.extract_strided_slice %230 {offsets = [0, 128], sizes = [8, 128], strides = [1, 1]} : vector<8x512xf32> to vector<8x128xf32>
    %cst_138 = arith.constant 0.000000e+00 : f32
    %239 = vector.broadcast %cst_138 : f32 to vector<8x128xf32>
    %240 = arith.subf %239, %238 : vector<8x128xf32>
    %241 = math.exp %240 : vector<8x128xf32>
    %cst_139 = arith.constant 1.000000e+00 : f32
    %242 = vector.broadcast %cst_139 : f32 to vector<8x128xf32>
    %243 = arith.addf %242, %241 : vector<8x128xf32>
    %244 = tpu.reciprocal %243 {approx = true} : vector<8x128xf32> -> vector<8x128xf32>
    %245 = vector.extract_strided_slice %230 {offsets = [0, 256], sizes = [8, 128], strides = [1, 1]} : vector<8x512xf32> to vector<8x128xf32>
    %246 = math.tanh %245 : vector<8x128xf32>
    %247 = vector.extract_strided_slice %230 {offsets = [0, 384], sizes = [8, 128], strides = [1, 1]} : vector<8x512xf32> to vector<8x128xf32>
    %cst_140 = arith.constant 0.000000e+00 : f32
    %248 = vector.broadcast %cst_140 : f32 to vector<8x128xf32>
    %249 = arith.subf %248, %247 : vector<8x128xf32>
    %250 = math.exp %249 : vector<8x128xf32>
    %cst_141 = arith.constant 1.000000e+00 : f32
    %251 = vector.broadcast %cst_141 : f32 to vector<8x128xf32>
    %252 = arith.addf %251, %250 : vector<8x128xf32>
    %253 = tpu.reciprocal %252 {approx = true} : vector<8x128xf32> -> vector<8x128xf32>
    %254 = arith.mulf %244, %219 : vector<8x128xf32>
    %255 = arith.mulf %237, %246 : vector<8x128xf32>
    %256 = arith.addf %254, %255 : vector<8x128xf32>
    %257 = math.tanh %256 : vector<8x128xf32>
    %258 = arith.mulf %253, %257 : vector<8x128xf32>
    %c3_142 = arith.constant 3 : index
    %c0_143 = arith.constant 0 : index
    %c0_144 = arith.constant 0 : index
    %259 = vector.load %arg15[%c3_142, %c0_143, %c0_144] : memref<9x8x128xf32, #tpu.memory_space<vmem>>, vector<1x8x128xf32>
    %260 = vector.shape_cast %259 : vector<1x8x128xf32> to vector<8x128xf32>
    %261 = vector.shape_cast %258 : vector<8x128xf32> to vector<1x8x128xf32>
    tpu.vector_store %arg15[%c3_142, %c0_143, %c0_144], %261 {strides = array<i32>} : memref<9x8x128xf32, #tpu.memory_space<vmem>>, vector<1x8x128xf32>,
    %c4_145 = arith.constant 4 : index
    %c0_146 = arith.constant 0 : index
    %c0_147 = arith.constant 0 : index
    %262 = vector.load %arg14[%c4_145, %c0_146, %c0_147] : memref<9x8x512xf32, #tpu.memory_space<vmem>>, vector<1x8x512xf32>
    %263 = vector.shape_cast %262 : vector<1x8x512xf32> to vector<8x512xf32>
    %264 = arith.truncf %258 : vector<8x128xf32> to vector<8x128xbf16>
    %c0_148 = arith.constant 0 : index
    %c0_149 = arith.constant 0 : index
    %265 = vector.load %arg5[%c0_148, %c0_149] : memref<128x512xbf16, #tpu.memory_space<vmem>>, vector<128x512xbf16>
    %cst_150 = arith.constant dense<0.000000e+00> : vector<8x512xf32>
    %266 = tpu.matmul %264, %265, %cst_150 {dimension_numbers = #tpu.dot_dimension_numbers<[1], [0], [0], [1], [0, 0, 1, 1], [], []>} : vector<8x128xbf16>, vector<128x512xbf16>, vector<8x512xf32> -> vector<8x512xf32>
    %267 = arith.addf %263, %266 : vector<8x512xf32>
    %268 = vector.extract_strided_slice %267 {offsets = [0, 0], sizes = [8, 128], strides = [1, 1]} : vector<8x512xf32> to vector<8x128xf32>
    %cst_151 = arith.constant 0.000000e+00 : f32
    %269 = vector.broadcast %cst_151 : f32 to vector<8x128xf32>
    %270 = arith.subf %269, %268 : vector<8x128xf32>
    %271 = math.exp %270 : vector<8x128xf32>
    %cst_152 = arith.constant 1.000000e+00 : f32
    %272 = vector.broadcast %cst_152 : f32 to vector<8x128xf32>
    %273 = arith.addf %272, %271 : vector<8x128xf32>
    %274 = tpu.reciprocal %273 {approx = true} : vector<8x128xf32> -> vector<8x128xf32>
    %275 = vector.extract_strided_slice %267 {offsets = [0, 128], sizes = [8, 128], strides = [1, 1]} : vector<8x512xf32> to vector<8x128xf32>
    %cst_153 = arith.constant 0.000000e+00 : f32
    %276 = vector.broadcast %cst_153 : f32 to vector<8x128xf32>
    %277 = arith.subf %276, %275 : vector<8x128xf32>
    %278 = math.exp %277 : vector<8x128xf32>
    %cst_154 = arith.constant 1.000000e+00 : f32
    %279 = vector.broadcast %cst_154 : f32 to vector<8x128xf32>
    %280 = arith.addf %279, %278 : vector<8x128xf32>
    %281 = tpu.reciprocal %280 {approx = true} : vector<8x128xf32> -> vector<8x128xf32>
    %282 = vector.extract_strided_slice %267 {offsets = [0, 256], sizes = [8, 128], strides = [1, 1]} : vector<8x512xf32> to vector<8x128xf32>
    %283 = math.tanh %282 : vector<8x128xf32>
    %284 = vector.extract_strided_slice %267 {offsets = [0, 384], sizes = [8, 128], strides = [1, 1]} : vector<8x512xf32> to vector<8x128xf32>
    %cst_155 = arith.constant 0.000000e+00 : f32
    %285 = vector.broadcast %cst_155 : f32 to vector<8x128xf32>
    %286 = arith.subf %285, %284 : vector<8x128xf32>
    %287 = math.exp %286 : vector<8x128xf32>
    %cst_156 = arith.constant 1.000000e+00 : f32
    %288 = vector.broadcast %cst_156 : f32 to vector<8x128xf32>
    %289 = arith.addf %288, %287 : vector<8x128xf32>
    %290 = tpu.reciprocal %289 {approx = true} : vector<8x128xf32> -> vector<8x128xf32>
    %291 = arith.mulf %281, %256 : vector<8x128xf32>
    %292 = arith.mulf %274, %283 : vector<8x128xf32>
    %293 = arith.addf %291, %292 : vector<8x128xf32>
    %294 = math.tanh %293 : vector<8x128xf32>
    %295 = arith.mulf %290, %294 : vector<8x128xf32>
    %c4_157 = arith.constant 4 : index
    %c0_158 = arith.constant 0 : index
    %c0_159 = arith.constant 0 : index
    %296 = vector.load %arg15[%c4_157, %c0_158, %c0_159] : memref<9x8x128xf32, #tpu.memory_space<vmem>>, vector<1x8x128xf32>
    %297 = vector.shape_cast %296 : vector<1x8x128xf32> to vector<8x128xf32>
    %298 = vector.shape_cast %295 : vector<8x128xf32> to vector<1x8x128xf32>
    tpu.vector_store %arg15[%c4_157, %c0_158, %c0_159], %298 {strides = array<i32>} : memref<9x8x128xf32, #tpu.memory_space<vmem>>, vector<1x8x128xf32>,
    %c5_160 = arith.constant 5 : index
    %c0_161 = arith.constant 0 : index
    %c0_162 = arith.constant 0 : index
    %299 = vector.load %arg14[%c5_160, %c0_161, %c0_162] : memref<9x8x512xf32, #tpu.memory_space<vmem>>, vector<1x8x512xf32>
    %300 = vector.shape_cast %299 : vector<1x8x512xf32> to vector<8x512xf32>
    %301 = arith.truncf %295 : vector<8x128xf32> to vector<8x128xbf16>
    %c0_163 = arith.constant 0 : index
    %c0_164 = arith.constant 0 : index
    %302 = vector.load %arg5[%c0_163, %c0_164] : memref<128x512xbf16, #tpu.memory_space<vmem>>, vector<128x512xbf16>
    %cst_165 = arith.constant dense<0.000000e+00> : vector<8x512xf32>
    %303 = tpu.matmul %301, %302, %cst_165 {dimension_numbers = #tpu.dot_dimension_numbers<[1], [0], [0], [1], [0, 0, 1, 1], [], []>} : vector<8x128xbf16>, vector<128x512xbf16>, vector<8x512xf32> -> vector<8x512xf32>
    %304 = arith.addf %300, %303 : vector<8x512xf32>
    %305 = vector.extract_strided_slice %304 {offsets = [0, 0], sizes = [8, 128], strides = [1, 1]} : vector<8x512xf32> to vector<8x128xf32>
    %cst_166 = arith.constant 0.000000e+00 : f32
    %306 = vector.broadcast %cst_166 : f32 to vector<8x128xf32>
    %307 = arith.subf %306, %305 : vector<8x128xf32>
    %308 = math.exp %307 : vector<8x128xf32>
    %cst_167 = arith.constant 1.000000e+00 : f32
    %309 = vector.broadcast %cst_167 : f32 to vector<8x128xf32>
    %310 = arith.addf %309, %308 : vector<8x128xf32>
    %311 = tpu.reciprocal %310 {approx = true} : vector<8x128xf32> -> vector<8x128xf32>
    %312 = vector.extract_strided_slice %304 {offsets = [0, 128], sizes = [8, 128], strides = [1, 1]} : vector<8x512xf32> to vector<8x128xf32>
    %cst_168 = arith.constant 0.000000e+00 : f32
    %313 = vector.broadcast %cst_168 : f32 to vector<8x128xf32>
    %314 = arith.subf %313, %312 : vector<8x128xf32>
    %315 = math.exp %314 : vector<8x128xf32>
    %cst_169 = arith.constant 1.000000e+00 : f32
    %316 = vector.broadcast %cst_169 : f32 to vector<8x128xf32>
    %317 = arith.addf %316, %315 : vector<8x128xf32>
    %318 = tpu.reciprocal %317 {approx = true} : vector<8x128xf32> -> vector<8x128xf32>
    %319 = vector.extract_strided_slice %304 {offsets = [0, 256], sizes = [8, 128], strides = [1, 1]} : vector<8x512xf32> to vector<8x128xf32>
    %320 = math.tanh %319 : vector<8x128xf32>
    %321 = vector.extract_strided_slice %304 {offsets = [0, 384], sizes = [8, 128], strides = [1, 1]} : vector<8x512xf32> to vector<8x128xf32>
    %cst_170 = arith.constant 0.000000e+00 : f32
    %322 = vector.broadcast %cst_170 : f32 to vector<8x128xf32>
    %323 = arith.subf %322, %321 : vector<8x128xf32>
    %324 = math.exp %323 : vector<8x128xf32>
    %cst_171 = arith.constant 1.000000e+00 : f32
    %325 = vector.broadcast %cst_171 : f32 to vector<8x128xf32>
    %326 = arith.addf %325, %324 : vector<8x128xf32>
    %327 = tpu.reciprocal %326 {approx = true} : vector<8x128xf32> -> vector<8x128xf32>
    %328 = arith.mulf %318, %293 : vector<8x128xf32>
    %329 = arith.mulf %311, %320 : vector<8x128xf32>
    %330 = arith.addf %328, %329 : vector<8x128xf32>
    %331 = math.tanh %330 : vector<8x128xf32>
    %332 = arith.mulf %327, %331 : vector<8x128xf32>
    %c5_172 = arith.constant 5 : index
    %c0_173 = arith.constant 0 : index
    %c0_174 = arith.constant 0 : index
    %333 = vector.load %arg15[%c5_172, %c0_173, %c0_174] : memref<9x8x128xf32, #tpu.memory_space<vmem>>, vector<1x8x128xf32>
    %334 = vector.shape_cast %333 : vector<1x8x128xf32> to vector<8x128xf32>
    %335 = vector.shape_cast %332 : vector<8x128xf32> to vector<1x8x128xf32>
    tpu.vector_store %arg15[%c5_172, %c0_173, %c0_174], %335 {strides = array<i32>} : memref<9x8x128xf32, #tpu.memory_space<vmem>>, vector<1x8x128xf32>,
    %c6_175 = arith.constant 6 : index
    %c0_176 = arith.constant 0 : index
    %c0_177 = arith.constant 0 : index
    %336 = vector.load %arg14[%c6_175, %c0_176, %c0_177] : memref<9x8x512xf32, #tpu.memory_space<vmem>>, vector<1x8x512xf32>
    %337 = vector.shape_cast %336 : vector<1x8x512xf32> to vector<8x512xf32>
    %338 = arith.truncf %332 : vector<8x128xf32> to vector<8x128xbf16>
    %c0_178 = arith.constant 0 : index
    %c0_179 = arith.constant 0 : index
    %339 = vector.load %arg5[%c0_178, %c0_179] : memref<128x512xbf16, #tpu.memory_space<vmem>>, vector<128x512xbf16>
    %cst_180 = arith.constant dense<0.000000e+00> : vector<8x512xf32>
    %340 = tpu.matmul %338, %339, %cst_180 {dimension_numbers = #tpu.dot_dimension_numbers<[1], [0], [0], [1], [0, 0, 1, 1], [], []>} : vector<8x128xbf16>, vector<128x512xbf16>, vector<8x512xf32> -> vector<8x512xf32>
    %341 = arith.addf %337, %340 : vector<8x512xf32>
    %342 = vector.extract_strided_slice %341 {offsets = [0, 0], sizes = [8, 128], strides = [1, 1]} : vector<8x512xf32> to vector<8x128xf32>
    %cst_181 = arith.constant 0.000000e+00 : f32
    %343 = vector.broadcast %cst_181 : f32 to vector<8x128xf32>
    %344 = arith.subf %343, %342 : vector<8x128xf32>
    %345 = math.exp %344 : vector<8x128xf32>
    %cst_182 = arith.constant 1.000000e+00 : f32
    %346 = vector.broadcast %cst_182 : f32 to vector<8x128xf32>
    %347 = arith.addf %346, %345 : vector<8x128xf32>
    %348 = tpu.reciprocal %347 {approx = true} : vector<8x128xf32> -> vector<8x128xf32>
    %349 = vector.extract_strided_slice %341 {offsets = [0, 128], sizes = [8, 128], strides = [1, 1]} : vector<8x512xf32> to vector<8x128xf32>
    %cst_183 = arith.constant 0.000000e+00 : f32
    %350 = vector.broadcast %cst_183 : f32 to vector<8x128xf32>
    %351 = arith.subf %350, %349 : vector<8x128xf32>
    %352 = math.exp %351 : vector<8x128xf32>
    %cst_184 = arith.constant 1.000000e+00 : f32
    %353 = vector.broadcast %cst_184 : f32 to vector<8x128xf32>
    %354 = arith.addf %353, %352 : vector<8x128xf32>
    %355 = tpu.reciprocal %354 {approx = true} : vector<8x128xf32> -> vector<8x128xf32>
    %356 = vector.extract_strided_slice %341 {offsets = [0, 256], sizes = [8, 128], strides = [1, 1]} : vector<8x512xf32> to vector<8x128xf32>
    %357 = math.tanh %356 : vector<8x128xf32>
    %358 = vector.extract_strided_slice %341 {offsets = [0, 384], sizes = [8, 128], strides = [1, 1]} : vector<8x512xf32> to vector<8x128xf32>
    %cst_185 = arith.constant 0.000000e+00 : f32
    %359 = vector.broadcast %cst_185 : f32 to vector<8x128xf32>
    %360 = arith.subf %359, %358 : vector<8x128xf32>
    %361 = math.exp %360 : vector<8x128xf32>
    %cst_186 = arith.constant 1.000000e+00 : f32
    %362 = vector.broadcast %cst_186 : f32 to vector<8x128xf32>
    %363 = arith.addf %362, %361 : vector<8x128xf32>
    %364 = tpu.reciprocal %363 {approx = true} : vector<8x128xf32> -> vector<8x128xf32>
    %365 = arith.mulf %355, %330 : vector<8x128xf32>
    %366 = arith.mulf %348, %357 : vector<8x128xf32>
    %367 = arith.addf %365, %366 : vector<8x128xf32>
    %368 = math.tanh %367 : vector<8x128xf32>
    %369 = arith.mulf %364, %368 : vector<8x128xf32>
    %c6_187 = arith.constant 6 : index
    %c0_188 = arith.constant 0 : index
    %c0_189 = arith.constant 0 : index
    %370 = vector.load %arg15[%c6_187, %c0_188, %c0_189] : memref<9x8x128xf32, #tpu.memory_space<vmem>>, vector<1x8x128xf32>
    %371 = vector.shape_cast %370 : vector<1x8x128xf32> to vector<8x128xf32>
    %372 = vector.shape_cast %369 : vector<8x128xf32> to vector<1x8x128xf32>
    tpu.vector_store %arg15[%c6_187, %c0_188, %c0_189], %372 {strides = array<i32>} : memref<9x8x128xf32, #tpu.memory_space<vmem>>, vector<1x8x128xf32>,
    %c7_190 = arith.constant 7 : index
    %c0_191 = arith.constant 0 : index
    %c0_192 = arith.constant 0 : index
    %373 = vector.load %arg14[%c7_190, %c0_191, %c0_192] : memref<9x8x512xf32, #tpu.memory_space<vmem>>, vector<1x8x512xf32>
    %374 = vector.shape_cast %373 : vector<1x8x512xf32> to vector<8x512xf32>
    %375 = arith.truncf %369 : vector<8x128xf32> to vector<8x128xbf16>
    %c0_193 = arith.constant 0 : index
    %c0_194 = arith.constant 0 : index
    %376 = vector.load %arg5[%c0_193, %c0_194] : memref<128x512xbf16, #tpu.memory_space<vmem>>, vector<128x512xbf16>
    %cst_195 = arith.constant dense<0.000000e+00> : vector<8x512xf32>
    %377 = tpu.matmul %375, %376, %cst_195 {dimension_numbers = #tpu.dot_dimension_numbers<[1], [0], [0], [1], [0, 0, 1, 1], [], []>} : vector<8x128xbf16>, vector<128x512xbf16>, vector<8x512xf32> -> vector<8x512xf32>
    %378 = arith.addf %374, %377 : vector<8x512xf32>
    %379 = vector.extract_strided_slice %378 {offsets = [0, 0], sizes = [8, 128], strides = [1, 1]} : vector<8x512xf32> to vector<8x128xf32>
    %cst_196 = arith.constant 0.000000e+00 : f32
    %380 = vector.broadcast %cst_196 : f32 to vector<8x128xf32>
    %381 = arith.subf %380, %379 : vector<8x128xf32>
    %382 = math.exp %381 : vector<8x128xf32>
    %cst_197 = arith.constant 1.000000e+00 : f32
    %383 = vector.broadcast %cst_197 : f32 to vector<8x128xf32>
    %384 = arith.addf %383, %382 : vector<8x128xf32>
    %385 = tpu.reciprocal %384 {approx = true} : vector<8x128xf32> -> vector<8x128xf32>
    %386 = vector.extract_strided_slice %378 {offsets = [0, 128], sizes = [8, 128], strides = [1, 1]} : vector<8x512xf32> to vector<8x128xf32>
    %cst_198 = arith.constant 0.000000e+00 : f32
    %387 = vector.broadcast %cst_198 : f32 to vector<8x128xf32>
    %388 = arith.subf %387, %386 : vector<8x128xf32>
    %389 = math.exp %388 : vector<8x128xf32>
    %cst_199 = arith.constant 1.000000e+00 : f32
    %390 = vector.broadcast %cst_199 : f32 to vector<8x128xf32>
    %391 = arith.addf %390, %389 : vector<8x128xf32>
    %392 = tpu.reciprocal %391 {approx = true} : vector<8x128xf32> -> vector<8x128xf32>
    %393 = vector.extract_strided_slice %378 {offsets = [0, 256], sizes = [8, 128], strides = [1, 1]} : vector<8x512xf32> to vector<8x128xf32>
    %394 = math.tanh %393 : vector<8x128xf32>
    %395 = vector.extract_strided_slice %378 {offsets = [0, 384], sizes = [8, 128], strides = [1, 1]} : vector<8x512xf32> to vector<8x128xf32>
    %cst_200 = arith.constant 0.000000e+00 : f32
    %396 = vector.broadcast %cst_200 : f32 to vector<8x128xf32>
    %397 = arith.subf %396, %395 : vector<8x128xf32>
    %398 = math.exp %397 : vector<8x128xf32>
    %cst_201 = arith.constant 1.000000e+00 : f32
    %399 = vector.broadcast %cst_201 : f32 to vector<8x128xf32>
    %400 = arith.addf %399, %398 : vector<8x128xf32>
    %401 = tpu.reciprocal %400 {approx = true} : vector<8x128xf32> -> vector<8x128xf32>
    %402 = arith.mulf %392, %367 : vector<8x128xf32>
    %403 = arith.mulf %385, %394 : vector<8x128xf32>
    %404 = arith.addf %402, %403 : vector<8x128xf32>
    %405 = math.tanh %404 : vector<8x128xf32>
    %406 = arith.mulf %401, %405 : vector<8x128xf32>
    %c7_202 = arith.constant 7 : index
    %c0_203 = arith.constant 0 : index
    %c0_204 = arith.constant 0 : index
    %407 = vector.load %arg15[%c7_202, %c0_203, %c0_204] : memref<9x8x128xf32, #tpu.memory_space<vmem>>, vector<1x8x128xf32>
    %408 = vector.shape_cast %407 : vector<1x8x128xf32> to vector<8x128xf32>
    %409 = vector.shape_cast %406 : vector<8x128xf32> to vector<1x8x128xf32>
    tpu.vector_store %arg15[%c7_202, %c0_203, %c0_204], %409 {strides = array<i32>} : memref<9x8x128xf32, #tpu.memory_space<vmem>>, vector<1x8x128xf32>,
    %c8_205 = arith.constant 8 : index
    %c0_206 = arith.constant 0 : index
    %c0_207 = arith.constant 0 : index
    %410 = vector.load %arg14[%c8_205, %c0_206, %c0_207] : memref<9x8x512xf32, #tpu.memory_space<vmem>>, vector<1x8x512xf32>
    %411 = vector.shape_cast %410 : vector<1x8x512xf32> to vector<8x512xf32>
    %412 = arith.truncf %406 : vector<8x128xf32> to vector<8x128xbf16>
    %c0_208 = arith.constant 0 : index
    %c0_209 = arith.constant 0 : index
    %413 = vector.load %arg5[%c0_208, %c0_209] : memref<128x512xbf16, #tpu.memory_space<vmem>>, vector<128x512xbf16>
    %cst_210 = arith.constant dense<0.000000e+00> : vector<8x512xf32>
    %414 = tpu.matmul %412, %413, %cst_210 {dimension_numbers = #tpu.dot_dimension_numbers<[1], [0], [0], [1], [0, 0, 1, 1], [], []>} : vector<8x128xbf16>, vector<128x512xbf16>, vector<8x512xf32> -> vector<8x512xf32>
    %415 = arith.addf %411, %414 : vector<8x512xf32>
    %416 = vector.extract_strided_slice %415 {offsets = [0, 0], sizes = [8, 128], strides = [1, 1]} : vector<8x512xf32> to vector<8x128xf32>
    %cst_211 = arith.constant 0.000000e+00 : f32
    %417 = vector.broadcast %cst_211 : f32 to vector<8x128xf32>
    %418 = arith.subf %417, %416 : vector<8x128xf32>
    %419 = math.exp %418 : vector<8x128xf32>
    %cst_212 = arith.constant 1.000000e+00 : f32
    %420 = vector.broadcast %cst_212 : f32 to vector<8x128xf32>
    %421 = arith.addf %420, %419 : vector<8x128xf32>
    %422 = tpu.reciprocal %421 {approx = true} : vector<8x128xf32> -> vector<8x128xf32>
    %423 = vector.extract_strided_slice %415 {offsets = [0, 128], sizes = [8, 128], strides = [1, 1]} : vector<8x512xf32> to vector<8x128xf32>
    %cst_213 = arith.constant 0.000000e+00 : f32
    %424 = vector.broadcast %cst_213 : f32 to vector<8x128xf32>
    %425 = arith.subf %424, %423 : vector<8x128xf32>
    %426 = math.exp %425 : vector<8x128xf32>
    %cst_214 = arith.constant 1.000000e+00 : f32
    %427 = vector.broadcast %cst_214 : f32 to vector<8x128xf32>
    %428 = arith.addf %427, %426 : vector<8x128xf32>
    %429 = tpu.reciprocal %428 {approx = true} : vector<8x128xf32> -> vector<8x128xf32>
    %430 = vector.extract_strided_slice %415 {offsets = [0, 256], sizes = [8, 128], strides = [1, 1]} : vector<8x512xf32> to vector<8x128xf32>
    %431 = math.tanh %430 : vector<8x128xf32>
    %432 = vector.extract_strided_slice %415 {offsets = [0, 384], sizes = [8, 128], strides = [1, 1]} : vector<8x512xf32> to vector<8x128xf32>
    %cst_215 = arith.constant 0.000000e+00 : f32
    %433 = vector.broadcast %cst_215 : f32 to vector<8x128xf32>
    %434 = arith.subf %433, %432 : vector<8x128xf32>
    %435 = math.exp %434 : vector<8x128xf32>
    %cst_216 = arith.constant 1.000000e+00 : f32
    %436 = vector.broadcast %cst_216 : f32 to vector<8x128xf32>
    %437 = arith.addf %436, %435 : vector<8x128xf32>
    %438 = tpu.reciprocal %437 {approx = true} : vector<8x128xf32> -> vector<8x128xf32>
    %439 = arith.mulf %429, %404 : vector<8x128xf32>
    %440 = arith.mulf %422, %431 : vector<8x128xf32>
    %441 = arith.addf %439, %440 : vector<8x128xf32>
    %442 = math.tanh %441 : vector<8x128xf32>
    %443 = arith.mulf %438, %442 : vector<8x128xf32>
    %c8_217 = arith.constant 8 : index
    %c0_218 = arith.constant 0 : index
    %c0_219 = arith.constant 0 : index
    %444 = vector.load %arg15[%c8_217, %c0_218, %c0_219] : memref<9x8x128xf32, #tpu.memory_space<vmem>>, vector<1x8x128xf32>
    %445 = vector.shape_cast %444 : vector<1x8x128xf32> to vector<8x128xf32>
    %446 = vector.shape_cast %443 : vector<8x128xf32> to vector<1x8x128xf32>
    tpu.vector_store %arg15[%c8_217, %c0_218, %c0_219], %446 {strides = array<i32>} : memref<9x8x128xf32, #tpu.memory_space<vmem>>, vector<1x8x128xf32>,
    %c0_220 = arith.constant 0 : index
    %c0_221 = arith.constant 0 : index
    %c0_222 = arith.constant 0 : index
    %447 = vector.load %arg15[%c0_220, %c0_221, %c0_222] : memref<9x8x128xf32, #tpu.memory_space<vmem>>, vector<9x8x128xf32>
    %448 = vector.shape_cast %447 : vector<9x8x128xf32> to vector<72x128xf32>
    %449 = arith.truncf %448 : vector<72x128xf32> to vector<72x128xbf16>
    %c0_223 = arith.constant 0 : index
    %c0_224 = arith.constant 0 : index
    %450 = vector.load %arg7[%c0_223, %c0_224] : memref<128x512xbf16, #tpu.memory_space<vmem>>, vector<128x512xbf16>
    %cst_225 = arith.constant dense<0.000000e+00> : vector<72x512xf32>
    %451 = tpu.matmul %449, %450, %cst_225 {dimension_numbers = #tpu.dot_dimension_numbers<[1], [0], [0], [1], [0, 0, 1, 1], [], []>} : vector<72x128xbf16>, vector<128x512xbf16>, vector<72x512xf32> -> vector<72x512xf32>
    %c0_226 = arith.constant 0 : index
    %c0_227 = arith.constant 0 : index
    %452 = vector.load %arg9[%c0_226, %c0_227] : memref<1x512xf32, #tpu.memory_space<vmem>>, vector<1x512xf32>
    %453 = vector.broadcast %452 : vector<1x512xf32> to vector<72x512xf32>
    %454 = arith.addf %451, %453 : vector<72x512xf32>
    %455 = vector.shape_cast %454 : vector<72x512xf32> to vector<9x8x512xf32>
    %c0_228 = arith.constant 0 : index
    %c0_229 = arith.constant 0 : index
    %c0_230 = arith.constant 0 : index
    %456 = vector.load %arg14[%c0_228, %c0_229, %c0_230] : memref<9x8x512xf32, #tpu.memory_space<vmem>>, vector<9x8x512xf32>
    tpu.vector_store %arg14[%c0_228, %c0_229, %c0_230], %455 {strides = array<i32>} : memref<9x8x512xf32, #tpu.memory_space<vmem>>, vector<9x8x512xf32>,
    %cst_231 = arith.constant 0.000000e+00 : f32
    %457 = vector.broadcast %cst_231 : f32 to vector<8x128xf32>
    %cst_232 = arith.constant 0.000000e+00 : f32
    %458 = vector.broadcast %cst_232 : f32 to vector<8x128xf32>
    %c0_233 = arith.constant 0 : index
    %c0_234 = arith.constant 0 : index
    %c0_235 = arith.constant 0 : index
    %459 = vector.load %arg14[%c0_233, %c0_234, %c0_235] : memref<9x8x512xf32, #tpu.memory_space<vmem>>, vector<1x8x512xf32>
    %460 = vector.shape_cast %459 : vector<1x8x512xf32> to vector<8x512xf32>
    %461 = arith.truncf %457 : vector<8x128xf32> to vector<8x128xbf16>
    %c0_236 = arith.constant 0 : index
    %c0_237 = arith.constant 0 : index
    %462 = vector.load %arg8[%c0_236, %c0_237] : memref<128x512xbf16, #tpu.memory_space<vmem>>, vector<128x512xbf16>
    %cst_238 = arith.constant dense<0.000000e+00> : vector<8x512xf32>
    %463 = tpu.matmul %461, %462, %cst_238 {dimension_numbers = #tpu.dot_dimension_numbers<[1], [0], [0], [1], [0, 0, 1, 1], [], []>} : vector<8x128xbf16>, vector<128x512xbf16>, vector<8x512xf32> -> vector<8x512xf32>
    %464 = arith.addf %460, %463 : vector<8x512xf32>
    %465 = vector.extract_strided_slice %464 {offsets = [0, 0], sizes = [8, 128], strides = [1, 1]} : vector<8x512xf32> to vector<8x128xf32>
    %cst_239 = arith.constant 0.000000e+00 : f32
    %466 = vector.broadcast %cst_239 : f32 to vector<8x128xf32>
    %467 = arith.subf %466, %465 : vector<8x128xf32>
    %468 = math.exp %467 : vector<8x128xf32>
    %cst_240 = arith.constant 1.000000e+00 : f32
    %469 = vector.broadcast %cst_240 : f32 to vector<8x128xf32>
    %470 = arith.addf %469, %468 : vector<8x128xf32>
    %471 = tpu.reciprocal %470 {approx = true} : vector<8x128xf32> -> vector<8x128xf32>
    %472 = vector.extract_strided_slice %464 {offsets = [0, 128], sizes = [8, 128], strides = [1, 1]} : vector<8x512xf32> to vector<8x128xf32>
    %cst_241 = arith.constant 0.000000e+00 : f32
    %473 = vector.broadcast %cst_241 : f32 to vector<8x128xf32>
    %474 = arith.subf %473, %472 : vector<8x128xf32>
    %475 = math.exp %474 : vector<8x128xf32>
    %cst_242 = arith.constant 1.000000e+00 : f32
    %476 = vector.broadcast %cst_242 : f32 to vector<8x128xf32>
    %477 = arith.addf %476, %475 : vector<8x128xf32>
    %478 = tpu.reciprocal %477 {approx = true} : vector<8x128xf32> -> vector<8x128xf32>
    %479 = vector.extract_strided_slice %464 {offsets = [0, 256], sizes = [8, 128], strides = [1, 1]} : vector<8x512xf32> to vector<8x128xf32>
    %480 = math.tanh %479 : vector<8x128xf32>
    %481 = vector.extract_strided_slice %464 {offsets = [0, 384], sizes = [8, 128], strides = [1, 1]} : vector<8x512xf32> to vector<8x128xf32>
    %cst_243 = arith.constant 0.000000e+00 : f32
    %482 = vector.broadcast %cst_243 : f32 to vector<8x128xf32>
    %483 = arith.subf %482, %481 : vector<8x128xf32>
    %484 = math.exp %483 : vector<8x128xf32>
    %cst_244 = arith.constant 1.000000e+00 : f32
    %485 = vector.broadcast %cst_244 : f32 to vector<8x128xf32>
    %486 = arith.addf %485, %484 : vector<8x128xf32>
    %487 = tpu.reciprocal %486 {approx = true} : vector<8x128xf32> -> vector<8x128xf32>
    %488 = arith.mulf %478, %458 : vector<8x128xf32>
    %489 = arith.mulf %471, %480 : vector<8x128xf32>
    %490 = arith.addf %488, %489 : vector<8x128xf32>
    %491 = math.tanh %490 : vector<8x128xf32>
    %492 = arith.mulf %487, %491 : vector<8x128xf32>
    %c1_245 = arith.constant 1 : index
    %c0_246 = arith.constant 0 : index
    %c0_247 = arith.constant 0 : index
    %493 = vector.load %arg14[%c1_245, %c0_246, %c0_247] : memref<9x8x512xf32, #tpu.memory_space<vmem>>, vector<1x8x512xf32>
    %494 = vector.shape_cast %493 : vector<1x8x512xf32> to vector<8x512xf32>
    %495 = arith.truncf %492 : vector<8x128xf32> to vector<8x128xbf16>
    %c0_248 = arith.constant 0 : index
    %c0_249 = arith.constant 0 : index
    %496 = vector.load %arg8[%c0_248, %c0_249] : memref<128x512xbf16, #tpu.memory_space<vmem>>, vector<128x512xbf16>
    %cst_250 = arith.constant dense<0.000000e+00> : vector<8x512xf32>
    %497 = tpu.matmul %495, %496, %cst_250 {dimension_numbers = #tpu.dot_dimension_numbers<[1], [0], [0], [1], [0, 0, 1, 1], [], []>} : vector<8x128xbf16>, vector<128x512xbf16>, vector<8x512xf32> -> vector<8x512xf32>
    %498 = arith.addf %494, %497 : vector<8x512xf32>
    %499 = vector.extract_strided_slice %498 {offsets = [0, 0], sizes = [8, 128], strides = [1, 1]} : vector<8x512xf32> to vector<8x128xf32>
    %cst_251 = arith.constant 0.000000e+00 : f32
    %500 = vector.broadcast %cst_251 : f32 to vector<8x128xf32>
    %501 = arith.subf %500, %499 : vector<8x128xf32>
    %502 = math.exp %501 : vector<8x128xf32>
    %cst_252 = arith.constant 1.000000e+00 : f32
    %503 = vector.broadcast %cst_252 : f32 to vector<8x128xf32>
    %504 = arith.addf %503, %502 : vector<8x128xf32>
    %505 = tpu.reciprocal %504 {approx = true} : vector<8x128xf32> -> vector<8x128xf32>
    %506 = vector.extract_strided_slice %498 {offsets = [0, 128], sizes = [8, 128], strides = [1, 1]} : vector<8x512xf32> to vector<8x128xf32>
    %cst_253 = arith.constant 0.000000e+00 : f32
    %507 = vector.broadcast %cst_253 : f32 to vector<8x128xf32>
    %508 = arith.subf %507, %506 : vector<8x128xf32>
    %509 = math.exp %508 : vector<8x128xf32>
    %cst_254 = arith.constant 1.000000e+00 : f32
    %510 = vector.broadcast %cst_254 : f32 to vector<8x128xf32>
    %511 = arith.addf %510, %509 : vector<8x128xf32>
    %512 = tpu.reciprocal %511 {approx = true} : vector<8x128xf32> -> vector<8x128xf32>
    %513 = vector.extract_strided_slice %498 {offsets = [0, 256], sizes = [8, 128], strides = [1, 1]} : vector<8x512xf32> to vector<8x128xf32>
    %514 = math.tanh %513 : vector<8x128xf32>
    %515 = vector.extract_strided_slice %498 {offsets = [0, 384], sizes = [8, 128], strides = [1, 1]} : vector<8x512xf32> to vector<8x128xf32>
    %cst_255 = arith.constant 0.000000e+00 : f32
    %516 = vector.broadcast %cst_255 : f32 to vector<8x128xf32>
    %517 = arith.subf %516, %515 : vector<8x128xf32>
    %518 = math.exp %517 : vector<8x128xf32>
    %cst_256 = arith.constant 1.000000e+00 : f32
    %519 = vector.broadcast %cst_256 : f32 to vector<8x128xf32>
    %520 = arith.addf %519, %518 : vector<8x128xf32>
    %521 = tpu.reciprocal %520 {approx = true} : vector<8x128xf32> -> vector<8x128xf32>
    %522 = arith.mulf %512, %490 : vector<8x128xf32>
    %523 = arith.mulf %505, %514 : vector<8x128xf32>
    %524 = arith.addf %522, %523 : vector<8x128xf32>
    %525 = math.tanh %524 : vector<8x128xf32>
    %526 = arith.mulf %521, %525 : vector<8x128xf32>
    %c2_257 = arith.constant 2 : index
    %c0_258 = arith.constant 0 : index
    %c0_259 = arith.constant 0 : index
    %527 = vector.load %arg14[%c2_257, %c0_258, %c0_259] : memref<9x8x512xf32, #tpu.memory_space<vmem>>, vector<1x8x512xf32>
    %528 = vector.shape_cast %527 : vector<1x8x512xf32> to vector<8x512xf32>
    %529 = arith.truncf %526 : vector<8x128xf32> to vector<8x128xbf16>
    %c0_260 = arith.constant 0 : index
    %c0_261 = arith.constant 0 : index
    %530 = vector.load %arg8[%c0_260, %c0_261] : memref<128x512xbf16, #tpu.memory_space<vmem>>, vector<128x512xbf16>
    %cst_262 = arith.constant dense<0.000000e+00> : vector<8x512xf32>
    %531 = tpu.matmul %529, %530, %cst_262 {dimension_numbers = #tpu.dot_dimension_numbers<[1], [0], [0], [1], [0, 0, 1, 1], [], []>} : vector<8x128xbf16>, vector<128x512xbf16>, vector<8x512xf32> -> vector<8x512xf32>
    %532 = arith.addf %528, %531 : vector<8x512xf32>
    %533 = vector.extract_strided_slice %532 {offsets = [0, 0], sizes = [8, 128], strides = [1, 1]} : vector<8x512xf32> to vector<8x128xf32>
    %cst_263 = arith.constant 0.000000e+00 : f32
    %534 = vector.broadcast %cst_263 : f32 to vector<8x128xf32>
    %535 = arith.subf %534, %533 : vector<8x128xf32>
    %536 = math.exp %535 : vector<8x128xf32>
    %cst_264 = arith.constant 1.000000e+00 : f32
    %537 = vector.broadcast %cst_264 : f32 to vector<8x128xf32>
    %538 = arith.addf %537, %536 : vector<8x128xf32>
    %539 = tpu.reciprocal %538 {approx = true} : vector<8x128xf32> -> vector<8x128xf32>
    %540 = vector.extract_strided_slice %532 {offsets = [0, 128], sizes = [8, 128], strides = [1, 1]} : vector<8x512xf32> to vector<8x128xf32>
    %cst_265 = arith.constant 0.000000e+00 : f32
    %541 = vector.broadcast %cst_265 : f32 to vector<8x128xf32>
    %542 = arith.subf %541, %540 : vector<8x128xf32>
    %543 = math.exp %542 : vector<8x128xf32>
    %cst_266 = arith.constant 1.000000e+00 : f32
    %544 = vector.broadcast %cst_266 : f32 to vector<8x128xf32>
    %545 = arith.addf %544, %543 : vector<8x128xf32>
    %546 = tpu.reciprocal %545 {approx = true} : vector<8x128xf32> -> vector<8x128xf32>
    %547 = vector.extract_strided_slice %532 {offsets = [0, 256], sizes = [8, 128], strides = [1, 1]} : vector<8x512xf32> to vector<8x128xf32>
    %548 = math.tanh %547 : vector<8x128xf32>
    %549 = vector.extract_strided_slice %532 {offsets = [0, 384], sizes = [8, 128], strides = [1, 1]} : vector<8x512xf32> to vector<8x128xf32>
    %cst_267 = arith.constant 0.000000e+00 : f32
    %550 = vector.broadcast %cst_267 : f32 to vector<8x128xf32>
    %551 = arith.subf %550, %549 : vector<8x128xf32>
    %552 = math.exp %551 : vector<8x128xf32>
    %cst_268 = arith.constant 1.000000e+00 : f32
    %553 = vector.broadcast %cst_268 : f32 to vector<8x128xf32>
    %554 = arith.addf %553, %552 : vector<8x128xf32>
    %555 = tpu.reciprocal %554 {approx = true} : vector<8x128xf32> -> vector<8x128xf32>
    %556 = arith.mulf %546, %524 : vector<8x128xf32>
    %557 = arith.mulf %539, %548 : vector<8x128xf32>
    %558 = arith.addf %556, %557 : vector<8x128xf32>
    %559 = math.tanh %558 : vector<8x128xf32>
    %560 = arith.mulf %555, %559 : vector<8x128xf32>
    %c3_269 = arith.constant 3 : index
    %c0_270 = arith.constant 0 : index
    %c0_271 = arith.constant 0 : index
    %561 = vector.load %arg14[%c3_269, %c0_270, %c0_271] : memref<9x8x512xf32, #tpu.memory_space<vmem>>, vector<1x8x512xf32>
    %562 = vector.shape_cast %561 : vector<1x8x512xf32> to vector<8x512xf32>
    %563 = arith.truncf %560 : vector<8x128xf32> to vector<8x128xbf16>
    %c0_272 = arith.constant 0 : index
    %c0_273 = arith.constant 0 : index
    %564 = vector.load %arg8[%c0_272, %c0_273] : memref<128x512xbf16, #tpu.memory_space<vmem>>, vector<128x512xbf16>
    %cst_274 = arith.constant dense<0.000000e+00> : vector<8x512xf32>
    %565 = tpu.matmul %563, %564, %cst_274 {dimension_numbers = #tpu.dot_dimension_numbers<[1], [0], [0], [1], [0, 0, 1, 1], [], []>} : vector<8x128xbf16>, vector<128x512xbf16>, vector<8x512xf32> -> vector<8x512xf32>
    %566 = arith.addf %562, %565 : vector<8x512xf32>
    %567 = vector.extract_strided_slice %566 {offsets = [0, 0], sizes = [8, 128], strides = [1, 1]} : vector<8x512xf32> to vector<8x128xf32>
    %cst_275 = arith.constant 0.000000e+00 : f32
    %568 = vector.broadcast %cst_275 : f32 to vector<8x128xf32>
    %569 = arith.subf %568, %567 : vector<8x128xf32>
    %570 = math.exp %569 : vector<8x128xf32>
    %cst_276 = arith.constant 1.000000e+00 : f32
    %571 = vector.broadcast %cst_276 : f32 to vector<8x128xf32>
    %572 = arith.addf %571, %570 : vector<8x128xf32>
    %573 = tpu.reciprocal %572 {approx = true} : vector<8x128xf32> -> vector<8x128xf32>
    %574 = vector.extract_strided_slice %566 {offsets = [0, 128], sizes = [8, 128], strides = [1, 1]} : vector<8x512xf32> to vector<8x128xf32>
    %cst_277 = arith.constant 0.000000e+00 : f32
    %575 = vector.broadcast %cst_277 : f32 to vector<8x128xf32>
    %576 = arith.subf %575, %574 : vector<8x128xf32>
    %577 = math.exp %576 : vector<8x128xf32>
    %cst_278 = arith.constant 1.000000e+00 : f32
    %578 = vector.broadcast %cst_278 : f32 to vector<8x128xf32>
    %579 = arith.addf %578, %577 : vector<8x128xf32>
    %580 = tpu.reciprocal %579 {approx = true} : vector<8x128xf32> -> vector<8x128xf32>
    %581 = vector.extract_strided_slice %566 {offsets = [0, 256], sizes = [8, 128], strides = [1, 1]} : vector<8x512xf32> to vector<8x128xf32>
    %582 = math.tanh %581 : vector<8x128xf32>
    %583 = vector.extract_strided_slice %566 {offsets = [0, 384], sizes = [8, 128], strides = [1, 1]} : vector<8x512xf32> to vector<8x128xf32>
    %cst_279 = arith.constant 0.000000e+00 : f32
    %584 = vector.broadcast %cst_279 : f32 to vector<8x128xf32>
    %585 = arith.subf %584, %583 : vector<8x128xf32>
    %586 = math.exp %585 : vector<8x128xf32>
    %cst_280 = arith.constant 1.000000e+00 : f32
    %587 = vector.broadcast %cst_280 : f32 to vector<8x128xf32>
    %588 = arith.addf %587, %586 : vector<8x128xf32>
    %589 = tpu.reciprocal %588 {approx = true} : vector<8x128xf32> -> vector<8x128xf32>
    %590 = arith.mulf %580, %558 : vector<8x128xf32>
    %591 = arith.mulf %573, %582 : vector<8x128xf32>
    %592 = arith.addf %590, %591 : vector<8x128xf32>
    %593 = math.tanh %592 : vector<8x128xf32>
    %594 = arith.mulf %589, %593 : vector<8x128xf32>
    %c4_281 = arith.constant 4 : index
    %c0_282 = arith.constant 0 : index
    %c0_283 = arith.constant 0 : index
    %595 = vector.load %arg14[%c4_281, %c0_282, %c0_283] : memref<9x8x512xf32, #tpu.memory_space<vmem>>, vector<1x8x512xf32>
    %596 = vector.shape_cast %595 : vector<1x8x512xf32> to vector<8x512xf32>
    %597 = arith.truncf %594 : vector<8x128xf32> to vector<8x128xbf16>
    %c0_284 = arith.constant 0 : index
    %c0_285 = arith.constant 0 : index
    %598 = vector.load %arg8[%c0_284, %c0_285] : memref<128x512xbf16, #tpu.memory_space<vmem>>, vector<128x512xbf16>
    %cst_286 = arith.constant dense<0.000000e+00> : vector<8x512xf32>
    %599 = tpu.matmul %597, %598, %cst_286 {dimension_numbers = #tpu.dot_dimension_numbers<[1], [0], [0], [1], [0, 0, 1, 1], [], []>} : vector<8x128xbf16>, vector<128x512xbf16>, vector<8x512xf32> -> vector<8x512xf32>
    %600 = arith.addf %596, %599 : vector<8x512xf32>
    %601 = vector.extract_strided_slice %600 {offsets = [0, 0], sizes = [8, 128], strides = [1, 1]} : vector<8x512xf32> to vector<8x128xf32>
    %cst_287 = arith.constant 0.000000e+00 : f32
    %602 = vector.broadcast %cst_287 : f32 to vector<8x128xf32>
    %603 = arith.subf %602, %601 : vector<8x128xf32>
    %604 = math.exp %603 : vector<8x128xf32>
    %cst_288 = arith.constant 1.000000e+00 : f32
    %605 = vector.broadcast %cst_288 : f32 to vector<8x128xf32>
    %606 = arith.addf %605, %604 : vector<8x128xf32>
    %607 = tpu.reciprocal %606 {approx = true} : vector<8x128xf32> -> vector<8x128xf32>
    %608 = vector.extract_strided_slice %600 {offsets = [0, 128], sizes = [8, 128], strides = [1, 1]} : vector<8x512xf32> to vector<8x128xf32>
    %cst_289 = arith.constant 0.000000e+00 : f32
    %609 = vector.broadcast %cst_289 : f32 to vector<8x128xf32>
    %610 = arith.subf %609, %608 : vector<8x128xf32>
    %611 = math.exp %610 : vector<8x128xf32>
    %cst_290 = arith.constant 1.000000e+00 : f32
    %612 = vector.broadcast %cst_290 : f32 to vector<8x128xf32>
    %613 = arith.addf %612, %611 : vector<8x128xf32>
    %614 = tpu.reciprocal %613 {approx = true} : vector<8x128xf32> -> vector<8x128xf32>
    %615 = vector.extract_strided_slice %600 {offsets = [0, 256], sizes = [8, 128], strides = [1, 1]} : vector<8x512xf32> to vector<8x128xf32>
    %616 = math.tanh %615 : vector<8x128xf32>
    %617 = vector.extract_strided_slice %600 {offsets = [0, 384], sizes = [8, 128], strides = [1, 1]} : vector<8x512xf32> to vector<8x128xf32>
    %cst_291 = arith.constant 0.000000e+00 : f32
    %618 = vector.broadcast %cst_291 : f32 to vector<8x128xf32>
    %619 = arith.subf %618, %617 : vector<8x128xf32>
    %620 = math.exp %619 : vector<8x128xf32>
    %cst_292 = arith.constant 1.000000e+00 : f32
    %621 = vector.broadcast %cst_292 : f32 to vector<8x128xf32>
    %622 = arith.addf %621, %620 : vector<8x128xf32>
    %623 = tpu.reciprocal %622 {approx = true} : vector<8x128xf32> -> vector<8x128xf32>
    %624 = arith.mulf %614, %592 : vector<8x128xf32>
    %625 = arith.mulf %607, %616 : vector<8x128xf32>
    %626 = arith.addf %624, %625 : vector<8x128xf32>
    %627 = math.tanh %626 : vector<8x128xf32>
    %628 = arith.mulf %623, %627 : vector<8x128xf32>
    %c5_293 = arith.constant 5 : index
    %c0_294 = arith.constant 0 : index
    %c0_295 = arith.constant 0 : index
    %629 = vector.load %arg14[%c5_293, %c0_294, %c0_295] : memref<9x8x512xf32, #tpu.memory_space<vmem>>, vector<1x8x512xf32>
    %630 = vector.shape_cast %629 : vector<1x8x512xf32> to vector<8x512xf32>
    %631 = arith.truncf %628 : vector<8x128xf32> to vector<8x128xbf16>
    %c0_296 = arith.constant 0 : index
    %c0_297 = arith.constant 0 : index
    %632 = vector.load %arg8[%c0_296, %c0_297] : memref<128x512xbf16, #tpu.memory_space<vmem>>, vector<128x512xbf16>
    %cst_298 = arith.constant dense<0.000000e+00> : vector<8x512xf32>
    %633 = tpu.matmul %631, %632, %cst_298 {dimension_numbers = #tpu.dot_dimension_numbers<[1], [0], [0], [1], [0, 0, 1, 1], [], []>} : vector<8x128xbf16>, vector<128x512xbf16>, vector<8x512xf32> -> vector<8x512xf32>
    %634 = arith.addf %630, %633 : vector<8x512xf32>
    %635 = vector.extract_strided_slice %634 {offsets = [0, 0], sizes = [8, 128], strides = [1, 1]} : vector<8x512xf32> to vector<8x128xf32>
    %cst_299 = arith.constant 0.000000e+00 : f32
    %636 = vector.broadcast %cst_299 : f32 to vector<8x128xf32>
    %637 = arith.subf %636, %635 : vector<8x128xf32>
    %638 = math.exp %637 : vector<8x128xf32>
    %cst_300 = arith.constant 1.000000e+00 : f32
    %639 = vector.broadcast %cst_300 : f32 to vector<8x128xf32>
    %640 = arith.addf %639, %638 : vector<8x128xf32>
    %641 = tpu.reciprocal %640 {approx = true} : vector<8x128xf32> -> vector<8x128xf32>
    %642 = vector.extract_strided_slice %634 {offsets = [0, 128], sizes = [8, 128], strides = [1, 1]} : vector<8x512xf32> to vector<8x128xf32>
    %cst_301 = arith.constant 0.000000e+00 : f32
    %643 = vector.broadcast %cst_301 : f32 to vector<8x128xf32>
    %644 = arith.subf %643, %642 : vector<8x128xf32>
    %645 = math.exp %644 : vector<8x128xf32>
    %cst_302 = arith.constant 1.000000e+00 : f32
    %646 = vector.broadcast %cst_302 : f32 to vector<8x128xf32>
    %647 = arith.addf %646, %645 : vector<8x128xf32>
    %648 = tpu.reciprocal %647 {approx = true} : vector<8x128xf32> -> vector<8x128xf32>
    %649 = vector.extract_strided_slice %634 {offsets = [0, 256], sizes = [8, 128], strides = [1, 1]} : vector<8x512xf32> to vector<8x128xf32>
    %650 = math.tanh %649 : vector<8x128xf32>
    %651 = vector.extract_strided_slice %634 {offsets = [0, 384], sizes = [8, 128], strides = [1, 1]} : vector<8x512xf32> to vector<8x128xf32>
    %cst_303 = arith.constant 0.000000e+00 : f32
    %652 = vector.broadcast %cst_303 : f32 to vector<8x128xf32>
    %653 = arith.subf %652, %651 : vector<8x128xf32>
    %654 = math.exp %653 : vector<8x128xf32>
    %cst_304 = arith.constant 1.000000e+00 : f32
    %655 = vector.broadcast %cst_304 : f32 to vector<8x128xf32>
    %656 = arith.addf %655, %654 : vector<8x128xf32>
    %657 = tpu.reciprocal %656 {approx = true} : vector<8x128xf32> -> vector<8x128xf32>
    %658 = arith.mulf %648, %626 : vector<8x128xf32>
    %659 = arith.mulf %641, %650 : vector<8x128xf32>
    %660 = arith.addf %658, %659 : vector<8x128xf32>
    %661 = math.tanh %660 : vector<8x128xf32>
    %662 = arith.mulf %657, %661 : vector<8x128xf32>
    %c6_305 = arith.constant 6 : index
    %c0_306 = arith.constant 0 : index
    %c0_307 = arith.constant 0 : index
    %663 = vector.load %arg14[%c6_305, %c0_306, %c0_307] : memref<9x8x512xf32, #tpu.memory_space<vmem>>, vector<1x8x512xf32>
    %664 = vector.shape_cast %663 : vector<1x8x512xf32> to vector<8x512xf32>
    %665 = arith.truncf %662 : vector<8x128xf32> to vector<8x128xbf16>
    %c0_308 = arith.constant 0 : index
    %c0_309 = arith.constant 0 : index
    %666 = vector.load %arg8[%c0_308, %c0_309] : memref<128x512xbf16, #tpu.memory_space<vmem>>, vector<128x512xbf16>
    %cst_310 = arith.constant dense<0.000000e+00> : vector<8x512xf32>
    %667 = tpu.matmul %665, %666, %cst_310 {dimension_numbers = #tpu.dot_dimension_numbers<[1], [0], [0], [1], [0, 0, 1, 1], [], []>} : vector<8x128xbf16>, vector<128x512xbf16>, vector<8x512xf32> -> vector<8x512xf32>
    %668 = arith.addf %664, %667 : vector<8x512xf32>
    %669 = vector.extract_strided_slice %668 {offsets = [0, 0], sizes = [8, 128], strides = [1, 1]} : vector<8x512xf32> to vector<8x128xf32>
    %cst_311 = arith.constant 0.000000e+00 : f32
    %670 = vector.broadcast %cst_311 : f32 to vector<8x128xf32>
    %671 = arith.subf %670, %669 : vector<8x128xf32>
    %672 = math.exp %671 : vector<8x128xf32>
    %cst_312 = arith.constant 1.000000e+00 : f32
    %673 = vector.broadcast %cst_312 : f32 to vector<8x128xf32>
    %674 = arith.addf %673, %672 : vector<8x128xf32>
    %675 = tpu.reciprocal %674 {approx = true} : vector<8x128xf32> -> vector<8x128xf32>
    %676 = vector.extract_strided_slice %668 {offsets = [0, 128], sizes = [8, 128], strides = [1, 1]} : vector<8x512xf32> to vector<8x128xf32>
    %cst_313 = arith.constant 0.000000e+00 : f32
    %677 = vector.broadcast %cst_313 : f32 to vector<8x128xf32>
    %678 = arith.subf %677, %676 : vector<8x128xf32>
    %679 = math.exp %678 : vector<8x128xf32>
    %cst_314 = arith.constant 1.000000e+00 : f32
    %680 = vector.broadcast %cst_314 : f32 to vector<8x128xf32>
    %681 = arith.addf %680, %679 : vector<8x128xf32>
    %682 = tpu.reciprocal %681 {approx = true} : vector<8x128xf32> -> vector<8x128xf32>
    %683 = vector.extract_strided_slice %668 {offsets = [0, 256], sizes = [8, 128], strides = [1, 1]} : vector<8x512xf32> to vector<8x128xf32>
    %684 = math.tanh %683 : vector<8x128xf32>
    %685 = vector.extract_strided_slice %668 {offsets = [0, 384], sizes = [8, 128], strides = [1, 1]} : vector<8x512xf32> to vector<8x128xf32>
    %cst_315 = arith.constant 0.000000e+00 : f32
    %686 = vector.broadcast %cst_315 : f32 to vector<8x128xf32>
    %687 = arith.subf %686, %685 : vector<8x128xf32>
    %688 = math.exp %687 : vector<8x128xf32>
    %cst_316 = arith.constant 1.000000e+00 : f32
    %689 = vector.broadcast %cst_316 : f32 to vector<8x128xf32>
    %690 = arith.addf %689, %688 : vector<8x128xf32>
    %691 = tpu.reciprocal %690 {approx = true} : vector<8x128xf32> -> vector<8x128xf32>
    %692 = arith.mulf %682, %660 : vector<8x128xf32>
    %693 = arith.mulf %675, %684 : vector<8x128xf32>
    %694 = arith.addf %692, %693 : vector<8x128xf32>
    %695 = math.tanh %694 : vector<8x128xf32>
    %696 = arith.mulf %691, %695 : vector<8x128xf32>
    %c7_317 = arith.constant 7 : index
    %c0_318 = arith.constant 0 : index
    %c0_319 = arith.constant 0 : index
    %697 = vector.load %arg14[%c7_317, %c0_318, %c0_319] : memref<9x8x512xf32, #tpu.memory_space<vmem>>, vector<1x8x512xf32>
    %698 = vector.shape_cast %697 : vector<1x8x512xf32> to vector<8x512xf32>
    %699 = arith.truncf %696 : vector<8x128xf32> to vector<8x128xbf16>
    %c0_320 = arith.constant 0 : index
    %c0_321 = arith.constant 0 : index
    %700 = vector.load %arg8[%c0_320, %c0_321] : memref<128x512xbf16, #tpu.memory_space<vmem>>, vector<128x512xbf16>
    %cst_322 = arith.constant dense<0.000000e+00> : vector<8x512xf32>
    %701 = tpu.matmul %699, %700, %cst_322 {dimension_numbers = #tpu.dot_dimension_numbers<[1], [0], [0], [1], [0, 0, 1, 1], [], []>} : vector<8x128xbf16>, vector<128x512xbf16>, vector<8x512xf32> -> vector<8x512xf32>
    %702 = arith.addf %698, %701 : vector<8x512xf32>
    %703 = vector.extract_strided_slice %702 {offsets = [0, 0], sizes = [8, 128], strides = [1, 1]} : vector<8x512xf32> to vector<8x128xf32>
    %cst_323 = arith.constant 0.000000e+00 : f32
    %704 = vector.broadcast %cst_323 : f32 to vector<8x128xf32>
    %705 = arith.subf %704, %703 : vector<8x128xf32>
    %706 = math.exp %705 : vector<8x128xf32>
    %cst_324 = arith.constant 1.000000e+00 : f32
    %707 = vector.broadcast %cst_324 : f32 to vector<8x128xf32>
    %708 = arith.addf %707, %706 : vector<8x128xf32>
    %709 = tpu.reciprocal %708 {approx = true} : vector<8x128xf32> -> vector<8x128xf32>
    %710 = vector.extract_strided_slice %702 {offsets = [0, 128], sizes = [8, 128], strides = [1, 1]} : vector<8x512xf32> to vector<8x128xf32>
    %cst_325 = arith.constant 0.000000e+00 : f32
    %711 = vector.broadcast %cst_325 : f32 to vector<8x128xf32>
    %712 = arith.subf %711, %710 : vector<8x128xf32>
    %713 = math.exp %712 : vector<8x128xf32>
    %cst_326 = arith.constant 1.000000e+00 : f32
    %714 = vector.broadcast %cst_326 : f32 to vector<8x128xf32>
    %715 = arith.addf %714, %713 : vector<8x128xf32>
    %716 = tpu.reciprocal %715 {approx = true} : vector<8x128xf32> -> vector<8x128xf32>
    %717 = vector.extract_strided_slice %702 {offsets = [0, 256], sizes = [8, 128], strides = [1, 1]} : vector<8x512xf32> to vector<8x128xf32>
    %718 = math.tanh %717 : vector<8x128xf32>
    %719 = vector.extract_strided_slice %702 {offsets = [0, 384], sizes = [8, 128], strides = [1, 1]} : vector<8x512xf32> to vector<8x128xf32>
    %cst_327 = arith.constant 0.000000e+00 : f32
    %720 = vector.broadcast %cst_327 : f32 to vector<8x128xf32>
    %721 = arith.subf %720, %719 : vector<8x128xf32>
    %722 = math.exp %721 : vector<8x128xf32>
    %cst_328 = arith.constant 1.000000e+00 : f32
    %723 = vector.broadcast %cst_328 : f32 to vector<8x128xf32>
    %724 = arith.addf %723, %722 : vector<8x128xf32>
    %725 = tpu.reciprocal %724 {approx = true} : vector<8x128xf32> -> vector<8x128xf32>
    %726 = arith.mulf %716, %694 : vector<8x128xf32>
    %727 = arith.mulf %709, %718 : vector<8x128xf32>
    %728 = arith.addf %726, %727 : vector<8x128xf32>
    %729 = math.tanh %728 : vector<8x128xf32>
    %730 = arith.mulf %725, %729 : vector<8x128xf32>
    %c8_329 = arith.constant 8 : index
    %c0_330 = arith.constant 0 : index
    %c0_331 = arith.constant 0 : index
    %731 = vector.load %arg14[%c8_329, %c0_330, %c0_331] : memref<9x8x512xf32, #tpu.memory_space<vmem>>, vector<1x8x512xf32>
    %732 = vector.shape_cast %731 : vector<1x8x512xf32> to vector<8x512xf32>
    %733 = arith.truncf %730 : vector<8x128xf32> to vector<8x128xbf16>
    %c0_332 = arith.constant 0 : index
    %c0_333 = arith.constant 0 : index
    %734 = vector.load %arg8[%c0_332, %c0_333] : memref<128x512xbf16, #tpu.memory_space<vmem>>, vector<128x512xbf16>
    %cst_334 = arith.constant dense<0.000000e+00> : vector<8x512xf32>
    %735 = tpu.matmul %733, %734, %cst_334 {dimension_numbers = #tpu.dot_dimension_numbers<[1], [0], [0], [1], [0, 0, 1, 1], [], []>} : vector<8x128xbf16>, vector<128x512xbf16>, vector<8x512xf32> -> vector<8x512xf32>
    %736 = arith.addf %732, %735 : vector<8x512xf32>
    %737 = vector.extract_strided_slice %736 {offsets = [0, 0], sizes = [8, 128], strides = [1, 1]} : vector<8x512xf32> to vector<8x128xf32>
    %cst_335 = arith.constant 0.000000e+00 : f32
    %738 = vector.broadcast %cst_335 : f32 to vector<8x128xf32>
    %739 = arith.subf %738, %737 : vector<8x128xf32>
    %740 = math.exp %739 : vector<8x128xf32>
    %cst_336 = arith.constant 1.000000e+00 : f32
    %741 = vector.broadcast %cst_336 : f32 to vector<8x128xf32>
    %742 = arith.addf %741, %740 : vector<8x128xf32>
    %743 = tpu.reciprocal %742 {approx = true} : vector<8x128xf32> -> vector<8x128xf32>
    %744 = vector.extract_strided_slice %736 {offsets = [0, 128], sizes = [8, 128], strides = [1, 1]} : vector<8x512xf32> to vector<8x128xf32>
    %cst_337 = arith.constant 0.000000e+00 : f32
    %745 = vector.broadcast %cst_337 : f32 to vector<8x128xf32>
    %746 = arith.subf %745, %744 : vector<8x128xf32>
    %747 = math.exp %746 : vector<8x128xf32>
    %cst_338 = arith.constant 1.000000e+00 : f32
    %748 = vector.broadcast %cst_338 : f32 to vector<8x128xf32>
    %749 = arith.addf %748, %747 : vector<8x128xf32>
    %750 = tpu.reciprocal %749 {approx = true} : vector<8x128xf32> -> vector<8x128xf32>
    %751 = vector.extract_strided_slice %736 {offsets = [0, 256], sizes = [8, 128], strides = [1, 1]} : vector<8x512xf32> to vector<8x128xf32>
    %752 = math.tanh %751 : vector<8x128xf32>
    %753 = vector.extract_strided_slice %736 {offsets = [0, 384], sizes = [8, 128], strides = [1, 1]} : vector<8x512xf32> to vector<8x128xf32>
    %cst_339 = arith.constant 0.000000e+00 : f32
    %754 = vector.broadcast %cst_339 : f32 to vector<8x128xf32>
    %755 = arith.subf %754, %753 : vector<8x128xf32>
    %756 = math.exp %755 : vector<8x128xf32>
    %cst_340 = arith.constant 1.000000e+00 : f32
    %757 = vector.broadcast %cst_340 : f32 to vector<8x128xf32>
    %758 = arith.addf %757, %756 : vector<8x128xf32>
    %759 = tpu.reciprocal %758 {approx = true} : vector<8x128xf32> -> vector<8x128xf32>
    %760 = arith.mulf %750, %728 : vector<8x128xf32>
    %761 = arith.mulf %743, %752 : vector<8x128xf32>
    %762 = arith.addf %760, %761 : vector<8x128xf32>
    %763 = math.tanh %762 : vector<8x128xf32>
    %764 = arith.mulf %759, %763 : vector<8x128xf32>
    %765 = arith.truncf %764 : vector<8x128xf32> to vector<8x128xbf16>
    %c0_341 = arith.constant 0 : index
    %c0_342 = arith.constant 0 : index
    %766 = vector.load %arg10[%c0_341, %c0_342] : memref<128x1024xbf16, #tpu.memory_space<vmem>>, vector<128x1024xbf16>
    %cst_343 = arith.constant dense<0.000000e+00> : vector<8x1024xf32>
    %767 = tpu.matmul %765, %766, %cst_343 {dimension_numbers = #tpu.dot_dimension_numbers<[1], [0], [0], [1], [0, 0, 1, 1], [], []>} : vector<8x128xbf16>, vector<128x1024xbf16>, vector<8x1024xf32> -> vector<8x1024xf32>
    %c0_344 = arith.constant 0 : index
    %c0_345 = arith.constant 0 : index
    %768 = vector.load %arg11[%c0_344, %c0_345] : memref<1x1024xf32, #tpu.memory_space<vmem>>, vector<1x1024xf32>
    %769 = vector.broadcast %768 : vector<1x1024xf32> to vector<8x1024xf32>
    %770 = arith.addf %767, %769 : vector<8x1024xf32>
    %771 = vector.extract_strided_slice %770 {offsets = [0, 0], sizes = [2, 1024], strides = [1, 1]} : vector<8x1024xf32> to vector<2x1024xf32>
    %c0_346 = arith.constant 0 : index
    %c0_347 = arith.constant 0 : index
    %772 = vector.load %arg12[%c0_346, %c0_347] : memref<2x1024xf32, #tpu.memory_space<vmem>>, vector<2x1024xf32>
    tpu.vector_store %arg12[%c0_346, %c0_347], %771 {strides = array<i32>} : memref<2x1024xf32, #tpu.memory_space<vmem>>, vector<2x1024xf32>,
    return
  }
  func.func @transform_0(%arg0: i32, %arg1: memref<16xi32, #tpu.memory_space<smem>>) -> (i32, i32) {
    %c0_i32 = arith.constant 0 : i32
    %c0_i32_0 = arith.constant 0 : i32
    %c0_i32_1 = arith.constant 0 : i32
    return %c0_i32, %c0_i32_0 : i32, i32
  }
  func.func @transform_1(%arg0: i32, %arg1: memref<16xi32, #tpu.memory_space<smem>>) -> (i32, i32) {
    %c0_i32 = arith.constant 0 : i32
    %c0_i32_0 = arith.constant 0 : i32
    %c0_i32_1 = arith.constant 0 : i32
    return %c0_i32, %c0_i32_0 : i32, i32
  }
  func.func @transform_2(%arg0: i32, %arg1: memref<16xi32, #tpu.memory_space<smem>>) -> (i32, i32) {
    %c0_i32 = arith.constant 0 : i32
    %c0_i32_0 = arith.constant 0 : i32
    %c0_i32_1 = arith.constant 0 : i32
    return %c0_i32, %c0_i32_0 : i32, i32
  }
  func.func @transform_3(%arg0: i32, %arg1: memref<16xi32, #tpu.memory_space<smem>>) -> (i32, i32) {
    %c0_i32 = arith.constant 0 : i32
    %c0_i32_0 = arith.constant 0 : i32
    %c0_i32_1 = arith.constant 0 : i32
    return %c0_i32, %c0_i32_0 : i32, i32
  }
  func.func @transform_4(%arg0: i32, %arg1: memref<16xi32, #tpu.memory_space<smem>>) -> (i32, i32) {
    %c0_i32 = arith.constant 0 : i32
    %c0_i32_0 = arith.constant 0 : i32
    %c0_i32_1 = arith.constant 0 : i32
    return %c0_i32, %c0_i32_0 : i32, i32
  }
  func.func @transform_5(%arg0: i32, %arg1: memref<16xi32, #tpu.memory_space<smem>>) -> (i32, i32) {
    %c0_i32 = arith.constant 0 : i32
    %c0_i32_0 = arith.constant 0 : i32
    %c0_i32_1 = arith.constant 0 : i32
    return %c0_i32, %c0_i32_0 : i32, i32
  }
  func.func @transform_6(%arg0: i32, %arg1: memref<16xi32, #tpu.memory_space<smem>>) -> (i32, i32) {
    %c0_i32 = arith.constant 0 : i32
    %c0_i32_0 = arith.constant 0 : i32
    %c0_i32_1 = arith.constant 0 : i32
    return %c0_i32, %c0_i32_0 : i32, i32
  }
  func.func @transform_7(%arg0: i32, %arg1: memref<16xi32, #tpu.memory_space<smem>>) -> (i32, i32) {
    %c0_i32 = arith.constant 0 : i32
    %c0_i32_0 = arith.constant 0 : i32
    %c0_i32_1 = arith.constant 0 : i32
    return %c0_i32, %c0_i32_0 : i32, i32
  }
  func.func @transform_8(%arg0: i32, %arg1: memref<16xi32, #tpu.memory_space<smem>>) -> (i32, i32) {
    %c0_i32 = arith.constant 0 : i32
    %c0_i32_0 = arith.constant 0 : i32
    %c0_i32_1 = arith.constant 0 : i32
    return %c0_i32, %c0_i32_0 : i32, i32
  }
  func.func @transform_9(%arg0: i32, %arg1: memref<16xi32, #tpu.memory_space<smem>>) -> (i32, i32) {
    %c0_i32 = arith.constant 0 : i32
    %c0_i32_0 = arith.constant 0 : i32
    %c0_i32_1 = arith.constant 0 : i32
    return %c0_i32, %c0_i32_0 : i32, i32
  }
  func.func @transform_10(%arg0: i32, %arg1: memref<16xi32, #tpu.memory_space<smem>>) -> (i32, i32) {
    %c0_i32 = arith.constant 0 : i32
    %c0_i32_0 = arith.constant 0 : i32
    %c0_i32_1 = arith.constant 0 : i32
    return %c0_i32, %c0_i32_0 : i32, i32
  }
}

</mosaic_0001>

<bundles_post_ra>
// kernel: _lambda_.1
= control target key start
LH: loop header
LB: loop body
LE: loop exit
PB: predicated region body
PF: predicated region fallthrough
CT: control target
= control target key end

     0   :  { %s8471_s20 = smov [#allocation6]   ;;  %s9586_s0 = inlined_call_operand.vmem [shape: s32[16], index: 0, kind: input, shape index: {}]   ;;  %s9587_s1 = inlined_call_operand.vmem [shape: f32[2,256], index: 1, kind: input, shape index: {}]   ;;  %s9588_s2 = inlined_call_operand.hbm [shape: f32[1024,256], index: 2, kind: input, shape index: {}]   ;;  %s9589_s3 = inlined_call_operand.hbm [shape: bf16[256,512], index: 3, kind: input, shape index: {}]   ;;  %s9590_s4 = inlined_call_operand.hbm [shape: bf16[128,512], index: 4, kind: input, shape index: {}]   ;;  %s9591_s5 = inlined_call_operand.vmem [shape: f32[1,512], index: 5, kind: input, shape index: {}]   ;;  %s9592_s6 = inlined_call_operand.hbm [shape: bf16[128,512], index: 6, kind: input, shape index: {}]   ;;  %s9593_s7 = inlined_call_operand.hbm [shape: bf16[128,512], index: 7, kind: input, shape index: {}]   ;;  %s9594_s8 = inlined_call_operand.vmem [shape: f32[1,512], index: 8, kind: input, shape index: {}]   ;;  %s9595_s9 = inlined_call_operand.hbm [shape: bf16[128,1024], index: 9, kind: input, shape index: {}]   ;;  %s9596_s10 = inlined_call_operand.vmem [shape: f32[1,1024], index: 10, kind: input, shape index: {}]   ;;  %s9597_s11 = inlined_call_operand.hbm [shape: f32[2,1024], index: 11, kind: output, shape index: {}]  }
   0x1   :  { %s17_s19 = sshll.u32 %s9586_s0, 4  ;;  %s18_s19 = int_to_ptr.vmem [resolvable:$true] %s17_s19 }
   0x2   :  { %20 = dma.vmem_to_smem %s18_s19, 16, %s8471_s20, [#allocation5] }
   0x3   :  { %8459 = dma.done.wait [#allocation5], 16 }
   0x4   :  { %8460 = vsyncadd [#allocation5], 4294967280 }
   0x5   :  { %23 = sfence }
   0x6   :  { %24 = vsyncpa [#allocation8], 0 }
   0x7   :  { %25 = vsyncpa [#allocation11], 0 }
   0x8   :  { %26 = vsyncpa [#allocation14], 0 }
   0x9   :  { %27 = vsyncpa [#allocation17], 0 }
   0xa   :  { %28 = vsyncpa [#allocation9], 0  ;;  %s48_s23 = sshll.u32 %s9589_s3, 4  ;;  %s8472_s24 = smov [#allocation10]   ;;  %s49_s23 = int_to_ptr.hbm [resolvable:$true] %s48_s23 }
   0xb   :  { %s50_s25 = sshll.u32 %s8472_s24, 4  ;;  %s76_s27 = sshll.u32 %s9592_s6, 4  ;;  %s51_s25 = int_to_ptr.vmem [resolvable:$true] %s50_s25  ;;  %s77_s27 = int_to_ptr.hbm [resolvable:$true] %s76_s27 }
   0xc   :  { %s8473_s28 = smov 256   ;;  %s8474_s29 = smov 16  }
   0xd   :  { %56 = dma.hbm_to_vmem [thread:$0]  %s49_s23, 8192, %s51_s25, [#allocation11], %s8473_s28, %s8473_s28, %s8474_s29  }
   0xe   :  { %s8475_s30 = smov [#allocation13]   ;;  %s35_s3 = sshll.u32 %s9588_s2, 4  ;;  %s36_s3 = int_to_ptr.hbm [resolvable:$true] %s35_s3 }
   0xf   :  { %s78_s12 = sshll.u32 %s8475_s30, 4  ;;  %s61_s16 = sshll.u32 %s9590_s4, 4  ;;  %s79_s12 = int_to_ptr.vmem [resolvable:$true] %s78_s12  ;;  %s62_s16 = int_to_ptr.hbm [resolvable:$true] %s61_s16 }
  0x10   :  { %84 = dma.hbm_to_vmem [thread:$0]  %s77_s27, 4096, %s79_s12, [#allocation14], %s8473_s28, %s8473_s28, %s8474_s29  }
  0x11   :  { %s8476_s17 = smov [#allocation7]   ;;  %s8477_s19 = smov [#allocation12]  }
  0x12   :  { %s37_s18 = sshll.u32 %s8476_s17, 4  ;;  %s63_s2 = sshll.u32 %s8477_s19, 4  ;;  %s38_s18 = int_to_ptr.vmem [resolvable:$true] %s37_s18  ;;  %s64_s2 = int_to_ptr.vmem [resolvable:$true] %s63_s2 }
  0x13   :  { %43 = dma.hbm_to_vmem [thread:$0]  %s36_s3, 32768, %s38_s18, [#allocation8], %s8473_s28, %s8473_s28, %s8474_s29  }
  0x14   :  { %s89_s22 = sshll.u32 %s9593_s7, 4  ;;  %s104_s24 = sshll.u32 %s9595_s9, 4  ;;  %s90_s22 = int_to_ptr.hbm [resolvable:$true] %s89_s22  ;;  %s105_s24 = int_to_ptr.hbm [resolvable:$true] %s104_s24 }
  0x15   :  { %69 = dma.hbm_to_vmem [thread:$0]  %s62_s16, 4096, %s64_s2, [#allocation11], %s8473_s28, %s8473_s28, %s8474_s29  }
  0x16   :  { %s8478_s25 = smov [#allocation15]   ;;  %s8479_s26 = smov [#allocation16]  }
  0x17   :  { %s91_s0 = sshll.u32 %s8478_s25, 4  ;;  %s106_s7 = sshll.u32 %s8479_s26, 4  ;;  %s92_s0 = int_to_ptr.vmem [resolvable:$true] %s91_s0  ;;  %s107_s7 = int_to_ptr.vmem [resolvable:$true] %s106_s7 }
  0x18   :  { %97 = dma.hbm_to_vmem [thread:$0]  %s90_s22, 4096, %s92_s0, [#allocation14], %s8473_s28, %s8473_s28, %s8474_s29  }
  0x19   :  { %s8480_s27 = smov 512   ;;  %s8481_s30 = smov 32  }
  0x1a   :  { %112 = dma.hbm_to_vmem [thread:$0]  %s105_s24, 8192, %s107_s7, [#allocation17], %s8480_s27, %s8480_s27, %s8481_s30  }
  0x1b   :  { %8461 = dma.done.wait [#allocation8], 32768  }
  0x1c   :  { %8462 = vsyncadd [#allocation8], 4294934528 }
  0x1d   :  { %8463 = dma.done.wait [#allocation11], 12288  }
  0x1e   :  { %8464 = vsyncadd [#allocation11], 4294955008 }
  0x1f   :  { %8465 = dma.done.wait [#allocation14], 8192  }
  0x20   :  { %8466 = vsyncadd [#allocation14], 4294959104 }
  0x21   :  { %8467 = dma.done.wait [#allocation17], 8192  }
  0x22   :  { %8468 = vsyncadd [#allocation17], 4294959104  ;;  %v8482_v0 = vmov 0.0   ;;  %s8586_s9 = sld [smem:[#allocation6]]  ;;  %v5675_v1 = vld [vmem:[#allocation10 + $0xe0] sm:$0xf]  ;;  %v178_v46 = vlaneseq }
  0x23   :  { %140 = vst [vmem:[#allocation2] sm:$0xff] %v8482_v0  ;;  %v7527_v2 = vld [vmem:[#allocation10 + $0xec] sm:$0xf0]  ;;  %v5803_v3 = vld [vmem:[#allocation10 + $0x1e0] sm:$0xf]  ;;  %s8589_s28 = sld [smem:[#allocation6 + $0x8]] }
  0x24   :  { %142 = vst [vmem:[#allocation2 + $0x10] sm:$0xff] %v8482_v0  ;;  %v5676_v4 = vor.u32 %v7527_v2, %v5675_v1  ;;  %v7559_v5 = vld [vmem:[#allocation10 + $0x1ec] sm:$0xf0]  ;;  %v7525_v6 = vld [vmem:[#allocation10 + $0xe4] sm:$0xf]  ;;  %s8591_s29 = sld [smem:[#allocation6 + $0x1]] }
  0x25   :  { %143 = vst [vmem:[#allocation2 + $0x18] sm:$0xff] %v8482_v0  ;;  %v5677_v7 = vld [vmem:[#allocation10 + $0xf0] sm:$0xf0]  ;;  %v5804_v8 = vor.u32 %v7559_v5, %v5803_v3  ;;  %v7557_v10 = vld [vmem:[#allocation10 + $0x1e4] sm:$0xf]  ;;  %s8593_s12 = sld [smem:[#allocation6 + $0x2]] }
  0x26   :  { %141 = vst [vmem:[#allocation2 + $0x8] sm:$0xff] %v8482_v0  ;;  %v5680_v9 = vor.u32 %v7525_v6, %v5677_v7  ;;  %v5805_v11 = vld [vmem:[#allocation10 + $0x1f0] sm:$0xf0]  ;;  %v5659_v12 = vld [vmem:[#allocation10 + $0xc0] sm:$0xf]  ;;  %801 = vmatpush.bf16.msra.mxu0 %v5676_v4  ;;  %vm8595_vm0 = vcmp.lt.s32.totalorder %v178_v46, 256 }
  0x27   :  { %144 = vst [vmem:[#allocation2 + $0x20] sm:$0xff] %v8482_v0  ;;  %v5808_v13 = vor.u32 %v7557_v10, %v5805_v11  ;;  %v7523_v14 = vld [vmem:[#allocation10 + $0xcc] sm:$0xf0]  ;;  %v5787_v15 = vld [vmem:[#allocation10 + $0x1c0] sm:$0xf]  ;;  %834 = vmatpush.bf16.msra.mxu1 %v5804_v8  ;;  %s8599_s13 = sld [smem:[#allocation6 + $0x9]] }
  0x28   :  { %145 = vst [vmem:[#allocation2 + $0x28] sm:$0xff] %v8482_v0  ;;  %v7555_v16 = vld [vmem:[#allocation10 + $0x1cc] sm:$0xf0]  ;;  %867 = vmatpush.bf16.msra.mxu2 %v5680_v9  ;;  %v5660_v17 = vor.u32 %v7523_v14, %v5659_v12  ;;  %v7521_v19 = vld [vmem:[#allocation10 + $0xc4] sm:$0xf]  ;;  %s168_s6 = sshra.s32 %s8586_s9, 3 }
  0x29   :  { %v5788_v18 = vor.u32 %v7555_v16, %v5787_v15  ;;  %v5661_v20 = vld [vmem:[#allocation10 + $0xd0] sm:$0xf0]  ;;  %v7553_v21 = vld [vmem:[#allocation10 + $0x1c4] sm:$0xf]  ;;  %900 = vmatpush.bf16.msra.mxu3 %v5808_v13  ;;  %v5643_v24 = vld [vmem:[#allocation10 + $0xa0] sm:$0xf] }
  0x2a   :  { %v5664_v22 = vor.u32 %v7521_v19, %v5661_v20  ;;  %v5789_v23 = vld [vmem:[#allocation10 + $0x1d0] sm:$0xf0]  ;;  %v7519_v25 = vld [vmem:[#allocation10 + $0xac] sm:$0xf0]  ;;  %v5771_v27 = vld [vmem:[#allocation10 + $0x1a0] sm:$0xf]  ;;  %802 = vmatpush.bf16.msra.mxu0 %v5660_v17 }
  0x2b   :  { %v5792_v26 = vor.u32 %v7553_v21, %v5789_v23  ;;  %v7551_v28 = vld [vmem:[#allocation10 + $0x1ac] sm:$0xf0]  ;;  %v7517_v29 = vld [vmem:[#allocation10 + $0xa4] sm:$0xf]  ;;  %v5644_v30 = vor.u32 %v7519_v25, %v5643_v24  ;;  %v5645_v31 = vld [vmem:[#allocation10 + $0xb0] sm:$0xf0]  ;;  %835 = vmatpush.bf16.msra.mxu1 %v5788_v18 }
  0x2c   :  { %v7549_v32 = vld [vmem:[#allocation10 + $0x1a4] sm:$0xf]  ;;  %v5773_v33 = vld [vmem:[#allocation10 + $0x1b0] sm:$0xf0]  ;;  %868 = vmatpush.bf16.msra.mxu2 %v5664_v22  ;;  %v5772_v34 = vor.u32 %v7551_v28, %v5771_v27  ;;  %v5648_v35 = vor.u32 %v7517_v29, %v5645_v31  ;;  %v5627_v36 = vld [vmem:[#allocation10 + $0x80] sm:$0xf] }
  0x2d   :  { %v7515_v37 = vld [vmem:[#allocation10 + $0x8c] sm:$0xf0]  ;;  %v5755_v38 = vld [vmem:[#allocation10 + $0x180] sm:$0xf]  ;;  %901 = vmatpush.bf16.msra.mxu3 %v5792_v26  ;;  %v5776_v39 = vor.u32 %v7549_v32, %v5773_v33  ;;  %v7513_v41 = vld [vmem:[#allocation10 + $0x84] sm:$0xf] }
  0x2e   :  { %v7547_v40 = vld [vmem:[#allocation10 + $0x18c] sm:$0xf0]  ;;  %v5629_v42 = vld [vmem:[#allocation10 + $0x90] sm:$0xf0]  ;;  %v7545_v43 = vld [vmem:[#allocation10 + $0x184] sm:$0xf]  ;;  %803 = vmatpush.bf16.msra.mxu0 %v5644_v30  ;;  %v5628_v45 = vor.u32 %v7515_v37, %v5627_v36 }
  0x2f   :  { %v5757_v44 = vld [vmem:[#allocation10 + $0x190] sm:$0xf0]  ;;  %836 = vmatpush.bf16.msra.mxu1 %v5772_v34  ;;  %v5756_v47 = vor.u32 %v7547_v40, %v5755_v38  ;;  %v5632_v48 = vor.u32 %v7513_v41, %v5629_v42  ;;  %v5611_v49 = vld [vmem:[#allocation10 + $0x60] sm:$0xf]  ;;  %v7511_v50 = vld [vmem:[#allocation10 + $0x6c] sm:$0xf0] }
  0x30   :  { %869 = vmatpush.bf16.msra.mxu2 %v5648_v35  ;;  %v5739_v51 = vld [vmem:[#allocation10 + $0x160] sm:$0xf]  ;;  %v5760_v52 = vor.u32 %v7545_v43, %v5757_v44  ;;  %v7543_v53 = vld [vmem:[#allocation10 + $0x16c] sm:$0xf0]  ;;  %v7509_v54 = vld [vmem:[#allocation10 + $0x64] sm:$0xf]  ;;  %v5612_v58 = vor.u32 %v7511_v50, %v5611_v49 }
  0x31   :  { %902 = vmatpush.bf16.msra.mxu3 %v5776_v39  ;;  %v5613_v55 = vld [vmem:[#allocation10 + $0x70] sm:$0xf0]  ;;  %v7541_v56 = vld [vmem:[#allocation10 + $0x164] sm:$0xf]  ;;  %v5740_v60 = vor.u32 %v7543_v53, %v5739_v51  ;;  %v5595_v62 = vld [vmem:[#allocation10 + $0x40] sm:$0xf] }
  0x32   :  { %v5741_v57 = vld [vmem:[#allocation10 + $0x170] sm:$0xf0]  ;;  %804 = vmatpush.bf16.msra.mxu0 %v5628_v45  ;;  %v5616_v61 = vor.u32 %v7509_v54, %v5613_v55  ;;  %v7507_v63 = vld [vmem:[#allocation10 + $0x4c] sm:$0xf0]  ;;  %v5723_v1 = vld [vmem:[#allocation10 + $0x140] sm:$0xf] }
  0x33   :  { %837 = vmatpush.bf16.msra.mxu1 %v5756_v47  ;;  %v5744_v2 = vor.u32 %v7541_v56, %v5741_v57  ;;  %v7539_v3 = vld [vmem:[#allocation10 + $0x14c] sm:$0xf0]  ;;  %v7505_v4 = vld [vmem:[#allocation10 + $0x44] sm:$0xf]  ;;  %v5597_v5 = vld [vmem:[#allocation10 + $0x50] sm:$0xf0]  ;;  %v5596_v9 = vor.u32 %v7507_v63, %v5595_v62 }
  0x34   :  { %870 = vmatpush.bf16.msra.mxu2 %v5632_v48  ;;  %v7537_v6 = vld [vmem:[#allocation10 + $0x144] sm:$0xf]  ;;  %v5725_v7 = vld [vmem:[#allocation10 + $0x150] sm:$0xf0]  ;;  %v5579_v8 = vld [vmem:[#allocation10 + $0x20] sm:$0xf]  ;;  %v5724_v13 = vor.u32 %v7539_v3, %v5723_v1  ;;  %v5600_v14 = vor.u32 %v7505_v4, %v5597_v5 }
  0x35   :  { %903 = vmatpush.bf16.msra.mxu3 %v5760_v52  ;;  %v7503_v10 = vld [vmem:[#allocation10 + $0x2c] sm:$0xf0]  ;;  %v5707_v11 = vld [vmem:[#allocation10 + $0x120] sm:$0xf]  ;;  %v7501_v15 = vld [vmem:[#allocation10 + $0x24] sm:$0xf]  ;;  %v5728_v18 = vor.u32 %v7537_v6, %v5725_v7 }
  0x36   :  { %805 = vmatpush.bf16.msra.mxu0 %v5612_v58  ;;  %v7535_v12 = vld [vmem:[#allocation10 + $0x12c] sm:$0xf0]  ;;  %v5581_v16 = vld [vmem:[#allocation10 + $0x30] sm:$0xf0]  ;;  %v7533_v17 = vld [vmem:[#allocation10 + $0x124] sm:$0xf]  ;;  %v5580_v23 = vor.u32 %v7503_v10, %v5579_v8 }
  0x37   :  { %838 = vmatpush.bf16.msra.mxu1 %v5740_v60  ;;  %v5709_v19 = vld [vmem:[#allocation10 + $0x130] sm:$0xf0]  ;;  %v158_v20 = vld [vmem:[%s9587_s1] sm:$0xf]  ;;  %s171_s15 = sand.u32 7, %s8586_s9  ;;  %s7481_s16 = sshll.u32 %s168_s6, 4  ;;  %v5708_v28 = vor.u32 %v7535_v12, %v5707_v11  ;;  %v5584_v29 = vor.u32 %v7501_v15, %v5581_v16 }
  0x38   :  { %871 = vmatpush.bf16.msra.mxu2 %v5616_v61  ;;  %v5563_v21 = vld [vmem:[#allocation10] sm:$0xf]  ;;  %v7499_v22 = vld [vmem:[#allocation10 + $0xc] sm:$0xf0]  ;;  %160 = vst [vmem:[#allocation1] ss:$4 sm:$0xff] %v158_v20  ;;  %s174_s18 = sadd.s32 %s7481_s16, %s171_s15  ;;  %v5712_v34 = vor.u32 %v7533_v17, %v5709_v19 }
  0x39   :  { %904 = vmatpush.bf16.msra.mxu3 %v5744_v2  ;;  %s276_s17 = sshra.s32 %s8589_s28, 3  ;;  %v5691_v24 = vld [vmem:[#allocation10 + $0x100] sm:$0xf]  ;;  %v7531_v25 = vld [vmem:[#allocation10 + $0x10c] sm:$0xf0]  ;;  %s279_s19 = sand.u32 7, %s8589_s28  ;;  %v5564_v40 = vor.u32 %v7499_v22, %v5563_v21 }
  0x3a   :  { %806 = vmatpush.bf16.msra.mxu0 %v5596_v9  ;;  %v7497_v26 = vld [vmem:[#allocation10 + $0x4] sm:$0xf]  ;;  %v5565_v27 = vld [vmem:[#allocation10 + $0x10] sm:$0xf0]  ;;  %146 = vst [vmem:[#allocation2 + $0x30] sm:$0xff] %v8482_v0  ;;  %s7489_s1 = sshll.u32 %s276_s17, 4  ;;  %v5692_v43 = vor.u32 %v7531_v25, %v5691_v24 }
  0x3b   :  { %839 = vmatpush.bf16.msra.mxu1 %v5724_v13  ;;  %v7529_v30 = vld [vmem:[#allocation10 + $0x104] sm:$0xf]  ;;  %v5693_v31 = vld [vmem:[#allocation10 + $0x110] sm:$0xf0]  ;;  %147 = vst [vmem:[#allocation2 + $0x38] sm:$0xff] %v8482_v0  ;;  %s175_s2 = scalar_lea.vmem [#allocation7], %s174_s18  ;;  %s282_s20 = sadd.s32 %s7489_s1, %s279_s19  ;;  %v5568_v44 = vor.u32 %v7497_v26, %v5565_v27 }
  0x3c   :  { %872 = vmatpush.bf16.msra.mxu2 %v5600_v14  ;;  %v5683_v32 = vld [vmem:[#allocation10 + $0xe8] sm:$0xf]  ;;  %v7528_v33 = vld [vmem:[#allocation10 + $0xf4] sm:$0xf0]  ;;  %148 = vst [vmem:[#allocation2 + $0x40] sm:$0xff] %v8482_v0  ;;  %s283_s21 = scalar_lea.vmem [#allocation7], %s282_s20  ;;  %v5696_v46 = vor.u32 %v7529_v30, %v5693_v31 }
  0x3d   :  { %905 = vmatpush.bf16.msra.mxu3 %v5728_v18  ;;  %v176_v35 = vld [vmem:[%s175_s2] ss:$8 sm:$0x3]  ;;  %v7560_v37 = vld [vmem:[#allocation10 + $0x1f4] sm:$0xf0]  ;;  %149 = vst [vmem:[#allocation2 + $0x48] sm:$0xff] %v8482_v0  ;;  %v5684_v48 = vor.u32 %v7528_v33, %v5683_v32 }
  0x3e   :  { %v5811_v36 = vld [vmem:[#allocation10 + $0x1e8] sm:$0xf]  ;;  %v7558_v38 = vld [vmem:[#allocation10 + $0x1ec] sm:$0xf]  ;;  %v5813_v39 = vld [vmem:[#allocation10 + $0x1f8] sm:$0xf0]  ;;  %807 = vmatpush.bf16.msra.mxu0 %v5580_v23 }
  0x3f   :  { %182 = vst.msk [vmem:[#allocation2 + $0x10] ss:$8 sm:$0x3] %vm8595_vm0, %v176_v35  ;;  %v284_v41 = vld [vmem:[%s283_s21] ss:$8 sm:$0x3]  ;;  %840 = vmatpush.bf16.msra.mxu1 %v5708_v28  ;;  %v5812_v49 = vor.u32 %v7560_v37, %v5811_v36  ;;  %v5816_v50 = vor.u32 %v7558_v38, %v5813_v39 }
  0x40   :  { %v7526_v42 = vld [vmem:[#allocation10 + $0xec] sm:$0xf]  ;;  %873 = vmatpush.bf16.msra.mxu2 %v5584_v29  ;;  %286 = vst.msk [vmem:[#allocation2 + $0x11] ss:$8 sm:$0x3] %vm8595_vm0, %v284_v41  ;;  %s185_s22 = sshra.s32 %s8591_s29, 3 }
  0x41   :  { %v5685_v45 = vld [vmem:[#allocation10 + $0xf8] sm:$0xf0]  ;;  %906 = vmatpush.bf16.msra.mxu3 %v5712_v34  ;;  %v161_v47 = vld.sshfl [vmem:[#allocation1] sm:$0xff pattern:$0x73625140]  ;;  %150 = vst [vmem:[#allocation2 + $0x50] sm:$0xff] %v8482_v0 }
  0x42   :  { %s8618_s4 = sld [smem:[#allocation6 + $0xa]]  ;;  %165 = vst [vmem:[#allocation2] sm:$0x3] %v161_v47  ;;  %v5667_v51 = vld [vmem:[#allocation10 + $0xc8] sm:$0xf]  ;;  %s188_s23 = sand.u32 7, %s8591_s29  ;;  %808 = vmatpush.bf16.msra.mxu0 %v5564_v40  ;;  %v5688_v52 = vor.u32 %v7526_v42, %v5685_v45 }
  0x43   :  { %151 = vst [vmem:[#allocation2 + $0x58] sm:$0xff] %v8482_v0  ;;  %v7524_v53 = vld [vmem:[#allocation10 + $0xd4] sm:$0xf0]  ;;  %v5795_v54 = vld [vmem:[#allocation10 + $0x1c8] sm:$0xf]  ;;  %s7482_s24 = sshll.u32 %s185_s22, 4  ;;  %841 = vmatpush.bf16.msra.mxu1 %v5692_v43 }
  0x44   :  { %874 = vmatpush.bf16.msra.mxu2 %v5568_v44  ;;  %152 = vst [vmem:[#allocation2 + $0x60] sm:$0xff] %v8482_v0  ;;  %v7556_v55 = vld [vmem:[#allocation10 + $0x1d4] sm:$0xf0]  ;;  %v7554_v56 = vld [vmem:[#allocation10 + $0x1cc] sm:$0xf]  ;;  %s191_s25 = sadd.s32 %s7482_s24, %s188_s23  ;;  %s198_s0 = sshra.s32 %s8593_s12, 3  ;;  %v5668_v58 = vor.u32 %v7524_v53, %v5667_v51 }
  0x45   :  { %907 = vmatpush.bf16.msra.mxu3 %v5696_v46  ;;  %153 = vst [vmem:[#allocation2 + $0x68] sm:$0xff] %v8482_v0  ;;  %v162_v57 = vld.sshfl [vmem:[#allocation1 + $0x8] sm:$0xff pattern:$0x73625140]  ;;  %v5797_v60 = vld [vmem:[#allocation10 + $0x1d8] sm:$0xf0]  ;;  %v5796_v61 = vor.u32 %v7556_v55, %v5795_v54 }
  0x46   :  { %933 = vmatpush.bf16.msrb.mxu0 %v5684_v48  ;;  %s201_s26 = sand.u32 7, %s8593_s12  ;;  %154 = vst [vmem:[#allocation2 + $0x70] sm:$0xff] %v8482_v0  ;;  %v5800_v62 = vor.u32 %v7554_v56, %v5797_v60  ;;  %s192_s7 = scalar_lea.vmem [#allocation7], %s191_s25  ;;  %v7522_v2 = vld [vmem:[#allocation10 + $0xcc] sm:$0xf]  ;;  %vm5425_vm1 = vcmask 1041408  }
  0x47   :  { %966 = vmatpush.bf16.msrb.mxu1 %v5812_v49  ;;  %v193_v63 = vld [vmem:[%s192_s7] ss:$8 sm:$0x3]  ;;  %s7483_s27 = sshll.u32 %s198_s0, 4  ;;  %s289_s30 = sshra.s32 %s8599_s13, 3  ;;  %v381_v1 = vld [vmem:[#allocation2 + $0x10] sm:$0xff] }
  0x48   :  { %155 = vst [vmem:[#allocation2 + $0x78] sm:$0xff] %v8482_v0  ;;  %999 = vmatpush.bf16.msrb.mxu2 %v5688_v52  ;;  %s204_s9 = sadd.s32 %s7483_s27, %s201_s26  ;;  %s292_s28 = sand.u32 7, %s8599_s13  ;;  %v5669_v3 = vld [vmem:[#allocation10 + $0xd8] sm:$0xf0]  ;;  %v5651_v8 = vld [vmem:[#allocation10 + $0xa8] sm:$0xf] }
  0x49   :  { %1032 = vmatpush.bf16.msrb.mxu3 %v5816_v50  ;;  %156 = vst [vmem:[#allocation2 + $0x80] sm:$0xff] %v8482_v0  ;;  %s7490_s29 = sshll.u32 %s289_s30, 4  ;;  %v379_v4 = vld [vmem:[#allocation2] sm:$0xff]  ;;  %s205_s12 = scalar_lea.vmem [#allocation7], %s204_s9  ;;  %v5672_v6 = vor.u32 %v7522_v2, %v5669_v3  ;;  %v5779_v11 = vld [vmem:[#allocation10 + $0x1a8] sm:$0xf] }
  0x4a   :  { %157 = vst [vmem:[#allocation2 + $0x88] sm:$0xff] %v8482_v0  ;;  %934 = vmatpush.bf16.msrb.mxu0 %v5668_v58  ;;  %v206_v5 = vld [vmem:[%s205_s12] ss:$8 sm:$0x3]  ;;  %s295_s14 = sadd.s32 %s7490_s29, %s292_s28  ;;  %s302_s3 = sshra.s32 %s8618_s4, 3  ;;  %v8633_v7 = vpack.c.bf16 %v381_v1, %v379_v4  ;;  %vm5427_vm2 = vcmask 1045508  }
  0x4b   :  { %166 = vst [vmem:[#allocation2 + $0x8] sm:$0x3] %v162_v57  ;;  %967 = vmatpush.bf16.msrb.mxu1 %v5796_v61  ;;  %s305_s13 = sand.u32 7, %s8618_s4  ;;  %s296_s6 = scalar_lea.vmem [#allocation7], %s295_s14  ;;  %v7520_v0 = vld [vmem:[#allocation10 + $0xb4] sm:$0xf0] }
  0x4c   :  { %195 = vst.msk [vmem:[#allocation2 + $0x20] ss:$8 sm:$0x3] %vm8595_vm0, %v193_v63  ;;  %v297_v9 = vld [vmem:[%s296_s6] ss:$8 sm:$0x3]  ;;  %1000 = vmatpush.bf16.msrb.mxu2 %v5672_v6  ;;  %809 = vmatmul.bf16.vlgmr.msra.gmra.mxu0 %v8633_v7  ;;  %v5652_v10 = vor.u32 %v7520_v0, %v5651_v8 }
  0x4d   :  { %1033 = vmatpush.bf16.msrb.mxu3 %v5800_v62  ;;  %875 = vmatmul.bf16.vlgmr.msra.gmra.mxu2 %v8633_v7  ;;  %208 = vst.msk [vmem:[#allocation2 + $0x30] ss:$8 sm:$0x3] %vm8595_vm0, %v206_v5  ;;  %s7491_s15 = sshll.u32 %s302_s3, 4  ;;  %v7552_v12 = vld [vmem:[#allocation10 + $0x1b4] sm:$0xf0] }
  0x4e   :  { %299 = vst.msk [vmem:[#allocation2 + $0x21] ss:$8 sm:$0x3] %vm8595_vm0, %v297_v9  ;;  %s308_s16 = sadd.s32 %s7491_s15, %s305_s13  ;;  %v7550_v13 = vld [vmem:[#allocation10 + $0x1ac] sm:$0xf]  ;;  %935 = vmatpush.bf16.msrb.mxu0 %v5652_v10  ;;  %v5780_v16 = vor.u32 %v7552_v12, %v5779_v11  ;;  %s8648_s18 = sld [smem:[#allocation6 + $0x3]] }
  0x4f   :  { %v382_v14 = vld [vmem:[#allocation2 + $0x18] sm:$0xff]  ;;  %s309_s17 = scalar_lea.vmem [#allocation7], %s308_s16  ;;  %v5781_v17 = vld [vmem:[#allocation10 + $0x1b8] sm:$0xf0]  ;;  %v7516_v25 = vld [vmem:[#allocation10 + $0x94] sm:$0xf0] }
  0x50   :  { %v310_v15 = vld [vmem:[%s309_s17] ss:$8 sm:$0x3]  ;;  %v5784_v18 = vor.u32 %v7550_v13, %v5781_v17  ;;  %v7518_v19 = vld [vmem:[#allocation10 + $0xac] sm:$0xf]  ;;  %968 = vmatpush.bf16.msrb.mxu1 %v5780_v16  ;;  %s8652_s19 = sld [smem:[#allocation6 + $0x4]] }
  0x51   :  { %312 = vst.msk [vmem:[#allocation2 + $0x31] ss:$8 sm:$0x3] %vm8595_vm0, %v310_v15  ;;  %v5653_v21 = vld [vmem:[#allocation10 + $0xb8] sm:$0xf0]  ;;  %s8654_s1 = sld [smem:[#allocation6 + $0xb]] }
  0x52   :  { %v380_v20 = vld [vmem:[#allocation2 + $0x8] sm:$0xff]  ;;  %v5635_v22 = vld [vmem:[#allocation10 + $0x88] sm:$0xf]  ;;  %1034 = vmatpush.bf16.msrb.mxu3 %v5784_v18  ;;  %v5656_v24 = vor.u32 %v7518_v19, %v5653_v21  ;;  %v7546_v31 = vld [vmem:[#allocation10 + $0x18c] sm:$0xf]  ;;  %s8656_s2 = sld [smem:[#allocation6 + $0xc]] }
  0x53   :  { %v8646_v23 = vpack.c.bf16 %v382_v14, %v380_v20  ;;  %v5763_v26 = vld [vmem:[#allocation10 + $0x188] sm:$0xf]  ;;  %v7548_v27 = vld [vmem:[#allocation10 + $0x194] sm:$0xf0]  ;;  %v5636_v28 = vor.u32 %v7516_v25, %v5635_v22  ;;  %v5765_v32 = vld [vmem:[#allocation10 + $0x198] sm:$0xf0] }
  0x54   :  { %v5764_v29 = vor.u32 %v7548_v27, %v5763_v26  ;;  %1001 = vmatpush.bf16.msrb.mxu2 %v5656_v24  ;;  %v7514_v33 = vld [vmem:[#allocation10 + $0x8c] sm:$0xf]  ;;  %v5768_v34 = vor.u32 %v7546_v31, %v5765_v32  ;;  %v5637_v35 = vld [vmem:[#allocation10 + $0x98] sm:$0xf0]  ;;  %v5619_v36 = vld [vmem:[#allocation10 + $0x68] sm:$0xf] }
  0x55   :  { %842 = vmatmul.bf16.vlgmr.msra.gmra.mxu1 %v8646_v23  ;;  %908 = vmatmul.bf16.vlgmr.msra.gmra.mxu3 %v8646_v23  ;;  %v383_v30 = vld [vmem:[#allocation2 + $0x20] sm:$0xff]  ;;  %v5640_v38 = vor.u32 %v7514_v33, %v5637_v35  ;;  %v7512_v39 = vld [vmem:[#allocation10 + $0x74] sm:$0xf0]  ;;  %s8658_s20 = sld [smem:[#allocation6 + $0x5]]  ;;  %v5747_v42 = vld [vmem:[#allocation10 + $0x168] sm:$0xf] }
  0x56   :  { %936 = vmatpush.bf16.msrb.mxu0 %v5636_v28  ;;  %969 = vmatpush.bf16.msrb.mxu1 %v5764_v29  ;;  %v5620_v41 = vor.u32 %v7512_v39, %v5619_v36  ;;  %v7544_v43 = vld [vmem:[#allocation10 + $0x174] sm:$0xf0]  ;;  %v7542_v44 = vld [vmem:[#allocation10 + $0x16c] sm:$0xf]  ;;  %s211_s21 = sshra.s32 %s8648_s18, 3  ;;  %s214_s22 = sand.u32 7, %s8648_s18 }
  0x57   :  { %1035 = vmatpush.bf16.msrb.mxu3 %v5768_v34  ;;  %v5748_v45 = vor.u32 %v7544_v43, %v5747_v42  ;;  %v5749_v46 = vld [vmem:[#allocation10 + $0x178] sm:$0xf0]  ;;  %v7510_v47 = vld [vmem:[#allocation10 + $0x6c] sm:$0xf]  ;;  %s7484_s4 = sshll.u32 %s211_s21, 4  ;;  %s224_s23 = sshra.s32 %s8652_s19, 3 }
  0x58   :  { %v385_v37 = vld [vmem:[#allocation2 + $0x30] sm:$0xff]  ;;  %1002 = vmatpush.bf16.msrb.mxu2 %v5640_v38  ;;  %v5752_v48 = vor.u32 %v7542_v44, %v5749_v46  ;;  %v5621_v49 = vld [vmem:[#allocation10 + $0x78] sm:$0xf0]  ;;  %s217_s24 = sadd.s32 %s7484_s4, %s214_s22  ;;  %s227_s25 = sand.u32 7, %s8652_s19  ;;  %v386_v52 = vld [vmem:[#allocation2 + $0x38] sm:$0xff]  ;;  %vm5429_vm3 = vcmask 1043456  }
  0x59   :  { %v8660_v40 = vpack.c.bf16 %v385_v37, %v383_v30  ;;  %v5624_v50 = vor.u32 %v7510_v47, %v5621_v49  ;;  %s7485_s0 = sshll.u32 %s224_s23, 4  ;;  %v384_v51 = vld [vmem:[#allocation2 + $0x28] sm:$0xff]  ;;  %s218_s26 = scalar_lea.vmem [#allocation7], %s217_s24  ;;  %v5603_v58 = vld [vmem:[#allocation10 + $0x48] sm:$0xf] }
  0x5a   :  { %937 = vmatpush.bf16.msrb.mxu0 %v5620_v41  ;;  %970 = vmatpush.bf16.msrb.mxu1 %v5748_v45  ;;  %v219_v53 = vld [vmem:[%s218_s26] ss:$8 sm:$0x3]  ;;  %s230_s7 = sadd.s32 %s7485_s0, %s227_s25  ;;  %s315_s27 = sshra.s32 %s8654_s1, 3  ;;  %v8673_v55 = vpack.c.bf16 %v386_v52, %v384_v51  ;;  %v7508_v61 = vld [vmem:[#allocation10 + $0x54] sm:$0xf0] }
  0x5b   :  { %1036 = vmatpush.bf16.msrb.mxu3 %v5752_v48  ;;  %221 = vst.msk [vmem:[#allocation2 + $0x40] ss:$8 sm:$0x3] %vm8595_vm0, %v219_v53  ;;  %s318_s30 = sand.u32 7, %s8654_s1  ;;  %s231_s9 = scalar_lea.vmem [#allocation7], %s230_s7  ;;  %v5604_v62 = vor.u32 %v7508_v61, %v5603_v58 }
  0x5c   :  { %814 = vmatmul.bf16.gmra.mxu0 %v8660_v40  ;;  %1003 = vmatpush.bf16.msrb.mxu2 %v5624_v50  ;;  %v232_v54 = vld [vmem:[%s231_s9] ss:$8 sm:$0x3]  ;;  %s7492_s28 = sshll.u32 %s315_s27, 4  ;;  %s328_s29 = sshra.s32 %s8656_s2, 3 }
  0x5d   :  { %880 = vmatmul.bf16.gmra.mxu2 %v8660_v40  ;;  %234 = vst.msk [vmem:[#allocation2 + $0x50] ss:$8 sm:$0x3] %vm8595_vm0, %v232_v54  ;;  %s321_s12 = sadd.s32 %s7492_s28, %s318_s30  ;;  %s331_s14 = sand.u32 7, %s8656_s2  ;;  %v5731_v63 = vld [vmem:[#allocation10 + $0x148] sm:$0xf] }
  0x5e   :  { %s7493_s3 = sshll.u32 %s328_s29, 4  ;;  %s322_s13 = scalar_lea.vmem [#allocation7], %s321_s12  ;;  %v7540_v1 = vld [vmem:[#allocation10 + $0x154] sm:$0xf0]  ;;  %v7538_v2 = vld [vmem:[#allocation10 + $0x14c] sm:$0xf]  ;;  %938 = vmatpush.bf16.msrb.mxu0 %v5604_v62 }
  0x5f   :  { %v323_v56 = vld [vmem:[%s322_s13] ss:$8 sm:$0x3]  ;;  %s334_s6 = sadd.s32 %s7493_s3, %s331_s14  ;;  %s237_s15 = sshra.s32 %s8658_s20, 3  ;;  %v5733_v3 = vld [vmem:[#allocation10 + $0x158] sm:$0xf0]  ;;  %v5732_v5 = vor.u32 %v7540_v1, %v5731_v63 }
  0x60   :  { %325 = vst.msk [vmem:[#allocation2 + $0x41] ss:$8 sm:$0x3] %vm8595_vm0, %v323_v56  ;;  %s240_s16 = sand.u32 7, %s8658_s20  ;;  %s335_s17 = scalar_lea.vmem [#allocation7], %s334_s6  ;;  %v5736_v6 = vor.u32 %v7538_v2, %v5733_v3 }
  0x61   :  { %v336_v57 = vld [vmem:[%s335_s17] ss:$8 sm:$0x3]  ;;  %s7486_s18 = sshll.u32 %s237_s15, 4  ;;  %s8684_s19 = sld [smem:[#allocation6 + $0x6]]  ;;  %971 = vmatpush.bf16.msrb.mxu1 %v5732_v5 }
  0x62   :  { %338 = vst.msk [vmem:[#allocation2 + $0x51] ss:$8 sm:$0x3] %vm8595_vm0, %v336_v57  ;;  %s243_s1 = sadd.s32 %s7486_s18, %s240_s16  ;;  %s8688_s2 = sld [smem:[#allocation6 + $0xd]]  ;;  %v7506_v8 = vld [vmem:[#allocation10 + $0x4c] sm:$0xf]  ;;  %1037 = vmatpush.bf16.msrb.mxu3 %v5736_v6 }
  0x63   :  { %s8690_s21 = sld [smem:[#allocation6 + $0xe]]  ;;  %s244_s20 = scalar_lea.vmem [#allocation7], %s243_s1  ;;  %v5605_v0 = vld [vmem:[#allocation10 + $0x58] sm:$0xf0]  ;;  %v5587_v10 = vld [vmem:[#allocation10 + $0x28] sm:$0xf] }
  0x64   :  { %v245_v60 = vld [vmem:[%s244_s20] ss:$8 sm:$0x3]  ;;  %v5608_v13 = vor.u32 %v7506_v8, %v5605_v0  ;;  %v7504_v14 = vld [vmem:[#allocation10 + $0x34] sm:$0xf0]  ;;  %s5534_s12 = sld [smem:[#allocation6 + $0x7]] }
  0x65   :  { %847 = vmatmul.bf16.gmra.mxu1 %v8673_v55  ;;  %913 = vmatmul.bf16.gmra.mxu3 %v8673_v55  ;;  %247 = vst.msk [vmem:[#allocation2 + $0x60] ss:$8 sm:$0x3] %vm8595_vm0, %v245_v60  ;;  %v5588_v16 = vor.u32 %v7504_v14, %v5587_v10  ;;  %v5715_v17 = vld [vmem:[#allocation10 + $0x128] sm:$0xf]  ;;  %s8710_s3 = sld [smem:[#allocation6 + $0xf]] }
  0x66   :  { %v7536_v18 = vld [vmem:[#allocation10 + $0x134] sm:$0xf0]  ;;  %1004 = vmatpush.bf16.msrb.mxu2 %v5608_v13  ;;  %v7534_v25 = vld [vmem:[#allocation10 + $0x12c] sm:$0xf]  ;;  %v5717_v26 = vld [vmem:[#allocation10 + $0x138] sm:$0xf0] }
  0x67   :  { %v387_v4 = vld [vmem:[#allocation2 + $0x40] sm:$0xff]  ;;  %s250_s22 = sshra.s32 %s8684_s19, 3  ;;  %s253_s4 = sand.u32 7, %s8684_s19  ;;  %v388_v9 = vld [vmem:[#allocation2 + $0x48] sm:$0xff]  ;;  %v5716_v20 = vor.u32 %v7536_v18, %v5715_v17  ;;  %939 = vmatpush.bf16.msrb.mxu0 %v5588_v16  ;;  %v7502_v27 = vld [vmem:[#allocation10 + $0x2c] sm:$0xf]  ;;  %v5720_v29 = vor.u32 %v7534_v25, %v5717_v26 }
  0x68   :  { %s7487_s23 = sshll.u32 %s250_s22, 4  ;;  %s341_s24 = sshra.s32 %s8688_s2, 3  ;;  %v5589_v28 = vld [vmem:[#allocation10 + $0x38] sm:$0xf0]  ;;  %v5571_v31 = vld [vmem:[#allocation10 + $0x8] sm:$0xf] }
  0x69   :  { %v389_v11 = vld [vmem:[#allocation2 + $0x50] sm:$0xff]  ;;  %v390_v12 = vld [vmem:[#allocation2 + $0x58] sm:$0xff]  ;;  %s256_s25 = sadd.s32 %s7487_s23, %s253_s4  ;;  %s344_s0 = sand.u32 7, %s8688_s2  ;;  %972 = vmatpush.bf16.msrb.mxu1 %v5716_v20  ;;  %v5592_v30 = vor.u32 %v7502_v27, %v5589_v28  ;;  %v7500_v32 = vld [vmem:[#allocation10 + $0x14] sm:$0xf0]  ;;  %1038 = vmatpush.bf16.msrb.mxu3 %v5720_v29 }
  0x6a   :  { %v8698_v15 = vpack.c.bf16 %v389_v11, %v387_v4  ;;  %s7494_s26 = sshll.u32 %s341_s24, 4  ;;  %s257_s7 = scalar_lea.vmem [#allocation7], %s256_s25  ;;  %v8706_v21 = vpack.c.bf16 %v390_v12, %v388_v9  ;;  %v5572_v33 = vor.u32 %v7500_v32, %v5571_v31  ;;  %v5699_v34 = vld [vmem:[#allocation10 + $0x108] sm:$0xf]  ;;  %v7532_v35 = vld [vmem:[#allocation10 + $0x114] sm:$0xf0] }
  0x6b   :  { %v258_v19 = vld [vmem:[%s257_s7] ss:$8 sm:$0x3]  ;;  %s347_s27 = sadd.s32 %s7494_s26, %s344_s0  ;;  %s354_s30 = sshra.s32 %s8690_s21, 3  ;;  %1005 = vmatpush.bf16.msrb.mxu2 %v5592_v30  ;;  %v5700_v37 = vor.u32 %v7532_v35, %v5699_v34  ;;  %v7530_v38 = vld [vmem:[#allocation10 + $0x10c] sm:$0xf] }
  0x6c   :  { %819 = vmatmul.bf16.gmra.mxu0 %v8698_v15  ;;  %260 = vst.msk [vmem:[#allocation2 + $0x70] ss:$8 sm:$0x3] %vm8595_vm0, %v258_v19  ;;  %s357_s9 = sand.u32 7, %s8690_s21  ;;  %s348_s28 = scalar_lea.vmem [#allocation7], %s347_s27 }
  0x6d   :  { %885 = vmatmul.bf16.gmra.mxu2 %v8698_v15  ;;  %v349_v22 = vld [vmem:[%s348_s28] ss:$8 sm:$0x3]  ;;  %s7495_s29 = sshll.u32 %s354_s30, 4  ;;  %s263_s6 = sshra.s32 %s5534_s12, 3  ;;  %940 = vmatpush.bf16.msrb.mxu0 %v5572_v33 }
  0x6e   :  { %351 = vst.msk [vmem:[#allocation2 + $0x61] ss:$8 sm:$0x3] %vm8595_vm0, %v349_v22  ;;  %s360_s14 = sadd.s32 %s7495_s29, %s357_s9  ;;  %s266_s15 = sand.u32 7, %s5534_s12  ;;  %v5701_v39 = vld [vmem:[#allocation10 + $0x118] sm:$0xf0]  ;;  %973 = vmatpush.bf16.msrb.mxu1 %v5700_v37 }
  0x6f   :  { %s361_s13 = scalar_lea.vmem [#allocation7], %s360_s14  ;;  %s7488_s16 = sshll.u32 %s263_s6, 4  ;;  %v7498_v41 = vld [vmem:[#allocation10 + $0xc] sm:$0xf]  ;;  %v5704_v43 = vor.u32 %v7530_v38, %v5701_v39  ;;  %v5573_v44 = vld [vmem:[#allocation10 + $0x18] sm:$0xf0] }
  0x70   :  { %v362_v24 = vld [vmem:[%s361_s13] ss:$8 sm:$0x3]  ;;  %s367_s17 = sshra.s32 %s8710_s3, 3  ;;  %s269_s18 = sadd.s32 %s7488_s16, %s266_s15  ;;  %v5576_v46 = vor.u32 %v7498_v41, %v5573_v44  ;;  %v5931_v52 = vld [vmem:[#allocation12 + $0xe0] sm:$0xf] }
  0x71   :  { %364 = vst.msk [vmem:[#allocation2 + $0x71] ss:$8 sm:$0x3] %vm8595_vm0, %v362_v24  ;;  %s370_s19 = sand.u32 7, %s8710_s3  ;;  %s7496_s1 = sshll.u32 %s367_s17, 4  ;;  %1039 = vmatpush.bf16.msrb.mxu3 %v5704_v43 }
  0x72   :  { %s270_s2 = scalar_lea.vmem [#allocation7], %s269_s18  ;;  %s373_s21 = sadd.s32 %s7496_s1, %s370_s19  ;;  %1006 = vmatpush.bf16.msrb.mxu2 %v5576_v46  ;;  %v7591_v53 = vld [vmem:[#allocation12 + $0xec] sm:$0xf0]  ;;  %v7589_v54 = vld [vmem:[#allocation12 + $0xe4] sm:$0xf] }
  0x73   :  { %v271_v42 = vld [vmem:[%s270_s2] ss:$8 sm:$0x3]  ;;  %s374_s20 = scalar_lea.vmem [#allocation7], %s373_s21  ;;  %v5933_v56 = vld [vmem:[#allocation12 + $0xf0] sm:$0xf0]  ;;  %v5932_v58 = vor.u32 %v7591_v53, %v5931_v52 }
  0x74   :  { %273 = vst.msk [vmem:[#allocation2 + $0x80] ss:$8 sm:$0x3] %vm8595_vm0, %v271_v42  ;;  %v375_v48 = vld [vmem:[%s374_s20] ss:$8 sm:$0x3]  ;;  %v5936_v60 = vor.u32 %v7589_v54, %v5933_v56 }
  0x75   :  { %852 = vmatmul.bf16.gmra.mxu1 %v8706_v21  ;;  %918 = vmatmul.bf16.gmra.mxu3 %v8706_v21  ;;  %v391_v36 = vld [vmem:[#allocation2 + $0x60] sm:$0xff]  ;;  %v392_v49 = vld [vmem:[#allocation2 + $0x68] sm:$0xff]  ;;  %377 = vst.msk [vmem:[#allocation2 + $0x81] ss:$8 sm:$0x3] %vm8595_vm0, %v375_v48  ;;  %s5445_s7 = sshll.u32 %s9597_s11, 4  ;;  %s5446_s7 = int_to_ptr.hbm [resolvable:$true] %s5445_s7 }
  0x76   :  { %v7590_v59 = vld [vmem:[#allocation12 + $0xec] sm:$0xf]  ;;  %v5941_v61 = vld [vmem:[#allocation12 + $0xf8] sm:$0xf0]  ;;  %v5939_v62 = vld [vmem:[#allocation12 + $0xe8] sm:$0xf]  ;;  %1297 = vmatpush.bf16.msra.mxu0 %v5932_v58  ;;  %1310 = vmatpush.bf16.msra.mxu1 %v5936_v60 }
  0x77   :  { %v5944_v63 = vor.u32 %v7590_v59, %v5941_v61  ;;  %v7592_v1 = vld [vmem:[#allocation12 + $0xf4] sm:$0xf0]  ;;  %v5915_v2 = vld [vmem:[#allocation12 + $0xc0] sm:$0xf]  ;;  %v7587_v3 = vld [vmem:[#allocation12 + $0xcc] sm:$0xf0] }
  0x78   :  { %v393_v45 = vld [vmem:[#allocation2 + $0x70] sm:$0xff]  ;;  %v394_v50 = vld [vmem:[#allocation2 + $0x78] sm:$0xff]  ;;  %v5940_v4 = vor.u32 %v7592_v1, %v5939_v62  ;;  %v5916_v5 = vor.u32 %v7587_v3, %v5915_v2  ;;  %v5917_v8 = vld [vmem:[#allocation12 + $0xd0] sm:$0xf0] }
  0x79   :  { %v8720_v47 = vpack.c.bf16 %v393_v45, %v391_v36  ;;  %v8726_v51 = vpack.c.bf16 %v394_v50, %v392_v49  ;;  %v7585_v6 = vld [vmem:[#allocation12 + $0xc4] sm:$0xf]  ;;  %v7586_v9 = vld [vmem:[#allocation12 + $0xcc] sm:$0xf]  ;;  %1336 = vmatpush.bf16.msra.mxu3 %v5944_v63  ;;  %v5925_v10 = vld [vmem:[#allocation12 + $0xd8] sm:$0xf0] }
  0x7a   :  { %v5920_v0 = vor.u32 %v7585_v6, %v5917_v8  ;;  %1323 = vmatpush.bf16.msra.mxu2 %v5940_v4  ;;  %v5928_v11 = vor.u32 %v7586_v9, %v5925_v10  ;;  %1298 = vmatpush.bf16.msra.mxu0 %v5916_v5  ;;  %v5923_v16 = vld [vmem:[#allocation12 + $0xc8] sm:$0xf]  ;;  %v7588_v17 = vld [vmem:[#allocation12 + $0xd4] sm:$0xf0]  ;;  %v5899_v18 = vld [vmem:[#allocation12 + $0xa0] sm:$0xf] }
  0x7b   :  { %v5924_v19 = vor.u32 %v7588_v17, %v5923_v16  ;;  %v7583_v20 = vld [vmem:[#allocation12 + $0xac] sm:$0xf0]  ;;  %v7581_v22 = vld [vmem:[#allocation12 + $0xa4] sm:$0xf]  ;;  %v5901_v24 = vld [vmem:[#allocation12 + $0xb0] sm:$0xf0] }
  0x7c   :  { %824 = vmatmul.bf16.gmra.mxu0 %v8720_v47  ;;  %v395_v57 = vld [vmem:[#allocation2 + $0x80] sm:$0xff]  ;;  %1311 = vmatpush.bf16.msra.mxu1 %v5920_v0  ;;  %v396_v13 = vld [vmem:[#allocation2 + $0x88] sm:$0xff]  ;;  %v5900_v25 = vor.u32 %v7583_v20, %v5899_v18  ;;  %v5904_v26 = vor.u32 %v7581_v22, %v5901_v24  ;;  %v7582_v27 = vld [vmem:[#allocation12 + $0xac] sm:$0xf] }
  0x7d   :  { %890 = vmatmul.bf16.gmra.mxu2 %v8720_v47  ;;  %v8730_v12 = vpack.c.bf16 %v395_v57, %v395_v57  ;;  %1337 = vmatpush.bf16.msra.mxu3 %v5928_v11  ;;  %v8734_v14 = vpack.c.bf16 %v396_v13, %v396_v13  ;;  %v5909_v28 = vld [vmem:[#allocation12 + $0xb8] sm:$0xf0]  ;;  %v5907_v29 = vld [vmem:[#allocation12 + $0xa8] sm:$0xf]  ;;  %v7584_v31 = vld [vmem:[#allocation12 + $0xb4] sm:$0xf0] }
  0x7e   :  { %1324 = vmatpush.bf16.msra.mxu2 %v5924_v19  ;;  %v5912_v30 = vor.u32 %v7582_v27, %v5909_v28  ;;  %v5883_v32 = vld [vmem:[#allocation12 + $0x80] sm:$0xf]  ;;  %v7579_v33 = vld [vmem:[#allocation12 + $0x8c] sm:$0xf0]  ;;  %1299 = vmatpush.bf16.msra.mxu0 %v5900_v25  ;;  %v5908_v34 = vor.u32 %v7584_v31, %v5907_v29  ;;  %v7577_v36 = vld [vmem:[#allocation12 + $0x84] sm:$0xf] }
  0x7f   :  { %v5884_v35 = vor.u32 %v7579_v33, %v5883_v32  ;;  %v5885_v37 = vld [vmem:[#allocation12 + $0x90] sm:$0xf0]  ;;  %v7578_v39 = vld [vmem:[#allocation12 + $0x8c] sm:$0xf]  ;;  %v5893_v41 = vld [vmem:[#allocation12 + $0x98] sm:$0xf0] }
  0x80   :  { %1312 = vmatpush.bf16.msra.mxu1 %v5904_v26  ;;  %v5888_v38 = vor.u32 %v7577_v36, %v5885_v37  ;;  %v5891_v42 = vld [vmem:[#allocation12 + $0x88] sm:$0xf]  ;;  %v5896_v43 = vor.u32 %v7578_v39, %v5893_v41  ;;  %v7580_v44 = vld [vmem:[#allocation12 + $0x94] sm:$0xf0]  ;;  %v5867_v45 = vld [vmem:[#allocation12 + $0x60] sm:$0xf] }
  0x81   :  { %1338 = vmatpush.bf16.msra.mxu3 %v5912_v30  ;;  %v7575_v46 = vld [vmem:[#allocation12 + $0x6c] sm:$0xf0]  ;;  %v5892_v48 = vor.u32 %v7580_v44, %v5891_v42  ;;  %v7573_v50 = vld [vmem:[#allocation12 + $0x64] sm:$0xf]  ;;  %v5869_v52 = vld [vmem:[#allocation12 + $0x70] sm:$0xf0] }
  0x82   :  { %1325 = vmatpush.bf16.msra.mxu2 %v5908_v34  ;;  %1300 = vmatpush.bf16.msra.mxu0 %v5884_v35  ;;  %v5868_v49 = vor.u32 %v7575_v46, %v5867_v45  ;;  %v5872_v53 = vor.u32 %v7573_v50, %v5869_v52  ;;  %v5875_v54 = vld [vmem:[#allocation12 + $0x68] sm:$0xf]  ;;  %v7576_v57 = vld [vmem:[#allocation12 + $0x74] sm:$0xf0]  ;;  %v5851_v60 = vld [vmem:[#allocation12 + $0x40] sm:$0xf] }
  0x83   :  { %v5876_v58 = vor.u32 %v7576_v57, %v5875_v54  ;;  %v7571_v59 = vld [vmem:[#allocation12 + $0x4c] sm:$0xf0]  ;;  %v7569_v61 = vld [vmem:[#allocation12 + $0x44] sm:$0xf]  ;;  %v5853_v63 = vld [vmem:[#allocation12 + $0x50] sm:$0xf0] }
  0x84   :  { %1313 = vmatpush.bf16.msra.mxu1 %v5888_v38  ;;  %v5852_v62 = vor.u32 %v7571_v59, %v5851_v60  ;;  %v5856_v1 = vor.u32 %v7569_v61, %v5853_v63  ;;  %v5861_v2 = vld [vmem:[#allocation12 + $0x58] sm:$0xf0]  ;;  %v5859_v3 = vld [vmem:[#allocation12 + $0x48] sm:$0xf]  ;;  %v7572_v5 = vld [vmem:[#allocation12 + $0x54] sm:$0xf0] }
  0x85   :  { %857 = vmatmul.bf16.gmra.mxu1 %v8726_v51  ;;  %923 = vmatmul.bf16.gmra.mxu3 %v8726_v51  ;;  %v5860_v6 = vor.u32 %v7572_v5, %v5859_v3  ;;  %v7567_v8 = vld [vmem:[#allocation12 + $0x2c] sm:$0xf0]  ;;  %v7565_v9 = vld [vmem:[#allocation12 + $0x24] sm:$0xf]  ;;  %v5837_v10 = vld [vmem:[#allocation12 + $0x30] sm:$0xf0] }
  0x86   :  { %1339 = vmatpush.bf16.msra.mxu3 %v5896_v43  ;;  %1326 = vmatpush.bf16.msra.mxu2 %v5892_v48  ;;  %v5840_v11 = vor.u32 %v7565_v9, %v5837_v10  ;;  %v7566_v13 = vld [vmem:[#allocation12 + $0x2c] sm:$0xf]  ;;  %v5845_v16 = vld [vmem:[#allocation12 + $0x38] sm:$0xf0]  ;;  %v8753_v18 = vld [vmem:[%s9591_s5] sm:$0xf] }
  0x87   :  { %1301 = vmatpush.bf16.msra.mxu0 %v5868_v49  ;;  %v5848_v17 = vor.u32 %v7566_v13, %v5845_v16  ;;  %v7568_v19 = vld [vmem:[#allocation12 + $0x34] sm:$0xf0]  ;;  %v8756_v20 = vperm.slane %v8753_v18, 0  ;;  %v5819_v25 = vld [vmem:[#allocation12] sm:$0xf]  ;;  %v8762_v37 = vperm.slane %v8753_v18, 1 }
  0x88   :  { %1314 = vmatpush.bf16.msra.mxu1 %v5872_v53  ;;  %v7563_v26 = vld [vmem:[#allocation12 + $0xc] sm:$0xf0]  ;;  %v5821_v28 = vld [vmem:[#allocation12 + $0x10] sm:$0xf0]  ;;  %v7562_v31 = vld [vmem:[#allocation12 + $0xc] sm:$0xf] }
  0x89   :  { %v5820_v27 = vor.u32 %v7563_v26, %v5819_v25  ;;  %v5829_v32 = vld [vmem:[#allocation12 + $0x18] sm:$0xf0]  ;;  %v5827_v33 = vld [vmem:[#allocation12 + $0x8] sm:$0xf]  ;;  %v7564_v36 = vld [vmem:[#allocation12 + $0x14] sm:$0xf0] }
  0x8a   :  { %1327 = vmatpush.bf16.msra.mxu2 %v5876_v58  ;;  %v5832_v35 = vor.u32 %v7562_v31, %v5829_v32  ;;  %v5828_v38 = vor.u32 %v7564_v36, %v5827_v33  ;;  %v9598_v61 = vmov 0  }
  0x8b   :  { %1302 = vmatpush.bf16.msra.mxu0 %v5852_v62 }
  0x8c   :  { %829 = vmatmul.bf16.gmra.mxu0 %v8730_v12  ;;  %1315 = vmatpush.bf16.msra.mxu1 %v5856_v1 }
  0x8d   :  { %895 = vmatmul.bf16.gmra.mxu2 %v8730_v12 }
  0x8e   :  { %1328 = vmatpush.bf16.msra.mxu2 %v5860_v6 }
  0x90   :  { %1316 = vmatpush.bf16.msra.mxu1 %v5840_v11 }
  0x95   :  { %862 = vmatmul.bf16.gmra.mxu1 %v8734_v14  ;;  %928 = vmatmul.bf16.gmra.mxu3 %v8734_v14 }
  0x9c   :  { %941 = vmatmul.bf16.vlgmr.msrb.gmra.mxu0 %v8633_v7 }
  0x9d   :  { %1007 = vmatmul.bf16.vlgmr.msrb.gmra.mxu2 %v8633_v7  ;;  %v7574_v7 = vld [vmem:[#allocation12 + $0x6c] sm:$0xf] }
  0xa5   :  { %974 = vmatmul.bf16.vlgmr.msrb.gmra.mxu1 %v8646_v23  ;;  %1040 = vmatmul.bf16.vlgmr.msrb.gmra.mxu3 %v8646_v23  ;;  %v5877_v23 = vld [vmem:[#allocation12 + $0x78] sm:$0xf0] }
  0xa6   :  { %v5880_v56 = vor.u32 %v7574_v7, %v5877_v23 }
  0xa8   :  { %1340 = vmatpush.bf16.msra.mxu3 %v5880_v56 }
  0xac   :  { %946 = vmatmul.bf16.gmra.mxu0 %v8660_v40 }
  0xad   :  { %1012 = vmatmul.bf16.gmra.mxu2 %v8660_v40  ;;  %v7570_v40 = vld [vmem:[#allocation12 + $0x4c] sm:$0xf] }
  0xae   :  { %v5864_v4 = vor.u32 %v7570_v40, %v5861_v2 }
  0xb0   :  { %1341 = vmatpush.bf16.msra.mxu3 %v5864_v4 }
  0xb4   :  { %1342 = vmatpush.bf16.msra.mxu3 %v5848_v17 }
  0xb5   :  { %979 = vmatmul.bf16.gmra.mxu1 %v8673_v55  ;;  %1045 = vmatmul.bf16.gmra.mxu3 %v8673_v55  ;;  %v5835_v55 = vld [vmem:[#allocation12 + $0x20] sm:$0xf] }
  0xb6   :  { %v5836_v0 = vor.u32 %v7567_v8, %v5835_v55 }
  0xb8   :  { %1303 = vmatpush.bf16.msra.mxu0 %v5836_v0  ;;  %1343 = vmatpush.bf16.msra.mxu3 %v5832_v35 }
  0xbc   :  { %951 = vmatmul.bf16.gmra.mxu0 %v8698_v15 }
  0xbd   :  { %1017 = vmatmul.bf16.gmra.mxu2 %v8698_v15  ;;  %v5843_v15 = vld [vmem:[#allocation12 + $0x28] sm:$0xf]  ;;  %1304 = vmatpush.bf16.msra.mxu0 %v5820_v27 }
  0xbe   :  { %v5844_v24 = vor.u32 %v7568_v19, %v5843_v15 }
  0xc0   :  { %1329 = vmatpush.bf16.msra.mxu2 %v5844_v24 }
  0xc4   :  { %1330 = vmatpush.bf16.msra.mxu2 %v5828_v38 }
  0xc5   :  { %984 = vmatmul.bf16.gmra.mxu1 %v8706_v21  ;;  %1050 = vmatmul.bf16.gmra.mxu3 %v8706_v21  ;;  %v7561_v21 = vld [vmem:[#allocation12 + $0x4] sm:$0xf] }
  0xc6   :  { %v5824_v29 = vor.u32 %v7561_v21, %v5821_v28 }
  0xc8   :  { %1317 = vmatpush.bf16.msra.mxu1 %v5824_v29 }
  0xc9   :  { %v810_v22 = vpop.f32.mrf.mxu0 }
  0xca   :  { %v811_v30 = vadd.f32 %v810_v22, %v8756_v20 }
  0xcc   :  { %956 = vmatmul.bf16.gmra.mxu0 %v8720_v47 }
  0xcd   :  { %1022 = vmatmul.bf16.gmra.mxu2 %v8720_v47 }
  0xd0   :  { %v876_v34 = vpop.f32.mrf.mxu2 }
  0xd1   :  { %v8764_v41 = vpop.f32.mrf.mxu0  ;;  %v877_v47 = vadd.f32 %v876_v34, %v8762_v37  ;;  %v8836_v34 = vperm.slane %v8753_v18, 2 }
  0xd2   :  { %v843_v39 = vpop.f32.mrf.mxu1 }
  0xd3   :  { %v8766_v42 = vadd.f32 %v843_v39, %v811_v30  ;;  %v8840_v39 = vperm.slane %v8753_v18, 3 }
  0xd5   :  { %989 = vmatmul.bf16.gmra.mxu1 %v8726_v51  ;;  %1055 = vmatmul.bf16.gmra.mxu3 %v8726_v51 }
  0xd8   :  { %v909_v43 = vpop.f32.mrf.mxu3  ;;  %v8771_v44 = vpop.f32.mrf.mxu2 }
  0xd9   :  { %v8773_v45 = vadd.f32 %v909_v43, %v877_v47  ;;  %v815_v48 = vpop.f32.mrf.mxu0 }
  0xda   :  { %v8775_v46 = vpop.f32.mrf.mxu1  ;;  %v816_v49 = vadd.f32 %v815_v48, %v8756_v20 }
  0xdc   :  { %961 = vmatmul.bf16.gmra.mxu0 %v8730_v12 }
  0xdd   :  { %1027 = vmatmul.bf16.gmra.mxu2 %v8730_v12 }
  0xe0   :  { %v8778_v50 = vpop.f32.mrf.mxu3  ;;  %v881_v52 = vpop.f32.mrf.mxu2 }
  0xe1   :  { %v8784_v7 = vpop.f32.mrf.mxu0  ;;  %v882_v23 = vadd.f32 %v881_v52, %v8762_v37 }
  0xe2   :  { %v848_v51 = vpop.f32.mrf.mxu1 }
  0xe3   :  { %v8782_v53 = vadd.f32 %v848_v51, %v816_v49 }
  0xe5   :  { %994 = vmatmul.bf16.gmra.mxu1 %v8734_v14  ;;  %1060 = vmatmul.bf16.gmra.mxu3 %v8734_v14 }
  0xe8   :  { %v914_v54 = vpop.f32.mrf.mxu3  ;;  %v8791_v57 = vpop.f32.mrf.mxu2 }
  0xe9   :  { %v8789_v56 = vadd.f32 %v914_v54, %v882_v23  ;;  %v820_v12 = vpop.f32.mrf.mxu0 }
  0xea   :  { %v8793_v58 = vpop.f32.mrf.mxu1  ;;  %v821_v60 = vadd.f32 %v820_v12, %v8756_v20 }
  0xec   :  { %1305 = vmatmul.bf16.vlgmr.msra.gmra.mxu0 %v9598_v61 }
  0xed   :  { %1331 = vmatmul.bf16.vlgmr.msra.gmra.mxu2 %v9598_v61 }
  0xf0   :  { %v8796_v59 = vpop.f32.mrf.mxu3  ;;  %v886_v63 = vpop.f32.mrf.mxu2 }
  0xf1   :  { %v887_v1 = vadd.f32 %v886_v63, %v8762_v37  ;;  %v8805_v40 = vpop.f32.mrf.mxu0 }
  0xf2   :  { %v853_v14 = vpop.f32.mrf.mxu1 }
  0xf3   :  { %v8800_v62 = vadd.f32 %v853_v14, %v821_v60 }
  0xf5   :  { %1318 = vmatmul.bf16.vlgmr.msra.gmra.mxu1 %v9598_v61  ;;  %1344 = vmatmul.bf16.vlgmr.msra.gmra.mxu3 %v9598_v61 }
  0xf8   :  { %v919_v2 = vpop.f32.mrf.mxu3  ;;  %v8811_v5 = vpop.f32.mrf.mxu2 }
  0xf9   :  { %v8807_v3 = vadd.f32 %v919_v2, %v887_v1  ;;  %v825_v6 = vpop.f32.mrf.mxu0 }
  0xfa   :  { %v8809_v4 = vpop.f32.mrf.mxu1  ;;  %v826_v55 = vadd.f32 %v825_v6, %v8756_v20 }
 0x100   :  { %v8814_v8 = vpop.f32.mrf.mxu3  ;;  %v891_v10 = vpop.f32.mrf.mxu2 }
 0x101   :  { %v892_v11 = vadd.f32 %v891_v10, %v8762_v37  ;;  %v8819_v13 = vpop.f32.mrf.mxu0 }
 0x102   :  { %v858_v9 = vpop.f32.mrf.mxu1  ;;  %9602 = vst [vmem:[#allocation25_spill] sm:$0xff] %v8819_v13 }
 0x103   :  { %v8816_v0 = vadd.f32 %v858_v9, %v826_v55 }
 0x108   :  { %v924_v16 = vpop.f32.mrf.mxu3  ;;  %v8825_v19 = vpop.f32.mrf.mxu2 }
 0x109   :  { %v8821_v17 = vadd.f32 %v924_v16, %v892_v11  ;;  %9605 = vst [vmem:[#allocation28_spill] sm:$0xff] %v8825_v19  ;;  %v830_v22 = vpop.f32.mrf.mxu0  ;;  %v6045_v19 = vld [vmem:[#allocation12 + $0xd0] sm:$0xf0] }
 0x10a   :  { %v8823_v15 = vpop.f32.mrf.mxu1  ;;  %v831_v24 = vadd.f32 %v830_v22, %v8756_v20 }
 0x10b   :  { %9603 = vst [vmem:[#allocation26_spill] sm:$0xff] %v8821_v17 }
 0x10c   :  { %9604 = vst [vmem:[#allocation27_spill] sm:$0xff] %v8823_v15  ;;  %v7617_v15 = vld [vmem:[#allocation12 + $0xc4] sm:$0xf] }
 0x110   :  { %v8828_v25 = vpop.f32.mrf.mxu3  ;;  %v896_v27 = vpop.f32.mrf.mxu2 }
 0x111   :  { %9606 = vst [vmem:[#allocation29_spill] sm:$0xff] %v8828_v25  ;;  %v897_v28 = vadd.f32 %v896_v27, %v8762_v37  ;;  %v832_v29 = vpop.f32.mrf.mxu0 }
 0x112   :  { %v863_v26 = vpop.f32.mrf.mxu1 }
 0x113   :  { %v8830_v21 = vadd.f32 %v863_v26, %v831_v24 }
 0x115   :  { %9607 = vst [vmem:[#allocation30_spill] sm:$0xff] %v8830_v21  ;;  %v6069_v21 = vld [vmem:[#allocation12 + $0xf8] sm:$0xf0] }
 0x118   :  { %v929_v30 = vpop.f32.mrf.mxu3  ;;  %v898_v33 = vpop.f32.mrf.mxu2 }
 0x119   :  { %v8833_v31 = vadd.f32 %v929_v30, %v897_v28  ;;  %v942_v35 = vpop.f32.mrf.mxu0 }
 0x11a   :  { %v865_v32 = vpop.f32.mrf.mxu1  ;;  %v943_v36 = vadd.f32 %v942_v35, %v8836_v34 }
 0x11b   :  { %9608 = vst [vmem:[#allocation31_spill] sm:$0xff] %v8833_v31  ;;  %v7622_v31 = vld [vmem:[#allocation12 + $0xec] sm:$0xf] }
 0x120   :  { %v931_v38 = vpop.f32.mrf.mxu3  ;;  %v1008_v48 = vpop.f32.mrf.mxu2 }
 0x121   :  { %v1009_v49 = vadd.f32 %v1008_v48, %v8840_v39  ;;  %v8845_v52 = vpop.f32.mrf.mxu0 }
 0x122   :  { %v975_v47 = vpop.f32.mrf.mxu1 }
 0x123   :  { %v8842_v43 = vadd.f32 %v975_v47, %v943_v36 }
 0x128   :  { %v1041_v51 = vpop.f32.mrf.mxu3  ;;  %v8851_v12 = vpop.f32.mrf.mxu2 }
 0x129   :  { %v8847_v23 = vadd.f32 %v1041_v51, %v1009_v49  ;;  %v947_v60 = vpop.f32.mrf.mxu0 }
 0x12a   :  { %v8849_v54 = vpop.f32.mrf.mxu1  ;;  %v948_v14 = vadd.f32 %v947_v60, %v8836_v34 }
 0x130   :  { %v8854_v18 = vpop.f32.mrf.mxu3  ;;  %v1013_v2 = vpop.f32.mrf.mxu2 }
 0x131   :  { %v1014_v6 = vadd.f32 %v1013_v2, %v8840_v39  ;;  %v8859_v55 = vpop.f32.mrf.mxu0 }
 0x132   :  { %v980_v63 = vpop.f32.mrf.mxu1 }
 0x133   :  { %v8856_v1 = vadd.f32 %v980_v63, %v948_v14 }
 0x138   :  { %v1046_v9 = vpop.f32.mrf.mxu3  ;;  %v8865_v16 = vpop.f32.mrf.mxu2 }
 0x139   :  { %v8861_v10 = vadd.f32 %v1046_v9, %v1014_v6  ;;  %v952_v22 = vpop.f32.mrf.mxu0  ;;  %v6059_v6 = vld [vmem:[#allocation12 + $0xe0] sm:$0xf]  ;;  %v7623_v9 = vld [vmem:[#allocation12 + $0xec] sm:$0xf0] }
 0x13a   :  { %v8863_v11 = vpop.f32.mrf.mxu1  ;;  %v953_v24 = vadd.f32 %v952_v22, %v8836_v34  ;;  %v7621_v22 = vld [vmem:[#allocation12 + $0xe4] sm:$0xf] }
 0x140   :  { %v8868_v26 = vpop.f32.mrf.mxu3  ;;  %v1018_v29 = vpop.f32.mrf.mxu2 }
 0x141   :  { %v1019_v30 = vadd.f32 %v1018_v29, %v8840_v39  ;;  %v8873_v32 = vpop.f32.mrf.mxu0  ;;  %v6067_v29 = vld [vmem:[#allocation12 + $0xe8] sm:$0xf] }
 0x142   :  { %v985_v27 = vpop.f32.mrf.mxu1 }
 0x143   :  { %v8870_v28 = vadd.f32 %v985_v27, %v953_v24  ;;  %v6060_v24 = vor.u32 %v7623_v9, %v6059_v6  ;;  %v6061_v27 = vld [vmem:[#allocation12 + $0xf0] sm:$0xf0] }
 0x144   :  { %v6064_v61 = vor.u32 %v7621_v22, %v6061_v27  ;;  %v6051_v22 = vld [vmem:[#allocation12 + $0xc8] sm:$0xf]  ;;  %v7620_v27 = vld [vmem:[#allocation12 + $0xd4] sm:$0xf0] }
 0x145   :  { %1573 = vmatpush.bf16.msrb.mxu0 %v6060_v24 }
 0x146   :  { %1586 = vmatpush.bf16.msrb.mxu1 %v6064_v61 }
 0x148   :  { %v1051_v33 = vpop.f32.mrf.mxu3  ;;  %v8879_v38 = vpop.f32.mrf.mxu2 }
 0x149   :  { %v8875_v35 = vadd.f32 %v1051_v33, %v1019_v30  ;;  %v957_v47 = vpop.f32.mrf.mxu0  ;;  %v7624_v30 = vld [vmem:[#allocation12 + $0xf4] sm:$0xf0] }
 0x14a   :  { %v8877_v36 = vpop.f32.mrf.mxu1  ;;  %v958_v48 = vadd.f32 %v957_v47, %v8836_v34  ;;  %v6068_v47 = vor.u32 %v7624_v30, %v6067_v29  ;;  %v6048_v29 = vor.u32 %v7617_v15, %v6045_v19  ;;  %v6052_v30 = vor.u32 %v7620_v27, %v6051_v22  ;;  %v7614_v22 = vld [vmem:[#allocation12 + $0xac] sm:$0xf]  ;;  %v6037_v27 = vld [vmem:[#allocation12 + $0xb8] sm:$0xf0] }
 0x14c   :  { %1599 = vmatpush.bf16.msrb.mxu2 %v6068_v47  ;;  %1587 = vmatpush.bf16.msrb.mxu1 %v6048_v29  ;;  %v7615_v47 = vld [vmem:[#allocation12 + $0xac] sm:$0xf0]  ;;  %v6011_v29 = vld [vmem:[#allocation12 + $0x80] sm:$0xf] }
 0x150   :  { %v8882_v49 = vpop.f32.mrf.mxu3  ;;  %v1023_v14 = vpop.f32.mrf.mxu2  ;;  %1600 = vmatpush.bf16.msrb.mxu2 %v6052_v30  ;;  %v7611_v30 = vld [vmem:[#allocation12 + $0x8c] sm:$0xf0] }
 0x151   :  { %v1024_v63 = vadd.f32 %v1023_v14, %v8840_v39  ;;  %v8887_v2 = vpop.f32.mrf.mxu0  ;;  %v6043_v14 = vld [vmem:[#allocation12 + $0xc0] sm:$0xf] }
 0x152   :  { %v990_v51 = vpop.f32.mrf.mxu1  ;;  %9610 = vst [vmem:[#allocation33_spill] sm:$0xff] %v8887_v2  ;;  %v7619_v2 = vld [vmem:[#allocation12 + $0xcc] sm:$0xf0] }
 0x153   :  { %v8884_v60 = vadd.f32 %v990_v51, %v958_v48  ;;  %v6072_v48 = vor.u32 %v7622_v31, %v6069_v21  ;;  %v6044_v9 = vor.u32 %v7619_v2, %v6043_v14  ;;  %v6027_v31 = vld [vmem:[#allocation12 + $0xa0] sm:$0xf]  ;;  %v6029_v2 = vld [vmem:[#allocation12 + $0xb0] sm:$0xf0]  ;;  %v6035_v14 = vld [vmem:[#allocation12 + $0xa8] sm:$0xf] }
 0x155   :  { %9609 = vst [vmem:[#allocation32_spill] sm:$0xff] %v8884_v60  ;;  %1612 = vmatpush.bf16.msrb.mxu3 %v6072_v48  ;;  %1574 = vmatpush.bf16.msrb.mxu0 %v6044_v9  ;;  %v6028_v48 = vor.u32 %v7615_v47, %v6027_v31  ;;  %v6040_v9 = vor.u32 %v7614_v22, %v6037_v27  ;;  %v6013_v47 = vld [vmem:[#allocation12 + $0x90] sm:$0xf0]  ;;  %v6019_v60 = vld [vmem:[#allocation12 + $0x88] sm:$0xf] }
 0x156   :  { %v6012_v31 = vor.u32 %v7611_v30, %v6011_v29  ;;  %v7605_v27 = vld [vmem:[#allocation12 + $0x64] sm:$0xf]  ;;  %v6003_v29 = vld [vmem:[#allocation12 + $0x68] sm:$0xf]  ;;  %v7608_v30 = vld [vmem:[#allocation12 + $0x74] sm:$0xf0] }
 0x158   :  { %v1056_v33 = vpop.f32.mrf.mxu3  ;;  %v8893_v6 = vpop.f32.mrf.mxu2 }
 0x159   :  { %v8889_v25 = vadd.f32 %v1056_v33, %v1024_v63  ;;  %9613 = vst [vmem:[#allocation36_spill] sm:$0xff] %v8893_v6  ;;  %v7618_v63 = vld [vmem:[#allocation12 + $0xcc] sm:$0xf]  ;;  %v6053_v33 = vld [vmem:[#allocation12 + $0xd8] sm:$0xf0]  ;;  %v962_v24 = vpop.f32.mrf.mxu0  ;;  %1575 = vmatpush.bf16.msrb.mxu0 %v6028_v48 }
 0x15a   :  { %v8891_v51 = vpop.f32.mrf.mxu1  ;;  %v6056_v21 = vor.u32 %v7618_v63, %v6053_v33  ;;  %v963_v61 = vadd.f32 %v962_v24, %v8836_v34  ;;  %v7616_v6 = vld [vmem:[#allocation12 + $0xb4] sm:$0xf0]  ;;  %v7609_v33 = vld [vmem:[#allocation12 + $0x84] sm:$0xf]  ;;  %v7610_v48 = vld [vmem:[#allocation12 + $0x8c] sm:$0xf] }
 0x15b   :  { %9611 = vst [vmem:[#allocation34_spill] sm:$0xff] %v8889_v25  ;;  %v6036_v19 = vor.u32 %v7616_v6, %v6035_v14  ;;  %v6016_v6 = vor.u32 %v7609_v33, %v6013_v47  ;;  %v6021_v14 = vld [vmem:[#allocation12 + $0x98] sm:$0xf0]  ;;  %v7606_v33 = vld [vmem:[#allocation12 + $0x6c] sm:$0xf] }
 0x15c   :  { %9612 = vst [vmem:[#allocation35_spill] sm:$0xff] %v8891_v51  ;;  %v7613_v51 = vld [vmem:[#allocation12 + $0xa4] sm:$0xf]  ;;  %1613 = vmatpush.bf16.msrb.mxu3 %v6056_v21 }
 0x15d   :  { %v6032_v15 = vor.u32 %v7613_v51, %v6029_v2  ;;  %1601 = vmatpush.bf16.msrb.mxu2 %v6036_v19  ;;  %1576 = vmatpush.bf16.msrb.mxu0 %v6012_v31  ;;  %v5995_v19 = vld [vmem:[#allocation12 + $0x60] sm:$0xf] }
 0x15f   :  { %1588 = vmatpush.bf16.msrb.mxu1 %v6032_v15  ;;  %v6024_v15 = vor.u32 %v7610_v48, %v6021_v14  ;;  %v7601_v48 = vld [vmem:[#allocation12 + $0x44] sm:$0xf] }
 0x160   :  { %v8896_v13 = vpop.f32.mrf.mxu3  ;;  %v1028_v21 = vpop.f32.mrf.mxu2  ;;  %1614 = vmatpush.bf16.msrb.mxu3 %v6040_v9 }
 0x161   :  { %9614 = vst [vmem:[#allocation37_spill] sm:$0xff] %v8896_v13  ;;  %v7612_v13 = vld [vmem:[#allocation12 + $0x94] sm:$0xf0]  ;;  %v1029_v51 = vadd.f32 %v1028_v21, %v8840_v39  ;;  %v964_v22 = vpop.f32.mrf.mxu0  ;;  %v6004_v21 = vor.u32 %v7608_v30, %v6003_v29  ;;  %v7602_v29 = vld [vmem:[#allocation12 + $0x4c] sm:$0xf] }
 0x162   :  { %v995_v63 = vpop.f32.mrf.mxu1  ;;  %v6020_v2 = vor.u32 %v7612_v13, %v6019_v60  ;;  %v6005_v13 = vld [vmem:[#allocation12 + $0x78] sm:$0xf0] }
 0x163   :  { %v8898_v24 = vadd.f32 %v995_v63, %v963_v61  ;;  %1589 = vmatpush.bf16.msrb.mxu1 %v6016_v6  ;;  %v7607_v61 = vld [vmem:[#allocation12 + $0x6c] sm:$0xf0]  ;;  %v5997_v63 = vld [vmem:[#allocation12 + $0x70] sm:$0xf0]  ;;  %v6008_v31 = vor.u32 %v7606_v33, %v6005_v13  ;;  %v5979_v6 = vld [vmem:[#allocation12 + $0x40] sm:$0xf] }
 0x164   :  { %1602 = vmatpush.bf16.msrb.mxu2 %v6020_v2  ;;  %1615 = vmatpush.bf16.msrb.mxu3 %v6024_v15  ;;  %v5996_v9 = vor.u32 %v7607_v61, %v5995_v19  ;;  %v6000_v25 = vor.u32 %v7605_v27, %v5997_v63  ;;  %v7603_v2 = vld [vmem:[#allocation12 + $0x4c] sm:$0xf0]  ;;  %v5981_v15 = vld [vmem:[#allocation12 + $0x50] sm:$0xf0]  ;;  %v5987_v19 = vld [vmem:[#allocation12 + $0x48] sm:$0xf] }
 0x165   :  { %9615 = vst [vmem:[#allocation38_spill] sm:$0xff] %v8898_v24  ;;  %v5980_v22 = vor.u32 %v7603_v2, %v5979_v6  ;;  %v7604_v61 = vld [vmem:[#allocation12 + $0x54] sm:$0xf0]  ;;  %v5984_v27 = vor.u32 %v7601_v48, %v5981_v15  ;;  %v5989_v30 = vld [vmem:[#allocation12 + $0x58] sm:$0xf0] }
 0x166   :  { %1577 = vmatpush.bf16.msrb.mxu0 %v5996_v9  ;;  %v5988_v63 = vor.u32 %v7604_v61, %v5987_v19  ;;  %v5963_v9 = vld [vmem:[#allocation12 + $0x20] sm:$0xf]  ;;  %v7599_v33 = vld [vmem:[#allocation12 + $0x2c] sm:$0xf0]  ;;  %v7600_v6 = vld [vmem:[#allocation12 + $0x34] sm:$0xf0] }
 0x167   :  { %1590 = vmatpush.bf16.msrb.mxu1 %v6000_v25  ;;  %v7597_v25 = vld [vmem:[#allocation12 + $0x24] sm:$0xf]  ;;  %v5964_v13 = vor.u32 %v7599_v33, %v5963_v9  ;;  %v5973_v15 = vld [vmem:[#allocation12 + $0x38] sm:$0xf0]  ;;  %v5947_v19 = vld [vmem:[#allocation12] sm:$0xf] }
 0x168   :  { %v1061_v24 = vpop.f32.mrf.mxu3  ;;  %1603 = vmatpush.bf16.msrb.mxu2 %v6004_v21  ;;  %v1030_v14 = vpop.f32.mrf.mxu2  ;;  %1616 = vmatpush.bf16.msrb.mxu3 %v6008_v31  ;;  %v5965_v31 = vld [vmem:[#allocation12 + $0x30] sm:$0xf0] }
 0x169   :  { %v8901_v60 = vadd.f32 %v1061_v24, %v1029_v51  ;;  %v1306_v24 = vpop.f32.mrf.mxu0  ;;  %v5992_v51 = vor.u32 %v7602_v29, %v5989_v30  ;;  %v5968_v2 = vor.u32 %v7597_v25, %v5965_v31  ;;  %v7598_v14 = vld [vmem:[#allocation12 + $0x2c] sm:$0xf]  ;;  %v7595_v30 = vld [vmem:[#allocation12 + $0xc] sm:$0xf0]  ;;  %v5957_v31 = vld [vmem:[#allocation12 + $0x18] sm:$0xf0] }
 0x16a   :  { %v997_v47 = vpop.f32.mrf.mxu1  ;;  %1578 = vmatpush.bf16.msrb.mxu0 %v5980_v22  ;;  %v1349_v21 = vadd.f32 %v1306_v24, %v8766_v42  ;;  %v5976_v29 = vor.u32 %v7598_v14, %v5973_v15  ;;  %v5948_v17 = vor.u32 %v7595_v30, %v5947_v19  ;;  %v5949_v42 = vld [vmem:[#allocation12 + $0x10] sm:$0xf0]  ;;  %v7594_v25 = vld [vmem:[#allocation12 + $0xc] sm:$0xf] }
 0x16b   :  { %9616 = vst [vmem:[#allocation39_spill] sm:$0xff] %v8901_v60  ;;  %1591 = vmatpush.bf16.msrb.mxu1 %v5984_v27  ;;  %v5971_v47 = vld [vmem:[#allocation12 + $0x28] sm:$0xf]  ;;  %v7593_v60 = vld [vmem:[#allocation12 + $0x4] sm:$0xf] }
 0x16c   :  { %1604 = vmatpush.bf16.msrb.mxu2 %v5988_v63  ;;  %1617 = vmatpush.bf16.msrb.mxu3 %v5992_v51  ;;  %v5972_v48 = vor.u32 %v7600_v6, %v5971_v47  ;;  %v1353_v22 = vsub.f32 0.0, %v1349_v21  ;;  %v5955_v27 = vld [vmem:[#allocation12 + $0x8] sm:$0xf]  ;;  %v7596_v63 = vld [vmem:[#allocation12 + $0x14] sm:$0xf0]  ;;  %v5952_v51 = vor.u32 %v7593_v60, %v5949_v42  ;;  %v5960_v21 = vor.u32 %v7594_v25, %v5957_v31 }
 0x16d   :  { %v5956_v33 = vor.u32 %v7596_v63, %v5955_v27 }
 0x16e   :  { %1579 = vmatpush.bf16.msrb.mxu0 %v5964_v13  ;;  %v1354_v24 = vmul.f32 1.442695, %v1353_v22 }
 0x16f   :  { %1592 = vmatpush.bf16.msrb.mxu1 %v5968_v2 }
 0x170   :  { %v1063_v61 = vpop.f32.mrf.mxu3  ;;  %1605 = vmatpush.bf16.msrb.mxu2 %v5972_v48  ;;  %v1332_v6 = vpop.f32.mrf.mxu2  ;;  %1618 = vmatpush.bf16.msrb.mxu3 %v5976_v29  ;;  %7991 = vpow2.f32 %v1354_v24 }
 0x171   :  { %v1308_v13 = vpop.f32.mrf.mxu0  ;;  %v1351_v2 = vadd.f32 %v1332_v6, %v8842_v43 }
 0x172   :  { %v1319_v9 = vpop.f32.mrf.mxu1  ;;  %1580 = vmatpush.bf16.msrb.mxu0 %v5948_v17  ;;  %v7655_v13 = vld [vmem:[#allocation12 + $0xec] sm:$0xf0] }
 0x173   :  { %v1350_v47 = vadd.f32 %v1319_v9, %v8773_v45  ;;  %1593 = vmatpush.bf16.msrb.mxu1 %v5952_v51 }
 0x174   :  { %1606 = vmatpush.bf16.msrb.mxu2 %v5956_v33  ;;  %1619 = vmatpush.bf16.msrb.mxu3 %v5960_v21 }
 0x175   :  { %v1358_v14 = vsub.f32 0.0, %v1350_v47 }
 0x176   :  { %v7992_v19 = vpop.eup %7991 }
 0x177   :  { %v1359_v15 = vmul.f32 1.442695, %v1358_v14  ;;  %v1356_v45 = vadd.f32 1.0, %v7992_v19  ;;  %v6187_v14 = vld [vmem:[#allocation12 + $0xe0] sm:$0xf] }
 0x178   :  { %v1345_v48 = vpop.f32.mrf.mxu3  ;;  %v1334_v29 = vpop.f32.mrf.mxu2  ;;  %v7656_v19 = vld [vmem:[#allocation12 + $0xf4] sm:$0xf0] }
 0x179   :  { %7993 = vpow2.f32 %v1359_v15  ;;  %v1352_v60 = vadd.f32 %v1345_v48, %v8847_v23  ;;  %v7653_v15 = vld [vmem:[#allocation12 + $0xe4] sm:$0xf]  ;;  %v6189_v48 = vld [vmem:[#allocation12 + $0xf0] sm:$0xf0]  ;;  %v6197_v29 = vld [vmem:[#allocation12 + $0xf8] sm:$0xf0] }
 0x17a   :  { %v1321_v61 = vpop.f32.mrf.mxu1  ;;  %7995 = vtanh.f32 %v1351_v2  ;;  %v6188_v2 = vor.u32 %v7655_v13, %v6187_v14  ;;  %v7647_v14 = vld [vmem:[#allocation12 + $0xac] sm:$0xf0]  ;;  %v7645_v13 = vld [vmem:[#allocation12 + $0xa4] sm:$0xf] }
 0x17b   :  { %v1364_v22 = vsub.f32 0.0, %v1352_v60  ;;  %7997 = vrcp.f32 %v1356_v45  ;;  %v6195_v60 = vld [vmem:[#allocation12 + $0xe8] sm:$0xf]  ;;  %v6192_v61 = vor.u32 %v7653_v15, %v6189_v48 }
 0x17c   :  { %v6196_v45 = vor.u32 %v7656_v19, %v6195_v60  ;;  %1850 = vmatpush.bf16.msra.mxu0 %v6188_v2  ;;  %v6157_v2 = vld [vmem:[#allocation12 + $0xb0] sm:$0xf0]  ;;  %v6163_v48 = vld [vmem:[#allocation12 + $0xa8] sm:$0xf]  ;;  %v7648_v60 = vld [vmem:[#allocation12 + $0xb4] sm:$0xf0] }
 0x17d   :  { %v1365_v30 = vmul.f32 1.442695, %v1364_v22  ;;  %v7654_v22 = vld [vmem:[#allocation12 + $0xec] sm:$0xf]  ;;  %1863 = vmatpush.bf16.msra.mxu1 %v6192_v61  ;;  %v6160_v19 = vor.u32 %v7645_v13, %v6157_v2  ;;  %v6164_v61 = vor.u32 %v7648_v60, %v6163_v48  ;;  %v6131_v2 = vld [vmem:[#allocation12 + $0x68] sm:$0xf] }
 0x17e   :  { %1876 = vmatpush.bf16.msra.mxu2 %v6196_v45  ;;  %v7646_v45 = vld [vmem:[#allocation12 + $0xac] sm:$0xf]  ;;  %v7640_v48 = vld [vmem:[#allocation12 + $0x74] sm:$0xf0] }
 0x17f   :  { %v7994_v42 = vpop.eup %7993  ;;  %7999 = vpow2.f32 %v1365_v30  ;;  %v6200_v30 = vor.u32 %v7654_v22, %v6197_v29  ;;  %v6165_v22 = vld [vmem:[#allocation12 + $0xb8] sm:$0xf0] }
 0x180   :  { %v1361_v17 = vadd.f32 1.0, %v7994_v42  ;;  %v1347_v27 = vpop.f32.mrf.mxu3  ;;  %v7996_v63 = vpop.eup %7995  ;;  %v6171_v42 = vld [vmem:[#allocation12 + $0xc0] sm:$0xf]  ;;  %v6168_v29 = vor.u32 %v7646_v45, %v6165_v22  ;;  %v6133_v45 = vld [vmem:[#allocation12 + $0x78] sm:$0xf0] }
 0x181   :  { %v7998_v24 = vpop.eup %7997  ;;  %v7649_v27 = vld [vmem:[#allocation12 + $0xc4] sm:$0xf]  ;;  %1889 = vmatpush.bf16.msra.mxu3 %v6200_v30  ;;  %v6139_v30 = vld [vmem:[#allocation12 + $0x80] sm:$0xf] }
 0x182   :  { %8001 = vrcp.f32 %v1361_v17  ;;  %v1370_v43 = vmul.f32 %v7998_v24, %v7996_v63  ;;  %v7651_v17 = vld [vmem:[#allocation12 + $0xcc] sm:$0xf0]  ;;  %v6173_v24 = vld [vmem:[#allocation12 + $0xd0] sm:$0xf0] }
 0x183   :  { %v6172_v63 = vor.u32 %v7651_v17, %v6171_v42  ;;  %v7643_v42 = vld [vmem:[#allocation12 + $0x8c] sm:$0xf0]  ;;  %v7641_v17 = vld [vmem:[#allocation12 + $0x84] sm:$0xf] }
 0x185   :  { %v8000_v9 = vpop.eup %7999  ;;  %1851 = vmatpush.bf16.msra.mxu0 %v6172_v63  ;;  %v6141_v63 = vld [vmem:[#allocation12 + $0x90] sm:$0xf0] }
 0x186   :  { %v1367_v33 = vadd.f32 1.0, %v8000_v9  ;;  %v7652_v9 = vld [vmem:[#allocation12 + $0xd4] sm:$0xf0] }
 0x188   :  { %v8002_v51 = vpop.eup %8001  ;;  %8003 = vrcp.f32 %v1367_v33 }
 0x189   :  { %v1369_v23 = vmul.f32 0.0, %v8002_v51  ;;  %v6176_v51 = vor.u32 %v7649_v27, %v6173_v24  ;;  %v6140_v27 = vor.u32 %v7643_v42, %v6139_v30  ;;  %v6147_v24 = vld [vmem:[#allocation12 + $0x88] sm:$0xf]  ;;  %v7635_v30 = vld [vmem:[#allocation12 + $0x4c] sm:$0xf0] }
 0x18a   :  { %v7633_v42 = vld [vmem:[#allocation12 + $0x44] sm:$0xf] }
 0x18b   :  { %v8907_v25 = vadd.f32 %v1370_v43, %v1369_v23  ;;  %v6179_v43 = vld [vmem:[#allocation12 + $0xc8] sm:$0xf]  ;;  %v7650_v23 = vld [vmem:[#allocation12 + $0xcc] sm:$0xf]  ;;  %1864 = vmatpush.bf16.msra.mxu1 %v6176_v51 }
 0x18c   :  { %v6180_v33 = vor.u32 %v7652_v9, %v6179_v43  ;;  %v7644_v43 = vld [vmem:[#allocation12 + $0x94] sm:$0xf0]  ;;  %v6144_v9 = vor.u32 %v7641_v17, %v6141_v63  ;;  %v6115_v63 = vld [vmem:[#allocation12 + $0x48] sm:$0xf] }
 0x18d   :  { %8005 = vtanh.f32 %v8907_v25  ;;  %v6148_v51 = vor.u32 %v7644_v43, %v6147_v24  ;;  %v7636_v24 = vld [vmem:[#allocation12 + $0x54] sm:$0xf0]  ;;  %v813_v43 = vadd.f32 %v8764_v41, %v8756_v20 }
 0x18e   :  { %v8004_v31 = vpop.eup %8003  ;;  %1877 = vmatpush.bf16.msra.mxu2 %v6180_v33  ;;  %v7642_v33 = vld [vmem:[#allocation12 + $0x8c] sm:$0xf] }
 0x18f   :  { %1865 = vmatpush.bf16.msra.mxu1 %v6160_v19  ;;  %v6132_v19 = vor.u32 %v7640_v48, %v6131_v2  ;;  %v6093_v2 = vld [vmem:[#allocation12 + $0x30] sm:$0xf0]  ;;  %v6099_v48 = vld [vmem:[#allocation12 + $0x28] sm:$0xf]  ;;  %v846_v41 = vadd.f32 %v8775_v46, %v813_v43  ;;  %v1011_v46 = vadd.f32 %v8851_v12, %v8840_v39 }
 0x190   :  { %v6077_v43 = vld [vmem:[#allocation12 + $0x10] sm:$0xf0] }
 0x191   :  { %v1044_v12 = vadd.f32 %v8854_v18, %v1011_v46 }
 0x192   :  { %1878 = vmatpush.bf16.msra.mxu2 %v6164_v61  ;;  %v7638_v61 = vld [vmem:[#allocation12 + $0x6c] sm:$0xf] }
 0x193   :  { %v8006_v47 = vpop.eup %8005  ;;  %1866 = vmatpush.bf16.msra.mxu1 %v6144_v9  ;;  %v6136_v22 = vor.u32 %v7638_v61, %v6133_v45  ;;  %v879_v9 = vadd.f32 %v8771_v44, %v8762_v37  ;;  %v7630_v45 = vld [vmem:[#allocation12 + $0x2c] sm:$0xf] }
 0x194   :  { %v8910_v6 = vmul.f32 %v8006_v47, %v8004_v31  ;;  %v6181_v31 = vld [vmem:[#allocation12 + $0xd8] sm:$0xf0] }
 0x195   :  { %v6184_v47 = vor.u32 %v7650_v23, %v6181_v31  ;;  %v6149_v23 = vld [vmem:[#allocation12 + $0x98] sm:$0xf0]  ;;  %v912_v44 = vadd.f32 %v8778_v50, %v879_v9  ;;  %v6083_v9 = vld [vmem:[#allocation12 + $0x8] sm:$0xf] }
 0x196   :  { %v1380_v21 = vpack.c.bf16 %v8910_v6, %v8910_v6  ;;  %v6152_v31 = vor.u32 %v7642_v33, %v6149_v23  ;;  %1879 = vmatpush.bf16.msra.mxu2 %v6148_v51  ;;  %v6116_v33 = vor.u32 %v7636_v24, %v6115_v63  ;;  %v7634_v23 = vld [vmem:[#allocation12 + $0x4c] sm:$0xf]  ;;  %v6075_v63 = vld [vmem:[#allocation12] sm:$0xf]  ;;  %v7627_v24 = vld [vmem:[#allocation12 + $0xc] sm:$0xf0] }
 0x197   :  { %1890 = vmatpush.bf16.msra.mxu3 %v6184_v47  ;;  %v6123_v47 = vld [vmem:[#allocation12 + $0x60] sm:$0xf]  ;;  %v6076_v50 = vor.u32 %v7627_v24, %v6075_v63 }
 0x198   :  { %1581 = vmatmul.bf16.vlgmr.msrb.gmra.mxu0 %v1380_v21  ;;  %1594 = vmatmul.bf16.vlgmr.msrb.gmra.mxu1 %v1380_v21 }
 0x199   :  { %1607 = vmatmul.bf16.vlgmr.msrb.gmra.mxu2 %v1380_v21  ;;  %1620 = vmatmul.bf16.vlgmr.msrb.gmra.mxu3 %v1380_v21  ;;  %v6155_v21 = vld [vmem:[#allocation12 + $0xa0] sm:$0xf] }
 0x19a   :  { %v6156_v15 = vor.u32 %v7647_v14, %v6155_v21  ;;  %v7639_v21 = vld [vmem:[#allocation12 + $0x6c] sm:$0xf0]  ;;  %v7637_v14 = vld [vmem:[#allocation12 + $0x64] sm:$0xf]  ;;  %1880 = vmatpush.bf16.msra.mxu2 %v6132_v19 }
 0x19b   :  { %1891 = vmatpush.bf16.msra.mxu3 %v6168_v29  ;;  %v6124_v13 = vor.u32 %v7639_v21, %v6123_v47  ;;  %v6107_v29 = vld [vmem:[#allocation12 + $0x40] sm:$0xf] }
 0x19c   :  { %1852 = vmatpush.bf16.msra.mxu0 %v6156_v15  ;;  %v6125_v15 = vld [vmem:[#allocation12 + $0x70] sm:$0xf0]  ;;  %v6108_v17 = vor.u32 %v7635_v30, %v6107_v29  ;;  %v6091_v21 = vld [vmem:[#allocation12 + $0x20] sm:$0xf] }
 0x19d   :  { %v6128_v60 = vor.u32 %v7637_v14, %v6125_v15  ;;  %v7631_v14 = vld [vmem:[#allocation12 + $0x2c] sm:$0xf0] }
 0x19e   :  { %1881 = vmatpush.bf16.msra.mxu2 %v6116_v33  ;;  %v6092_v15 = vor.u32 %v7631_v14, %v6091_v21  ;;  %v7628_v33 = vld [vmem:[#allocation12 + $0x14] sm:$0xf0]  ;;  %v7626_v14 = vld [vmem:[#allocation12 + $0xc] sm:$0xf] }
 0x19f   :  { %1892 = vmatpush.bf16.msra.mxu3 %v6152_v31  ;;  %1867 = vmatpush.bf16.msra.mxu1 %v6128_v60  ;;  %v6117_v31 = vld [vmem:[#allocation12 + $0x58] sm:$0xf0]  ;;  %v7632_v60 = vld [vmem:[#allocation12 + $0x34] sm:$0xf0]  ;;  %v6084_v21 = vor.u32 %v7628_v33, %v6083_v9 }
 0x1a0   :  { %1853 = vmatpush.bf16.msra.mxu0 %v6140_v27  ;;  %v6109_v27 = vld [vmem:[#allocation12 + $0x50] sm:$0xf0]  ;;  %v6120_v47 = vor.u32 %v7634_v23, %v6117_v31  ;;  %v6100_v61 = vor.u32 %v7632_v60, %v6099_v48 }
 0x1a1   :  { %v6112_v51 = vor.u32 %v7633_v42, %v6109_v27 }
 0x1a2   :  { %1882 = vmatpush.bf16.msra.mxu2 %v6100_v61 }
 0x1a3   :  { %1893 = vmatpush.bf16.msra.mxu3 %v6136_v22  ;;  %1868 = vmatpush.bf16.msra.mxu1 %v6112_v51  ;;  %v6101_v22 = vld [vmem:[#allocation12 + $0x38] sm:$0xf0]  ;;  %v7625_v51 = vld [vmem:[#allocation12 + $0x4] sm:$0xf] }
 0x1a4   :  { %1854 = vmatpush.bf16.msra.mxu0 %v6124_v13  ;;  %v7629_v13 = vld [vmem:[#allocation12 + $0x24] sm:$0xf]  ;;  %v6104_v42 = vor.u32 %v7630_v45, %v6101_v22 }
 0x1a5   :  { %v6096_v19 = vor.u32 %v7629_v13, %v6093_v2  ;;  %v6085_v13 = vld [vmem:[#allocation12 + $0x18] sm:$0xf0]  ;;  %v945_v2 = vadd.f32 %v8845_v52, %v8836_v34 }
 0x1a6   :  { %1883 = vmatpush.bf16.msra.mxu2 %v6084_v21 }
 0x1a7   :  { %1894 = vmatpush.bf16.msra.mxu3 %v6120_v47  ;;  %1869 = vmatpush.bf16.msra.mxu1 %v6096_v19  ;;  %v6080_v47 = vor.u32 %v7625_v51, %v6077_v43  ;;  %v978_v22 = vadd.f32 %v8849_v54, %v945_v2  ;;  %v7685_v2 = vld [vmem:[#allocation12 + $0xe4] sm:$0xf] }
 0x1a8   :  { %1855 = vmatpush.bf16.msra.mxu0 %v6108_v17 }
 0x1ab   :  { %1895 = vmatpush.bf16.msra.mxu3 %v6104_v42  ;;  %1870 = vmatpush.bf16.msra.mxu1 %v6080_v47 }
 0x1ac   :  { %1856 = vmatpush.bf16.msra.mxu0 %v6092_v15  ;;  %v6088_v15 = vor.u32 %v7626_v14, %v6085_v13  ;;  %v6315_v13 = vld [vmem:[#allocation12 + $0xe0] sm:$0xf] }
 0x1af   :  { %1896 = vmatpush.bf16.msra.mxu3 %v6088_v15  ;;  %v7687_v15 = vld [vmem:[#allocation12 + $0xec] sm:$0xf0] }
 0x1b0   :  { %1857 = vmatpush.bf16.msra.mxu0 %v6076_v50 }
 0x215   :  { %v1582_v29 = vpop.f32.mrf.mxu0  ;;  %v1595_v30 = vpop.f32.mrf.mxu1 }
 0x216   :  { %v1625_v17 = vadd.f32 %v1582_v29, %v846_v41  ;;  %v1626_v27 = vadd.f32 %v1595_v30, %v912_v44 }
 0x218   :  { %v1629_v23 = vsub.f32 0.0, %v1625_v17  ;;  %v1634_v31 = vsub.f32 0.0, %v1626_v27 }
 0x21a   :  { %v1630_v48 = vmul.f32 1.442695, %v1629_v23  ;;  %v1635_v60 = vmul.f32 1.442695, %v1634_v31 }
 0x21c   :  { %8007 = vpow2.f32 %v1630_v48  ;;  %v1608_v41 = vpop.f32.mrf.mxu2  ;;  %v1621_v44 = vpop.f32.mrf.mxu3  ;;  %v6317_v48 = vld [vmem:[#allocation12 + $0xf0] sm:$0xf0] }
 0x21d   :  { %8009 = vpow2.f32 %v1635_v60  ;;  %v1628_v19 = vadd.f32 %v1621_v44, %v1044_v12  ;;  %v1584_v61 = vpop.f32.mrf.mxu0  ;;  %v1597_v45 = vpop.f32.mrf.mxu1  ;;  %v1627_v30 = vadd.f32 %v1608_v41, %v978_v22  ;;  %v6323_v60 = vld [vmem:[#allocation12 + $0xe8] sm:$0xf]  ;;  %v7688_v12 = vld [vmem:[#allocation12 + $0xf4] sm:$0xf0]  ;;  %v6320_v41 = vor.u32 %v7685_v2, %v6317_v48  ;;  %v6299_v22 = vld [vmem:[#allocation12 + $0xc0] sm:$0xf] }
 0x21e   :  { %v6324_v44 = vor.u32 %v7688_v12, %v6323_v60  ;;  %v6325_v61 = vld [vmem:[#allocation12 + $0xf8] sm:$0xf0]  ;;  %v6267_v48 = vld [vmem:[#allocation12 + $0x80] sm:$0xf]  ;;  %v7675_v60 = vld [vmem:[#allocation12 + $0x8c] sm:$0xf0] }
 0x21f   :  { %v1640_v29 = vsub.f32 0.0, %v1628_v19  ;;  %v7686_v19 = vld [vmem:[#allocation12 + $0xec] sm:$0xf]  ;;  %2140 = vmatpush.bf16.msrb.mxu1 %v6320_v41  ;;  %v6293_v2 = vld [vmem:[#allocation12 + $0xb8] sm:$0xf0]  ;;  %v6268_v41 = vor.u32 %v7675_v60, %v6267_v48 }
 0x220   :  { %v6328_v45 = vor.u32 %v7686_v19, %v6325_v61  ;;  %2153 = vmatpush.bf16.msrb.mxu2 %v6324_v44  ;;  %v7673_v12 = vld [vmem:[#allocation12 + $0x84] sm:$0xf]  ;;  %v6269_v44 = vld [vmem:[#allocation12 + $0x90] sm:$0xf0]  ;;  %v6275_v19 = vld [vmem:[#allocation12 + $0x88] sm:$0xf] }
 0x221   :  { %v1641_v42 = vmul.f32 1.442695, %v1640_v29  ;;  %v7683_v29 = vld [vmem:[#allocation12 + $0xcc] sm:$0xf0]  ;;  %v7676_v61 = vld [vmem:[#allocation12 + $0x94] sm:$0xf0] }
 0x222   :  { %v8008_v52 = vpop.eup %8007  ;;  %2166 = vmatpush.bf16.msrb.mxu3 %v6328_v45  ;;  %v6272_v45 = vor.u32 %v7673_v12, %v6269_v44  ;;  %v7666_v60 = vld [vmem:[#allocation12 + $0x4c] sm:$0xf]  ;;  %v6245_v12 = vld [vmem:[#allocation12 + $0x58] sm:$0xf0]  ;;  %v6219_v44 = vld [vmem:[#allocation12 + $0x20] sm:$0xf] }
 0x223   :  { %v8010_v17 = vpop.eup %8009  ;;  %v1632_v27 = vadd.f32 1.0, %v8008_v52  ;;  %8011 = vpow2.f32 %v1641_v42  ;;  %v6300_v42 = vor.u32 %v7683_v29, %v6299_v22  ;;  %v6301_v52 = vld [vmem:[#allocation12 + $0xd0] sm:$0xf0]  ;;  %v6276_v22 = vor.u32 %v7676_v61, %v6275_v19  ;;  %v7674_v29 = vld [vmem:[#allocation12 + $0x8c] sm:$0xf] }
 0x224   :  { %v1637_v63 = vadd.f32 1.0, %v8010_v17  ;;  %8013 = vtanh.f32 %v1627_v30  ;;  %v1610_v18 = vpop.f32.mrf.mxu2  ;;  %v1623_v24 = vpop.f32.mrf.mxu3  ;;  %v7681_v30 = vld [vmem:[#allocation12 + $0xc4] sm:$0xf]  ;;  %v6307_v17 = vld [vmem:[#allocation12 + $0xc8] sm:$0xf] }
 0x225   :  { %8015 = vrcp.f32 %v1632_v27  ;;  %v7684_v27 = vld [vmem:[#allocation12 + $0xd4] sm:$0xf0]  ;;  %v7682_v24 = vld [vmem:[#allocation12 + $0xcc] sm:$0xf]  ;;  %v7663_v19 = vld [vmem:[#allocation12 + $0x2c] sm:$0xf0] }
 0x226   :  { %8017 = vrcp.f32 %v1637_v63  ;;  %v6304_v63 = vor.u32 %v7681_v30, %v6301_v52  ;;  %v6308_v18 = vor.u32 %v7684_v27, %v6307_v17  ;;  %v6277_v30 = vld [vmem:[#allocation12 + $0x98] sm:$0xf0]  ;;  %v6251_v52 = vld [vmem:[#allocation12 + $0x60] sm:$0xf]  ;;  %v7671_v17 = vld [vmem:[#allocation12 + $0x6c] sm:$0xf0] }
 0x227   :  { %v7669_v27 = vld [vmem:[#allocation12 + $0x64] sm:$0xf] }
 0x228   :  { %2141 = vmatpush.bf16.msrb.mxu1 %v6304_v63  ;;  %2154 = vmatpush.bf16.msrb.mxu2 %v6308_v18  ;;  %v6252_v63 = vor.u32 %v7671_v17, %v6251_v52  ;;  %v6253_v18 = vld [vmem:[#allocation12 + $0x70] sm:$0xf0]  ;;  %v7661_v61 = vld [vmem:[#allocation12 + $0x24] sm:$0xf]  ;;  %v7662_v17 = vld [vmem:[#allocation12 + $0x2c] sm:$0xf] }
 0x229   :  { %v8012_v51 = vpop.eup %8011 }
 0x22a   :  { %v8014_v46 = vpop.eup %8013  ;;  %v1643_v33 = vadd.f32 1.0, %v8012_v51  ;;  %v6309_v51 = vld [vmem:[#allocation12 + $0xd8] sm:$0xf0] }
 0x22b   :  { %v8016_v50 = vpop.eup %8015 }
 0x22c   :  { %v8018_v43 = vpop.eup %8017  ;;  %v1646_v9 = vmul.f32 %v8016_v50, %v8014_v46  ;;  %8019 = vrcp.f32 %v1643_v33  ;;  %v6312_v46 = vor.u32 %v7682_v24, %v6309_v51  ;;  %v6283_v50 = vld [vmem:[#allocation12 + $0xa0] sm:$0xf]  ;;  %v6259_v24 = vld [vmem:[#allocation12 + $0x68] sm:$0xf]  ;;  %v7672_v51 = vld [vmem:[#allocation12 + $0x74] sm:$0xf0] }
 0x22d   :  { %v1645_v54 = vmul.f32 %v8018_v43, %v8907_v25  ;;  %v6316_v25 = vor.u32 %v7687_v15, %v6315_v13  ;;  %v7679_v43 = vld [vmem:[#allocation12 + $0xac] sm:$0xf0]  ;;  %v7678_v15 = vld [vmem:[#allocation12 + $0xac] sm:$0xf] }
 0x22e   :  { %2167 = vmatpush.bf16.msrb.mxu3 %v6312_v46  ;;  %v6284_v33 = vor.u32 %v7679_v43, %v6283_v50  ;;  %v6256_v46 = vor.u32 %v7669_v27, %v6253_v18  ;;  %v6260_v50 = vor.u32 %v7672_v51, %v6259_v24  ;;  %v7670_v43 = vld [vmem:[#allocation12 + $0x6c] sm:$0xf]  ;;  %v6229_v27 = vld [vmem:[#allocation12 + $0x38] sm:$0xf0] }
 0x22f   :  { %v8927_v23 = vadd.f32 %v1646_v9, %v1645_v54  ;;  %2127 = vmatpush.bf16.msrb.mxu0 %v6316_v25  ;;  %v7677_v9 = vld [vmem:[#allocation12 + $0xa4] sm:$0xf]  ;;  %v6285_v54 = vld [vmem:[#allocation12 + $0xb0] sm:$0xf0]  ;;  %v6296_v25 = vor.u32 %v7678_v15, %v6293_v2  ;;  %v6243_v15 = vld [vmem:[#allocation12 + $0x48] sm:$0xf]  ;;  %v6232_v24 = vor.u32 %v7662_v17, %v6229_v27 }
 0x230   :  { %v7668_v2 = vld [vmem:[#allocation12 + $0x54] sm:$0xf0] }
 0x231   :  { %8021 = vtanh.f32 %v8927_v23  ;;  %v6244_v48 = vor.u32 %v7668_v2, %v6243_v15 }
 0x232   :  { %v8020_v31 = vpop.eup %8019  ;;  %2168 = vmatpush.bf16.msrb.mxu3 %v6296_v25 }
 0x233   :  { %2128 = vmatpush.bf16.msrb.mxu0 %v6300_v42  ;;  %v6280_v42 = vor.u32 %v7674_v29, %v6277_v30  ;;  %v6227_v29 = vld [vmem:[#allocation12 + $0x28] sm:$0xf]  ;;  %v7664_v30 = vld [vmem:[#allocation12 + $0x34] sm:$0xf0] }
 0x234   :  { %v6228_v52 = vor.u32 %v7664_v30, %v6227_v29 }
 0x236   :  { %2169 = vmatpush.bf16.msrb.mxu3 %v6280_v42 }
 0x237   :  { %v8022_v47 = vpop.eup %8021  ;;  %2129 = vmatpush.bf16.msrb.mxu0 %v6284_v33 }
 0x238   :  { %v8930_v21 = vmul.f32 %v8022_v47, %v8020_v31  ;;  %v6291_v31 = vld [vmem:[#allocation12 + $0xa8] sm:$0xf]  ;;  %v7680_v47 = vld [vmem:[#allocation12 + $0xb4] sm:$0xf0] }
 0x239   :  { %v6292_v13 = vor.u32 %v7680_v47, %v6291_v31  ;;  %v7667_v31 = vld [vmem:[#allocation12 + $0x4c] sm:$0xf0]  ;;  %v7665_v47 = vld [vmem:[#allocation12 + $0x44] sm:$0xf] }
 0x23a   :  { %v1657_v14 = vpack.c.bf16 %v8930_v21, %v8930_v21 }
 0x23b   :  { %2155 = vmatpush.bf16.msrb.mxu2 %v6292_v13  ;;  %2130 = vmatpush.bf16.msrb.mxu0 %v6268_v41  ;;  %v6237_v13 = vld [vmem:[#allocation12 + $0x50] sm:$0xf0]  ;;  %v6248_v41 = vor.u32 %v7666_v60, %v6245_v12 }
 0x23c   :  { %1858 = vmatmul.bf16.vlgmr.msra.gmra.mxu0 %v1657_v14  ;;  %1871 = vmatmul.bf16.vlgmr.msra.gmra.mxu1 %v1657_v14  ;;  %v6240_v25 = vor.u32 %v7665_v47, %v6237_v13  ;;  %v7660_v47 = vld [vmem:[#allocation12 + $0x14] sm:$0xf0] }
 0x23d   :  { %1884 = vmatmul.bf16.vlgmr.msra.gmra.mxu2 %v1657_v14  ;;  %1897 = vmatmul.bf16.vlgmr.msra.gmra.mxu3 %v1657_v14  ;;  %v6288_v14 = vor.u32 %v7677_v9, %v6285_v54  ;;  %v6261_v9 = vld [vmem:[#allocation12 + $0x78] sm:$0xf0]  ;;  %v6235_v54 = vld [vmem:[#allocation12 + $0x40] sm:$0xf] }
 0x23e   :  { %v6264_v33 = vor.u32 %v7670_v43, %v6261_v9  ;;  %v7659_v43 = vld [vmem:[#allocation12 + $0xc] sm:$0xf0]  ;;  %v7657_v9 = vld [vmem:[#allocation12 + $0x4] sm:$0xf] }
 0x23f   :  { %2142 = vmatpush.bf16.msrb.mxu1 %v6288_v14  ;;  %2156 = vmatpush.bf16.msrb.mxu2 %v6276_v22  ;;  %v6236_v14 = vor.u32 %v7667_v31, %v6235_v54  ;;  %v6221_v22 = vld [vmem:[#allocation12 + $0x30] sm:$0xf0]  ;;  %v6211_v31 = vld [vmem:[#allocation12 + $0x8] sm:$0xf] }
 0x240   :  { %2131 = vmatpush.bf16.msrb.mxu0 %v6252_v63  ;;  %2170 = vmatpush.bf16.msrb.mxu3 %v6264_v33  ;;  %v6224_v42 = vor.u32 %v7661_v61, %v6221_v22  ;;  %v6205_v54 = vld [vmem:[#allocation12 + $0x10] sm:$0xf0]  ;;  %v6212_v2 = vor.u32 %v7660_v47, %v6211_v31  ;;  %v6443_v47 = vld [vmem:[#allocation12 + $0xe0] sm:$0xf] }
 0x241   :  { %v6208_v15 = vor.u32 %v7657_v9, %v6205_v54 }
 0x243   :  { %2143 = vmatpush.bf16.msrb.mxu1 %v6272_v45  ;;  %2157 = vmatpush.bf16.msrb.mxu2 %v6260_v50  ;;  %v6220_v45 = vor.u32 %v7663_v19, %v6219_v44  ;;  %v6203_v50 = vld [vmem:[#allocation12] sm:$0xf] }
 0x244   :  { %2132 = vmatpush.bf16.msrb.mxu0 %v6236_v14  ;;  %2171 = vmatpush.bf16.msrb.mxu3 %v6248_v41  ;;  %v6204_v33 = vor.u32 %v7659_v43, %v6203_v50 }
 0x247   :  { %2144 = vmatpush.bf16.msrb.mxu1 %v6256_v46  ;;  %2158 = vmatpush.bf16.msrb.mxu2 %v6244_v48  ;;  %v6213_v48 = vld [vmem:[#allocation12 + $0x18] sm:$0xf0] }
 0x248   :  { %2133 = vmatpush.bf16.msrb.mxu0 %v6220_v45  ;;  %2172 = vmatpush.bf16.msrb.mxu3 %v6232_v24 }
 0x24b   :  { %2145 = vmatpush.bf16.msrb.mxu1 %v6240_v25  ;;  %2159 = vmatpush.bf16.msrb.mxu2 %v6228_v52  ;;  %v7658_v25 = vld [vmem:[#allocation12 + $0xc] sm:$0xf] }
 0x24c   :  { %2134 = vmatpush.bf16.msrb.mxu0 %v6204_v33 }
 0x24f   :  { %2146 = vmatpush.bf16.msrb.mxu1 %v6224_v42  ;;  %2160 = vmatpush.bf16.msrb.mxu2 %v6212_v2  ;;  %v6451_v2 = vld [vmem:[#allocation12 + $0xe8] sm:$0xf] }
 0x253   :  { %2147 = vmatpush.bf16.msrb.mxu1 %v6208_v15  ;;  %v6445_v15 = vld [vmem:[#allocation12 + $0xf0] sm:$0xf0] }
 0x2b9   :  { %v1859_v63 = vpop.f32.mrf.mxu0  ;;  %v1872_v18 = vpop.f32.mrf.mxu1 }
 0x2ba   :  { %v1902_v51 = vadd.f32 %v1859_v63, %v8782_v53  ;;  %v1903_v46 = vadd.f32 %v1872_v18, %v8789_v56  ;;  %v6216_v53 = vor.u32 %v7658_v25, %v6213_v48  ;;  %v7720_v25 = vld [vmem:[#allocation12 + $0xf4] sm:$0xf0] }
 0x2bc   :  { %v1906_v14 = vsub.f32 0.0, %v1902_v51  ;;  %v1911_v13 = vsub.f32 0.0, %v1903_v46  ;;  %2173 = vmatpush.bf16.msrb.mxu3 %v6216_v53  ;;  %v6452_v53 = vor.u32 %v7720_v25, %v6451_v2  ;;  %v6397_v2 = vld [vmem:[#allocation12 + $0x90] sm:$0xf0]  ;;  %v6403_v25 = vld [vmem:[#allocation12 + $0x88] sm:$0xf] }
 0x2be   :  { %v1907_v60 = vmul.f32 1.442695, %v1906_v14  ;;  %v1912_v56 = vmul.f32 1.442695, %v1911_v13  ;;  %v7719_v14 = vld [vmem:[#allocation12 + $0xec] sm:$0xf0]  ;;  %2430 = vmatpush.bf16.msra.mxu2 %v6452_v53 }
 0x2bf   :  { %v7717_v13 = vld [vmem:[#allocation12 + $0xe4] sm:$0xf] }
 0x2c0   :  { %8023 = vpow2.f32 %v1907_v60  ;;  %v1885_v12 = vpop.f32.mrf.mxu2  ;;  %v1898_v41 = vpop.f32.mrf.mxu3  ;;  %v6448_v48 = vor.u32 %v7717_v13, %v6445_v15  ;;  %v7718_v60 = vld [vmem:[#allocation12 + $0xec] sm:$0xf]  ;;  %v7707_v13 = vld [vmem:[#allocation12 + $0x8c] sm:$0xf0] }
 0x2c1   :  { %8025 = vpow2.f32 %v1912_v56  ;;  %v1905_v44 = vadd.f32 %v1898_v41, %v8861_v10  ;;  %v1861_v19 = vpop.f32.mrf.mxu0  ;;  %v1874_v61 = vpop.f32.mrf.mxu1  ;;  %v1904_v22 = vadd.f32 %v1885_v12, %v8856_v1  ;;  %v6453_v56 = vld [vmem:[#allocation12 + $0xf8] sm:$0xf0]  ;;  %v6427_v41 = vld [vmem:[#allocation12 + $0xc0] sm:$0xf] }
 0x2c2   :  { %v6456_v12 = vor.u32 %v7718_v60, %v6453_v56  ;;  %2417 = vmatpush.bf16.msra.mxu1 %v6448_v48  ;;  %v7713_v19 = vld [vmem:[#allocation12 + $0xc4] sm:$0xf]  ;;  %v7708_v48 = vld [vmem:[#allocation12 + $0x94] sm:$0xf0]  ;;  %v7706_v56 = vld [vmem:[#allocation12 + $0x8c] sm:$0xf] }
 0x2c3   :  { %v1917_v45 = vsub.f32 0.0, %v1905_v44  ;;  %v7715_v44 = vld [vmem:[#allocation12 + $0xcc] sm:$0xf0]  ;;  %v6404_v60 = vor.u32 %v7708_v48, %v6403_v25  ;;  %v7693_v25 = vld [vmem:[#allocation12 + $0x24] sm:$0xf] }
 0x2c4   :  { %2443 = vmatpush.bf16.msra.mxu3 %v6456_v12  ;;  %v6428_v61 = vor.u32 %v7715_v44, %v6427_v41  ;;  %v6405_v12 = vld [vmem:[#allocation12 + $0x98] sm:$0xf0]  ;;  %v6379_v44 = vld [vmem:[#allocation12 + $0x60] sm:$0xf] }
 0x2c5   :  { %v1918_v29 = vmul.f32 1.442695, %v1917_v45  ;;  %v6429_v45 = vld [vmem:[#allocation12 + $0xd0] sm:$0xf0]  ;;  %v6408_v41 = vor.u32 %v7706_v56, %v6405_v12  ;;  %v7696_v56 = vld [vmem:[#allocation12 + $0x34] sm:$0xf0] }
 0x2c6   :  { %v8024_v30 = vpop.eup %8023 }
 0x2c7   :  { %v8026_v42 = vpop.eup %8025  ;;  %v1909_v52 = vadd.f32 1.0, %v8024_v30  ;;  %8027 = vpow2.f32 %v1918_v29  ;;  %v7716_v29 = vld [vmem:[#allocation12 + $0xd4] sm:$0xf0]  ;;  %v6432_v30 = vor.u32 %v7713_v19, %v6429_v45  ;;  %v7703_v19 = vld [vmem:[#allocation12 + $0x6c] sm:$0xf0] }
 0x2c8   :  { %v1914_v17 = vadd.f32 1.0, %v8026_v42  ;;  %8029 = vtanh.f32 %v1904_v22  ;;  %v1887_v27 = vpop.f32.mrf.mxu2  ;;  %v1900_v63 = vpop.f32.mrf.mxu3  ;;  %v6435_v22 = vld [vmem:[#allocation12 + $0xc8] sm:$0xf]  ;;  %v6380_v45 = vor.u32 %v7703_v19, %v6379_v44  ;;  %v7694_v44 = vld [vmem:[#allocation12 + $0x2c] sm:$0xf] }
 0x2c9   :  { %8031 = vrcp.f32 %v1909_v52  ;;  %v6436_v42 = vor.u32 %v7716_v29, %v6435_v22  ;;  %v7714_v52 = vld [vmem:[#allocation12 + $0xcc] sm:$0xf]  ;;  %2418 = vmatpush.bf16.msra.mxu1 %v6432_v30  ;;  %v6411_v63 = vld [vmem:[#allocation12 + $0xa0] sm:$0xf]  ;;  %v6381_v22 = vld [vmem:[#allocation12 + $0x70] sm:$0xf0] }
 0x2ca   :  { %8033 = vrcp.f32 %v1914_v17  ;;  %v6437_v17 = vld [vmem:[#allocation12 + $0xd8] sm:$0xf0]  ;;  %v6387_v29 = vld [vmem:[#allocation12 + $0x68] sm:$0xf]  ;;  %v7704_v30 = vld [vmem:[#allocation12 + $0x74] sm:$0xf0] }
 0x2cb   :  { %v6440_v27 = vor.u32 %v7714_v52, %v6437_v17  ;;  %2431 = vmatpush.bf16.msra.mxu2 %v6436_v42  ;;  %v6388_v52 = vor.u32 %v7704_v30, %v6387_v29  ;;  %v7702_v17 = vld [vmem:[#allocation12 + $0x6c] sm:$0xf]  ;;  %v6357_v19 = vld [vmem:[#allocation12 + $0x38] sm:$0xf0] }
 0x2cd   :  { %v8028_v18 = vpop.eup %8027  ;;  %2444 = vmatpush.bf16.msra.mxu3 %v6440_v27  ;;  %v6389_v27 = vld [vmem:[#allocation12 + $0x78] sm:$0xf0] }
 0x2ce   :  { %v8030_v24 = vpop.eup %8029  ;;  %v1920_v50 = vadd.f32 1.0, %v8028_v18  ;;  %v7711_v18 = vld [vmem:[#allocation12 + $0xac] sm:$0xf0] }
 0x2cf   :  { %v8032_v51 = vpop.eup %8031 }
 0x2d0   :  { %v8034_v10 = vpop.eup %8033  ;;  %v1923_v46 = vmul.f32 %v8032_v51, %v8030_v24  ;;  %8035 = vrcp.f32 %v1920_v50  ;;  %v7709_v24 = vld [vmem:[#allocation12 + $0xa4] sm:$0xf]  ;;  %v6412_v51 = vor.u32 %v7711_v18, %v6411_v63  ;;  %v7712_v50 = vld [vmem:[#allocation12 + $0xb4] sm:$0xf0]  ;;  %v6392_v63 = vor.u32 %v7702_v17, %v6389_v27  ;;  %v6363_v18 = vld [vmem:[#allocation12 + $0x40] sm:$0xf] }
 0x2d1   :  { %v1922_v43 = vmul.f32 %v8034_v10, %v8927_v23  ;;  %v6444_v23 = vor.u32 %v7719_v14, %v6443_v47  ;;  %v6413_v10 = vld [vmem:[#allocation12 + $0xb0] sm:$0xf0]  ;;  %v6395_v14 = vld [vmem:[#allocation12 + $0x80] sm:$0xf]  ;;  %v7689_v17 = vld [vmem:[#allocation12 + $0x4] sm:$0xf] }
 0x2d2   :  { %v6396_v15 = vor.u32 %v7707_v13, %v6395_v14  ;;  %v7698_v14 = vld [vmem:[#allocation12 + $0x4c] sm:$0xf]  ;;  %v6373_v13 = vld [vmem:[#allocation12 + $0x58] sm:$0xf0]  ;;  %v6333_v27 = vld [vmem:[#allocation12 + $0x10] sm:$0xf0] }
 0x2d3   :  { %v8939_v1 = vadd.f32 %v1923_v46, %v1922_v43  ;;  %2404 = vmatpush.bf16.msra.mxu0 %v6444_v23  ;;  %v6419_v46 = vld [vmem:[#allocation12 + $0xa8] sm:$0xf]  ;;  %v6416_v43 = vor.u32 %v7709_v24, %v6413_v10  ;;  %v7705_v23 = vld [vmem:[#allocation12 + $0x84] sm:$0xf]  ;;  %v7699_v24 = vld [vmem:[#allocation12 + $0x4c] sm:$0xf0] }
 0x2d4   :  { %v6400_v53 = vor.u32 %v7705_v23, %v6397_v2  ;;  %v6364_v10 = vor.u32 %v7699_v24, %v6363_v18  ;;  %v6376_v23 = vor.u32 %v7698_v14, %v6373_v13  ;;  %v7695_v2 = vld [vmem:[#allocation12 + $0x2c] sm:$0xf0]  ;;  %v7692_v18 = vld [vmem:[#allocation12 + $0x14] sm:$0xf0] }
 0x2d5   :  { %8037 = vtanh.f32 %v8939_v1  ;;  %2419 = vmatpush.bf16.msra.mxu1 %v6416_v43  ;;  %v7700_v43 = vld [vmem:[#allocation12 + $0x54] sm:$0xf0] }
 0x2d6   :  { %v8036_v9 = vpop.eup %8035 }
 0x2d7   :  { %2405 = vmatpush.bf16.msra.mxu0 %v6428_v61  ;;  %v7701_v61 = vld [vmem:[#allocation12 + $0x64] sm:$0xf] }
 0x2d8   :  { %v6384_v42 = vor.u32 %v7701_v61, %v6381_v22  ;;  %v6360_v22 = vor.u32 %v7694_v44, %v6357_v19 }
 0x2d9   :  { %2420 = vmatpush.bf16.msra.mxu1 %v6400_v53  ;;  %v6349_v53 = vld [vmem:[#allocation12 + $0x30] sm:$0xf0] }
 0x2da   :  { %v6352_v12 = vor.u32 %v7693_v25, %v6349_v53 }
 0x2db   :  { %v8038_v33 = vpop.eup %8037  ;;  %2406 = vmatpush.bf16.msra.mxu0 %v6412_v51  ;;  %v7697_v51 = vld [vmem:[#allocation12 + $0x44] sm:$0xf] }
 0x2dc   :  { %v8942_v54 = vmul.f32 %v8038_v33, %v8036_v9  ;;  %v6420_v9 = vor.u32 %v7712_v50, %v6419_v46  ;;  %v7710_v33 = vld [vmem:[#allocation12 + $0xac] sm:$0xf]  ;;  %v6365_v46 = vld [vmem:[#allocation12 + $0x50] sm:$0xf0]  ;;  %v6371_v50 = vld [vmem:[#allocation12 + $0x48] sm:$0xf] }
 0x2dd   :  { %2421 = vmatpush.bf16.msra.mxu1 %v6384_v42  ;;  %v6331_v42 = vld [vmem:[#allocation12] sm:$0xf] }
 0x2de   :  { %v1934_v31 = vpack.c.bf16 %v8942_v54, %v8942_v54  ;;  %2432 = vmatpush.bf16.msra.mxu2 %v6420_v9  ;;  %v818_v9 = vadd.f32 %v8784_v7, %v8756_v20 }
 0x2df   :  { %2407 = vmatpush.bf16.msra.mxu0 %v6396_v15  ;;  %v6347_v15 = vld [vmem:[#allocation12 + $0x20] sm:$0xf] }
 0x2e0   :  { %2135 = vmatmul.bf16.vlgmr.msrb.gmra.mxu0 %v1934_v31  ;;  %2148 = vmatmul.bf16.vlgmr.msrb.gmra.mxu1 %v1934_v31  ;;  %v6348_v48 = vor.u32 %v7695_v2, %v6347_v15  ;;  %v851_v7 = vadd.f32 %v8793_v58, %v818_v9  ;;  %v1016_v58 = vadd.f32 %v8865_v16, %v8840_v39 }
 0x2e1   :  { %2161 = vmatmul.bf16.vlgmr.msrb.gmra.mxu2 %v1934_v31  ;;  %2174 = vmatmul.bf16.vlgmr.msrb.gmra.mxu3 %v1934_v31  ;;  %v6421_v31 = vld [vmem:[#allocation12 + $0xb8] sm:$0xf0] }
 0x2e2   :  { %v6424_v47 = vor.u32 %v7710_v33, %v6421_v31  ;;  %2433 = vmatpush.bf16.msra.mxu2 %v6404_v60  ;;  %v884_v33 = vadd.f32 %v8791_v57, %v8762_v37  ;;  %v6368_v31 = vor.u32 %v7697_v51, %v6365_v46  ;;  %v6355_v60 = vld [vmem:[#allocation12 + $0x28] sm:$0xf]  ;;  %v1049_v16 = vadd.f32 %v8868_v26, %v1016_v58  ;;  %v6571_v58 = vld [vmem:[#allocation12 + $0xe0] sm:$0xf] }
 0x2e3   :  { %2408 = vmatpush.bf16.msra.mxu0 %v6380_v45 }
 0x2e4   :  { %2445 = vmatpush.bf16.msra.mxu3 %v6424_v47  ;;  %v6372_v47 = vor.u32 %v7700_v43, %v6371_v50  ;;  %2422 = vmatpush.bf16.msra.mxu1 %v6368_v31  ;;  %v917_v57 = vadd.f32 %v8796_v59, %v884_v33  ;;  %v7690_v50 = vld [vmem:[#allocation12 + $0xc] sm:$0xf]  ;;  %v6341_v43 = vld [vmem:[#allocation12 + $0x18] sm:$0xf0]  ;;  %v950_v33 = vadd.f32 %v8859_v55, %v8836_v34 }
 0x2e5   :  { %v6344_v9 = vor.u32 %v7690_v50, %v6341_v43  ;;  %v6581_v50 = vld [vmem:[#allocation12 + $0xf8] sm:$0xf0] }
 0x2e6   :  { %2434 = vmatpush.bf16.msra.mxu2 %v6388_v52  ;;  %v7691_v52 = vld [vmem:[#allocation12 + $0xc] sm:$0xf0]  ;;  %v983_v25 = vadd.f32 %v8863_v11, %v950_v33 }
 0x2e7   :  { %2409 = vmatpush.bf16.msra.mxu0 %v6364_v10  ;;  %v6332_v59 = vor.u32 %v7691_v52, %v6331_v42  ;;  %v6336_v10 = vor.u32 %v7689_v17, %v6333_v27  ;;  %v7749_v27 = vld [vmem:[#allocation12 + $0xe4] sm:$0xf]  ;;  %v7747_v33 = vld [vmem:[#allocation12 + $0xcc] sm:$0xf0] }
 0x2e8   :  { %2446 = vmatpush.bf16.msra.mxu3 %v6408_v41  ;;  %v6356_v41 = vor.u32 %v7696_v56, %v6355_v60  ;;  %2423 = vmatpush.bf16.msra.mxu1 %v6352_v12 }
 0x2ea   :  { %2435 = vmatpush.bf16.msra.mxu2 %v6372_v47 }
 0x2eb   :  { %2410 = vmatpush.bf16.msra.mxu0 %v6348_v48 }
 0x2ec   :  { %2447 = vmatpush.bf16.msra.mxu3 %v6392_v63  ;;  %v6339_v63 = vld [vmem:[#allocation12 + $0x8] sm:$0xf]  ;;  %2424 = vmatpush.bf16.msra.mxu1 %v6336_v10 }
 0x2ed   :  { %v6340_v46 = vor.u32 %v7692_v18, %v6339_v63  ;;  %v6573_v63 = vld [vmem:[#allocation12 + $0xf0] sm:$0xf0]  ;;  %v6579_v18 = vld [vmem:[#allocation12 + $0xe8] sm:$0xf] }
 0x2ee   :  { %2436 = vmatpush.bf16.msra.mxu2 %v6356_v41 }
 0x2ef   :  { %2411 = vmatpush.bf16.msra.mxu0 %v6332_v59  ;;  %v7751_v59 = vld [vmem:[#allocation12 + $0xec] sm:$0xf0] }
 0x2f0   :  { %2448 = vmatpush.bf16.msra.mxu3 %v6376_v23 }
 0x2f2   :  { %2437 = vmatpush.bf16.msra.mxu2 %v6340_v46  ;;  %v7750_v46 = vld [vmem:[#allocation12 + $0xec] sm:$0xf] }
 0x2f3   :  { %v6584_v43 = vor.u32 %v7750_v46, %v6581_v50  ;;  %v6509_v50 = vld [vmem:[#allocation12 + $0x70] sm:$0xf0] }
 0x2f4   :  { %2449 = vmatpush.bf16.msra.mxu3 %v6360_v22 }
 0x2f8   :  { %2450 = vmatpush.bf16.msra.mxu3 %v6344_v9  ;;  %v6555_v9 = vld [vmem:[#allocation12 + $0xc0] sm:$0xf] }
 0x2fc   :  { %2720 = vmatpush.bf16.msrb.mxu3 %v6584_v43  ;;  %v6515_v43 = vld [vmem:[#allocation12 + $0x68] sm:$0xf] }
 0x35d   :  { %v2136_v61 = vpop.f32.mrf.mxu0  ;;  %v2149_v45 = vpop.f32.mrf.mxu1 }
 0x35e   :  { %v2179_v29 = vadd.f32 %v2136_v61, %v851_v7  ;;  %v2180_v30 = vadd.f32 %v2149_v45, %v917_v57 }
 0x360   :  { %v2183_v24 = vsub.f32 0.0, %v2179_v29  ;;  %v2188_v51 = vsub.f32 0.0, %v2180_v30 }
 0x362   :  { %v2184_v31 = vmul.f32 1.442695, %v2183_v24  ;;  %v2189_v47 = vmul.f32 1.442695, %v2188_v51  ;;  %v7752_v24 = vld [vmem:[#allocation12 + $0xf4] sm:$0xf0]  ;;  %v6576_v51 = vor.u32 %v7749_v27, %v6573_v63 }
 0x363   :  { %v6580_v10 = vor.u32 %v7752_v24, %v6579_v18  ;;  %v6533_v63 = vld [vmem:[#allocation12 + $0x98] sm:$0xf0]  ;;  %v6507_v24 = vld [vmem:[#allocation12 + $0x60] sm:$0xf] }
 0x364   :  { %8039 = vpow2.f32 %v2184_v31  ;;  %v2162_v14 = vpop.f32.mrf.mxu2  ;;  %v2175_v13 = vpop.f32.mrf.mxu3  ;;  %2694 = vmatpush.bf16.msrb.mxu1 %v6576_v51  ;;  %v7745_v31 = vld [vmem:[#allocation12 + $0xc4] sm:$0xf]  ;;  %v7735_v51 = vld [vmem:[#allocation12 + $0x6c] sm:$0xf0] }
 0x365   :  { %8041 = vpow2.f32 %v2189_v47  ;;  %v2182_v23 = vadd.f32 %v2175_v13, %v1049_v16  ;;  %v2138_v15 = vpop.f32.mrf.mxu0  ;;  %v2151_v2 = vpop.f32.mrf.mxu1  ;;  %v2181_v53 = vadd.f32 %v2162_v14, %v983_v25  ;;  %2707 = vmatpush.bf16.msrb.mxu2 %v6580_v10  ;;  %v6556_v47 = vor.u32 %v7747_v33, %v6555_v9  ;;  %v6557_v16 = vld [vmem:[#allocation12 + $0xd0] sm:$0xf0]  ;;  %v6563_v14 = vld [vmem:[#allocation12 + $0xc8] sm:$0xf]  ;;  %v7748_v13 = vld [vmem:[#allocation12 + $0xd4] sm:$0xf0] }
 0x366   :  { %v6564_v15 = vor.u32 %v7748_v13, %v6563_v14  ;;  %v7746_v2 = vld [vmem:[#allocation12 + $0xcc] sm:$0xf]  ;;  %v6565_v25 = vld [vmem:[#allocation12 + $0xd8] sm:$0xf0]  ;;  %v7733_v10 = vld [vmem:[#allocation12 + $0x64] sm:$0xf]  ;;  %v6508_v46 = vor.u32 %v7735_v51, %v6507_v24 }
 0x367   :  { %v2194_v48 = vsub.f32 0.0, %v2182_v23  ;;  %v6560_v23 = vor.u32 %v7745_v31, %v6557_v16  ;;  %v7736_v9 = vld [vmem:[#allocation12 + $0x74] sm:$0xf0]  ;;  %v6512_v33 = vor.u32 %v7733_v10, %v6509_v50  ;;  %v6517_v16 = vld [vmem:[#allocation12 + $0x78] sm:$0xf0] }
 0x368   :  { %v6516_v31 = vor.u32 %v7736_v9, %v6515_v43  ;;  %v6491_v13 = vld [vmem:[#allocation12 + $0x40] sm:$0xf]  ;;  %v7721_v24 = vld [vmem:[#allocation12 + $0x4] sm:$0xf]  ;;  %v6461_v10 = vld [vmem:[#allocation12 + $0x10] sm:$0xf0] }
 0x369   :  { %v2195_v60 = vmul.f32 1.442695, %v2194_v48  ;;  %v6568_v48 = vor.u32 %v7746_v2, %v6565_v25  ;;  %2695 = vmatpush.bf16.msrb.mxu1 %v6560_v23  ;;  %2708 = vmatpush.bf16.msrb.mxu2 %v6564_v15  ;;  %v7731_v23 = vld [vmem:[#allocation12 + $0x4c] sm:$0xf0]  ;;  %v7729_v15 = vld [vmem:[#allocation12 + $0x44] sm:$0xf] }
 0x36a   :  { %v8040_v55 = vpop.eup %8039  ;;  %v6492_v2 = vor.u32 %v7731_v23, %v6491_v13  ;;  %v6493_v25 = vld [vmem:[#allocation12 + $0x50] sm:$0xf0]  ;;  %v7724_v50 = vld [vmem:[#allocation12 + $0x14] sm:$0xf0] }
 0x36b   :  { %v8042_v56 = vpop.eup %8041  ;;  %v2186_v7 = vadd.f32 1.0, %v8040_v55  ;;  %8043 = vpow2.f32 %v2195_v60  ;;  %v7743_v60 = vld [vmem:[#allocation12 + $0xac] sm:$0xf0]  ;;  %v7741_v55 = vld [vmem:[#allocation12 + $0xa4] sm:$0xf]  ;;  %2721 = vmatpush.bf16.msrb.mxu3 %v6568_v48 }
 0x36c   :  { %v2191_v57 = vadd.f32 1.0, %v8042_v56  ;;  %8045 = vtanh.f32 %v2181_v53  ;;  %v2164_v26 = vpop.f32.mrf.mxu2  ;;  %v2177_v12 = vpop.f32.mrf.mxu3  ;;  %v6539_v53 = vld [vmem:[#allocation12 + $0xa0] sm:$0xf]  ;;  %v6499_v48 = vld [vmem:[#allocation12 + $0x48] sm:$0xf] }
 0x36d   :  { %8047 = vrcp.f32 %v2186_v7  ;;  %v6540_v56 = vor.u32 %v7743_v60, %v6539_v53  ;;  %v6541_v7 = vld [vmem:[#allocation12 + $0xb0] sm:$0xf0]  ;;  %v7744_v26 = vld [vmem:[#allocation12 + $0xb4] sm:$0xf0]  ;;  %v6496_v60 = vor.u32 %v7729_v15, %v6493_v25 }
 0x36e   :  { %8049 = vrcp.f32 %v2191_v57  ;;  %v6547_v57 = vld [vmem:[#allocation12 + $0xa8] sm:$0xf]  ;;  %v6544_v12 = vor.u32 %v7741_v55, %v6541_v7  ;;  %v7732_v53 = vld [vmem:[#allocation12 + $0x54] sm:$0xf0]  ;;  %v6501_v7 = vld [vmem:[#allocation12 + $0x58] sm:$0xf0] }
 0x36f   :  { %v6500_v55 = vor.u32 %v7732_v53, %v6499_v48 }
 0x370   :  { %2696 = vmatpush.bf16.msrb.mxu1 %v6544_v12  ;;  %v7727_v12 = vld [vmem:[#allocation12 + $0x2c] sm:$0xf0] }
 0x371   :  { %v8044_v41 = vpop.eup %8043 }
 0x372   :  { %v8046_v44 = vpop.eup %8045  ;;  %v2197_v22 = vadd.f32 1.0, %v8044_v41  ;;  %v6548_v41 = vor.u32 %v7744_v26, %v6547_v57  ;;  %v6475_v26 = vld [vmem:[#allocation12 + $0x20] sm:$0xf] }
 0x373   :  { %v8048_v19 = vpop.eup %8047 }
 0x374   :  { %v8050_v61 = vpop.eup %8049  ;;  %v2200_v45 = vmul.f32 %v8048_v19, %v8046_v44  ;;  %8051 = vrcp.f32 %v2197_v22  ;;  %v7742_v44 = vld [vmem:[#allocation12 + $0xac] sm:$0xf]  ;;  %v6549_v19 = vld [vmem:[#allocation12 + $0xb8] sm:$0xf0]  ;;  %2709 = vmatpush.bf16.msrb.mxu2 %v6548_v41  ;;  %v7739_v22 = vld [vmem:[#allocation12 + $0x8c] sm:$0xf0] }
 0x375   :  { %v2199_v11 = vmul.f32 %v8050_v61, %v8939_v1  ;;  %v6572_v1 = vor.u32 %v7751_v59, %v6571_v58  ;;  %v6552_v61 = vor.u32 %v7742_v44, %v6549_v19  ;;  %v7740_v58 = vld [vmem:[#allocation12 + $0x94] sm:$0xf0]  ;;  %v7725_v41 = vld [vmem:[#allocation12 + $0x24] sm:$0xf]  ;;  %v6476_v44 = vor.u32 %v7727_v12, %v6475_v26  ;;  %v6477_v19 = vld [vmem:[#allocation12 + $0x30] sm:$0xf0] }
 0x377   :  { %v8959_v29 = vadd.f32 %v2200_v45, %v2199_v11  ;;  %2681 = vmatpush.bf16.msrb.mxu0 %v6572_v1  ;;  %v6523_v45 = vld [vmem:[#allocation12 + $0x80] sm:$0xf]  ;;  %v7737_v11 = vld [vmem:[#allocation12 + $0x84] sm:$0xf]  ;;  %2722 = vmatpush.bf16.msrb.mxu3 %v6552_v61  ;;  %v7738_v1 = vld [vmem:[#allocation12 + $0x8c] sm:$0xf] }
 0x378   :  { %v6536_v18 = vor.u32 %v7738_v1, %v6533_v63  ;;  %v6483_v61 = vld [vmem:[#allocation12 + $0x28] sm:$0xf]  ;;  %v6459_v63 = vld [vmem:[#allocation12] sm:$0xf] }
 0x379   :  { %8053 = vtanh.f32 %v8959_v29 }
 0x37a   :  { %v8052_v30 = vpop.eup %8051 }
 0x37b   :  { %2682 = vmatpush.bf16.msrb.mxu0 %v6556_v47  ;;  %2723 = vmatpush.bf16.msrb.mxu3 %v6536_v18  ;;  %v7734_v47 = vld [vmem:[#allocation12 + $0x6c] sm:$0xf]  ;;  %v7723_v18 = vld [vmem:[#allocation12 + $0xc] sm:$0xf0] }
 0x37c   :  { %v6520_v14 = vor.u32 %v7734_v47, %v6517_v16  ;;  %v6460_v51 = vor.u32 %v7723_v18, %v6459_v63  ;;  %v7722_v47 = vld [vmem:[#allocation12 + $0xc] sm:$0xf]  ;;  %v6469_v16 = vld [vmem:[#allocation12 + $0x18] sm:$0xf0]  ;;  %v6707_v63 = vld [vmem:[#allocation12 + $0xe8] sm:$0xf] }
 0x37d   :  { %v7784_v18 = vld [vmem:[#allocation12 + $0xf4] sm:$0xf0] }
 0x37f   :  { %v8054_v42 = vpop.eup %8053  ;;  %2683 = vmatpush.bf16.msrb.mxu0 %v6540_v56  ;;  %2724 = vmatpush.bf16.msrb.mxu3 %v6520_v14  ;;  %v7730_v56 = vld [vmem:[#allocation12 + $0x4c] sm:$0xf] }
 0x380   :  { %v8962_v52 = vmul.f32 %v8054_v42, %v8052_v30  ;;  %v6524_v30 = vor.u32 %v7739_v22, %v6523_v45  ;;  %v6525_v42 = vld [vmem:[#allocation12 + $0x90] sm:$0xf0]  ;;  %v6504_v57 = vor.u32 %v7730_v56, %v6501_v7  ;;  %v7728_v45 = vld [vmem:[#allocation12 + $0x34] sm:$0xf0]  ;;  %v6480_v22 = vor.u32 %v7725_v41, %v6477_v19 }
 0x381   :  { %v6528_v59 = vor.u32 %v7737_v11, %v6525_v42  ;;  %v6484_v11 = vor.u32 %v7728_v45, %v6483_v61  ;;  %v6485_v42 = vld [vmem:[#allocation12 + $0x38] sm:$0xf0] }
 0x382   :  { %v2211_v17 = vpack.c.bf16 %v8962_v52, %v8962_v52 }
 0x383   :  { %2684 = vmatpush.bf16.msrb.mxu0 %v6524_v30  ;;  %2697 = vmatpush.bf16.msrb.mxu1 %v6528_v59  ;;  %v7726_v30 = vld [vmem:[#allocation12 + $0x2c] sm:$0xf] }
 0x384   :  { %2412 = vmatmul.bf16.vlgmr.msra.gmra.mxu0 %v2211_v17  ;;  %2425 = vmatmul.bf16.vlgmr.msra.gmra.mxu1 %v2211_v17  ;;  %v6488_v59 = vor.u32 %v7726_v30, %v6485_v42 }
 0x385   :  { %2438 = vmatmul.bf16.vlgmr.msra.gmra.mxu2 %v2211_v17  ;;  %2451 = vmatmul.bf16.vlgmr.msra.gmra.mxu3 %v2211_v17  ;;  %v6531_v17 = vld [vmem:[#allocation12 + $0x88] sm:$0xf] }
 0x386   :  { %v6532_v27 = vor.u32 %v7740_v58, %v6531_v17  ;;  %2725 = vmatpush.bf16.msrb.mxu3 %v6504_v57 }
 0x387   :  { %2685 = vmatpush.bf16.msrb.mxu0 %v6508_v46  ;;  %2698 = vmatpush.bf16.msrb.mxu1 %v6512_v33  ;;  %v6467_v46 = vld [vmem:[#allocation12 + $0x8] sm:$0xf]  ;;  %v6464_v33 = vor.u32 %v7721_v24, %v6461_v10  ;;  %v7782_v10 = vld [vmem:[#allocation12 + $0xec] sm:$0xf] }
 0x388   :  { %2710 = vmatpush.bf16.msrb.mxu2 %v6532_v27 }
 0x38a   :  { %2726 = vmatpush.bf16.msrb.mxu3 %v6488_v59  ;;  %v7783_v59 = vld [vmem:[#allocation12 + $0xec] sm:$0xf0] }
 0x38b   :  { %2686 = vmatpush.bf16.msrb.mxu0 %v6492_v2  ;;  %2699 = vmatpush.bf16.msrb.mxu1 %v6496_v60 }
 0x38c   :  { %2711 = vmatpush.bf16.msrb.mxu2 %v6516_v31  ;;  %v6468_v31 = vor.u32 %v7724_v50, %v6467_v46  ;;  %v6709_v46 = vld [vmem:[#allocation12 + $0xf8] sm:$0xf0] }
 0x38d   :  { %v6712_v50 = vor.u32 %v7782_v10, %v6709_v46  ;;  %v7768_v10 = vld [vmem:[#allocation12 + $0x74] sm:$0xf0] }
 0x38f   :  { %2687 = vmatpush.bf16.msrb.mxu0 %v6476_v44  ;;  %2700 = vmatpush.bf16.msrb.mxu1 %v6480_v22 }
 0x390   :  { %2712 = vmatpush.bf16.msrb.mxu2 %v6500_v55 }
 0x393   :  { %2688 = vmatpush.bf16.msrb.mxu0 %v6460_v51  ;;  %2701 = vmatpush.bf16.msrb.mxu1 %v6464_v33  ;;  %v6708_v51 = vor.u32 %v7784_v18, %v6707_v63  ;;  %v7777_v33 = vld [vmem:[#allocation12 + $0xc4] sm:$0xf] }
 0x394   :  { %2713 = vmatpush.bf16.msrb.mxu2 %v6484_v11  ;;  %v7765_v63 = vld [vmem:[#allocation12 + $0x64] sm:$0xf] }
 0x398   :  { %2714 = vmatpush.bf16.msrb.mxu2 %v6468_v31 }
 0x39c   :  { %2984 = vmatpush.bf16.msra.mxu2 %v6708_v51  ;;  %v6643_v51 = vld [vmem:[#allocation12 + $0x68] sm:$0xf] }
 0x401   :  { %v2413_v17 = vpop.f32.mrf.mxu0  ;;  %v2426_v58 = vpop.f32.mrf.mxu1 }
 0x402   :  { %v2456_v27 = vadd.f32 %v2413_v17, %v8800_v62  ;;  %v2457_v1 = vadd.f32 %v2426_v58, %v8807_v3  ;;  %v6472_v62 = vor.u32 %v7722_v47, %v6469_v16  ;;  %v6699_v58 = vld [vmem:[#allocation12 + $0xe0] sm:$0xf]  ;;  %v6685_v47 = vld [vmem:[#allocation12 + $0xd0] sm:$0xf0]  ;;  %v6691_v16 = vld [vmem:[#allocation12 + $0xc8] sm:$0xf] }
 0x404   :  { %v2460_v43 = vsub.f32 0.0, %v2456_v27  ;;  %v2465_v9 = vsub.f32 0.0, %v2457_v1  ;;  %2727 = vmatpush.bf16.msrb.mxu3 %v6472_v62  ;;  %v7781_v27 = vld [vmem:[#allocation12 + $0xe4] sm:$0xf]  ;;  %v6701_v1 = vld [vmem:[#allocation12 + $0xf0] sm:$0xf0] }
 0x405   :  { %v6704_v24 = vor.u32 %v7781_v27, %v6701_v1  ;;  %v7780_v62 = vld [vmem:[#allocation12 + $0xd4] sm:$0xf0]  ;;  %v7767_v1 = vld [vmem:[#allocation12 + $0x6c] sm:$0xf0] }
 0x406   :  { %v2461_v14 = vmul.f32 1.442695, %v2460_v43  ;;  %v2466_v3 = vmul.f32 1.442695, %v2465_v9  ;;  %v6683_v43 = vld [vmem:[#allocation12 + $0xc0] sm:$0xf] }
 0x407   :  { %2971 = vmatpush.bf16.msra.mxu1 %v6704_v24  ;;  %v7779_v9 = vld [vmem:[#allocation12 + $0xcc] sm:$0xf0]  ;;  %v6637_v24 = vld [vmem:[#allocation12 + $0x70] sm:$0xf0] }
 0x408   :  { %8055 = vpow2.f32 %v2461_v14  ;;  %v2439_v13 = vpop.f32.mrf.mxu2  ;;  %v2452_v23 = vpop.f32.mrf.mxu3  ;;  %2997 = vmatpush.bf16.msra.mxu3 %v6712_v50  ;;  %v6684_v31 = vor.u32 %v7779_v9, %v6683_v43  ;;  %v6688_v14 = vor.u32 %v7777_v33, %v6685_v47  ;;  %v6640_v46 = vor.u32 %v7765_v63, %v6637_v24  ;;  %v7766_v43 = vld [vmem:[#allocation12 + $0x6c] sm:$0xf]  ;;  %v6645_v9 = vld [vmem:[#allocation12 + $0x78] sm:$0xf0]  ;;  %v7763_v47 = vld [vmem:[#allocation12 + $0x4c] sm:$0xf0] }
 0x409   :  { %8057 = vpow2.f32 %v2466_v3  ;;  %v2459_v15 = vadd.f32 %v2452_v23, %v8875_v35  ;;  %v2415_v2 = vpop.f32.mrf.mxu0  ;;  %v2428_v25 = vpop.f32.mrf.mxu1  ;;  %v2458_v53 = vadd.f32 %v2439_v13, %v8870_v28  ;;  %v6692_v3 = vor.u32 %v7780_v62, %v6691_v16  ;;  %v7778_v13 = vld [vmem:[#allocation12 + $0xcc] sm:$0xf]  ;;  %v6693_v23 = vld [vmem:[#allocation12 + $0xd8] sm:$0xf0]  ;;  %v7761_v16 = vld [vmem:[#allocation12 + $0x44] sm:$0xf] }
 0x40a   :  { %v6667_v2 = vld [vmem:[#allocation12 + $0xa0] sm:$0xf]  ;;  %v7775_v25 = vld [vmem:[#allocation12 + $0xac] sm:$0xf0]  ;;  %v6644_v50 = vor.u32 %v7768_v10, %v6643_v51  ;;  %v6648_v33 = vor.u32 %v7766_v43, %v6645_v9  ;;  %v7756_v63 = vld [vmem:[#allocation12 + $0x14] sm:$0xf0]  ;;  %v955_v9 = vadd.f32 %v8873_v32, %v8836_v34 }
 0x40b   :  { %v2471_v48 = vsub.f32 0.0, %v2459_v15  ;;  %v6696_v15 = vor.u32 %v7778_v13, %v6693_v23  ;;  %2972 = vmatpush.bf16.msra.mxu1 %v6688_v14  ;;  %2985 = vmatpush.bf16.msra.mxu2 %v6692_v3  ;;  %v6621_v14 = vld [vmem:[#allocation12 + $0x50] sm:$0xf0]  ;;  %v6627_v3 = vld [vmem:[#allocation12 + $0x48] sm:$0xf]  ;;  %v823_v23 = vadd.f32 %v8805_v40, %v8756_v20 }
 0x40c   :  { %v7764_v13 = vld [vmem:[#allocation12 + $0x54] sm:$0xf0] }
 0x40d   :  { %v2472_v60 = vmul.f32 1.442695, %v2471_v48  ;;  %v7773_v48 = vld [vmem:[#allocation12 + $0xa4] sm:$0xf]  ;;  %2998 = vmatpush.bf16.msra.mxu3 %v6696_v15  ;;  %v889_v15 = vadd.f32 %v8811_v5, %v8762_v37  ;;  %v856_v40 = vadd.f32 %v8809_v4, %v823_v23  ;;  %v1021_v4 = vadd.f32 %v8879_v38, %v8840_v39 }
 0x40e   :  { %v8056_v55 = vpop.eup %8055 }
 0x40f   :  { %v8058_v56 = vpop.eup %8057  ;;  %v2463_v7 = vadd.f32 1.0, %v8056_v55  ;;  %8059 = vpow2.f32 %v2472_v60  ;;  %v6669_v60 = vld [vmem:[#allocation12 + $0xb0] sm:$0xf0]  ;;  %v6675_v55 = vld [vmem:[#allocation12 + $0xa8] sm:$0xf]  ;;  %v922_v5 = vadd.f32 %v8814_v8, %v889_v15  ;;  %v1054_v38 = vadd.f32 %v8882_v49, %v1021_v4 }
 0x410   :  { %v2468_v57 = vadd.f32 1.0, %v8058_v56  ;;  %8061 = vtanh.f32 %v2458_v53  ;;  %v2441_v26 = vpop.f32.mrf.mxu2  ;;  %v2454_v12 = vpop.f32.mrf.mxu3  ;;  %v6668_v53 = vor.u32 %v7775_v25, %v6667_v2  ;;  %v7776_v56 = vld [vmem:[#allocation12 + $0xb4] sm:$0xf0]  ;;  %v6624_v2 = vor.u32 %v7761_v16, %v6621_v14 }
 0x411   :  { %8063 = vrcp.f32 %v2463_v7  ;;  %v6672_v7 = vor.u32 %v7773_v48, %v6669_v60  ;;  %v7774_v26 = vld [vmem:[#allocation12 + $0xac] sm:$0xf]  ;;  %v6677_v12 = vld [vmem:[#allocation12 + $0xb8] sm:$0xf0]  ;;  %v6628_v25 = vor.u32 %v7764_v13, %v6627_v3  ;;  %v988_v13 = vadd.f32 %v8877_v36, %v955_v9 }
 0x412   :  { %8065 = vrcp.f32 %v2468_v57  ;;  %v6676_v57 = vor.u32 %v7776_v56, %v6675_v55  ;;  %v7762_v48 = vld [vmem:[#allocation12 + $0x4c] sm:$0xf]  ;;  %v6603_v55 = vld [vmem:[#allocation12 + $0x20] sm:$0xf]  ;;  %v7759_v56 = vld [vmem:[#allocation12 + $0x2c] sm:$0xf0] }
 0x413   :  { %2973 = vmatpush.bf16.msra.mxu1 %v6672_v7  ;;  %v7757_v7 = vld [vmem:[#allocation12 + $0x24] sm:$0xf] }
 0x414   :  { %2986 = vmatpush.bf16.msra.mxu2 %v6676_v57  ;;  %v6604_v57 = vor.u32 %v7759_v56, %v6603_v55 }
 0x415   :  { %v8060_v41 = vpop.eup %8059 }
 0x416   :  { %v8062_v44 = vpop.eup %8061  ;;  %v2474_v45 = vadd.f32 1.0, %v8060_v41  ;;  %v6680_v41 = vor.u32 %v7774_v26, %v6677_v12  ;;  %v6605_v26 = vld [vmem:[#allocation12 + $0x30] sm:$0xf0]  ;;  %v6611_v12 = vld [vmem:[#allocation12 + $0x28] sm:$0xf] }
 0x417   :  { %v8064_v19 = vpop.eup %8063 }
 0x418   :  { %v8066_v35 = vpop.eup %8065  ;;  %v2477_v61 = vmul.f32 %v8064_v19, %v8062_v44  ;;  %8067 = vrcp.f32 %v2474_v45  ;;  %v6651_v44 = vld [vmem:[#allocation12 + $0x80] sm:$0xf]  ;;  %v7771_v19 = vld [vmem:[#allocation12 + $0x8c] sm:$0xf0]  ;;  %2999 = vmatpush.bf16.msra.mxu3 %v6680_v41  ;;  %v6653_v45 = vld [vmem:[#allocation12 + $0x90] sm:$0xf0] }
 0x419   :  { %v2476_v22 = vmul.f32 %v8066_v35, %v8959_v29  ;;  %v6700_v29 = vor.u32 %v7783_v59, %v6699_v58  ;;  %v7769_v35 = vld [vmem:[#allocation12 + $0x84] sm:$0xf]  ;;  %v7770_v58 = vld [vmem:[#allocation12 + $0x8c] sm:$0xf]  ;;  %v6661_v59 = vld [vmem:[#allocation12 + $0x98] sm:$0xf0] }
 0x41a   :  { %v6664_v27 = vor.u32 %v7770_v58, %v6661_v59  ;;  %v7760_v41 = vld [vmem:[#allocation12 + $0x34] sm:$0xf0]  ;;  %v6587_v58 = vld [vmem:[#allocation12] sm:$0xf]  ;;  %v7755_v59 = vld [vmem:[#allocation12 + $0xc] sm:$0xf0] }
 0x41b   :  { %v8971_v28 = vadd.f32 %v2477_v61, %v2476_v22  ;;  %2958 = vmatpush.bf16.msra.mxu0 %v6700_v29  ;;  %v6652_v61 = vor.u32 %v7771_v19, %v6651_v44  ;;  %v6659_v22 = vld [vmem:[#allocation12 + $0x88] sm:$0xf]  ;;  %v6635_v29 = vld [vmem:[#allocation12 + $0x60] sm:$0xf]  ;;  %v6608_v44 = vor.u32 %v7757_v7, %v6605_v26  ;;  %v6612_v19 = vor.u32 %v7760_v41, %v6611_v12 }
 0x41c   :  { %3000 = vmatpush.bf16.msra.mxu3 %v6664_v27  ;;  %v6636_v18 = vor.u32 %v7767_v1, %v6635_v29  ;;  %v7753_v27 = vld [vmem:[#allocation12 + $0x4] sm:$0xf]  ;;  %v6588_v8 = vor.u32 %v7755_v59, %v6587_v58  ;;  %v6589_v29 = vld [vmem:[#allocation12 + $0x10] sm:$0xf0]  ;;  %v6595_v1 = vld [vmem:[#allocation12 + $0x8] sm:$0xf] }
 0x41d   :  { %8069 = vtanh.f32 %v8971_v28  ;;  %v6592_v51 = vor.u32 %v7753_v27, %v6589_v29  ;;  %v6596_v10 = vor.u32 %v7756_v63, %v6595_v1  ;;  %v7814_v59 = vld [vmem:[#allocation12 + $0xec] sm:$0xf]  ;;  %v6837_v27 = vld [vmem:[#allocation12 + $0xf8] sm:$0xf0]  ;;  %v7811_v29 = vld [vmem:[#allocation12 + $0xcc] sm:$0xf0] }
 0x41e   :  { %v8068_v11 = vpop.eup %8067  ;;  %v6840_v4 = vor.u32 %v7814_v59, %v6837_v27  ;;  %v7809_v1 = vld [vmem:[#allocation12 + $0xc4] sm:$0xf]  ;;  %v7795_v59 = vld [vmem:[#allocation12 + $0x4c] sm:$0xf0] }
 0x41f   :  { %2959 = vmatpush.bf16.msra.mxu0 %v6684_v31  ;;  %v6619_v31 = vld [vmem:[#allocation12 + $0x40] sm:$0xf]  ;;  %v7793_v27 = vld [vmem:[#allocation12 + $0x44] sm:$0xf] }
 0x420   :  { %3001 = vmatpush.bf16.msra.mxu3 %v6648_v33  ;;  %v6620_v62 = vor.u32 %v7763_v47, %v6619_v31 }
 0x423   :  { %v8070_v30 = vpop.eup %8069  ;;  %2960 = vmatpush.bf16.msra.mxu0 %v6668_v53  ;;  %v6629_v53 = vld [vmem:[#allocation12 + $0x58] sm:$0xf0] }
 0x424   :  { %v8974_v42 = vmul.f32 %v8070_v30, %v8068_v11  ;;  %v7772_v11 = vld [vmem:[#allocation12 + $0x94] sm:$0xf0]  ;;  %v6656_v30 = vor.u32 %v7769_v35, %v6653_v45  ;;  %v6632_v60 = vor.u32 %v7762_v48, %v6629_v53  ;;  %v7758_v35 = vld [vmem:[#allocation12 + $0x2c] sm:$0xf] }
 0x426   :  { %v2488_v17 = vpack.c.bf16 %v8974_v42, %v8974_v42  ;;  %2974 = vmatpush.bf16.msra.mxu1 %v6656_v30  ;;  %3002 = vmatpush.bf16.msra.mxu3 %v6632_v60 }
 0x427   :  { %2961 = vmatpush.bf16.msra.mxu0 %v6652_v61  ;;  %v6613_v61 = vld [vmem:[#allocation12 + $0x38] sm:$0xf0] }
 0x428   :  { %2689 = vmatmul.bf16.vlgmr.msrb.gmra.mxu0 %v2488_v17  ;;  %2702 = vmatmul.bf16.vlgmr.msrb.gmra.mxu1 %v2488_v17 }
 0x429   :  { %2715 = vmatmul.bf16.vlgmr.msrb.gmra.mxu2 %v2488_v17  ;;  %2728 = vmatmul.bf16.vlgmr.msrb.gmra.mxu3 %v2488_v17  ;;  %v6660_v17 = vor.u32 %v7772_v11, %v6659_v22  ;;  %v6616_v11 = vor.u32 %v7758_v35, %v6613_v61  ;;  %v6827_v35 = vld [vmem:[#allocation12 + $0xe0] sm:$0xf]  ;;  %v7815_v61 = vld [vmem:[#allocation12 + $0xec] sm:$0xf0] }
 0x42a   :  { %2975 = vmatpush.bf16.msra.mxu1 %v6640_v46  ;;  %v7754_v46 = vld [vmem:[#allocation12 + $0xc] sm:$0xf] }
 0x42b   :  { %2987 = vmatpush.bf16.msra.mxu2 %v6660_v17  ;;  %2962 = vmatpush.bf16.msra.mxu0 %v6636_v18 }
 0x42c   :  { %3003 = vmatpush.bf16.msra.mxu3 %v6616_v11  ;;  %v6835_v11 = vld [vmem:[#allocation12 + $0xe8] sm:$0xf] }
 0x42e   :  { %2976 = vmatpush.bf16.msra.mxu1 %v6624_v2 }
 0x42f   :  { %2988 = vmatpush.bf16.msra.mxu2 %v6644_v50  ;;  %2963 = vmatpush.bf16.msra.mxu0 %v6620_v62  ;;  %v6597_v50 = vld [vmem:[#allocation12 + $0x18] sm:$0xf0] }
 0x430   :  { %v6600_v43 = vor.u32 %v7754_v46, %v6597_v50  ;;  %v7810_v50 = vld [vmem:[#allocation12 + $0xcc] sm:$0xf] }
 0x432   :  { %2977 = vmatpush.bf16.msra.mxu1 %v6608_v44  ;;  %3004 = vmatpush.bf16.msra.mxu3 %v6600_v43  ;;  %v6821_v43 = vld [vmem:[#allocation12 + $0xd8] sm:$0xf0] }
 0x433   :  { %2989 = vmatpush.bf16.msra.mxu2 %v6628_v25  ;;  %2964 = vmatpush.bf16.msra.mxu0 %v6604_v57  ;;  %v6824_v9 = vor.u32 %v7810_v50, %v6821_v43  ;;  %v7791_v50 = vld [vmem:[#allocation12 + $0x2c] sm:$0xf0]  ;;  %v7789_v43 = vld [vmem:[#allocation12 + $0x24] sm:$0xf] }
 0x436   :  { %2978 = vmatpush.bf16.msra.mxu1 %v6592_v51  ;;  %3274 = vmatpush.bf16.msrb.mxu3 %v6840_v4  ;;  %v7812_v51 = vld [vmem:[#allocation12 + $0xd4] sm:$0xf0] }
 0x437   :  { %2990 = vmatpush.bf16.msra.mxu2 %v6612_v19  ;;  %2965 = vmatpush.bf16.msra.mxu0 %v6588_v8  ;;  %v6811_v8 = vld [vmem:[#allocation12 + $0xc0] sm:$0xf] }
 0x438   :  { %v6812_v63 = vor.u32 %v7811_v29, %v6811_v8  ;;  %v6749_v8 = vld [vmem:[#allocation12 + $0x50] sm:$0xf0]  ;;  %v6755_v29 = vld [vmem:[#allocation12 + $0x48] sm:$0xf] }
 0x43a   :  { %3275 = vmatpush.bf16.msrb.mxu3 %v6824_v9 }
 0x43b   :  { %2991 = vmatpush.bf16.msra.mxu2 %v6596_v10 }
 0x4a5   :  { %v2690_v45 = vpop.f32.mrf.mxu0  ;;  %v2703_v22 = vpop.f32.mrf.mxu1 }
 0x4a6   :  { %v2733_v30 = vadd.f32 %v2690_v45, %v856_v40  ;;  %v2734_v17 = vadd.f32 %v2703_v22, %v922_v5  ;;  %v7813_v45 = vld [vmem:[#allocation12 + $0xe4] sm:$0xf]  ;;  %v6829_v22 = vld [vmem:[#allocation12 + $0xf0] sm:$0xf0] }
 0x4a8   :  { %v2737_v18 = vsub.f32 0.0, %v2733_v30  ;;  %v2742_v24 = vsub.f32 0.0, %v2734_v17  ;;  %v7816_v30 = vld [vmem:[#allocation12 + $0xf4] sm:$0xf0]  ;;  %v6832_v17 = vor.u32 %v7813_v45, %v6829_v22 }
 0x4a9   :  { %v6836_v58 = vor.u32 %v7816_v30, %v6835_v11  ;;  %v7800_v45 = vld [vmem:[#allocation12 + $0x74] sm:$0xf0]  ;;  %v7798_v11 = vld [vmem:[#allocation12 + $0x6c] sm:$0xf]  ;;  %v6773_v30 = vld [vmem:[#allocation12 + $0x78] sm:$0xf0] }
 0x4aa   :  { %v2738_v33 = vmul.f32 1.442695, %v2737_v18  ;;  %v2743_v31 = vmul.f32 1.442695, %v2742_v24  ;;  %3248 = vmatpush.bf16.msrb.mxu1 %v6832_v17  ;;  %v6813_v18 = vld [vmem:[#allocation12 + $0xd0] sm:$0xf0]  ;;  %v6776_v17 = vor.u32 %v7798_v11, %v6773_v30 }
 0x4ab   :  { %3261 = vmatpush.bf16.msrb.mxu2 %v6836_v58  ;;  %v6819_v24 = vld [vmem:[#allocation12 + $0xc8] sm:$0xf]  ;;  %v6816_v10 = vor.u32 %v7809_v1, %v6813_v18  ;;  %v6747_v58 = vld [vmem:[#allocation12 + $0x40] sm:$0xf]  ;;  %v7796_v1 = vld [vmem:[#allocation12 + $0x54] sm:$0xf0] }
 0x4ac   :  { %8071 = vpow2.f32 %v2738_v33  ;;  %v2716_v47 = vpop.f32.mrf.mxu2  ;;  %v2729_v16 = vpop.f32.mrf.mxu3  ;;  %v6820_v46 = vor.u32 %v7812_v51, %v6819_v24  ;;  %v6795_v33 = vld [vmem:[#allocation12 + $0xa0] sm:$0xf]  ;;  %v6748_v4 = vor.u32 %v7795_v59, %v6747_v58  ;;  %v6756_v18 = vor.u32 %v7796_v1, %v6755_v29  ;;  %v7794_v24 = vld [vmem:[#allocation12 + $0x4c] sm:$0xf]  ;;  %v6757_v51 = vld [vmem:[#allocation12 + $0x58] sm:$0xf0] }
 0x4ad   :  { %8073 = vpow2.f32 %v2743_v31  ;;  %v2736_v62 = vadd.f32 %v2729_v16, %v1054_v38  ;;  %v2692_v14 = vpop.f32.mrf.mxu0  ;;  %v2705_v3 = vpop.f32.mrf.mxu1  ;;  %v2735_v15 = vadd.f32 %v2716_v47, %v988_v13  ;;  %v7807_v31 = vld [vmem:[#allocation12 + $0xac] sm:$0xf0]  ;;  %v7805_v38 = vld [vmem:[#allocation12 + $0xa4] sm:$0xf]  ;;  %v6797_v16 = vld [vmem:[#allocation12 + $0xb0] sm:$0xf0] }
 0x4ae   :  { %3249 = vmatpush.bf16.msrb.mxu1 %v6816_v10  ;;  %v6796_v47 = vor.u32 %v7807_v31, %v6795_v33  ;;  %v7808_v14 = vld [vmem:[#allocation12 + $0xb4] sm:$0xf0]  ;;  %v6800_v3 = vor.u32 %v7805_v38, %v6797_v16  ;;  %v6760_v10 = vor.u32 %v7794_v24, %v6757_v51  ;;  %v6733_v33 = vld [vmem:[#allocation12 + $0x30] sm:$0xf0]  ;;  %v6739_v31 = vld [vmem:[#allocation12 + $0x28] sm:$0xf] }
 0x4af   :  { %v2748_v23 = vsub.f32 0.0, %v2736_v62  ;;  %3262 = vmatpush.bf16.msrb.mxu2 %v6820_v46  ;;  %v6803_v62 = vld [vmem:[#allocation12 + $0xa8] sm:$0xf]  ;;  %v6731_v46 = vld [vmem:[#allocation12 + $0x20] sm:$0xf] }
 0x4b0   :  { %v6804_v13 = vor.u32 %v7808_v14, %v6803_v62  ;;  %v6732_v9 = vor.u32 %v7791_v50, %v6731_v46  ;;  %v7792_v38 = vld [vmem:[#allocation12 + $0x34] sm:$0xf0]  ;;  %v7790_v62 = vld [vmem:[#allocation12 + $0x2c] sm:$0xf]  ;;  %v6741_v14 = vld [vmem:[#allocation12 + $0x38] sm:$0xf0] }
 0x4b1   :  { %v2749_v2 = vmul.f32 1.442695, %v2748_v23  ;;  %v7806_v23 = vld [vmem:[#allocation12 + $0xac] sm:$0xf]  ;;  %v6740_v16 = vor.u32 %v7792_v38, %v6739_v31  ;;  %v6955_v30 = vld [vmem:[#allocation12 + $0xe0] sm:$0xf] }
 0x4b2   :  { %v8072_v32 = vpop.eup %8071  ;;  %3250 = vmatpush.bf16.msrb.mxu1 %v6800_v3  ;;  %v7845_v58 = vld [vmem:[#allocation12 + $0xe4] sm:$0xf]  ;;  %v6965_v24 = vld [vmem:[#allocation12 + $0xf8] sm:$0xf0]  ;;  %v9619_v51 = vld [vmem:[#allocation32_spill] sm:$0xff] }
 0x4b3   :  { %v8074_v25 = vpop.eup %8073  ;;  %v2740_v48 = vadd.f32 1.0, %v8072_v32  ;;  %8075 = vpow2.f32 %v2749_v2  ;;  %3263 = vmatpush.bf16.msrb.mxu2 %v6804_v13  ;;  %v6779_v32 = vld [vmem:[#allocation12 + $0x80] sm:$0xf]  ;;  %v6941_v38 = vld [vmem:[#allocation12 + $0xd0] sm:$0xf0] }
 0x4b4   :  { %v2745_v53 = vadd.f32 1.0, %v8074_v25  ;;  %8077 = vtanh.f32 %v2735_v15  ;;  %v2718_v49 = vpop.f32.mrf.mxu2  ;;  %v2731_v60 = vpop.f32.mrf.mxu3  ;;  %v6805_v15 = vld [vmem:[#allocation12 + $0xb8] sm:$0xf0]  ;;  %v7803_v25 = vld [vmem:[#allocation12 + $0x8c] sm:$0xf0] }
 0x4b5   :  { %8079 = vrcp.f32 %v2740_v48  ;;  %v6808_v2 = vor.u32 %v7806_v23, %v6805_v15  ;;  %v7801_v48 = vld [vmem:[#allocation12 + $0x84] sm:$0xf]  ;;  %v6781_v49 = vld [vmem:[#allocation12 + $0x90] sm:$0xf0]  ;;  %v6787_v60 = vld [vmem:[#allocation12 + $0x88] sm:$0xf]  ;;  %v6744_v23 = vor.u32 %v7790_v62, %v6741_v14 }
 0x4b6   :  { %8081 = vrcp.f32 %v2745_v53  ;;  %v6780_v53 = vor.u32 %v7803_v25, %v6779_v32  ;;  %v6715_v25 = vld [vmem:[#allocation12] sm:$0xf]  ;;  %v7844_v14 = vld [vmem:[#allocation12 + $0xd4] sm:$0xf0] }
 0x4b7   :  { %3276 = vmatpush.bf16.msrb.mxu3 %v6808_v2  ;;  %v9617_v2 = vld [vmem:[#allocation26_spill] sm:$0xff]  ;;  %v6939_v50 = vld [vmem:[#allocation12 + $0xc0] sm:$0xf] }
 0x4b9   :  { %v8076_v55 = vpop.eup %8075 }
 0x4ba   :  { %v8078_v56 = vpop.eup %8077  ;;  %v2751_v12 = vadd.f32 1.0, %v8076_v55  ;;  %v7804_v55 = vld [vmem:[#allocation12 + $0x94] sm:$0xf0] }
 0x4bb   :  { %v8080_v7 = vpop.eup %8079 }
 0x4bc   :  { %v8082_v57 = vpop.eup %8081  ;;  %v2754_v26 = vmul.f32 %v8080_v7, %v8078_v56  ;;  %8083 = vrcp.f32 %v2751_v12  ;;  %v6784_v56 = vor.u32 %v7801_v48, %v6781_v49  ;;  %v6788_v7 = vor.u32 %v7804_v55, %v6787_v60  ;;  %v7787_v48 = vld [vmem:[#allocation12 + $0xc] sm:$0xf0]  ;;  %v6717_v60 = vld [vmem:[#allocation12 + $0x10] sm:$0xf0]  ;;  %v6723_v55 = vld [vmem:[#allocation12 + $0x8] sm:$0xf] }
 0x4bd   :  { %v2753_v36 = vmul.f32 %v8082_v57, %v8971_v28  ;;  %v6828_v28 = vor.u32 %v7815_v61, %v6827_v35  ;;  %v7802_v57 = vld [vmem:[#allocation12 + $0x8c] sm:$0xf]  ;;  %v6765_v35 = vld [vmem:[#allocation12 + $0x70] sm:$0xf0]  ;;  %v6771_v61 = vld [vmem:[#allocation12 + $0x68] sm:$0xf]  ;;  %v6716_v49 = vor.u32 %v7787_v48, %v6715_v25 }
 0x4be   :  { %3251 = vmatpush.bf16.msrb.mxu1 %v6784_v56  ;;  %3264 = vmatpush.bf16.msrb.mxu2 %v6788_v7  ;;  %v6772_v22 = vor.u32 %v7800_v45, %v6771_v61  ;;  %v7788_v56 = vld [vmem:[#allocation12 + $0x14] sm:$0xf0] }
 0x4bf   :  { %v8991_v41 = vadd.f32 %v2754_v26, %v2753_v36  ;;  %3235 = vmatpush.bf16.msrb.mxu0 %v6828_v28  ;;  %v6789_v26 = vld [vmem:[#allocation12 + $0x98] sm:$0xf0]  ;;  %v6763_v36 = vld [vmem:[#allocation12 + $0x60] sm:$0xf] }
 0x4c0   :  { %v6792_v12 = vor.u32 %v7802_v57, %v6789_v26  ;;  %v9618_v45 = vld [vmem:[#allocation34_spill] sm:$0xff] }
 0x4c1   :  { %8085 = vtanh.f32 %v8991_v41 }
 0x4c2   :  { %v8084_v40 = vpop.eup %8083  ;;  %3277 = vmatpush.bf16.msrb.mxu3 %v6792_v12  ;;  %3265 = vmatpush.bf16.msrb.mxu2 %v6772_v22  ;;  %v6724_v12 = vor.u32 %v7788_v56, %v6723_v55 }
 0x4c3   :  { %3236 = vmatpush.bf16.msrb.mxu0 %v6812_v63  ;;  %v6752_v63 = vor.u32 %v7793_v27, %v6749_v8  ;;  %v6957_v27 = vld [vmem:[#allocation12 + $0xf0] sm:$0xf0]  ;;  %v7848_v8 = vld [vmem:[#allocation12 + $0xf4] sm:$0xf0] }
 0x4c4   :  { %v6960_v1 = vor.u32 %v7845_v58, %v6957_v27  ;;  %v6933_v58 = vld [vmem:[#allocation12 + $0xb8] sm:$0xf0]  ;;  %v6907_v27 = vld [vmem:[#allocation12 + $0x80] sm:$0xf] }
 0x4c6   :  { %3278 = vmatpush.bf16.msrb.mxu3 %v6776_v17  ;;  %3266 = vmatpush.bf16.msrb.mxu2 %v6756_v18  ;;  %v7847_v17 = vld [vmem:[#allocation12 + $0xec] sm:$0xf0]  ;;  %v7846_v18 = vld [vmem:[#allocation12 + $0xec] sm:$0xf] }
 0x4c7   :  { %v8086_v5 = vpop.eup %8085  ;;  %3237 = vmatpush.bf16.msrb.mxu0 %v6796_v47  ;;  %v6736_v47 = vor.u32 %v7789_v43, %v6733_v33  ;;  %v6956_v59 = vor.u32 %v7847_v17, %v6955_v30  ;;  %v6968_v46 = vor.u32 %v7846_v18, %v6965_v24  ;;  %v7843_v43 = vld [vmem:[#allocation12 + $0xcc] sm:$0xf0]  ;;  %v7838_v17 = vld [vmem:[#allocation12 + $0xac] sm:$0xf]  ;;  %v7836_v18 = vld [vmem:[#allocation12 + $0x94] sm:$0xf0] }
 0x4c8   :  { %v8994_v44 = vmul.f32 %v8086_v5, %v8084_v40  ;;  %v7799_v40 = vld [vmem:[#allocation12 + $0x6c] sm:$0xf0]  ;;  %v7797_v5 = vld [vmem:[#allocation12 + $0x64] sm:$0xf]  ;;  %v6940_v31 = vor.u32 %v7843_v43, %v6939_v50  ;;  %v6891_v43 = vld [vmem:[#allocation12 + $0x60] sm:$0xf] }
 0x4c9   :  { %v6768_v28 = vor.u32 %v7797_v5, %v6765_v35 }
 0x4ca   :  { %v2765_v19 = vpack.c.bf16 %v8994_v44, %v8994_v44  ;;  %3279 = vmatpush.bf16.msrb.mxu3 %v6760_v10  ;;  %3267 = vmatpush.bf16.msrb.mxu2 %v6740_v16 }
 0x4cb   :  { %3238 = vmatpush.bf16.msrb.mxu0 %v6780_v53  ;;  %3252 = vmatpush.bf16.msrb.mxu1 %v6768_v28  ;;  %v7785_v53 = vld [vmem:[#allocation12 + $0x4] sm:$0xf] }
 0x4cc   :  { %2966 = vmatmul.bf16.vlgmr.msra.gmra.mxu0 %v2765_v19  ;;  %2979 = vmatmul.bf16.vlgmr.msra.gmra.mxu1 %v2765_v19  ;;  %v6720_v26 = vor.u32 %v7785_v53, %v6717_v60 }
 0x4cd   :  { %2992 = vmatmul.bf16.vlgmr.msra.gmra.mxu2 %v2765_v19  ;;  %3005 = vmatmul.bf16.vlgmr.msra.gmra.mxu3 %v2765_v19  ;;  %v6764_v19 = vor.u32 %v7799_v40, %v6763_v36  ;;  %v7786_v36 = vld [vmem:[#allocation12 + $0xc] sm:$0xf]  ;;  %v6725_v40 = vld [vmem:[#allocation12 + $0x18] sm:$0xf0] }
 0x4ce   :  { %3280 = vmatpush.bf16.msrb.mxu3 %v6744_v23  ;;  %3268 = vmatpush.bf16.msrb.mxu2 %v6724_v12 }
 0x4cf   :  { %3239 = vmatpush.bf16.msrb.mxu0 %v6764_v19  ;;  %3253 = vmatpush.bf16.msrb.mxu1 %v6752_v63 }
 0x4d3   :  { %3240 = vmatpush.bf16.msrb.mxu0 %v6748_v4  ;;  %3254 = vmatpush.bf16.msrb.mxu1 %v6736_v47  ;;  %v6963_v4 = vld [vmem:[#allocation12 + $0xe8] sm:$0xf] }
 0x4d4   :  { %v6964_v63 = vor.u32 %v7848_v8, %v6963_v4  ;;  %v6947_v47 = vld [vmem:[#allocation12 + $0xc8] sm:$0xf]  ;;  %v7835_v4 = vld [vmem:[#allocation12 + $0x8c] sm:$0xf0]  ;;  %v7833_v8 = vld [vmem:[#allocation12 + $0x84] sm:$0xf] }
 0x4d6   :  { %3538 = vmatpush.bf16.msra.mxu2 %v6964_v63  ;;  %v6915_v63 = vld [vmem:[#allocation12 + $0x88] sm:$0xf] }
 0x4d7   :  { %3241 = vmatpush.bf16.msrb.mxu0 %v6732_v9  ;;  %3255 = vmatpush.bf16.msrb.mxu1 %v6720_v26  ;;  %v7841_v9 = vld [vmem:[#allocation12 + $0xc4] sm:$0xf] }
 0x4d8   :  { %v6944_v62 = vor.u32 %v7841_v9, %v6941_v38  ;;  %v7831_v9 = vld [vmem:[#allocation12 + $0x6c] sm:$0xf0]  ;;  %v6893_v38 = vld [vmem:[#allocation12 + $0x70] sm:$0xf0] }
 0x4db   :  { %3242 = vmatpush.bf16.msrb.mxu0 %v6716_v49  ;;  %3525 = vmatpush.bf16.msra.mxu1 %v6960_v1  ;;  %v6909_v1 = vld [vmem:[#allocation12 + $0x90] sm:$0xf0] }
 0x4dc   :  { %v6912_v24 = vor.u32 %v7833_v8, %v6909_v1  ;;  %v7820_v8 = vld [vmem:[#allocation12 + $0x14] sm:$0xf0] }
 0x4df   :  { %3512 = vmatpush.bf16.msra.mxu0 %v6956_v59  ;;  %3526 = vmatpush.bf16.msra.mxu1 %v6944_v62  ;;  %v6936_v59 = vor.u32 %v7838_v17, %v6933_v58  ;;  %v7819_v17 = vld [vmem:[#allocation12 + $0xc] sm:$0xf0]  ;;  %v7817_v58 = vld [vmem:[#allocation12 + $0x4] sm:$0xf] }
 0x4e3   :  { %3513 = vmatpush.bf16.msra.mxu0 %v6940_v31  ;;  %v6892_v31 = vor.u32 %v7831_v9, %v6891_v43 }
 0x549   :  { %v2967_v3 = vpop.f32.mrf.mxu0  ;;  %v2980_v13 = vpop.f32.mrf.mxu1 }
 0x54a   :  { %v3010_v15 = vadd.f32 %v2967_v3, %v8816_v0  ;;  %v3011_v32 = vadd.f32 %v2980_v13, %v9617_v2  ;;  %v6728_v0 = vor.u32 %v7786_v36, %v6725_v40  ;;  %v7842_v3 = vld [vmem:[#allocation12 + $0xcc] sm:$0xf]  ;;  %v6949_v13 = vld [vmem:[#allocation12 + $0xd8] sm:$0xf0]  ;;  %v6948_v2 = vor.u32 %v7844_v14, %v6947_v47  ;;  %v6899_v47 = vld [vmem:[#allocation12 + $0x68] sm:$0xf] }
 0x54c   :  { %v3014_v7 = vsub.f32 0.0, %v3010_v15  ;;  %v3019_v57 = vsub.f32 0.0, %v3011_v32  ;;  %3281 = vmatpush.bf16.msrb.mxu3 %v6728_v0  ;;  %v6952_v32 = vor.u32 %v7842_v3, %v6949_v13  ;;  %3539 = vmatpush.bf16.msra.mxu2 %v6948_v2  ;;  %v7830_v3 = vld [vmem:[#allocation12 + $0x6c] sm:$0xf]  ;;  %v6901_v13 = vld [vmem:[#allocation12 + $0x78] sm:$0xf0] }
 0x54d   :  { %v7827_v2 = vld [vmem:[#allocation12 + $0x4c] sm:$0xf0] }
 0x54e   :  { %v3015_v5 = vmul.f32 1.442695, %v3014_v7  ;;  %v3020_v19 = vmul.f32 1.442695, %v3019_v57 }
 0x550   :  { %8087 = vpow2.f32 %v3015_v5  ;;  %v2993_v35 = vpop.f32.mrf.mxu2  ;;  %v3006_v61 = vpop.f32.mrf.mxu3  ;;  %3551 = vmatpush.bf16.msra.mxu3 %v6968_v46  ;;  %v6917_v46 = vld [vmem:[#allocation12 + $0x98] sm:$0xf0] }
 0x551   :  { %8089 = vpow2.f32 %v3020_v19  ;;  %v3013_v28 = vadd.f32 %v3006_v61, %v9618_v45  ;;  %v2969_v22 = vpop.f32.mrf.mxu0  ;;  %v2982_v11 = vpop.f32.mrf.mxu1  ;;  %v3012_v10 = vadd.f32 %v2993_v35, %v9619_v51  ;;  %v6923_v19 = vld [vmem:[#allocation12 + $0xa0] sm:$0xf]  ;;  %v7839_v35 = vld [vmem:[#allocation12 + $0xac] sm:$0xf0]  ;;  %v7837_v61 = vld [vmem:[#allocation12 + $0xa4] sm:$0xf]  ;;  %v6916_v51 = vor.u32 %v7836_v18, %v6915_v63 }
 0x552   :  { %v6925_v45 = vld [vmem:[#allocation12 + $0xb0] sm:$0xf0]  ;;  %v7840_v22 = vld [vmem:[#allocation12 + $0xb4] sm:$0xf0]  ;;  %v7818_v63 = vld [vmem:[#allocation12 + $0xc] sm:$0xf] }
 0x553   :  { %v3025_v29 = vsub.f32 0.0, %v3013_v28  ;;  %v6931_v28 = vld [vmem:[#allocation12 + $0xa8] sm:$0xf]  ;;  %v6928_v11 = vor.u32 %v7837_v61, %v6925_v45  ;;  %v7824_v61 = vld [vmem:[#allocation12 + $0x34] sm:$0xf0] }
 0x554   :  { %3552 = vmatpush.bf16.msra.mxu3 %v6952_v32  ;;  %v6932_v30 = vor.u32 %v7840_v22, %v6931_v28  ;;  %v7825_v32 = vld [vmem:[#allocation12 + $0x44] sm:$0xf]  ;;  %v7822_v28 = vld [vmem:[#allocation12 + $0x2c] sm:$0xf]  ;;  %v6869_v22 = vld [vmem:[#allocation12 + $0x38] sm:$0xf0] }
 0x555   :  { %v3026_v33 = vmul.f32 1.442695, %v3025_v29  ;;  %3527 = vmatpush.bf16.msra.mxu1 %v6928_v11  ;;  %v6908_v29 = vor.u32 %v7835_v4, %v6907_v27  ;;  %v6872_v11 = vor.u32 %v7822_v28, %v6869_v22  ;;  %v6845_v27 = vld [vmem:[#allocation12 + $0x10] sm:$0xf0]  ;;  %v6851_v4 = vld [vmem:[#allocation12 + $0x8] sm:$0xf] }
 0x556   :  { %v8088_v16 = vpop.eup %8087  ;;  %3540 = vmatpush.bf16.msra.mxu2 %v6932_v30  ;;  %v6843_v30 = vld [vmem:[#allocation12] sm:$0xf]  ;;  %v6852_v1 = vor.u32 %v7820_v8, %v6851_v4  ;;  %v6853_v18 = vld [vmem:[#allocation12 + $0x18] sm:$0xf0] }
 0x557   :  { %v8090_v23 = vpop.eup %8089  ;;  %v3017_v15 = vadd.f32 1.0, %v8088_v16  ;;  %8091 = vpow2.f32 %v3026_v33  ;;  %v7829_v33 = vld [vmem:[#allocation12 + $0x64] sm:$0xf]  ;;  %v7832_v16 = vld [vmem:[#allocation12 + $0x74] sm:$0xf0] }
 0x558   :  { %v3022_v25 = vadd.f32 1.0, %v8090_v23  ;;  %8093 = vtanh.f32 %v3012_v10  ;;  %v2995_v48 = vpop.f32.mrf.mxu2  ;;  %v3008_v53 = vpop.f32.mrf.mxu3  ;;  %3553 = vmatpush.bf16.msra.mxu3 %v6936_v59  ;;  %v7834_v10 = vld [vmem:[#allocation12 + $0x8c] sm:$0xf]  ;;  %v6896_v62 = vor.u32 %v7829_v33, %v6893_v38  ;;  %v6900_v14 = vor.u32 %v7832_v16, %v6899_v47  ;;  %v7091_v33 = vld [vmem:[#allocation13 + $0xe8] sm:$0xf] }
 0x559   :  { %8095 = vrcp.f32 %v3017_v15  ;;  %v6920_v50 = vor.u32 %v7834_v10, %v6917_v46  ;;  %3528 = vmatpush.bf16.msra.mxu1 %v6912_v24  ;;  %v6904_v23 = vor.u32 %v7830_v3, %v6901_v13  ;;  %v6875_v15 = vld [vmem:[#allocation12 + $0x40] sm:$0xf]  ;;  %v6877_v48 = vld [vmem:[#allocation12 + $0x50] sm:$0xf0]  ;;  %v6883_v53 = vld [vmem:[#allocation12 + $0x48] sm:$0xf]  ;;  %v6844_v59 = vor.u32 %v7819_v17, %v6843_v30 }
 0x55a   :  { %8097 = vrcp.f32 %v3022_v25  ;;  %3541 = vmatpush.bf16.msra.mxu2 %v6916_v51  ;;  %v6876_v25 = vor.u32 %v7827_v2, %v6875_v15  ;;  %v7083_v24 = vld [vmem:[#allocation13 + $0xe0] sm:$0xf]  ;;  %v6856_v51 = vor.u32 %v7818_v63, %v6853_v18  ;;  %v7879_v10 = vld [vmem:[#allocation13 + $0xec] sm:$0xf0]  ;;  %v7877_v46 = vld [vmem:[#allocation13 + $0xe4] sm:$0xf] }
 0x55b   :  { %v7084_v43 = vor.u32 %v7879_v10, %v7083_v24  ;;  %v7878_v38 = vld [vmem:[#allocation13 + $0xec] sm:$0xf]  ;;  %v7093_v16 = vld [vmem:[#allocation13 + $0xf8] sm:$0xf0]  ;;  %v7069_v15 = vld [vmem:[#allocation13 + $0xd0] sm:$0xf0] }
 0x55c   :  { %3554 = vmatpush.bf16.msra.mxu3 %v6920_v50  ;;  %v7085_v50 = vld [vmem:[#allocation13 + $0xf0] sm:$0xf0]  ;;  %v7096_v3 = vor.u32 %v7878_v38, %v7093_v16  ;;  %v7075_v2 = vld [vmem:[#allocation13 + $0xc8] sm:$0xf]  ;;  %v7061_v30 = vld [vmem:[#allocation13 + $0xb8] sm:$0xf0] }
 0x55d   :  { %v8092_v49 = vpop.eup %8091  ;;  %3529 = vmatpush.bf16.msra.mxu1 %v6896_v62  ;;  %v7088_v9 = vor.u32 %v7877_v46, %v7085_v50  ;;  %v7067_v62 = vld [vmem:[#allocation13 + $0xc0] sm:$0xf]  ;;  %v9624_v63 = vld [vmem:[#allocation36_spill] sm:$0xff]  ;;  %v7868_v46 = vld [vmem:[#allocation13 + $0x94] sm:$0xf0] }
 0x55e   :  { %v8094_v60 = vpop.eup %8093  ;;  %v3028_v57 = vadd.f32 1.0, %v8092_v49  ;;  %3542 = vmatpush.bf16.msra.mxu2 %v6900_v14  ;;  %v7828_v49 = vld [vmem:[#allocation12 + $0x54] sm:$0xf0]  ;;  %v7875_v14 = vld [vmem:[#allocation13 + $0xcc] sm:$0xf0]  ;;  %v1026_v18 = vadd.f32 %v9624_v63, %v8840_v39 }
 0x55f   :  { %v8096_v55 = vpop.eup %8095  ;;  %v7068_v13 = vor.u32 %v7875_v14, %v7067_v62  ;;  %v7035_v8 = vld [vmem:[#allocation13 + $0x80] sm:$0xf]  ;;  %v7043_v10 = vld [vmem:[#allocation13 + $0x88] sm:$0xf]  ;;  %v7045_v38 = vld [vmem:[#allocation13 + $0x98] sm:$0xf0] }
 0x560   :  { %v8098_v56 = vpop.eup %8097  ;;  %v3031_v7 = vmul.f32 %v8096_v55, %v8094_v60  ;;  %8099 = vrcp.f32 %v3028_v57  ;;  %3555 = vmatpush.bf16.msra.mxu3 %v6904_v23  ;;  %v6880_v60 = vor.u32 %v7825_v32, %v6877_v48  ;;  %v6884_v55 = vor.u32 %v7828_v49, %v6883_v53  ;;  %v7873_v23 = vld [vmem:[#allocation13 + $0xc4] sm:$0xf]  ;;  %v9620_v32 = vld [vmem:[#allocation25_spill] sm:$0xff]  ;;  %v9621_v48 = vld [vmem:[#allocation28_spill] sm:$0xff] }
 0x561   :  { %v3030_v26 = vmul.f32 %v8098_v56, %v8991_v41  ;;  %v6924_v41 = vor.u32 %v7839_v35, %v6923_v19  ;;  %v7826_v56 = vld [vmem:[#allocation12 + $0x4c] sm:$0xf]  ;;  %v6861_v19 = vld [vmem:[#allocation12 + $0x30] sm:$0xf0]  ;;  %v6867_v35 = vld [vmem:[#allocation12 + $0x28] sm:$0xf]  ;;  %v894_v53 = vadd.f32 %v9621_v48, %v8762_v37  ;;  %v7072_v49 = vor.u32 %v7873_v23, %v7069_v15 }
 0x562   :  { %3530 = vmatpush.bf16.msra.mxu1 %v6880_v60  ;;  %3543 = vmatpush.bf16.msra.mxu2 %v6884_v55  ;;  %v6868_v45 = vor.u32 %v7824_v61, %v6867_v35  ;;  %v7876_v60 = vld [vmem:[#allocation13 + $0xd4] sm:$0xf0]  ;;  %v7874_v55 = vld [vmem:[#allocation13 + $0xcc] sm:$0xf]  ;;  %v7059_v35 = vld [vmem:[#allocation13 + $0xa8] sm:$0xf] }
 0x563   :  { %v9003_v12 = vadd.f32 %v3031_v7, %v3030_v26  ;;  %3514 = vmatpush.bf16.msra.mxu0 %v6924_v41  ;;  %v6885_v7 = vld [vmem:[#allocation12 + $0x58] sm:$0xf0]  ;;  %v6859_v26 = vld [vmem:[#allocation12 + $0x20] sm:$0xf]  ;;  %v9623_v37 = vld [vmem:[#allocation29_spill] sm:$0xff] }
 0x564   :  { %v6888_v57 = vor.u32 %v7826_v56, %v6885_v7  ;;  %v7077_v56 = vld [vmem:[#allocation13 + $0xd8] sm:$0xf0]  ;;  %v7076_v7 = vor.u32 %v7876_v60, %v7075_v2  ;;  %v9622_v61 = vld [vmem:[#allocation27_spill] sm:$0xff]  ;;  %v9625_v16 = vld [vmem:[#allocation33_spill] sm:$0xff] }
 0x565   :  { %8101 = vtanh.f32 %v9003_v12  ;;  %v960_v62 = vadd.f32 %v9625_v16, %v8836_v34  ;;  %v7019_v23 = vld [vmem:[#allocation13 + $0x60] sm:$0xf]  ;;  %v7863_v15 = vld [vmem:[#allocation13 + $0x6c] sm:$0xf0]  ;;  %v7861_v2 = vld [vmem:[#allocation13 + $0x64] sm:$0xf] }
 0x566   :  { %v8100_v36 = vpop.eup %8099  ;;  %3556 = vmatpush.bf16.msra.mxu3 %v6888_v57  ;;  %3544 = vmatpush.bf16.msra.mxu2 %v6868_v45  ;;  %v7080_v57 = vor.u32 %v7874_v55, %v7077_v56  ;;  %v927_v45 = vadd.f32 %v9623_v37, %v894_v53  ;;  %v7020_v48 = vor.u32 %v7863_v15, %v7019_v23  ;;  %v7021_v53 = vld [vmem:[#allocation13 + $0x70] sm:$0xf0]  ;;  %v7864_v60 = vld [vmem:[#allocation13 + $0x74] sm:$0xf0]  ;;  %v6979_v23 = vld [vmem:[#allocation13 + $0x8] sm:$0xf] }
 0x567   :  { %3515 = vmatpush.bf16.msra.mxu0 %v6908_v29  ;;  %v6848_v29 = vor.u32 %v7817_v58, %v6845_v27  ;;  %v7852_v15 = vld [vmem:[#allocation13 + $0x14] sm:$0xf0] }
 0x56a   :  { %3557 = vmatpush.bf16.msra.mxu3 %v6872_v11  ;;  %3545 = vmatpush.bf16.msra.mxu2 %v6852_v1  ;;  %v7870_v11 = vld [vmem:[#allocation13 + $0xac] sm:$0xf]  ;;  %v7865_v1 = vld [vmem:[#allocation13 + $0x84] sm:$0xf] }
 0x56b   :  { %v8102_v40 = vpop.eup %8101  ;;  %3516 = vmatpush.bf16.msra.mxu0 %v6892_v31  ;;  %v7880_v31 = vld [vmem:[#allocation13 + $0xf4] sm:$0xf0] }
 0x56c   :  { %v9006_v0 = vmul.f32 %v8102_v40, %v8100_v36  ;;  %v7823_v36 = vld [vmem:[#allocation12 + $0x2c] sm:$0xf0]  ;;  %v7821_v40 = vld [vmem:[#allocation12 + $0x24] sm:$0xf]  ;;  %v7092_v47 = vor.u32 %v7880_v31, %v7091_v33  ;;  %v7044_v33 = vor.u32 %v7868_v46, %v7043_v10  ;;  %v7866_v31 = vld [vmem:[#allocation13 + $0x8c] sm:$0xf] }
 0x56d   :  { %v6864_v41 = vor.u32 %v7821_v40, %v6861_v19  ;;  %v7869_v40 = vld [vmem:[#allocation13 + $0xa4] sm:$0xf]  ;;  %v7053_v19 = vld [vmem:[#allocation13 + $0xb0] sm:$0xf0] }
 0x56e   :  { %v3042_v5 = vpack.c.bf16 %v9006_v0, %v9006_v0  ;;  %3558 = vmatpush.bf16.msra.mxu3 %v6856_v51  ;;  %v7056_v28 = vor.u32 %v7869_v40, %v7053_v19  ;;  %v7037_v51 = vld [vmem:[#allocation13 + $0x90] sm:$0xf0]  ;;  %v9627_v40 = vld [vmem:[#allocation35_spill] sm:$0xff] }
 0x56f   :  { %3517 = vmatpush.bf16.msra.mxu0 %v6876_v25  ;;  %3531 = vmatpush.bf16.msra.mxu1 %v6864_v41  ;;  %v828_v25 = vadd.f32 %v9620_v32, %v8756_v20  ;;  %v7872_v20 = vld [vmem:[#allocation13 + $0xb4] sm:$0xf0] }
 0x570   :  { %3243 = vmatmul.bf16.vlgmr.msrb.gmra.mxu0 %v3042_v5  ;;  %3256 = vmatmul.bf16.vlgmr.msrb.gmra.mxu1 %v3042_v5  ;;  %v7060_v22 = vor.u32 %v7872_v20, %v7059_v35  ;;  %v7859_v20 = vld [vmem:[#allocation13 + $0x4c] sm:$0xf0] }
 0x571   :  { %3269 = vmatmul.bf16.vlgmr.msrb.gmra.mxu2 %v3042_v5  ;;  %3282 = vmatmul.bf16.vlgmr.msrb.gmra.mxu3 %v3042_v5  ;;  %v6860_v5 = vor.u32 %v7823_v36, %v6859_v26  ;;  %v7051_v26 = vld [vmem:[#allocation13 + $0xa0] sm:$0xf]  ;;  %v7871_v36 = vld [vmem:[#allocation13 + $0xac] sm:$0xf0]  ;;  %v861_v41 = vadd.f32 %v9622_v61, %v828_v25  ;;  %v7857_v61 = vld [vmem:[#allocation13 + $0x44] sm:$0xf] }
 0x572   :  { %3873 = vmatpush.bf16.msrb.mxu2 %v7092_v47  ;;  %3906 = vmatpush.bf16.msrb.mxu3 %v7096_v3  ;;  %v7048_v47 = vor.u32 %v7866_v31, %v7045_v38  ;;  %v9626_v3 = vld [vmem:[#allocation37_spill] sm:$0xff] }
 0x573   :  { %3518 = vmatpush.bf16.msra.mxu0 %v6860_v5  ;;  %3532 = vmatpush.bf16.msra.mxu1 %v6848_v29  ;;  %v7052_v5 = vor.u32 %v7871_v36, %v7051_v26  ;;  %v7867_v29 = vld [vmem:[#allocation13 + $0x8c] sm:$0xf0]  ;;  %v7029_v26 = vld [vmem:[#allocation13 + $0x78] sm:$0xf0]  ;;  %v7003_v36 = vld [vmem:[#allocation13 + $0x40] sm:$0xf] }
 0x574   :  { %v7036_v24 = vor.u32 %v7867_v29, %v7035_v8  ;;  %v7855_v29 = vld [vmem:[#allocation13 + $0x2c] sm:$0xf0] }
 0x576   :  { %3874 = vmatpush.bf16.msrb.mxu2 %v7076_v7  ;;  %3907 = vmatpush.bf16.msrb.mxu3 %v7080_v57  ;;  %v7024_v7 = vor.u32 %v7861_v2, %v7021_v53  ;;  %v7862_v57 = vld [vmem:[#allocation13 + $0x6c] sm:$0xf]  ;;  %v6980_v53 = vor.u32 %v7852_v15, %v6979_v23  ;;  %v7899_v23 = vld [vmem:[#allocation15 + $0x8c] sm:$0xf0]  ;;  %v7897_v15 = vld [vmem:[#allocation15 + $0x84] sm:$0xf] }
 0x577   :  { %3519 = vmatpush.bf16.msra.mxu0 %v6844_v59  ;;  %3840 = vmatpush.bf16.msrb.mxu1 %v7088_v9  ;;  %v7064_v59 = vor.u32 %v7870_v11, %v7061_v30  ;;  %v7040_v9 = vor.u32 %v7865_v1, %v7037_v51  ;;  %v7032_v35 = vor.u32 %v7862_v57, %v7029_v26  ;;  %v7860_v11 = vld [vmem:[#allocation13 + $0x54] sm:$0xf0]  ;;  %v7853_v1 = vld [vmem:[#allocation13 + $0x24] sm:$0xf]  ;;  %v7850_v2 = vld [vmem:[#allocation13 + $0xc] sm:$0xf] }
 0x578   :  { %v7856_v51 = vld [vmem:[#allocation13 + $0x34] sm:$0xf0] }
 0x57a   :  { %3875 = vmatpush.bf16.msrb.mxu2 %v7060_v22  ;;  %3908 = vmatpush.bf16.msrb.mxu3 %v7064_v59  ;;  %v7011_v22 = vld [vmem:[#allocation13 + $0x48] sm:$0xf]  ;;  %v7013_v59 = vld [vmem:[#allocation13 + $0x58] sm:$0xf0] }
 0x57b   :  { %3807 = vmatpush.bf16.msrb.mxu0 %v7084_v43  ;;  %3841 = vmatpush.bf16.msrb.mxu1 %v7072_v49  ;;  %v7027_v49 = vld [vmem:[#allocation13 + $0x68] sm:$0xf] }
 0x57c   :  { %v7028_v19 = vor.u32 %v7864_v60, %v7027_v49 }
 0x57e   :  { %3876 = vmatpush.bf16.msrb.mxu2 %v7044_v33  ;;  %3909 = vmatpush.bf16.msrb.mxu3 %v7048_v47  ;;  %v6997_v33 = vld [vmem:[#allocation13 + $0x38] sm:$0xf0] }
 0x57f   :  { %3808 = vmatpush.bf16.msrb.mxu0 %v7068_v13  ;;  %3842 = vmatpush.bf16.msrb.mxu1 %v7056_v28  ;;  %v1059_v13 = vadd.f32 %v9626_v3, %v1026_v18  ;;  %v6989_v18 = vld [vmem:[#allocation13 + $0x30] sm:$0xf0]  ;;  %v7849_v3 = vld [vmem:[#allocation13 + $0x4] sm:$0xf] }
 0x582   :  { %3877 = vmatpush.bf16.msrb.mxu2 %v7028_v19  ;;  %3910 = vmatpush.bf16.msrb.mxu3 %v7032_v35 }
 0x583   :  { %3809 = vmatpush.bf16.msrb.mxu0 %v7052_v5  ;;  %3843 = vmatpush.bf16.msrb.mxu1 %v7040_v9  ;;  %v993_v5 = vadd.f32 %v9627_v40, %v960_v62  ;;  %v7854_v9 = vld [vmem:[#allocation13 + $0x2c] sm:$0xf]  ;;  %v6971_v62 = vld [vmem:[#allocation13] sm:$0xf] }
 0x587   :  { %3810 = vmatpush.bf16.msrb.mxu0 %v7036_v24  ;;  %3844 = vmatpush.bf16.msrb.mxu1 %v7024_v7  ;;  %v6995_v24 = vld [vmem:[#allocation13 + $0x28] sm:$0xf] }
 0x588   :  { %v6996_v16 = vor.u32 %v7856_v51, %v6995_v24  ;;  %v7908_v24 = vld [vmem:[#allocation15 + $0xd4] sm:$0xf0]  ;;  %v7179_v51 = vld [vmem:[#allocation15 + $0xa0] sm:$0xf] }
 0x58b   :  { %3811 = vmatpush.bf16.msrb.mxu0 %v7020_v48 }
 0x5ed   :  { %v3244_v17 = vpop.f32.mrf.mxu0  ;;  %v3257_v58 = vpop.f32.mrf.mxu1 }
 0x5ee   :  { %v3287_v27 = vadd.f32 %v3244_v17, %v861_v41  ;;  %v3288_v4 = vadd.f32 %v3257_v58, %v927_v45  ;;  %v7005_v41 = vld [vmem:[#allocation13 + $0x50] sm:$0xf0]  ;;  %v7004_v45 = vor.u32 %v7859_v20, %v7003_v36  ;;  %v7012_v17 = vor.u32 %v7860_v11, %v7011_v22  ;;  %v7858_v58 = vld [vmem:[#allocation13 + $0x4c] sm:$0xf]  ;;  %v7221_v11 = vld [vmem:[#allocation15 + $0xf8] sm:$0xf0] }
 0x5ef   :  { %v7008_v28 = vor.u32 %v7857_v61, %v7005_v41  ;;  %v7016_v8 = vor.u32 %v7858_v58, %v7013_v59  ;;  %v3601_v20 = vpack.c.bf16 %v8962_v52, %v8942_v54  ;;  %v7211_v61 = vld [vmem:[#allocation15 + $0xe0] sm:$0xf]  ;;  %v7911_v41 = vld [vmem:[#allocation15 + $0xec] sm:$0xf0]  ;;  %v7910_v22 = vld [vmem:[#allocation15 + $0xec] sm:$0xf] }
 0x5f0   :  { %v3291_v50 = vsub.f32 0.0, %v3287_v27  ;;  %v3296_v43 = vsub.f32 0.0, %v3288_v4  ;;  %v6987_v27 = vld [vmem:[#allocation13 + $0x20] sm:$0xf]  ;;  %3812 = vmatpush.bf16.msrb.mxu0 %v7004_v45  ;;  %3878 = vmatpush.bf16.msrb.mxu2 %v7012_v17  ;;  %v9034_v45 = vor.u32 %v7911_v41, %v7211_v61  ;;  %v7912_v17 = vld [vmem:[#allocation15 + $0xf4] sm:$0xf0] }
 0x5f1   :  { %3845 = vmatpush.bf16.msrb.mxu1 %v7008_v28  ;;  %3911 = vmatpush.bf16.msrb.mxu3 %v7016_v8  ;;  %v7213_v28 = vld [vmem:[#allocation15 + $0xf0] sm:$0xf0]  ;;  %v7195_v58 = vld [vmem:[#allocation15 + $0xc0] sm:$0xf]  ;;  %v7907_v52 = vld [vmem:[#allocation15 + $0xcc] sm:$0xf0] }
 0x5f2   :  { %v3292_v14 = vmul.f32 1.442695, %v3291_v50  ;;  %v3297_v39 = vmul.f32 1.442695, %v3296_v43  ;;  %v6988_v50 = vor.u32 %v7855_v29, %v6987_v27  ;;  %v6992_v43 = vor.u32 %v7853_v1, %v6989_v18  ;;  %v7905_v59 = vld [vmem:[#allocation15 + $0xc4] sm:$0xf] }
 0x5f3   :  { %v7197_v27 = vld [vmem:[#allocation15 + $0xd0] sm:$0xf0]  ;;  %v7906_v29 = vld [vmem:[#allocation15 + $0xcc] sm:$0xf]  ;;  %v7205_v1 = vld [vmem:[#allocation15 + $0xd8] sm:$0xf0] }
 0x5f4   :  { %8103 = vpow2.f32 %v3292_v14  ;;  %v3270_v32 = vpop.f32.mrf.mxu2  ;;  %v3283_v25 = vpop.f32.mrf.mxu3  ;;  %v7851_v14 = vld [vmem:[#allocation13 + $0xc] sm:$0xf0]  ;;  %3813 = vmatpush.bf16.msrb.mxu0 %v6988_v50  ;;  %3879 = vmatpush.bf16.msrb.mxu2 %v6996_v16  ;;  %v9047_v8 = vor.u32 %v7905_v59, %v7197_v27  ;;  %v9050_v18 = vor.u32 %v7906_v29, %v7205_v1  ;;  %v7901_v50 = vld [vmem:[#allocation15 + $0xa4] sm:$0xf]  ;;  %v3602_v16 = vpack.c.bf16 %v8994_v44, %v8974_v42  ;;  %v7131_v41 = vld [vmem:[#allocation15 + $0x40] sm:$0xf] }
 0x5f5   :  { %8105 = vpow2.f32 %v3297_v39  ;;  %v3290_v55 = vadd.f32 %v3283_v25, %v1059_v13  ;;  %v3246_v34 = vpop.f32.mrf.mxu0  ;;  %v3259_v56 = vpop.f32.mrf.mxu1  ;;  %v3289_v30 = vadd.f32 %v3270_v32, %v993_v5  ;;  %v7000_v39 = vor.u32 %v7854_v9, %v6997_v33  ;;  %v6973_v13 = vld [vmem:[#allocation13 + $0x10] sm:$0xf0]  ;;  %v6981_v32 = vld [vmem:[#allocation13 + $0x18] sm:$0xf0]  ;;  %3846 = vmatpush.bf16.msrb.mxu1 %v6992_v43  ;;  %v7902_v9 = vld [vmem:[#allocation15 + $0xac] sm:$0xf] }
 0x5f6   :  { %v6972_v25 = vor.u32 %v7851_v14, %v6971_v62  ;;  %v6976_v48 = vor.u32 %v7849_v3, %v6973_v13  ;;  %v6984_v60 = vor.u32 %v7850_v2, %v6981_v32  ;;  %v7181_v43 = vld [vmem:[#allocation15 + $0xb0] sm:$0xf0]  ;;  %v7187_v14 = vld [vmem:[#allocation15 + $0xa8] sm:$0xf]  ;;  %v7163_v3 = vld [vmem:[#allocation15 + $0x80] sm:$0xf] }
 0x5f7   :  { %v3302_v37 = vsub.f32 0.0, %v3290_v55  ;;  %3912 = vmatpush.bf16.msrb.mxu3 %v7000_v39  ;;  %v7904_v39 = vld [vmem:[#allocation15 + $0xb4] sm:$0xf0]  ;;  %v7165_v2 = vld [vmem:[#allocation15 + $0x90] sm:$0xf0]  ;;  %v9073_v42 = vor.u32 %v7899_v23, %v7163_v3 }
 0x5f8   :  { %3814 = vmatpush.bf16.msrb.mxu0 %v6972_v25  ;;  %3880 = vmatpush.bf16.msrb.mxu2 %v6980_v53  ;;  %v9071_v13 = vor.u32 %v7904_v39, %v7187_v14  ;;  %v9075_v44 = vor.u32 %v7897_v15, %v7165_v2  ;;  %v7173_v32 = vld [vmem:[#allocation15 + $0x98] sm:$0xf0]  ;;  %v7171_v25 = vld [vmem:[#allocation15 + $0x88] sm:$0xf]  ;;  %v7900_v53 = vld [vmem:[#allocation15 + $0x94] sm:$0xf0] }
 0x5f9   :  { %v3303_v4 = vmul.f32 1.442695, %v3302_v37  ;;  %3847 = vmatpush.bf16.msrb.mxu1 %v6976_v48  ;;  %v7909_v37 = vld [vmem:[#allocation15 + $0xe4] sm:$0xf]  ;;  %v7890_v59 = vld [vmem:[#allocation15 + $0x4c] sm:$0xf] }
 0x5fa   :  { %v8104_v63 = vpop.eup %8103  ;;  %v7141_v27 = vld [vmem:[#allocation15 + $0x58] sm:$0xf0]  ;;  %v7139_v1 = vld [vmem:[#allocation15 + $0x48] sm:$0xf]  ;;  %v9630_v2 = vld [vmem:[#allocation39_spill] sm:$0xff] }
 0x5fb   :  { %v8106_v10 = vpop.eup %8105  ;;  %v3294_v46 = vadd.f32 1.0, %v8104_v63  ;;  %8107 = vpow2.f32 %v3303_v4  ;;  %3913 = vmatpush.bf16.msrb.mxu3 %v6984_v60  ;;  %v9045_v4 = vor.u32 %v7907_v52, %v7195_v58  ;;  %v7203_v63 = vld [vmem:[#allocation15 + $0xc8] sm:$0xf]  ;;  %v7895_v60 = vld [vmem:[#allocation15 + $0x6c] sm:$0xf0] }
 0x5fc   :  { %v3299_v31 = vadd.f32 1.0, %v8106_v10  ;;  %8109 = vtanh.f32 %v3289_v30  ;;  %v3272_v38 = vpop.f32.mrf.mxu2  ;;  %v3285_v47 = vpop.f32.mrf.mxu3  ;;  %v7219_v30 = vld [vmem:[#allocation15 + $0xe8] sm:$0xf]  ;;  %v7903_v10 = vld [vmem:[#allocation15 + $0xac] sm:$0xf0] }
 0x5fd   :  { %8111 = vrcp.f32 %v3294_v46  ;;  %v9041_v54 = vor.u32 %v7912_v17, %v7219_v30  ;;  %v9052_v46 = vor.u32 %v7908_v24, %v7203_v63  ;;  %v9055_v33 = vor.u32 %v7903_v10, %v7179_v51  ;;  %v9629_v30 = vld [vmem:[#allocation31_spill] sm:$0xff]  ;;  %v7133_v52 = vld [vmem:[#allocation15 + $0x50] sm:$0xf0]  ;;  %v7892_v63 = vld [vmem:[#allocation15 + $0x54] sm:$0xf0] }
 0x5fe   :  { %8113 = vrcp.f32 %v3299_v31  ;;  %v7189_v31 = vld [vmem:[#allocation15 + $0xb8] sm:$0xf0]  ;;  %v9059_v38 = vor.u32 %v7901_v50, %v7181_v43  ;;  %v7115_v24 = vld [vmem:[#allocation15 + $0x20] sm:$0xf]  ;;  %v9103_v50 = vor.u32 %v7890_v59, %v7141_v27  ;;  %v7887_v43 = vld [vmem:[#allocation15 + $0x2c] sm:$0xf0] }
 0x5ff   :  { %v9061_v47 = vor.u32 %v7902_v9, %v7189_v31  ;;  %v7885_v9 = vld [vmem:[#allocation15 + $0x24] sm:$0xf]  ;;  %v9107_v31 = vor.u32 %v7892_v63, %v7139_v1  ;;  %v7882_v63 = vld [vmem:[#allocation15 + $0xc] sm:$0xf] }
 0x601   :  { %v8108_v49 = vpop.eup %8107 }
 0x602   :  { %v8110_v55 = vpop.eup %8109  ;;  %v3305_v57 = vadd.f32 1.0, %v8108_v49  ;;  %v7147_v49 = vld [vmem:[#allocation15 + $0x60] sm:$0xf] }
 0x603   :  { %v8112_v34 = vpop.eup %8111 }
 0x604   :  { %v8114_v56 = vpop.eup %8113  ;;  %v3308_v7 = vmul.f32 %v8112_v34, %v8110_v55  ;;  %8115 = vrcp.f32 %v3305_v57  ;;  %v9082_v55 = vor.u32 %v7900_v53, %v7171_v25  ;;  %v9084_v34 = vor.u32 %v7895_v60, %v7147_v49  ;;  %v7894_v57 = vld [vmem:[#allocation15 + $0x6c] sm:$0xf]  ;;  %v7125_v49 = vld [vmem:[#allocation15 + $0x38] sm:$0xf0] }
 0x605   :  { %v3307_v26 = vmul.f32 %v8114_v56, %v9003_v12  ;;  %v3600_v12 = vpack.c.bf16 %v8930_v21, %v8910_v6  ;;  %v9036_v6 = vor.u32 %v7909_v37, %v7213_v28  ;;  %v9038_v21 = vor.u32 %v7910_v22, %v7221_v11  ;;  %v7893_v56 = vld [vmem:[#allocation15 + $0x64] sm:$0xf]  ;;  %v7891_v37 = vld [vmem:[#allocation15 + $0x4c] sm:$0xf0]  ;;  %v9628_v22 = vld [vmem:[#allocation30_spill] sm:$0xff] }
 0x606   :  { %v7889_v28 = vld [vmem:[#allocation15 + $0x44] sm:$0xf]  ;;  %v9098_v58 = vor.u32 %v7891_v37, %v7131_v41  ;;  %v7886_v53 = vld [vmem:[#allocation15 + $0x2c] sm:$0xf] }
 0x607   :  { %v9023_v36 = vadd.f32 %v3308_v7, %v3307_v26  ;;  %v7149_v7 = vld [vmem:[#allocation15 + $0x70] sm:$0xf0]  ;;  %v9100_v29 = vor.u32 %v7889_v28, %v7133_v52  ;;  %v9119_v60 = vor.u32 %v7886_v53, %v7125_v49 }
 0x608   :  { %v9087_v26 = vor.u32 %v7893_v56, %v7149_v7  ;;  %v7123_v56 = vld [vmem:[#allocation15 + $0x28] sm:$0xf]  ;;  %v7888_v7 = vld [vmem:[#allocation15 + $0x34] sm:$0xf0]  ;;  %v7101_v28 = vld [vmem:[#allocation15 + $0x10] sm:$0xf0] }
 0x609   :  { %8117 = vtanh.f32 %v9023_v36 }
 0x60a   :  { %v8116_v40 = vpop.eup %8115 }
 0x60f   :  { %v8118_v5 = vpop.eup %8117 }
 0x610   :  { %v9026_v19 = vmul.f32 %v8118_v5, %v8116_v40  ;;  %v7157_v40 = vld [vmem:[#allocation15 + $0x78] sm:$0xf0]  ;;  %v7155_v5 = vld [vmem:[#allocation15 + $0x68] sm:$0xf] }
 0x612   :  { %v3319_v35 = vpack.c.bf16 %v9026_v19, %v9026_v19  ;;  %v3603_v62 = vpack.c.bf16 %v9026_v19, %v9006_v0  ;;  %v7898_v0 = vld [vmem:[#allocation15 + $0x8c] sm:$0xf]  ;;  %v7896_v19 = vld [vmem:[#allocation15 + $0x74] sm:$0xf0] }
 0x613   :  { %v9080_v48 = vor.u32 %v7898_v0, %v7173_v32  ;;  %v9093_v61 = vor.u32 %v7896_v19, %v7155_v5  ;;  %v9121_v5 = vor.u32 %v7888_v7, %v7123_v56  ;;  %v7883_v19 = vld [vmem:[#allocation15 + $0xc] sm:$0xf0]  ;;  %v9632_v56 = vmov 0  }
 0x614   :  { %3520 = vmatmul.bf16.vlgmr.msra.gmra.mxu0 %v3319_v35  ;;  %3533 = vmatmul.bf16.vlgmr.msra.gmra.mxu1 %v3319_v35 }
 0x615   :  { %3546 = vmatmul.bf16.vlgmr.msra.gmra.mxu2 %v3319_v35  ;;  %3559 = vmatmul.bf16.vlgmr.msra.gmra.mxu3 %v3319_v35 }
 0x616   :  { %4171 = vmatpush.bf16.msra.mxu0 %v9034_v45  ;;  %4184 = vmatpush.bf16.msra.mxu1 %v9036_v6 }
 0x617   :  { %4210 = vmatpush.bf16.msra.mxu3 %v9038_v21  ;;  %4197 = vmatpush.bf16.msra.mxu2 %v9041_v54 }
 0x61a   :  { %4172 = vmatpush.bf16.msra.mxu0 %v9045_v4  ;;  %4185 = vmatpush.bf16.msra.mxu1 %v9047_v8 }
 0x61b   :  { %4211 = vmatpush.bf16.msra.mxu3 %v9050_v18  ;;  %4198 = vmatpush.bf16.msra.mxu2 %v9052_v46 }
 0x61e   :  { %4173 = vmatpush.bf16.msra.mxu0 %v9055_v33  ;;  %4186 = vmatpush.bf16.msra.mxu1 %v9059_v38 }
 0x61f   :  { %4212 = vmatpush.bf16.msra.mxu3 %v9061_v47  ;;  %4199 = vmatpush.bf16.msra.mxu2 %v9071_v13 }
 0x622   :  { %4174 = vmatpush.bf16.msra.mxu0 %v9073_v42  ;;  %4187 = vmatpush.bf16.msra.mxu1 %v9075_v44 }
 0x623   :  { %4213 = vmatpush.bf16.msra.mxu3 %v9080_v48  ;;  %4200 = vmatpush.bf16.msra.mxu2 %v9082_v55 }
 0x624   :  { %3815 = vmatmul.bf16.vlgmr.msrb.gmra.mxu0 %v3600_v12  ;;  %3848 = vmatmul.bf16.vlgmr.msrb.gmra.mxu1 %v3600_v12 }
 0x625   :  { %3881 = vmatmul.bf16.vlgmr.msrb.gmra.mxu2 %v3600_v12  ;;  %3914 = vmatmul.bf16.vlgmr.msrb.gmra.mxu3 %v3600_v12 }
 0x626   :  { %4175 = vmatpush.bf16.msra.mxu0 %v9084_v34  ;;  %4188 = vmatpush.bf16.msra.mxu1 %v9087_v26 }
 0x627   :  { %4201 = vmatpush.bf16.msra.mxu2 %v9093_v61 }
 0x62a   :  { %4176 = vmatpush.bf16.msra.mxu0 %v9098_v58  ;;  %4189 = vmatpush.bf16.msra.mxu1 %v9100_v29 }
 0x62b   :  { %4202 = vmatpush.bf16.msra.mxu2 %v9107_v31 }
 0x62f   :  { %4203 = vmatpush.bf16.msra.mxu2 %v9121_v5 }
 0x634   :  { %3820 = vmatmul.bf16.gmra.mxu0 %v3601_v20  ;;  %3853 = vmatmul.bf16.gmra.mxu1 %v3601_v20 }
 0x635   :  { %3886 = vmatmul.bf16.gmra.mxu2 %v3601_v20  ;;  %3919 = vmatmul.bf16.gmra.mxu3 %v3601_v20  ;;  %v9091_v20 = vor.u32 %v7894_v57, %v7157_v40  ;;  %v7099_v57 = vld [vmem:[#allocation15] sm:$0xf] }
 0x636   :  { %v9125_v37 = vor.u32 %v7883_v19, %v7099_v57 }
 0x637   :  { %4214 = vmatpush.bf16.msra.mxu3 %v9091_v20 }
 0x63b   :  { %4215 = vmatpush.bf16.msra.mxu3 %v9103_v50 }
 0x63f   :  { %4216 = vmatpush.bf16.msra.mxu3 %v9119_v60 }
 0x644   :  { %3825 = vmatmul.bf16.gmra.mxu0 %v3602_v16  ;;  %3858 = vmatmul.bf16.gmra.mxu1 %v3602_v16 }
 0x645   :  { %3891 = vmatmul.bf16.gmra.mxu2 %v3602_v16  ;;  %3924 = vmatmul.bf16.gmra.mxu3 %v3602_v16  ;;  %v9109_v16 = vor.u32 %v7887_v43, %v7115_v24  ;;  %v7109_v24 = vld [vmem:[#allocation15 + $0x18] sm:$0xf0]  ;;  %v7884_v43 = vld [vmem:[#allocation15 + $0x14] sm:$0xf0] }
 0x647   :  { %4177 = vmatpush.bf16.msra.mxu0 %v9109_v16 }
 0x64b   :  { %4178 = vmatpush.bf16.msra.mxu0 %v9125_v37 }
 0x64f   :  { %4253 = vmatpush.bf16.msrb.mxu0 %v9034_v45 }
 0x653   :  { %4254 = vmatpush.bf16.msrb.mxu0 %v9045_v4 }
 0x654   :  { %3830 = vmatmul.bf16.gmra.mxu0 %v3603_v62  ;;  %3863 = vmatmul.bf16.gmra.mxu1 %v3603_v62 }
 0x655   :  { %3896 = vmatmul.bf16.gmra.mxu2 %v3603_v62  ;;  %3929 = vmatmul.bf16.gmra.mxu3 %v3603_v62  ;;  %v7117_v62 = vld [vmem:[#allocation15 + $0x30] sm:$0xf0] }
 0x656   :  { %v9112_v3 = vor.u32 %v7885_v9, %v7117_v62 }
 0x657   :  { %4255 = vmatpush.bf16.msrb.mxu0 %v9055_v33 }
 0x658   :  { %4190 = vmatpush.bf16.msra.mxu1 %v9112_v3 }
 0x65b   :  { %4256 = vmatpush.bf16.msrb.mxu0 %v9073_v42 }
 0x65f   :  { %4257 = vmatpush.bf16.msrb.mxu0 %v9084_v34 }
 0x663   :  { %4258 = vmatpush.bf16.msrb.mxu0 %v9098_v58 }
 0x667   :  { %4259 = vmatpush.bf16.msrb.mxu0 %v9109_v16 }
 0x66b   :  { %4260 = vmatpush.bf16.msrb.mxu0 %v9125_v37 }
 0x691   :  { %v3521_v35 = vpop.f32.mrf.mxu0  ;;  %v3534_v12 = vpop.f32.mrf.mxu1 }
 0x692   :  { %v3564_v11 = vadd.f32 %v3521_v35, %v9628_v22  ;;  %v3565_v17 = vadd.f32 %v3534_v12, %v9629_v30  ;;  %v7881_v35 = vld [vmem:[#allocation15 + $0x4] sm:$0xf]  ;;  %v9631_v12 = vld [vmem:[#allocation38_spill] sm:$0xff] }
 0x694   :  { %v3568_v51 = vsub.f32 0.0, %v3564_v11  ;;  %v3573_v10 = vsub.f32 0.0, %v3565_v17  ;;  %v9128_v11 = vor.u32 %v7881_v35, %v7101_v28 }
 0x696   :  { %v3569_v14 = vmul.f32 1.442695, %v3568_v51  ;;  %v3574_v39 = vmul.f32 1.442695, %v3573_v10  ;;  %4191 = vmatpush.bf16.msra.mxu1 %v9128_v11  ;;  %v7107_v51 = vld [vmem:[#allocation15 + $0x8] sm:$0xf]  ;;  %v9134_v10 = vor.u32 %v7882_v63, %v7109_v24 }
 0x697   :  { %v9137_v9 = vor.u32 %v7884_v43, %v7107_v51 }
 0x698   :  { %8119 = vpow2.f32 %v3569_v14  ;;  %v3547_v23 = vpop.f32.mrf.mxu2  ;;  %v3560_v15 = vpop.f32.mrf.mxu3  ;;  %4217 = vmatpush.bf16.msra.mxu3 %v9134_v10 }
 0x699   :  { %8121 = vpow2.f32 %v3574_v39  ;;  %v3567_v0 = vadd.f32 %v3560_v15, %v9630_v2  ;;  %v3523_v32 = vpop.f32.mrf.mxu0  ;;  %v3536_v25 = vpop.f32.mrf.mxu1  ;;  %v3566_v41 = vadd.f32 %v3547_v23, %v9631_v12  ;;  %4204 = vmatpush.bf16.msra.mxu2 %v9137_v9 }
 0x69a   :  { %4266 = vmatpush.bf16.msrb.mxu1 %v9036_v6 }
 0x69b   :  { %v3579_v40 = vsub.f32 0.0, %v3567_v0 }
 0x69c   :  { %4292 = vmatpush.bf16.msrb.mxu3 %v9038_v21 }
 0x69d   :  { %v3580_v22 = vmul.f32 1.442695, %v3579_v40  ;;  %4279 = vmatpush.bf16.msrb.mxu2 %v9041_v54 }
 0x69e   :  { %v8120_v30 = vpop.eup %8119  ;;  %4267 = vmatpush.bf16.msrb.mxu1 %v9047_v8 }
 0x69f   :  { %v8122_v17 = vpop.eup %8121  ;;  %v3571_v52 = vadd.f32 1.0, %v8120_v30  ;;  %8123 = vpow2.f32 %v3580_v22 }
 0x6a0   :  { %v3576_v59 = vadd.f32 1.0, %v8122_v17  ;;  %8125 = vtanh.f32 %v3566_v41  ;;  %v3549_v27 = vpop.f32.mrf.mxu2  ;;  %v3562_v1 = vpop.f32.mrf.mxu3  ;;  %4293 = vmatpush.bf16.msrb.mxu3 %v9050_v18 }
 0x6a1   :  { %8127 = vrcp.f32 %v3571_v52  ;;  %4280 = vmatpush.bf16.msrb.mxu2 %v9052_v46  ;;  %v3816_v7 = vpop.f32.mrf.mxu0  ;;  %v3849_v57 = vpop.f32.mrf.mxu1 }
 0x6a2   :  { %8129 = vrcp.f32 %v3576_v59  ;;  %4268 = vmatpush.bf16.msrb.mxu1 %v9059_v38 }
 0x6a4   :  { %4294 = vmatpush.bf16.msrb.mxu3 %v9061_v47 }
 0x6a5   :  { %v8124_v62 = vpop.eup %8123  ;;  %4281 = vmatpush.bf16.msrb.mxu2 %v9071_v13 }
 0x6a6   :  { %v8126_v14 = vpop.eup %8125  ;;  %v3582_v2 = vadd.f32 1.0, %v8124_v62  ;;  %4269 = vmatpush.bf16.msrb.mxu1 %v9075_v44 }
 0x6a7   :  { %v8128_v39 = vpop.eup %8127 }
 0x6a8   :  { %v8130_v23 = vpop.eup %8129  ;;  %v3585_v15 = vmul.f32 %v8128_v39, %v8126_v14  ;;  %8131 = vrcp.f32 %v3582_v2  ;;  %4295 = vmatpush.bf16.msrb.mxu3 %v9080_v48  ;;  %v3882_v40 = vpop.f32.mrf.mxu2 }
 0x6a9   :  { %v3584_v0 = vmul.f32 %v8130_v23, %v9023_v36  ;;  %4282 = vmatpush.bf16.msrb.mxu2 %v9082_v55  ;;  %v3915_v19 = vpop.f32.mrf.mxu3  ;;  %v9207_v35 = vpop.f32.mrf.mxu0 }
 0x6aa   :  { %4270 = vmatpush.bf16.msrb.mxu1 %v9087_v26  ;;  %v9209_v12 = vpop.f32.mrf.mxu1 }
 0x6ab   :  { %v3586_v32 = vadd.f32 %v3585_v15, %v3584_v0 }
 0x6ac   :  { %4296 = vmatpush.bf16.msrb.mxu3 %v9091_v20 }
 0x6ad   :  { %8133 = vtanh.f32 %v3586_v32  ;;  %4283 = vmatpush.bf16.msrb.mxu2 %v9093_v61 }
 0x6ae   :  { %v8132_v36 = vpop.eup %8131  ;;  %4271 = vmatpush.bf16.msrb.mxu1 %v9100_v29 }
 0x6b0   :  { %4297 = vmatpush.bf16.msrb.mxu3 %v9103_v50  ;;  %v9211_v41 = vpop.f32.mrf.mxu2 }
 0x6b1   :  { %4284 = vmatpush.bf16.msrb.mxu2 %v9107_v31  ;;  %v9213_v28 = vpop.f32.mrf.mxu3  ;;  %v9215_v22 = vpop.f32.mrf.mxu0 }
 0x6b2   :  { %4272 = vmatpush.bf16.msrb.mxu1 %v9112_v3  ;;  %v9217_v30 = vpop.f32.mrf.mxu1 }
 0x6b3   :  { %v8134_v25 = vpop.eup %8133 }
 0x6b4   :  { %v3588_v53 = vmul.f32 %v8134_v25, %v8132_v36  ;;  %4298 = vmatpush.bf16.msrb.mxu3 %v9119_v60 }
 0x6b5   :  { %4285 = vmatpush.bf16.msrb.mxu2 %v9121_v5 }
 0x6b6   :  { %v3604_v49 = vpack.c.bf16 %v3588_v53, %v3588_v53  ;;  %4273 = vmatpush.bf16.msrb.mxu1 %v9128_v11 }
 0x6b8   :  { %3835 = vmatmul.bf16.gmra.mxu0 %v3604_v49  ;;  %3868 = vmatmul.bf16.gmra.mxu1 %v3604_v49  ;;  %v9219_v17 = vpop.f32.mrf.mxu2 }
 0x6b9   :  { %3901 = vmatmul.bf16.gmra.mxu2 %v3604_v49  ;;  %3934 = vmatmul.bf16.gmra.mxu3 %v3604_v49  ;;  %v9221_v52 = vpop.f32.mrf.mxu3  ;;  %v9223_v59 = vpop.f32.mrf.mxu0 }
 0x6ba   :  { %4299 = vmatpush.bf16.msrb.mxu3 %v9134_v10  ;;  %4286 = vmatpush.bf16.msrb.mxu2 %v9137_v9  ;;  %v9225_v27 = vpop.f32.mrf.mxu1 }
 0x6bb   :  { %9633 = vst [vmem:[#allocation26_spill] sm:$0xff] %v9225_v27 }
 0x6c0   :  { %v9227_v1 = vpop.f32.mrf.mxu2 }
 0x6c1   :  { %9634 = vst [vmem:[#allocation34_spill] sm:$0xff] %v9227_v1  ;;  %v9229_v63 = vpop.f32.mrf.mxu3  ;;  %v9231_v24 = vpop.f32.mrf.mxu0 }
 0x6c2   :  { %9635 = vst [vmem:[#allocation32_spill] sm:$0xff] %v9229_v63  ;;  %v9233_v51 = vpop.f32.mrf.mxu1 }
 0x6c3   :  { %9636 = vst [vmem:[#allocation25_spill] sm:$0xff] %v9231_v24 }
 0x6c4   :  { %9637 = vst [vmem:[#allocation28_spill] sm:$0xff] %v9233_v51 }
 0x6c8   :  { %4179 = vmatmul.bf16.vlgmr.msra.gmra.mxu0 %v9632_v56  ;;  %4192 = vmatmul.bf16.vlgmr.msra.gmra.mxu1 %v9632_v56  ;;  %v9235_v43 = vpop.f32.mrf.mxu2 }
 0x6c9   :  { %4205 = vmatmul.bf16.vlgmr.msra.gmra.mxu2 %v9632_v56  ;;  %4218 = vmatmul.bf16.vlgmr.msra.gmra.mxu3 %v9632_v56  ;;  %9638 = vst [vmem:[#allocation27_spill] sm:$0xff] %v9235_v43  ;;  %v9237_v62 = vpop.f32.mrf.mxu3  ;;  %v9239_v14 = vpop.f32.mrf.mxu0 }
 0x6ca   :  { %4335 = vmatpush.bf16.msra.mxu0 %v9034_v45  ;;  %4348 = vmatpush.bf16.msra.mxu1 %v9036_v6  ;;  %9639 = vst [vmem:[#allocation29_spill] sm:$0xff] %v9237_v62  ;;  %v9241_v39 = vpop.f32.mrf.mxu1 }
 0x6cb   :  { %4361 = vmatpush.bf16.msra.mxu2 %v9041_v54  ;;  %4374 = vmatpush.bf16.msra.mxu3 %v9038_v21  ;;  %9640 = vst [vmem:[#allocation36_spill] sm:$0xff] %v9239_v14 }
 0x6cc   :  { %9641 = vst [vmem:[#allocation33_spill] sm:$0xff] %v9241_v39 }
 0x6ce   :  { %4336 = vmatpush.bf16.msra.mxu0 %v9045_v4  ;;  %4349 = vmatpush.bf16.msra.mxu1 %v9047_v8 }
 0x6cf   :  { %4362 = vmatpush.bf16.msra.mxu2 %v9052_v46  ;;  %4375 = vmatpush.bf16.msra.mxu3 %v9050_v18 }
 0x6d0   :  { %v9243_v23 = vpop.f32.mrf.mxu2 }
 0x6d1   :  { %9642 = vst [vmem:[#allocation37_spill] sm:$0xff] %v9243_v23  ;;  %v9245_v15 = vpop.f32.mrf.mxu3  ;;  %v9247_v2 = vpop.f32.mrf.mxu0 }
 0x6d2   :  { %4337 = vmatpush.bf16.msra.mxu0 %v9055_v33  ;;  %4350 = vmatpush.bf16.msra.mxu1 %v9059_v38  ;;  %9643 = vst [vmem:[#allocation35_spill] sm:$0xff] %v9245_v15  ;;  %v9249_v0 = vpop.f32.mrf.mxu1 }
 0x6d3   :  { %4363 = vmatpush.bf16.msra.mxu2 %v9071_v13  ;;  %4376 = vmatpush.bf16.msra.mxu3 %v9061_v47  ;;  %9644 = vst [vmem:[#allocation30_spill] sm:$0xff] %v9247_v2 }
 0x6d4   :  { %9645 = vst [vmem:[#allocation31_spill] sm:$0xff] %v9249_v0 }
 0x6d6   :  { %4338 = vmatpush.bf16.msra.mxu0 %v9073_v42  ;;  %4351 = vmatpush.bf16.msra.mxu1 %v9075_v44 }
 0x6d7   :  { %4364 = vmatpush.bf16.msra.mxu2 %v9082_v55  ;;  %4377 = vmatpush.bf16.msra.mxu3 %v9080_v48 }
 0x6d8   :  { %v9251_v32 = vpop.f32.mrf.mxu2 }
 0x6d9   :  { %9646 = vst [vmem:[#allocation39_spill] sm:$0xff] %v9251_v32  ;;  %v9253_v36 = vpop.f32.mrf.mxu3  ;;  %v9255_v25 = vpop.f32.mrf.mxu0  ;;  %v3637_v32 = vld [vmem:[%s9594_s8] sm:$0xf] }
 0x6da   :  { %4339 = vmatpush.bf16.msra.mxu0 %v9084_v34  ;;  %4352 = vmatpush.bf16.msra.mxu1 %v9087_v26  ;;  %9647 = vst [vmem:[#allocation38_spill] sm:$0xff] %v9253_v36  ;;  %v9257_v53 = vpop.f32.mrf.mxu1  ;;  %v9274_v0 = vperm.slane %v3637_v32, 0  ;;  %v9280_v62 = vperm.slane %v3637_v32, 3 }
 0x6db   :  { %4365 = vmatpush.bf16.msra.mxu2 %v9093_v61  ;;  %4378 = vmatpush.bf16.msra.mxu3 %v9091_v20  ;;  %9648 = vst [vmem:[#allocation40_spill] sm:$0xff] %v9255_v25 }
 0x6dc   :  { %9649 = vst [vmem:[#allocation41_spill] sm:$0xff] %v9257_v53  ;;  %v9276_v53 = vperm.slane %v3637_v32, 1  ;;  %v3916_v63 = vadd.f32 %v3915_v19, %v9280_v62 }
 0x6de   :  { %4340 = vmatpush.bf16.msra.mxu0 %v9098_v58  ;;  %4353 = vmatpush.bf16.msra.mxu1 %v9100_v29 }
 0x6df   :  { %4366 = vmatpush.bf16.msra.mxu2 %v9107_v31  ;;  %4379 = vmatpush.bf16.msra.mxu3 %v9103_v50 }
 0x6e0   :  { %v9259_v49 = vpop.f32.mrf.mxu2 }
 0x6e1   :  { %9650 = vst [vmem:[#allocation42_spill] sm:$0xff] %v9259_v49  ;;  %v9261_v56 = vpop.f32.mrf.mxu3  ;;  %v3817_v49 = vadd.f32 %v3816_v7, %v9274_v0 }
 0x6e2   :  { %4341 = vmatpush.bf16.msra.mxu0 %v9109_v16  ;;  %4354 = vmatpush.bf16.msra.mxu1 %v9112_v3  ;;  %9651 = vst [vmem:[#allocation43_spill] sm:$0xff] %v9261_v56 }
 0x6e3   :  { %4367 = vmatpush.bf16.msra.mxu2 %v9121_v5  ;;  %4380 = vmatpush.bf16.msra.mxu3 %v9119_v60 }
 0x6e6   :  { %4342 = vmatpush.bf16.msra.mxu0 %v9125_v37  ;;  %4355 = vmatpush.bf16.msra.mxu1 %v9128_v11 }
 0x6e7   :  { %4368 = vmatpush.bf16.msra.mxu2 %v9137_v9  ;;  %4381 = vmatpush.bf16.msra.mxu3 %v9134_v10 }
 0x735   :  { %v9263_v39 = vpop.f32.mrf.mxu0  ;;  %v9265_v23 = vpop.f32.mrf.mxu1 }
 0x736   :  { %9652 = vst [vmem:[#allocation44_spill] sm:$0xff] %v9263_v39  ;;  %v3850_v39 = vadd.f32 %v3849_v57, %v9276_v53 }
 0x737   :  { %9653 = vst [vmem:[#allocation45_spill] sm:$0xff] %v9265_v23 }
 0x73c   :  { %v9267_v15 = vpop.f32.mrf.mxu2  ;;  %v9269_v2 = vpop.f32.mrf.mxu3 }
 0x73d   :  { %9654 = vst [vmem:[#allocation46_spill] sm:$0xff] %v9267_v15  ;;  %v3838_v36 = vpop.f32.mrf.mxu0  ;;  %v3871_v25 = vpop.f32.mrf.mxu1 }
 0x73e   :  { %9655 = vst [vmem:[#allocation47_spill] sm:$0xff] %v9269_v2  ;;  %v9282_v36 = vperm.slane %v3637_v32, 2 }
 0x744   :  { %v3904_v56 = vpop.f32.mrf.mxu2  ;;  %v3937_v23 = vpop.f32.mrf.mxu3 }
 0x745   :  { %v4180_v14 = vpop.f32.mrf.mxu0  ;;  %v4193_v15 = vpop.f32.mrf.mxu1 }
 0x746   :  { %v4223_v43 = vadd.f32 %v4180_v14, %v3817_v49  ;;  %v4224_v2 = vadd.f32 %v4193_v15, %v3850_v39  ;;  %v3883_v14 = vadd.f32 %v3882_v40, %v9282_v36 }
 0x748   :  { %v4227_v51 = vsub.f32 0.0, %v4223_v43  ;;  %v4232_v24 = vsub.f32 0.0, %v4224_v2 }
 0x74a   :  { %v4228_v25 = vmul.f32 1.442695, %v4227_v51  ;;  %v4233_v1 = vmul.f32 1.442695, %v4232_v24 }
 0x74c   :  { %8135 = vpow2.f32 %v4228_v25  ;;  %v4206_v7 = vpop.f32.mrf.mxu2  ;;  %v4219_v27 = vpop.f32.mrf.mxu3 }
 0x74d   :  { %8137 = vpow2.f32 %v4233_v1  ;;  %v4226_v57 = vadd.f32 %v4219_v27, %v3916_v63  ;;  %v4182_v23 = vpop.f32.mrf.mxu0  ;;  %v4195_v56 = vpop.f32.mrf.mxu1  ;;  %v4225_v15 = vadd.f32 %v4206_v7, %v3883_v14 }
 0x74f   :  { %v4238_v39 = vsub.f32 0.0, %v4226_v57 }
 0x751   :  { %v4239_v49 = vmul.f32 1.442695, %v4238_v39 }
 0x752   :  { %v8136_v43 = vpop.eup %8135 }
 0x753   :  { %v8138_v2 = vpop.eup %8137  ;;  %v4230_v32 = vadd.f32 1.0, %v8136_v43  ;;  %8139 = vpow2.f32 %v4239_v49  ;;  %v3819_v49 = vadd.f32 %v9207_v35, %v9274_v0  ;;  %v3852_v43 = vadd.f32 %v9209_v12, %v9276_v53 }
 0x754   :  { %v4235_v51 = vadd.f32 1.0, %v8138_v2  ;;  %8141 = vtanh.f32 %v4225_v15  ;;  %v4208_v24 = vpop.f32.mrf.mxu2  ;;  %v4221_v19 = vpop.f32.mrf.mxu3  ;;  %v3885_v12 = vadd.f32 %v9211_v41, %v9282_v36 }
 0x755   :  { %8143 = vrcp.f32 %v4230_v32 }
 0x756   :  { %8145 = vrcp.f32 %v4235_v51 }
 0x759   :  { %v8140_v25 = vpop.eup %8139 }
 0x75a   :  { %v8142_v1 = vpop.eup %8141  ;;  %v4241_v56 = vadd.f32 1.0, %v8140_v25 }
 0x75b   :  { %v8144_v27 = vpop.eup %8143 }
 0x75c   :  { %v8146_v63 = vpop.eup %8145  ;;  %v4244_v23 = vmul.f32 %v8144_v27, %v8142_v1  ;;  %8147 = vrcp.f32 %v4241_v56 }
 0x75d   :  { %v4243_v40 = vmul.f32 0.0, %v8146_v63  ;;  %v3918_v63 = vadd.f32 %v9213_v28, %v9280_v62 }
 0x75f   :  { %v9286_v57 = vadd.f32 %v4244_v23, %v4243_v40 }
 0x761   :  { %8149 = vtanh.f32 %v9286_v57 }
 0x762   :  { %v8148_v7 = vpop.eup %8147 }
 0x767   :  { %v8150_v14 = vpop.eup %8149 }
 0x768   :  { %v4247_v39 = vmul.f32 %v8150_v14, %v8148_v7 }
 0x76a   :  { %v4252_v15 = vpack.c.bf16 %v4247_v39, %v4247_v39 }
 0x76c   :  { %4261 = vmatmul.bf16.vlgmr.msrb.gmra.mxu0 %v4252_v15  ;;  %4274 = vmatmul.bf16.vlgmr.msrb.gmra.mxu1 %v4252_v15 }
 0x76d   :  { %4287 = vmatmul.bf16.vlgmr.msrb.gmra.mxu2 %v4252_v15  ;;  %4300 = vmatmul.bf16.vlgmr.msrb.gmra.mxu3 %v4252_v15 }
 0x76e   :  { %4417 = vmatpush.bf16.msrb.mxu0 %v9034_v45  ;;  %4430 = vmatpush.bf16.msrb.mxu1 %v9036_v6 }
 0x76f   :  { %4443 = vmatpush.bf16.msrb.mxu2 %v9041_v54  ;;  %4456 = vmatpush.bf16.msrb.mxu3 %v9038_v21 }
 0x772   :  { %4418 = vmatpush.bf16.msrb.mxu0 %v9045_v4  ;;  %4431 = vmatpush.bf16.msrb.mxu1 %v9047_v8 }
 0x773   :  { %4444 = vmatpush.bf16.msrb.mxu2 %v9052_v46  ;;  %4457 = vmatpush.bf16.msrb.mxu3 %v9050_v18 }
 0x776   :  { %4419 = vmatpush.bf16.msrb.mxu0 %v9055_v33  ;;  %4432 = vmatpush.bf16.msrb.mxu1 %v9059_v38 }
 0x777   :  { %4445 = vmatpush.bf16.msrb.mxu2 %v9071_v13  ;;  %4458 = vmatpush.bf16.msrb.mxu3 %v9061_v47 }
 0x77a   :  { %4420 = vmatpush.bf16.msrb.mxu0 %v9073_v42  ;;  %4433 = vmatpush.bf16.msrb.mxu1 %v9075_v44 }
 0x77b   :  { %4446 = vmatpush.bf16.msrb.mxu2 %v9082_v55  ;;  %4459 = vmatpush.bf16.msrb.mxu3 %v9080_v48 }
 0x77e   :  { %4421 = vmatpush.bf16.msrb.mxu0 %v9084_v34  ;;  %4434 = vmatpush.bf16.msrb.mxu1 %v9087_v26 }
 0x77f   :  { %4447 = vmatpush.bf16.msrb.mxu2 %v9093_v61  ;;  %4460 = vmatpush.bf16.msrb.mxu3 %v9091_v20 }
 0x782   :  { %4422 = vmatpush.bf16.msrb.mxu0 %v9098_v58  ;;  %4435 = vmatpush.bf16.msrb.mxu1 %v9100_v29 }
 0x783   :  { %4448 = vmatpush.bf16.msrb.mxu2 %v9107_v31  ;;  %4461 = vmatpush.bf16.msrb.mxu3 %v9103_v50 }
 0x786   :  { %4423 = vmatpush.bf16.msrb.mxu0 %v9109_v16  ;;  %4436 = vmatpush.bf16.msrb.mxu1 %v9112_v3 }
 0x787   :  { %4449 = vmatpush.bf16.msrb.mxu2 %v9121_v5  ;;  %4462 = vmatpush.bf16.msrb.mxu3 %v9119_v60 }
 0x78a   :  { %4424 = vmatpush.bf16.msrb.mxu0 %v9125_v37  ;;  %4437 = vmatpush.bf16.msrb.mxu1 %v9128_v11 }
 0x78b   :  { %4450 = vmatpush.bf16.msrb.mxu2 %v9137_v9  ;;  %4463 = vmatpush.bf16.msrb.mxu3 %v9134_v10 }
 0x7e9   :  { %v4262_v2 = vpop.f32.mrf.mxu0  ;;  %v4275_v32 = vpop.f32.mrf.mxu1 }
 0x7ea   :  { %v4305_v51 = vadd.f32 %v4262_v2, %v3819_v49  ;;  %v4306_v24 = vadd.f32 %v4275_v32, %v3852_v43 }
 0x7ec   :  { %v4309_v19 = vsub.f32 0.0, %v4305_v51  ;;  %v4314_v25 = vsub.f32 0.0, %v4306_v24 }
 0x7ee   :  { %v4310_v1 = vmul.f32 1.442695, %v4309_v19  ;;  %v4315_v27 = vmul.f32 1.442695, %v4314_v25 }
 0x7f0   :  { %8151 = vpow2.f32 %v4310_v1  ;;  %v4288_v23 = vpop.f32.mrf.mxu2  ;;  %v4301_v56 = vpop.f32.mrf.mxu3 }
 0x7f1   :  { %8153 = vpow2.f32 %v4315_v27  ;;  %v4308_v40 = vadd.f32 %v4301_v56, %v3918_v63  ;;  %v4264_v35 = vpop.f32.mrf.mxu0  ;;  %v4277_v7 = vpop.f32.mrf.mxu1  ;;  %v4307_v39 = vadd.f32 %v4288_v23, %v3885_v12  ;;  %v3855_v12 = vadd.f32 %v9217_v30, %v9276_v53 }
 0x7f2   :  { %v3888_v30 = vadd.f32 %v9219_v17, %v9282_v36 }
 0x7f3   :  { %v4320_v14 = vsub.f32 0.0, %v4308_v40 }
 0x7f5   :  { %v4321_v15 = vmul.f32 1.442695, %v4320_v14 }
 0x7f6   :  { %v8152_v49 = vpop.eup %8151 }
 0x7f7   :  { %v8154_v43 = vpop.eup %8153  ;;  %v4312_v2 = vadd.f32 1.0, %v8152_v49  ;;  %8155 = vpow2.f32 %v4321_v15 }
 0x7f8   :  { %v4317_v32 = vadd.f32 1.0, %v8154_v43  ;;  %8157 = vtanh.f32 %v4307_v39  ;;  %v4290_v28 = vpop.f32.mrf.mxu2  ;;  %v4303_v51 = vpop.f32.mrf.mxu3 }
 0x7f9   :  { %8159 = vrcp.f32 %v4312_v2  ;;  %v3921_v51 = vadd.f32 %v9221_v52, %v9280_v62 }
 0x7fa   :  { %8161 = vrcp.f32 %v4317_v32 }
 0x7fd   :  { %v8156_v24 = vpop.eup %8155 }
 0x7fe   :  { %v8158_v19 = vpop.eup %8157  ;;  %v4323_v63 = vadd.f32 1.0, %v8156_v24 }
 0x7ff   :  { %v8160_v25 = vpop.eup %8159 }
 0x800   :  { %v8162_v1 = vpop.eup %8161  ;;  %v4326_v27 = vmul.f32 %v8160_v25, %v8158_v19  ;;  %8163 = vrcp.f32 %v4323_v63 }
 0x801   :  { %v4325_v41 = vmul.f32 %v8162_v1, %v9286_v57  ;;  %v3822_v57 = vadd.f32 %v9215_v22, %v9274_v0 }
 0x803   :  { %v9330_v23 = vadd.f32 %v4326_v27, %v4325_v41 }
 0x805   :  { %8165 = vtanh.f32 %v9330_v23 }
 0x806   :  { %v8164_v56 = vpop.eup %8163 }
 0x80b   :  { %v8166_v40 = vpop.eup %8165 }
 0x80c   :  { %v4329_v35 = vmul.f32 %v8166_v40, %v8164_v56 }
 0x80e   :  { %v4334_v7 = vpack.c.bf16 %v4329_v35, %v4329_v35 }
 0x810   :  { %4343 = vmatmul.bf16.vlgmr.msra.gmra.mxu0 %v4334_v7  ;;  %4356 = vmatmul.bf16.vlgmr.msra.gmra.mxu1 %v4334_v7 }
 0x811   :  { %4369 = vmatmul.bf16.vlgmr.msra.gmra.mxu2 %v4334_v7  ;;  %4382 = vmatmul.bf16.vlgmr.msra.gmra.mxu3 %v4334_v7 }
 0x812   :  { %4499 = vmatpush.bf16.msra.mxu0 %v9034_v45  ;;  %4512 = vmatpush.bf16.msra.mxu1 %v9036_v6 }
 0x813   :  { %4525 = vmatpush.bf16.msra.mxu2 %v9041_v54  ;;  %4538 = vmatpush.bf16.msra.mxu3 %v9038_v21 }
 0x816   :  { %4500 = vmatpush.bf16.msra.mxu0 %v9045_v4  ;;  %4513 = vmatpush.bf16.msra.mxu1 %v9047_v8 }
 0x817   :  { %4526 = vmatpush.bf16.msra.mxu2 %v9052_v46  ;;  %4539 = vmatpush.bf16.msra.mxu3 %v9050_v18 }
 0x81a   :  { %4501 = vmatpush.bf16.msra.mxu0 %v9055_v33  ;;  %4514 = vmatpush.bf16.msra.mxu1 %v9059_v38 }
 0x81b   :  { %4527 = vmatpush.bf16.msra.mxu2 %v9071_v13  ;;  %4540 = vmatpush.bf16.msra.mxu3 %v9061_v47 }
 0x81e   :  { %4502 = vmatpush.bf16.msra.mxu0 %v9073_v42  ;;  %4515 = vmatpush.bf16.msra.mxu1 %v9075_v44 }
 0x81f   :  { %4528 = vmatpush.bf16.msra.mxu2 %v9082_v55  ;;  %4541 = vmatpush.bf16.msra.mxu3 %v9080_v48 }
 0x822   :  { %4503 = vmatpush.bf16.msra.mxu0 %v9084_v34  ;;  %4516 = vmatpush.bf16.msra.mxu1 %v9087_v26 }
 0x823   :  { %4529 = vmatpush.bf16.msra.mxu2 %v9093_v61  ;;  %4542 = vmatpush.bf16.msra.mxu3 %v9091_v20 }
 0x826   :  { %4504 = vmatpush.bf16.msra.mxu0 %v9098_v58  ;;  %4517 = vmatpush.bf16.msra.mxu1 %v9100_v29 }
 0x827   :  { %4530 = vmatpush.bf16.msra.mxu2 %v9107_v31  ;;  %4543 = vmatpush.bf16.msra.mxu3 %v9103_v50 }
 0x82a   :  { %4505 = vmatpush.bf16.msra.mxu0 %v9109_v16  ;;  %4518 = vmatpush.bf16.msra.mxu1 %v9112_v3 }
 0x82b   :  { %4531 = vmatpush.bf16.msra.mxu2 %v9121_v5  ;;  %4544 = vmatpush.bf16.msra.mxu3 %v9119_v60 }
 0x82e   :  { %4506 = vmatpush.bf16.msra.mxu0 %v9125_v37  ;;  %4519 = vmatpush.bf16.msra.mxu1 %v9128_v11 }
 0x82f   :  { %4532 = vmatpush.bf16.msra.mxu2 %v9137_v9  ;;  %4545 = vmatpush.bf16.msra.mxu3 %v9134_v10 }
 0x88d   :  { %v4344_v14 = vpop.f32.mrf.mxu0  ;;  %v4357_v39 = vpop.f32.mrf.mxu1 }
 0x88e   :  { %v4387_v15 = vadd.f32 %v4344_v14, %v3822_v57  ;;  %v4388_v49 = vadd.f32 %v4357_v39, %v3855_v12 }
 0x890   :  { %v4391_v43 = vsub.f32 0.0, %v4387_v15  ;;  %v4396_v2 = vsub.f32 0.0, %v4388_v49 }
 0x892   :  { %v4392_v32 = vmul.f32 1.442695, %v4391_v43  ;;  %v4397_v28 = vmul.f32 1.442695, %v4396_v2 }
 0x894   :  { %8167 = vpow2.f32 %v4392_v32  ;;  %v4370_v24 = vpop.f32.mrf.mxu2  ;;  %v4383_v19 = vpop.f32.mrf.mxu3 }
 0x895   :  { %8169 = vpow2.f32 %v4397_v28  ;;  %v4390_v25 = vadd.f32 %v4383_v19, %v3921_v51  ;;  %v4346_v22 = vpop.f32.mrf.mxu0  ;;  %v4359_v1 = vpop.f32.mrf.mxu1  ;;  %v4389_v63 = vadd.f32 %v4370_v24, %v3888_v30  ;;  %v9656_v19 = vld [vmem:[#allocation26_spill] sm:$0xff] }
 0x897   :  { %v4402_v27 = vsub.f32 0.0, %v4390_v25  ;;  %v3857_v25 = vadd.f32 %v9656_v19, %v9276_v53 }
 0x899   :  { %v4403_v41 = vmul.f32 1.442695, %v4402_v27 }
 0x89a   :  { %v8168_v56 = vpop.eup %8167 }
 0x89b   :  { %v8170_v40 = vpop.eup %8169  ;;  %v4394_v35 = vadd.f32 1.0, %v8168_v56  ;;  %8171 = vpow2.f32 %v4403_v41 }
 0x89c   :  { %v4399_v7 = vadd.f32 1.0, %v8170_v40  ;;  %8173 = vtanh.f32 %v4389_v63  ;;  %v4372_v52 = vpop.f32.mrf.mxu2  ;;  %v4385_v57 = vpop.f32.mrf.mxu3 }
 0x89d   :  { %8175 = vrcp.f32 %v4394_v35  ;;  %v9657_v35 = vld [vmem:[#allocation32_spill] sm:$0xff] }
 0x89e   :  { %8177 = vrcp.f32 %v4399_v7  ;;  %v3923_v7 = vadd.f32 %v9657_v35, %v9280_v62 }
 0x8a1   :  { %v8172_v12 = vpop.eup %8171 }
 0x8a2   :  { %v8174_v14 = vpop.eup %8173  ;;  %v4405_v43 = vadd.f32 1.0, %v8172_v12 }
 0x8a3   :  { %v8176_v39 = vpop.eup %8175 }
 0x8a4   :  { %v8178_v15 = vpop.eup %8177  ;;  %v4408_v49 = vmul.f32 %v8176_v39, %v8174_v14  ;;  %8179 = vrcp.f32 %v4405_v43  ;;  %v9658_v39 = vld [vmem:[#allocation34_spill] sm:$0xff] }
 0x8a5   :  { %v4407_v17 = vmul.f32 %v8178_v15, %v9330_v23  ;;  %v3824_v23 = vadd.f32 %v9223_v59, %v9274_v0  ;;  %v3890_v15 = vadd.f32 %v9658_v39, %v9282_v36 }
 0x8a7   :  { %v9374_v2 = vadd.f32 %v4408_v49, %v4407_v17 }
 0x8a9   :  { %8181 = vtanh.f32 %v9374_v2 }
 0x8aa   :  { %v8180_v32 = vpop.eup %8179 }
 0x8af   :  { %v8182_v28 = vpop.eup %8181 }
 0x8b0   :  { %v4411_v51 = vmul.f32 %v8182_v28, %v8180_v32 }
 0x8b2   :  { %v4416_v24 = vpack.c.bf16 %v4411_v51, %v4411_v51 }
 0x8b4   :  { %4425 = vmatmul.bf16.vlgmr.msrb.gmra.mxu0 %v4416_v24  ;;  %4438 = vmatmul.bf16.vlgmr.msrb.gmra.mxu1 %v4416_v24 }
 0x8b5   :  { %4451 = vmatmul.bf16.vlgmr.msrb.gmra.mxu2 %v4416_v24  ;;  %4464 = vmatmul.bf16.vlgmr.msrb.gmra.mxu3 %v4416_v24 }
 0x8b6   :  { %4581 = vmatpush.bf16.msrb.mxu0 %v9034_v45  ;;  %4594 = vmatpush.bf16.msrb.mxu1 %v9036_v6 }
 0x8b7   :  { %4607 = vmatpush.bf16.msrb.mxu2 %v9041_v54  ;;  %4620 = vmatpush.bf16.msrb.mxu3 %v9038_v21 }
 0x8ba   :  { %4582 = vmatpush.bf16.msrb.mxu0 %v9045_v4  ;;  %4595 = vmatpush.bf16.msrb.mxu1 %v9047_v8 }
 0x8bb   :  { %4608 = vmatpush.bf16.msrb.mxu2 %v9052_v46  ;;  %4621 = vmatpush.bf16.msrb.mxu3 %v9050_v18 }
 0x8be   :  { %4583 = vmatpush.bf16.msrb.mxu0 %v9055_v33  ;;  %4596 = vmatpush.bf16.msrb.mxu1 %v9059_v38 }
 0x8bf   :  { %4609 = vmatpush.bf16.msrb.mxu2 %v9071_v13  ;;  %4622 = vmatpush.bf16.msrb.mxu3 %v9061_v47 }
 0x8c2   :  { %4584 = vmatpush.bf16.msrb.mxu0 %v9073_v42  ;;  %4597 = vmatpush.bf16.msrb.mxu1 %v9075_v44 }
 0x8c3   :  { %4610 = vmatpush.bf16.msrb.mxu2 %v9082_v55  ;;  %4623 = vmatpush.bf16.msrb.mxu3 %v9080_v48 }
 0x8c6   :  { %4585 = vmatpush.bf16.msrb.mxu0 %v9084_v34  ;;  %4598 = vmatpush.bf16.msrb.mxu1 %v9087_v26 }
 0x8c7   :  { %4611 = vmatpush.bf16.msrb.mxu2 %v9093_v61  ;;  %4624 = vmatpush.bf16.msrb.mxu3 %v9091_v20 }
 0x8ca   :  { %4586 = vmatpush.bf16.msrb.mxu0 %v9098_v58  ;;  %4599 = vmatpush.bf16.msrb.mxu1 %v9100_v29 }
 0x8cb   :  { %4612 = vmatpush.bf16.msrb.mxu2 %v9107_v31  ;;  %4625 = vmatpush.bf16.msrb.mxu3 %v9103_v50 }
 0x8ce   :  { %4587 = vmatpush.bf16.msrb.mxu0 %v9109_v16  ;;  %4600 = vmatpush.bf16.msrb.mxu1 %v9112_v3 }
 0x8cf   :  { %4613 = vmatpush.bf16.msrb.mxu2 %v9121_v5  ;;  %4626 = vmatpush.bf16.msrb.mxu3 %v9119_v60 }
 0x8d2   :  { %4588 = vmatpush.bf16.msrb.mxu0 %v9125_v37  ;;  %4601 = vmatpush.bf16.msrb.mxu1 %v9128_v11 }
 0x8d3   :  { %4614 = vmatpush.bf16.msrb.mxu2 %v9137_v9  ;;  %4627 = vmatpush.bf16.msrb.mxu3 %v9134_v10 }
 0x931   :  { %v4426_v22 = vpop.f32.mrf.mxu0  ;;  %v4439_v1 = vpop.f32.mrf.mxu1 }
 0x932   :  { %v4469_v30 = vadd.f32 %v4426_v22, %v3824_v23  ;;  %v4470_v27 = vadd.f32 %v4439_v1, %v3857_v25 }
 0x934   :  { %v4473_v63 = vsub.f32 0.0, %v4469_v30  ;;  %v4478_v41 = vsub.f32 0.0, %v4470_v27 }
 0x936   :  { %v4474_v56 = vmul.f32 1.442695, %v4473_v63  ;;  %v4479_v40 = vmul.f32 1.442695, %v4478_v41 }
 0x938   :  { %8183 = vpow2.f32 %v4474_v56  ;;  %v4452_v52 = vpop.f32.mrf.mxu2  ;;  %v4465_v57 = vpop.f32.mrf.mxu3 }
 0x939   :  { %8185 = vpow2.f32 %v4479_v40  ;;  %v4472_v12 = vadd.f32 %v4465_v57, %v3923_v7  ;;  %v4428_v59 = vpop.f32.mrf.mxu0  ;;  %v4441_v14 = vpop.f32.mrf.mxu1  ;;  %v4471_v43 = vadd.f32 %v4452_v52, %v3890_v15 }
 0x93b   :  { %v4484_v49 = vsub.f32 0.0, %v4472_v12  ;;  %v9660_v12 = vld [vmem:[#allocation28_spill] sm:$0xff] }
 0x93c   :  { %v3860_v59 = vadd.f32 %v9660_v12, %v9276_v53 }
 0x93d   :  { %v4485_v17 = vmul.f32 1.442695, %v4484_v49 }
 0x93e   :  { %v8184_v32 = vpop.eup %8183 }
 0x93f   :  { %v8186_v28 = vpop.eup %8185  ;;  %v4476_v51 = vadd.f32 1.0, %v8184_v32  ;;  %8187 = vpow2.f32 %v4485_v17 }
 0x940   :  { %v4481_v24 = vadd.f32 1.0, %v8186_v28  ;;  %8189 = vtanh.f32 %v4471_v43  ;;  %v4454_v23 = vpop.f32.mrf.mxu2  ;;  %v4467_v19 = vpop.f32.mrf.mxu3 }
 0x941   :  { %8191 = vrcp.f32 %v4476_v51  ;;  %v9661_v51 = vld [vmem:[#allocation29_spill] sm:$0xff] }
 0x942   :  { %8193 = vrcp.f32 %v4481_v24  ;;  %v3926_v24 = vadd.f32 %v9661_v51, %v9280_v62 }
 0x945   :  { %v8188_v25 = vpop.eup %8187 }
 0x946   :  { %v8190_v22 = vpop.eup %8189  ;;  %v4487_v63 = vadd.f32 1.0, %v8188_v25 }
 0x947   :  { %v8192_v1 = vpop.eup %8191 }
 0x948   :  { %v8194_v30 = vpop.eup %8193  ;;  %v4490_v27 = vmul.f32 %v8192_v1, %v8190_v22  ;;  %8195 = vrcp.f32 %v4487_v63 }
 0x949   :  { %v4489_v41 = vmul.f32 %v8194_v30, %v9374_v2  ;;  %v9659_v2 = vld [vmem:[#allocation25_spill] sm:$0xff]  ;;  %v9662_v30 = vld [vmem:[#allocation27_spill] sm:$0xff] }
 0x94a   :  { %v3827_v57 = vadd.f32 %v9659_v2, %v9274_v0 }
 0x94b   :  { %v9418_v56 = vadd.f32 %v4490_v27, %v4489_v41  ;;  %v3893_v27 = vadd.f32 %v9662_v30, %v9282_v36 }
 0x94d   :  { %8197 = vtanh.f32 %v9418_v56 }
 0x94e   :  { %v8196_v40 = vpop.eup %8195 }
 0x953   :  { %v8198_v35 = vpop.eup %8197 }
 0x954   :  { %v4493_v7 = vmul.f32 %v8198_v35, %v8196_v40 }
 0x956   :  { %v4498_v52 = vpack.c.bf16 %v4493_v7, %v4493_v7 }
 0x958   :  { %4507 = vmatmul.bf16.vlgmr.msra.gmra.mxu0 %v4498_v52  ;;  %4520 = vmatmul.bf16.vlgmr.msra.gmra.mxu1 %v4498_v52 }
 0x959   :  { %4533 = vmatmul.bf16.vlgmr.msra.gmra.mxu2 %v4498_v52  ;;  %4546 = vmatmul.bf16.vlgmr.msra.gmra.mxu3 %v4498_v52 }
 0x95a   :  { %4663 = vmatpush.bf16.msra.mxu0 %v9034_v45  ;;  %4676 = vmatpush.bf16.msra.mxu1 %v9036_v6 }
 0x95b   :  { %4689 = vmatpush.bf16.msra.mxu2 %v9041_v54  ;;  %4702 = vmatpush.bf16.msra.mxu3 %v9038_v21 }
 0x95e   :  { %4664 = vmatpush.bf16.msra.mxu0 %v9045_v4  ;;  %4677 = vmatpush.bf16.msra.mxu1 %v9047_v8 }
 0x95f   :  { %4690 = vmatpush.bf16.msra.mxu2 %v9052_v46  ;;  %4703 = vmatpush.bf16.msra.mxu3 %v9050_v18 }
 0x962   :  { %4665 = vmatpush.bf16.msra.mxu0 %v9055_v33  ;;  %4678 = vmatpush.bf16.msra.mxu1 %v9059_v38 }
 0x963   :  { %4691 = vmatpush.bf16.msra.mxu2 %v9071_v13  ;;  %4704 = vmatpush.bf16.msra.mxu3 %v9061_v47 }
 0x966   :  { %4666 = vmatpush.bf16.msra.mxu0 %v9073_v42  ;;  %4679 = vmatpush.bf16.msra.mxu1 %v9075_v44 }
 0x967   :  { %4692 = vmatpush.bf16.msra.mxu2 %v9082_v55  ;;  %4705 = vmatpush.bf16.msra.mxu3 %v9080_v48 }
 0x96a   :  { %4667 = vmatpush.bf16.msra.mxu0 %v9084_v34  ;;  %4680 = vmatpush.bf16.msra.mxu1 %v9087_v26 }
 0x96b   :  { %4693 = vmatpush.bf16.msra.mxu2 %v9093_v61  ;;  %4706 = vmatpush.bf16.msra.mxu3 %v9091_v20 }
 0x96e   :  { %4668 = vmatpush.bf16.msra.mxu0 %v9098_v58  ;;  %4681 = vmatpush.bf16.msra.mxu1 %v9100_v29 }
 0x96f   :  { %4694 = vmatpush.bf16.msra.mxu2 %v9107_v31  ;;  %4707 = vmatpush.bf16.msra.mxu3 %v9103_v50 }
 0x972   :  { %4669 = vmatpush.bf16.msra.mxu0 %v9109_v16  ;;  %4682 = vmatpush.bf16.msra.mxu1 %v9112_v3 }
 0x973   :  { %4695 = vmatpush.bf16.msra.mxu2 %v9121_v5  ;;  %4708 = vmatpush.bf16.msra.mxu3 %v9119_v60 }
 0x976   :  { %4670 = vmatpush.bf16.msra.mxu0 %v9125_v37  ;;  %4683 = vmatpush.bf16.msra.mxu1 %v9128_v11 }
 0x977   :  { %4696 = vmatpush.bf16.msra.mxu2 %v9137_v9  ;;  %4709 = vmatpush.bf16.msra.mxu3 %v9134_v10 }
 0x9d5   :  { %v4508_v14 = vpop.f32.mrf.mxu0  ;;  %v4521_v39 = vpop.f32.mrf.mxu1 }
 0x9d6   :  { %v4551_v15 = vadd.f32 %v4508_v14, %v3827_v57  ;;  %v4552_v49 = vadd.f32 %v4521_v39, %v3860_v59 }
 0x9d8   :  { %v4555_v43 = vsub.f32 0.0, %v4551_v15  ;;  %v4560_v17 = vsub.f32 0.0, %v4552_v49 }
 0x9da   :  { %v4556_v32 = vmul.f32 1.442695, %v4555_v43  ;;  %v4561_v28 = vmul.f32 1.442695, %v4560_v17 }
 0x9dc   :  { %8199 = vpow2.f32 %v4556_v32  ;;  %v4534_v23 = vpop.f32.mrf.mxu2  ;;  %v4547_v19 = vpop.f32.mrf.mxu3 }
 0x9dd   :  { %8201 = vpow2.f32 %v4561_v28  ;;  %v4554_v25 = vadd.f32 %v4547_v19, %v3926_v24  ;;  %v4510_v22 = vpop.f32.mrf.mxu0  ;;  %v4523_v1 = vpop.f32.mrf.mxu1  ;;  %v4553_v41 = vadd.f32 %v4534_v23, %v3893_v27 }
 0x9df   :  { %v4566_v63 = vsub.f32 0.0, %v4554_v25  ;;  %v9664_v25 = vld [vmem:[#allocation33_spill] sm:$0xff] }
 0x9e0   :  { %v3862_v22 = vadd.f32 %v9664_v25, %v9276_v53 }
 0x9e1   :  { %v4567_v40 = vmul.f32 1.442695, %v4566_v63 }
 0x9e2   :  { %v8200_v35 = vpop.eup %8199 }
 0x9e3   :  { %v8202_v7 = vpop.eup %8201  ;;  %v4558_v52 = vadd.f32 1.0, %v8200_v35  ;;  %8203 = vpow2.f32 %v4567_v40 }
 0x9e4   :  { %v4563_v2 = vadd.f32 1.0, %v8202_v7  ;;  %8205 = vtanh.f32 %v4553_v41  ;;  %v4536_v57 = vpop.f32.mrf.mxu2  ;;  %v4549_v12 = vpop.f32.mrf.mxu3 }
 0x9e5   :  { %8207 = vrcp.f32 %v4558_v52  ;;  %v9665_v52 = vld [vmem:[#allocation35_spill] sm:$0xff] }
 0x9e6   :  { %8209 = vrcp.f32 %v4563_v2  ;;  %v3928_v2 = vadd.f32 %v9665_v52, %v9280_v62 }
 0x9e9   :  { %v8204_v59 = vpop.eup %8203 }
 0x9ea   :  { %v8206_v14 = vpop.eup %8205  ;;  %v4569_v43 = vadd.f32 1.0, %v8204_v59 }
 0x9eb   :  { %v8208_v39 = vpop.eup %8207 }
 0x9ec   :  { %v8210_v15 = vpop.eup %8209  ;;  %v4572_v49 = vmul.f32 %v8208_v39, %v8206_v14  ;;  %8211 = vrcp.f32 %v4569_v43 }
 0x9ed   :  { %v4571_v17 = vmul.f32 %v8210_v15, %v9418_v56  ;;  %v9663_v56 = vld [vmem:[#allocation36_spill] sm:$0xff]  ;;  %v9666_v15 = vld [vmem:[#allocation37_spill] sm:$0xff] }
 0x9ee   :  { %v3829_v19 = vadd.f32 %v9663_v56, %v9274_v0 }
 0x9ef   :  { %v9462_v32 = vadd.f32 %v4572_v49, %v4571_v17  ;;  %v3895_v49 = vadd.f32 %v9666_v15, %v9282_v36 }
 0x9f1   :  { %8213 = vtanh.f32 %v9462_v32 }
 0x9f2   :  { %v8212_v28 = vpop.eup %8211 }
 0x9f7   :  { %v8214_v51 = vpop.eup %8213 }
 0x9f8   :  { %v4575_v24 = vmul.f32 %v8214_v51, %v8212_v28 }
 0x9fa   :  { %v4580_v23 = vpack.c.bf16 %v4575_v24, %v4575_v24 }
 0x9fc   :  { %4589 = vmatmul.bf16.vlgmr.msrb.gmra.mxu0 %v4580_v23  ;;  %4602 = vmatmul.bf16.vlgmr.msrb.gmra.mxu1 %v4580_v23 }
 0x9fd   :  { %4615 = vmatmul.bf16.vlgmr.msrb.gmra.mxu2 %v4580_v23  ;;  %4628 = vmatmul.bf16.vlgmr.msrb.gmra.mxu3 %v4580_v23 }
 0x9fe   :  { %4745 = vmatpush.bf16.msrb.mxu0 %v9034_v45  ;;  %4758 = vmatpush.bf16.msrb.mxu1 %v9036_v6 }
 0x9ff   :  { %4771 = vmatpush.bf16.msrb.mxu2 %v9041_v54  ;;  %4784 = vmatpush.bf16.msrb.mxu3 %v9038_v21 }
 0xa02   :  { %4746 = vmatpush.bf16.msrb.mxu0 %v9045_v4  ;;  %4759 = vmatpush.bf16.msrb.mxu1 %v9047_v8 }
 0xa03   :  { %4772 = vmatpush.bf16.msrb.mxu2 %v9052_v46  ;;  %4785 = vmatpush.bf16.msrb.mxu3 %v9050_v18 }
 0xa06   :  { %4747 = vmatpush.bf16.msrb.mxu0 %v9055_v33  ;;  %4760 = vmatpush.bf16.msrb.mxu1 %v9059_v38 }
 0xa07   :  { %4773 = vmatpush.bf16.msrb.mxu2 %v9071_v13  ;;  %4786 = vmatpush.bf16.msrb.mxu3 %v9061_v47 }
 0xa0a   :  { %4748 = vmatpush.bf16.msrb.mxu0 %v9073_v42  ;;  %4761 = vmatpush.bf16.msrb.mxu1 %v9075_v44 }
 0xa0b   :  { %4774 = vmatpush.bf16.msrb.mxu2 %v9082_v55  ;;  %4787 = vmatpush.bf16.msrb.mxu3 %v9080_v48 }
 0xa0e   :  { %4749 = vmatpush.bf16.msrb.mxu0 %v9084_v34  ;;  %4762 = vmatpush.bf16.msrb.mxu1 %v9087_v26 }
 0xa0f   :  { %4775 = vmatpush.bf16.msrb.mxu2 %v9093_v61  ;;  %4788 = vmatpush.bf16.msrb.mxu3 %v9091_v20 }
 0xa12   :  { %4750 = vmatpush.bf16.msrb.mxu0 %v9098_v58  ;;  %4763 = vmatpush.bf16.msrb.mxu1 %v9100_v29 }
 0xa13   :  { %4776 = vmatpush.bf16.msrb.mxu2 %v9107_v31  ;;  %4789 = vmatpush.bf16.msrb.mxu3 %v9103_v50 }
 0xa16   :  { %4751 = vmatpush.bf16.msrb.mxu0 %v9109_v16  ;;  %4764 = vmatpush.bf16.msrb.mxu1 %v9112_v3 }
 0xa17   :  { %4777 = vmatpush.bf16.msrb.mxu2 %v9121_v5  ;;  %4790 = vmatpush.bf16.msrb.mxu3 %v9119_v60 }
 0xa1a   :  { %4752 = vmatpush.bf16.msrb.mxu0 %v9125_v37  ;;  %4765 = vmatpush.bf16.msrb.mxu1 %v9128_v11 }
 0xa1b   :  { %4778 = vmatpush.bf16.msrb.mxu2 %v9137_v9  ;;  %4791 = vmatpush.bf16.msrb.mxu3 %v9134_v10 }
 0xa79   :  { %v4590_v1 = vpop.f32.mrf.mxu0  ;;  %v4603_v30 = vpop.f32.mrf.mxu1 }
 0xa7a   :  { %v4633_v27 = vadd.f32 %v4590_v1, %v3829_v19  ;;  %v4634_v63 = vadd.f32 %v4603_v30, %v3862_v22 }
 0xa7c   :  { %v4637_v41 = vsub.f32 0.0, %v4633_v27  ;;  %v4642_v40 = vsub.f32 0.0, %v4634_v63 }
 0xa7e   :  { %v4638_v35 = vmul.f32 1.442695, %v4637_v41  ;;  %v4643_v7 = vmul.f32 1.442695, %v4642_v40 }
 0xa80   :  { %8215 = vpow2.f32 %v4638_v35  ;;  %v4616_v57 = vpop.f32.mrf.mxu2  ;;  %v4629_v12 = vpop.f32.mrf.mxu3 }
 0xa81   :  { %8217 = vpow2.f32 %v4643_v7  ;;  %v4636_v59 = vadd.f32 %v4629_v12, %v3928_v2  ;;  %v4592_v14 = vpop.f32.mrf.mxu0  ;;  %v4605_v39 = vpop.f32.mrf.mxu1  ;;  %v4635_v17 = vadd.f32 %v4616_v57, %v3895_v49 }
 0xa83   :  { %v4648_v43 = vsub.f32 0.0, %v4636_v59 }
 0xa85   :  { %v4649_v28 = vmul.f32 1.442695, %v4648_v43 }
 0xa86   :  { %v8216_v51 = vpop.eup %8215 }
 0xa87   :  { %v8218_v24 = vpop.eup %8217  ;;  %v4640_v23 = vadd.f32 1.0, %v8216_v51  ;;  %8219 = vpow2.f32 %v4649_v28  ;;  %v9671_v51 = vld [vmem:[#allocation40_spill] sm:$0xff] }
 0xa88   :  { %v4645_v56 = vadd.f32 1.0, %v8218_v24  ;;  %8221 = vtanh.f32 %v4635_v17  ;;  %v4618_v19 = vpop.f32.mrf.mxu2  ;;  %v4631_v25 = vpop.f32.mrf.mxu3  ;;  %v3834_v24 = vadd.f32 %v9671_v51, %v9274_v0 }
 0xa89   :  { %8223 = vrcp.f32 %v4640_v23  ;;  %v9672_v23 = vld [vmem:[#allocation41_spill] sm:$0xff] }
 0xa8a   :  { %8225 = vrcp.f32 %v4645_v56  ;;  %v3867_v56 = vadd.f32 %v9672_v23, %v9276_v53 }
 0xa8d   :  { %v8220_v22 = vpop.eup %8219 }
 0xa8e   :  { %v8222_v1 = vpop.eup %8221  ;;  %v4651_v41 = vadd.f32 1.0, %v8220_v22 }
 0xa8f   :  { %v8224_v30 = vpop.eup %8223 }
 0xa90   :  { %v8226_v27 = vpop.eup %8225  ;;  %v4654_v63 = vmul.f32 %v8224_v30, %v8222_v1  ;;  %8227 = vrcp.f32 %v4651_v41 }
 0xa91   :  { %v4653_v40 = vmul.f32 %v8226_v27, %v9462_v32 }
 0xa93   :  { %v9506_v35 = vadd.f32 %v4654_v63, %v4653_v40  ;;  %v9673_v40 = vld [vmem:[#allocation43_spill] sm:$0xff] }
 0xa95   :  { %8229 = vtanh.f32 %v9506_v35 }
 0xa96   :  { %v8228_v7 = vpop.eup %8227 }
 0xa9b   :  { %v8230_v52 = vpop.eup %8229 }
 0xa9c   :  { %v4657_v2 = vmul.f32 %v8230_v52, %v8228_v7 }
 0xa9e   :  { %v4662_v57 = vpack.c.bf16 %v4657_v2, %v4657_v2 }
 0xaa0   :  { %4671 = vmatmul.bf16.vlgmr.msra.gmra.mxu0 %v4662_v57  ;;  %4684 = vmatmul.bf16.vlgmr.msra.gmra.mxu1 %v4662_v57 }
 0xaa1   :  { %4697 = vmatmul.bf16.vlgmr.msra.gmra.mxu2 %v4662_v57  ;;  %4710 = vmatmul.bf16.vlgmr.msra.gmra.mxu3 %v4662_v57 }
 0xaa2   :  { %4827 = vmatpush.bf16.msra.mxu0 %v9034_v45  ;;  %4840 = vmatpush.bf16.msra.mxu1 %v9036_v6  ;;  %v9667_v45 = vld [vmem:[#allocation30_spill] sm:$0xff] }
 0xaa3   :  { %4853 = vmatpush.bf16.msra.mxu2 %v9041_v54  ;;  %4866 = vmatpush.bf16.msra.mxu3 %v9038_v21  ;;  %v3832_v6 = vadd.f32 %v9667_v45, %v9274_v0  ;;  %v9668_v21 = vld [vmem:[#allocation31_spill] sm:$0xff] }
 0xaa4   :  { %v3865_v54 = vadd.f32 %v9668_v21, %v9276_v53  ;;  %v7973_v21 = vld [vmem:[#allocation16 + $0x1dc] sm:$0xf0] }
 0xaa6   :  { %4828 = vmatpush.bf16.msra.mxu0 %v9045_v4  ;;  %4841 = vmatpush.bf16.msra.mxu1 %v9047_v8 }
 0xaa7   :  { %4854 = vmatpush.bf16.msra.mxu2 %v9052_v46  ;;  %4867 = vmatpush.bf16.msra.mxu3 %v9050_v18 }
 0xaaa   :  { %4829 = vmatpush.bf16.msra.mxu0 %v9055_v33  ;;  %4842 = vmatpush.bf16.msra.mxu1 %v9059_v38 }
 0xaab   :  { %4855 = vmatpush.bf16.msra.mxu2 %v9071_v13  ;;  %4868 = vmatpush.bf16.msra.mxu3 %v9061_v47 }
 0xaae   :  { %4830 = vmatpush.bf16.msra.mxu0 %v9073_v42  ;;  %4843 = vmatpush.bf16.msra.mxu1 %v9075_v44  ;;  %v9669_v42 = vld [vmem:[#allocation38_spill] sm:$0xff] }
 0xaaf   :  { %4856 = vmatpush.bf16.msra.mxu2 %v9082_v55  ;;  %4869 = vmatpush.bf16.msra.mxu3 %v9080_v48  ;;  %v3931_v44 = vadd.f32 %v9669_v42, %v9280_v62 }
 0xab2   :  { %4831 = vmatpush.bf16.msra.mxu0 %v9084_v34  ;;  %4844 = vmatpush.bf16.msra.mxu1 %v9087_v26 }
 0xab3   :  { %4857 = vmatpush.bf16.msra.mxu2 %v9093_v61  ;;  %4870 = vmatpush.bf16.msra.mxu3 %v9091_v20  ;;  %v9670_v61 = vld [vmem:[#allocation39_spill] sm:$0xff] }
 0xab6   :  { %4832 = vmatpush.bf16.msra.mxu0 %v9098_v58  ;;  %4845 = vmatpush.bf16.msra.mxu1 %v9100_v29  ;;  %v3898_v58 = vadd.f32 %v9670_v61, %v9282_v36  ;;  %v7961_v61 = vld [vmem:[#allocation16 + $0x184] sm:$0xf] }
 0xab7   :  { %4858 = vmatpush.bf16.msra.mxu2 %v9107_v31  ;;  %4871 = vmatpush.bf16.msra.mxu3 %v9103_v50 }
 0xaba   :  { %4833 = vmatpush.bf16.msra.mxu0 %v9109_v16  ;;  %4846 = vmatpush.bf16.msra.mxu1 %v9112_v3 }
 0xabb   :  { %4859 = vmatpush.bf16.msra.mxu2 %v9121_v5  ;;  %4872 = vmatpush.bf16.msra.mxu3 %v9119_v60 }
 0xabe   :  { %4834 = vmatpush.bf16.msra.mxu0 %v9125_v37  ;;  %4847 = vmatpush.bf16.msra.mxu1 %v9128_v11 }
 0xabf   :  { %4860 = vmatpush.bf16.msra.mxu2 %v9137_v9  ;;  %4873 = vmatpush.bf16.msra.mxu3 %v9134_v10 }
 0xb1d   :  { %v4672_v4 = vpop.f32.mrf.mxu0  ;;  %v4685_v8 = vpop.f32.mrf.mxu1 }
 0xb1e   :  { %v4715_v18 = vadd.f32 %v4672_v4, %v3832_v6  ;;  %v4716_v46 = vadd.f32 %v4685_v8, %v3865_v54  ;;  %v7451_v6 = vld [vmem:[#allocation16 + $0x1c0] sm:$0xf]  ;;  %v7969_v54 = vld [vmem:[#allocation16 + $0x1c4] sm:$0xf]  ;;  %v9674_v4 = vld [vmem:[#allocation42_spill] sm:$0xff] }
 0xb1f   :  { %v3900_v8 = vadd.f32 %v9674_v4, %v9282_v36  ;;  %v7357_v4 = vld [vmem:[#allocation16 + $0x120] sm:$0xf0] }
 0xb20   :  { %v4719_v33 = vsub.f32 0.0, %v4715_v18  ;;  %v4724_v38 = vsub.f32 0.0, %v4716_v46  ;;  %v7452_v18 = vor.u32 %v7973_v21, %v7451_v6  ;;  %v7453_v46 = vld [vmem:[#allocation16 + $0x1e0] sm:$0xf0]  ;;  %v7949_v6 = vld [vmem:[#allocation16 + $0x11c] sm:$0xf0] }
 0xb21   :  { %v7945_v21 = vld [vmem:[#allocation16 + $0x104] sm:$0xf] }
 0xb22   :  { %v4720_v47 = vmul.f32 1.442695, %v4719_v33  ;;  %v4725_v13 = vmul.f32 1.442695, %v4724_v38  ;;  %v7459_v33 = vld [vmem:[#allocation16 + $0x1c8] sm:$0xf] }
 0xb23   :  { %v7974_v38 = vld [vmem:[#allocation16 + $0x1e4] sm:$0xf0] }
 0xb24   :  { %8231 = vpow2.f32 %v4720_v47  ;;  %v4698_v48 = vpop.f32.mrf.mxu2  ;;  %v4711_v55 = vpop.f32.mrf.mxu3  ;;  %v7460_v42 = vor.u32 %v7974_v38, %v7459_v33  ;;  %v7946_v38 = vld [vmem:[#allocation16 + $0x10c] sm:$0xf] }
 0xb25   :  { %8233 = vpow2.f32 %v4725_v13  ;;  %v4718_v34 = vadd.f32 %v4711_v55, %v3931_v44  ;;  %v4674_v26 = vpop.f32.mrf.mxu0  ;;  %v4687_v20 = vpop.f32.mrf.mxu1  ;;  %v4717_v50 = vadd.f32 %v4698_v48, %v3898_v58  ;;  %v7456_v13 = vor.u32 %v7969_v54, %v7453_v46  ;;  %v7970_v44 = vld [vmem:[#allocation16 + $0x1cc] sm:$0xf] }
 0xb26   :  { %v7461_v48 = vld [vmem:[#allocation16 + $0x1e8] sm:$0xf0]  ;;  %v7419_v26 = vld [vmem:[#allocation16 + $0x180] sm:$0xf]  ;;  %v7360_v46 = vor.u32 %v7945_v21, %v7357_v4  ;;  %v7975_v21 = vld [vmem:[#allocation16 + $0x1ec] sm:$0xf0] }
 0xb27   :  { %v4730_v29 = vsub.f32 0.0, %v4718_v34  ;;  %v7464_v34 = vor.u32 %v7970_v44, %v7461_v48  ;;  %v7965_v20 = vld [vmem:[#allocation16 + $0x19c] sm:$0xf0]  ;;  %v7937_v48 = vld [vmem:[#allocation16 + $0xc4] sm:$0xf] }
 0xb28   :  { %v7941_v44 = vld [vmem:[#allocation16 + $0xdc] sm:$0xf0]  ;;  %v7469_v4 = vld [vmem:[#allocation16 + $0x1f0] sm:$0xf0] }
 0xb29   :  { %v4731_v31 = vmul.f32 1.442695, %v4730_v29  ;;  %v7420_v29 = vor.u32 %v7965_v20, %v7419_v26  ;;  %v7331_v26 = vld [vmem:[#allocation16 + $0xc8] sm:$0xf] }
 0xb2a   :  { %v8232_v16 = vpop.eup %8231  ;;  %v7942_v20 = vld [vmem:[#allocation16 + $0xe4] sm:$0xf0] }
 0xb2b   :  { %v8234_v3 = vpop.eup %8233  ;;  %v4722_v60 = vadd.f32 1.0, %v8232_v16  ;;  %8235 = vpow2.f32 %v4731_v31  ;;  %v7427_v31 = vld [vmem:[#allocation16 + $0x188] sm:$0xf] }
 0xb2c   :  { %v4727_v5 = vadd.f32 1.0, %v8234_v3  ;;  %8237 = vtanh.f32 %v4717_v50  ;;  %v4700_v37 = vpop.f32.mrf.mxu2  ;;  %v4713_v11 = vpop.f32.mrf.mxu3  ;;  %v7421_v50 = vld [vmem:[#allocation16 + $0x1a0] sm:$0xf0] }
 0xb2d   :  { %8239 = vrcp.f32 %v4722_v60  ;;  %v7424_v3 = vor.u32 %v7961_v61, %v7421_v50  ;;  %v7966_v60 = vld [vmem:[#allocation16 + $0x1a4] sm:$0xf0]  ;;  %v7429_v37 = vld [vmem:[#allocation16 + $0x1a8] sm:$0xf0] }
 0xb2e   :  { %8241 = vrcp.f32 %v4727_v5  ;;  %v7962_v5 = vld [vmem:[#allocation16 + $0x18c] sm:$0xf] }
 0xb2f   :  { %v7333_v50 = vld [vmem:[#allocation16 + $0xe8] sm:$0xf0] }
 0xb31   :  { %v8236_v10 = vpop.eup %8235 }
 0xb32   :  { %v8238_v9 = vpop.eup %8237  ;;  %v4733_v14 = vadd.f32 1.0, %v8236_v10 }
 0xb33   :  { %v8240_v32 = vpop.eup %8239 }
 0xb34   :  { %v8242_v12 = vpop.eup %8241  ;;  %v4736_v59 = vmul.f32 %v8240_v32, %v8238_v9  ;;  %8243 = vrcp.f32 %v4733_v14  ;;  %v7428_v9 = vor.u32 %v7966_v60, %v7427_v31  ;;  %v7432_v32 = vor.u32 %v7962_v5, %v7429_v37  ;;  %v7929_v60 = vld [vmem:[#allocation16 + $0x84] sm:$0xf] }
 0xb35   :  { %v4735_v39 = vmul.f32 %v8242_v12, %v9506_v35  ;;  %v3933_v35 = vadd.f32 %v9673_v40, %v9280_v62  ;;  %v7395_v40 = vld [vmem:[#allocation16 + $0x148] sm:$0xf]  ;;  %v7293_v37 = vld [vmem:[#allocation16 + $0xa0] sm:$0xf0] }
 0xb37   :  { %v9550_v15 = vadd.f32 %v4736_v59, %v4735_v39 }
 0xb39   :  { %8245 = vtanh.f32 %v9550_v15 }
 0xb3a   :  { %v8244_v49 = vpop.eup %8243 }
 0xb3f   :  { %v8246_v43 = vpop.eup %8245 }
 0xb40   :  { %v4739_v17 = vmul.f32 %v8246_v43, %v8244_v49 }
 0xb42   :  { %v4744_v28 = vpack.c.bf16 %v4739_v17, %v4739_v17 }
 0xb44   :  { %4753 = vmatmul.bf16.vlgmr.msrb.gmra.mxu0 %v4744_v28  ;;  %4766 = vmatmul.bf16.vlgmr.msrb.gmra.mxu1 %v4744_v28 }
 0xb45   :  { %4779 = vmatmul.bf16.vlgmr.msrb.gmra.mxu2 %v4744_v28  ;;  %4792 = vmatmul.bf16.vlgmr.msrb.gmra.mxu3 %v4744_v28 }
 0xb46   :  { %5307 = vmatpush.bf16.msrb.mxu0 %v7452_v18  ;;  %5320 = vmatpush.bf16.msrb.mxu1 %v7456_v13  ;;  %v7950_v18 = vld [vmem:[#allocation16 + $0x124] sm:$0xf0] }
 0xb47   :  { %5333 = vmatpush.bf16.msrb.mxu2 %v7460_v42  ;;  %5346 = vmatpush.bf16.msrb.mxu3 %v7464_v34  ;;  %v7323_v42 = vld [vmem:[#allocation16 + $0xc0] sm:$0xf]  ;;  %v7325_v34 = vld [vmem:[#allocation16 + $0xe0] sm:$0xf0] }
 0xb48   :  { %v7328_v61 = vor.u32 %v7937_v48, %v7325_v34  ;;  %v7963_v34 = vld [vmem:[#allocation16 + $0x194] sm:$0xf] }
 0xb4a   :  { %5308 = vmatpush.bf16.msrb.mxu0 %v7420_v29  ;;  %5321 = vmatpush.bf16.msrb.mxu1 %v7424_v3  ;;  %v7938_v29 = vld [vmem:[#allocation16 + $0xcc] sm:$0xf]  ;;  %v7933_v3 = vld [vmem:[#allocation16 + $0x9c] sm:$0xf0] }
 0xb4b   :  { %5334 = vmatpush.bf16.msrb.mxu2 %v7428_v9  ;;  %5347 = vmatpush.bf16.msrb.mxu3 %v7432_v32  ;;  %v7336_v31 = vor.u32 %v7938_v29, %v7333_v50  ;;  %v7296_v9 = vor.u32 %v7929_v60, %v7293_v37  ;;  %v7964_v29 = vld [vmem:[#allocation16 + $0x19c] sm:$0xf]  ;;  %v7959_v60 = vld [vmem:[#allocation16 + $0x16c] sm:$0xf0] }
 0xb4c   :  { %v7445_v50 = vld [vmem:[#allocation16 + $0x1b8] sm:$0xf0] }
 0xbc1   :  { %v4754_v19 = vpop.f32.mrf.mxu0  ;;  %v4767_v25 = vpop.f32.mrf.mxu1 }
 0xbc2   :  { %v4797_v22 = vadd.f32 %v4754_v19, %v3834_v24  ;;  %v4798_v1 = vadd.f32 %v4767_v25, %v3867_v56 }
 0xbc4   :  { %v4801_v30 = vsub.f32 0.0, %v4797_v22  ;;  %v4806_v27 = vsub.f32 0.0, %v4798_v1  ;;  %v7387_v1 = vld [vmem:[#allocation16 + $0x140] sm:$0xf] }
 0xbc6   :  { %v4802_v63 = vmul.f32 1.442695, %v4801_v30  ;;  %v4807_v41 = vmul.f32 1.442695, %v4806_v27  ;;  %v7957_v30 = vld [vmem:[#allocation16 + $0x15c] sm:$0xf0] }
 0xbc7   :  { %v7953_v27 = vld [vmem:[#allocation16 + $0x144] sm:$0xf] }
 0xbc8   :  { %8247 = vpow2.f32 %v4802_v63  ;;  %v4780_v7 = vpop.f32.mrf.mxu2  ;;  %v4793_v52 = vpop.f32.mrf.mxu3  ;;  %v7388_v63 = vor.u32 %v7957_v30, %v7387_v1  ;;  %v7227_v30 = vld [vmem:[#allocation16] sm:$0xf] }
 0xbc9   :  { %8249 = vpow2.f32 %v4807_v41  ;;  %v4800_v2 = vadd.f32 %v4793_v52, %v3933_v35  ;;  %v4756_v57 = vpop.f32.mrf.mxu0  ;;  %v4769_v45 = vpop.f32.mrf.mxu1  ;;  %v4799_v55 = vadd.f32 %v4780_v7, %v3900_v8  ;;  %v7389_v41 = vld [vmem:[#allocation16 + $0x160] sm:$0xf0]  ;;  %v7954_v52 = vld [vmem:[#allocation16 + $0x14c] sm:$0xf]  ;;  %v7363_v8 = vld [vmem:[#allocation16 + $0x108] sm:$0xf] }
 0xbca   :  { %v7392_v35 = vor.u32 %v7953_v27, %v7389_v41  ;;  %5309 = vmatpush.bf16.msrb.mxu0 %v7388_v63  ;;  %v7355_v45 = vld [vmem:[#allocation16 + $0x100] sm:$0xf]  ;;  %v7364_v33 = vor.u32 %v7950_v18, %v7363_v8  ;;  %v7913_v63 = vld [vmem:[#allocation16 + $0x4] sm:$0xf] }
 0xbcb   :  { %v4812_v47 = vsub.f32 0.0, %v4800_v2  ;;  %v7397_v2 = vld [vmem:[#allocation16 + $0x168] sm:$0xf0]  ;;  %v7356_v54 = vor.u32 %v7949_v6, %v7355_v45  ;;  %v7917_v27 = vld [vmem:[#allocation16 + $0x1c] sm:$0xf0] }
 0xbcc   :  { %v7400_v57 = vor.u32 %v7954_v52, %v7397_v2  ;;  %5322 = vmatpush.bf16.msrb.mxu1 %v7392_v35  ;;  %v7228_v41 = vor.u32 %v7917_v27, %v7227_v30  ;;  %v7918_v35 = vld [vmem:[#allocation16 + $0x24] sm:$0xf0]  ;;  %v7914_v2 = vld [vmem:[#allocation16 + $0xc] sm:$0xf]  ;;  %v7467_v45 = vld [vmem:[#allocation16 + $0x1d0] sm:$0xf] }
 0xbcd   :  { %v4813_v58 = vmul.f32 1.442695, %v4812_v47  ;;  %v7365_v47 = vld [vmem:[#allocation16 + $0x128] sm:$0xf0]  ;;  %v7468_v8 = vor.u32 %v7975_v21, %v7467_v45  ;;  %v7373_v30 = vld [vmem:[#allocation16 + $0x130] sm:$0xf0] }
 0xbce   :  { %v8248_v16 = vpop.eup %8247  ;;  %5348 = vmatpush.bf16.msrb.mxu3 %v7400_v57  ;;  %5310 = vmatpush.bf16.msrb.mxu0 %v7356_v54  ;;  %v7368_v13 = vor.u32 %v7946_v38, %v7365_v47  ;;  %v7237_v57 = vld [vmem:[#allocation16 + $0x28] sm:$0xf0]  ;;  %v7971_v54 = vld [vmem:[#allocation16 + $0x1d4] sm:$0xf]  ;;  %v7972_v38 = vld [vmem:[#allocation16 + $0x1dc] sm:$0xf] }
 0xbcf   :  { %v8250_v11 = vpop.eup %8249  ;;  %v4804_v10 = vadd.f32 1.0, %v8248_v16  ;;  %8251 = vpow2.f32 %v4813_v58  ;;  %v7332_v58 = vor.u32 %v7942_v20, %v7331_v26  ;;  %v7291_v16 = vld [vmem:[#allocation16 + $0x80] sm:$0xf]  ;;  %v7240_v6 = vor.u32 %v7914_v2, %v7237_v57  ;;  %v7437_v26 = vld [vmem:[#allocation16 + $0x1b0] sm:$0xf0] }
 0xbd0   :  { %v4809_v12 = vadd.f32 1.0, %v8250_v11  ;;  %8253 = vtanh.f32 %v4799_v55  ;;  %v4782_v59 = vpop.f32.mrf.mxu2  ;;  %v4795_v14 = vpop.f32.mrf.mxu3  ;;  %5323 = vmatpush.bf16.msrb.mxu1 %v7360_v46  ;;  %v7324_v55 = vor.u32 %v7941_v44, %v7323_v42  ;;  %v7292_v5 = vor.u32 %v7933_v3, %v7291_v16  ;;  %v7299_v11 = vld [vmem:[#allocation16 + $0x88] sm:$0xf]  ;;  %v7475_v46 = vld [vmem:[#allocation16 + $0x1d8] sm:$0xf]  ;;  %v9677_v45 = vld [vmem:[#allocation47_spill] sm:$0xff] }
 0xbd1   :  { %8255 = vrcp.f32 %v4804_v10  ;;  %v7934_v10 = vld [vmem:[#allocation16 + $0xa4] sm:$0xf0]  ;;  %v7301_v59 = vld [vmem:[#allocation16 + $0xa8] sm:$0xf0]  ;;  %v7472_v18 = vor.u32 %v7971_v54, %v7469_v4  ;;  %v7435_v42 = vld [vmem:[#allocation16 + $0x190] sm:$0xf]  ;;  %v7448_v16 = vor.u32 %v7964_v29, %v7445_v50 }
 0xbd2   :  { %8257 = vrcp.f32 %v4809_v12  ;;  %5349 = vmatpush.bf16.msrb.mxu3 %v7368_v13  ;;  %5311 = vmatpush.bf16.msrb.mxu0 %v7324_v55  ;;  %v7300_v32 = vor.u32 %v7934_v10, %v7299_v11  ;;  %v7930_v12 = vld [vmem:[#allocation16 + $0x8c] sm:$0xf]  ;;  %v7477_v13 = vld [vmem:[#allocation16 + $0x1f8] sm:$0xf0]  ;;  %v7967_v44 = vld [vmem:[#allocation16 + $0x1ac] sm:$0xf0] }
 0xbd3   :  { %v7304_v14 = vor.u32 %v7930_v12, %v7301_v59  ;;  %v7480_v48 = vor.u32 %v7972_v38, %v7477_v13  ;;  %v7436_v55 = vor.u32 %v7967_v44, %v7435_v42  ;;  %v7443_v20 = vld [vmem:[#allocation16 + $0x198] sm:$0xf]  ;;  %v7403_v3 = vld [vmem:[#allocation16 + $0x150] sm:$0xf]  ;;  %v7405_v11 = vld [vmem:[#allocation16 + $0x170] sm:$0xf0] }
 0xbd4   :  { %5324 = vmatpush.bf16.msrb.mxu1 %v7328_v61  ;;  %v7440_v61 = vor.u32 %v7963_v34, %v7437_v26  ;;  %v7404_v37 = vor.u32 %v7959_v60, %v7403_v3  ;;  %v7411_v10 = vld [vmem:[#allocation16 + $0x158] sm:$0xf]  ;;  %v9676_v59 = vld [vmem:[#allocation45_spill] sm:$0xff] }
 0xbd5   :  { %v8252_v39 = vpop.eup %8251  ;;  %v7379_v27 = vld [vmem:[#allocation16 + $0x118] sm:$0xf]  ;;  %v7339_v21 = vld [vmem:[#allocation16 + $0xd0] sm:$0xf]  ;;  %v7939_v4 = vld [vmem:[#allocation16 + $0xd4] sm:$0xf] }
 0xbd6   :  { %v8254_v49 = vpop.eup %8253  ;;  %v4815_v51 = vadd.f32 1.0, %v8252_v39  ;;  %5350 = vmatpush.bf16.msrb.mxu3 %v7336_v31  ;;  %5312 = vmatpush.bf16.msrb.mxu0 %v7292_v5  ;;  %v7259_v39 = vld [vmem:[#allocation16 + $0x40] sm:$0xf]  ;;  %v7955_v5 = vld [vmem:[#allocation16 + $0x154] sm:$0xf]  ;;  %v9678_v26 = vld [vmem:[#allocation46_spill] sm:$0xff] }
 0xbd7   :  { %v8256_v43 = vpop.eup %8255  ;;  %v7943_v54 = vld [vmem:[#allocation16 + $0xec] sm:$0xf0]  ;;  %v7347_v38 = vld [vmem:[#allocation16 + $0xd8] sm:$0xf]  ;;  %v7931_v50 = vld [vmem:[#allocation16 + $0x94] sm:$0xf] }
 0xbd8   :  { %v8258_v17 = vpop.eup %8257  ;;  %v4818_v28 = vmul.f32 %v8256_v43, %v8254_v49  ;;  %8259 = vrcp.f32 %v4815_v51  ;;  %5325 = vmatpush.bf16.msrb.mxu1 %v7296_v9  ;;  %v7925_v49 = vld [vmem:[#allocation16 + $0x5c] sm:$0xf0]  ;;  %v7921_v43 = vld [vmem:[#allocation16 + $0x44] sm:$0xf]  ;;  %v7267_v51 = vld [vmem:[#allocation16 + $0x48] sm:$0xf] }
 0xbd9   :  { %v4817_v24 = vmul.f32 %v8258_v17, %v9550_v15  ;;  %v7958_v15 = vld [vmem:[#allocation16 + $0x164] sm:$0xf0]  ;;  %v7260_v17 = vor.u32 %v7925_v49, %v7259_v39  ;;  %v7960_v9 = vld [vmem:[#allocation16 + $0x174] sm:$0xf0]  ;;  %v7408_v39 = vor.u32 %v7955_v5, %v7405_v11  ;;  %v7307_v34 = vld [vmem:[#allocation16 + $0x90] sm:$0xf] }
 0xbda   :  { %v7396_v7 = vor.u32 %v7958_v15, %v7395_v40  ;;  %5351 = vmatpush.bf16.msrb.mxu3 %v7304_v14  ;;  %v7229_v40 = vld [vmem:[#allocation16 + $0x20] sm:$0xf0]  ;;  %v7235_v15 = vld [vmem:[#allocation16 + $0x8] sm:$0xf]  ;;  %v3870_v14 = vadd.f32 %v9676_v59, %v9276_v53  ;;  %v7412_v49 = vor.u32 %v7960_v9, %v7411_v10  ;;  %v7952_v53 = vld [vmem:[#allocation16 + $0x134] sm:$0xf0] }
 0xbdb   :  { %v9562_v23 = vadd.f32 %v4818_v28, %v4817_v24  ;;  %v7261_v28 = vld [vmem:[#allocation16 + $0x60] sm:$0xf0]  ;;  %v7926_v24 = vld [vmem:[#allocation16 + $0x64] sm:$0xf0]  ;;  %5313 = vmatpush.bf16.msrb.mxu0 %v7260_v17  ;;  %v7236_v52 = vor.u32 %v7918_v35, %v7235_v15  ;;  %v7413_v17 = vld [vmem:[#allocation16 + $0x178] sm:$0xf0]  ;;  %v7380_v15 = vor.u32 %v7952_v53, %v7379_v27 }
 0xbdc   :  { %5335 = vmatpush.bf16.msrb.mxu2 %v7396_v7  ;;  %v7232_v7 = vor.u32 %v7913_v63, %v7229_v40  ;;  %v7948_v35 = vld [vmem:[#allocation16 + $0x11c] sm:$0xf]  ;;  %v7935_v29 = vld [vmem:[#allocation16 + $0xac] sm:$0xf0]  ;;  %v7315_v5 = vld [vmem:[#allocation16 + $0x98] sm:$0xf] }
 0xbdd   :  { %8261 = vtanh.f32 %v9562_v23  ;;  %v7308_v3 = vor.u32 %v7935_v29, %v7307_v34  ;;  %v7932_v9 = vld [vmem:[#allocation16 + $0x9c] sm:$0xf]  ;;  %v7243_v53 = vld [vmem:[#allocation16 + $0x10] sm:$0xf] }
 0xbde   :  { %v8260_v56 = vpop.eup %8259 }
 0xbdf   :  { %5314 = vmatpush.bf16.msrb.mxu0 %v7228_v41 }
 0xbe0   :  { %5336 = vmatpush.bf16.msrb.mxu2 %v7364_v33  ;;  %v7976_v33 = vld [vmem:[#allocation16 + $0x1f4] sm:$0xf0] }
 0xbe1   :  { %v7476_v47 = vor.u32 %v7976_v33, %v7475_v46  ;;  %v7340_v46 = vor.u32 %v7943_v54, %v7339_v21  ;;  %v7341_v33 = vld [vmem:[#allocation16 + $0xf0] sm:$0xf0] }
 0xbe3   :  { %v8262_v19 = vpop.eup %8261 }
 0xbe4   :  { %v4821_v25 = vmul.f32 %v8262_v19, %v8260_v56  ;;  %5337 = vmatpush.bf16.msrb.mxu2 %v7332_v58  ;;  %v7264_v56 = vor.u32 %v7921_v43, %v7261_v28  ;;  %v7268_v19 = vor.u32 %v7926_v24, %v7267_v51  ;;  %v7968_v58 = vld [vmem:[#allocation16 + $0x1b4] sm:$0xf0]  ;;  %v7956_v43 = vld [vmem:[#allocation16 + $0x15c] sm:$0xf] }
 0xbe5   :  { %v7444_v31 = vor.u32 %v7968_v58, %v7443_v20  ;;  %v7416_v24 = vor.u32 %v7956_v43, %v7413_v17  ;;  %v3903_v20 = vadd.f32 %v9678_v26, %v9282_v36  ;;  %v7277_v43 = vld [vmem:[#allocation16 + $0x70] sm:$0xf0]  ;;  %v7283_v17 = vld [vmem:[#allocation16 + $0x58] sm:$0xf] }
 0xbe6   :  { %v4826_v22 = vpack.c.bf16 %v4821_v25, %v4821_v25  ;;  %v7922_v25 = vld [vmem:[#allocation16 + $0x4c] sm:$0xf]  ;;  %5326 = vmatpush.bf16.msrb.mxu1 %v7264_v56 }
 0xbe8   :  { %4835 = vmatmul.bf16.vlgmr.msra.gmra.mxu0 %v4826_v22  ;;  %4848 = vmatmul.bf16.vlgmr.msra.gmra.mxu1 %v4826_v22 }
 0xbe9   :  { %4861 = vmatmul.bf16.vlgmr.msra.gmra.mxu2 %v4826_v22  ;;  %4874 = vmatmul.bf16.vlgmr.msra.gmra.mxu3 %v4826_v22  ;;  %v7269_v22 = vld [vmem:[#allocation16 + $0x68] sm:$0xf0] }
 0xbea   :  { %5338 = vmatpush.bf16.msrb.mxu2 %v7300_v32  ;;  %v7272_v1 = vor.u32 %v7922_v25, %v7269_v22  ;;  %5327 = vmatpush.bf16.msrb.mxu1 %v7232_v7  ;;  %v9675_v32 = vld [vmem:[#allocation44_spill] sm:$0xff]  ;;  %v7371_v25 = vld [vmem:[#allocation16 + $0x110] sm:$0xf]  ;;  %v7381_v7 = vld [vmem:[#allocation16 + $0x138] sm:$0xf0] }
 0xbeb   :  { %5359 = vmatpush.bf16.msra.mxu0 %v7468_v8  ;;  %v3837_v12 = vadd.f32 %v9675_v32, %v9274_v0  ;;  %v7951_v22 = vld [vmem:[#allocation16 + $0x12c] sm:$0xf0]  ;;  %v7317_v32 = vld [vmem:[#allocation16 + $0xb8] sm:$0xf0] }
 0xbec   :  { %5352 = vmatpush.bf16.msrb.mxu3 %v7272_v1  ;;  %v7947_v1 = vld [vmem:[#allocation16 + $0x114] sm:$0xf]  ;;  %v7372_v0 = vor.u32 %v7951_v22, %v7371_v25  ;;  %v7320_v36 = vor.u32 %v7932_v9, %v7317_v32  ;;  %v7924_v25 = vld [vmem:[#allocation16 + $0x5c] sm:$0xf] }
 0xbed   :  { %v7376_v40 = vor.u32 %v7947_v1, %v7373_v30  ;;  %v7285_v22 = vld [vmem:[#allocation16 + $0x78] sm:$0xf0] }
 0xbee   :  { %5339 = vmatpush.bf16.msrb.mxu2 %v7268_v19  ;;  %5372 = vmatpush.bf16.msra.mxu1 %v7472_v18 }
 0xbef   :  { %5360 = vmatpush.bf16.msra.mxu0 %v7436_v55  ;;  %v7349_v55 = vld [vmem:[#allocation16 + $0xf8] sm:$0xf0] }
 0xbf0   :  { %5353 = vmatpush.bf16.msrb.mxu3 %v7240_v6  ;;  %v3936_v6 = vadd.f32 %v9677_v45, %v9280_v62  ;;  %v7940_v62 = vld [vmem:[#allocation16 + $0xdc] sm:$0xf] }
 0xbf1   :  { %v7352_v58 = vor.u32 %v7940_v62, %v7349_v55 }
 0xbf2   :  { %5340 = vmatpush.bf16.msrb.mxu2 %v7236_v52  ;;  %5373 = vmatpush.bf16.msra.mxu1 %v7440_v61  ;;  %v7384_v52 = vor.u32 %v7948_v35, %v7381_v7  ;;  %v7251_v35 = vld [vmem:[#allocation16 + $0x18] sm:$0xf] }
 0xbf3   :  { %5361 = vmatpush.bf16.msra.mxu0 %v7404_v37  ;;  %v7936_v37 = vld [vmem:[#allocation16 + $0xb4] sm:$0xf0] }
 0xbf4   :  { %5398 = vmatpush.bf16.msra.mxu3 %v7480_v48  ;;  %v7344_v48 = vor.u32 %v7939_v4, %v7341_v33  ;;  %v7316_v10 = vor.u32 %v7936_v37, %v7315_v5  ;;  %v7920_v7 = vld [vmem:[#allocation16 + $0x34] sm:$0xf0] }
 0xbf6   :  { %5385 = vmatpush.bf16.msra.mxu2 %v7476_v47  ;;  %5374 = vmatpush.bf16.msra.mxu1 %v7408_v39  ;;  %v7944_v47 = vld [vmem:[#allocation16 + $0xf4] sm:$0xf0]  ;;  %v7923_v39 = vld [vmem:[#allocation16 + $0x54] sm:$0xf] }
 0xbf7   :  { %5362 = vmatpush.bf16.msra.mxu0 %v7372_v0  ;;  %v7348_v61 = vor.u32 %v7944_v47, %v7347_v38 }
 0xbf8   :  { %5399 = vmatpush.bf16.msra.mxu3 %v7448_v16 }
 0xbfa   :  { %5386 = vmatpush.bf16.msra.mxu2 %v7444_v31  ;;  %5375 = vmatpush.bf16.msra.mxu1 %v7376_v40  ;;  %v7309_v31 = vld [vmem:[#allocation16 + $0xb0] sm:$0xf0] }
 0xbfb   :  { %5363 = vmatpush.bf16.msra.mxu0 %v7340_v46  ;;  %v7312_v60 = vor.u32 %v7931_v50, %v7309_v31  ;;  %v7915_v40 = vld [vmem:[#allocation16 + $0x14] sm:$0xf] }
 0xbfc   :  { %5400 = vmatpush.bf16.msra.mxu3 %v7416_v24 }
 0xbfe   :  { %5387 = vmatpush.bf16.msra.mxu2 %v7412_v49  ;;  %5376 = vmatpush.bf16.msra.mxu1 %v7344_v48 }
 0xbff   :  { %5364 = vmatpush.bf16.msra.mxu0 %v7308_v3 }
 0xc00   :  { %5401 = vmatpush.bf16.msra.mxu3 %v7384_v52  ;;  %v7916_v52 = vld [vmem:[#allocation16 + $0x1c] sm:$0xf] }
 0xc02   :  { %5388 = vmatpush.bf16.msra.mxu2 %v7380_v15  ;;  %5377 = vmatpush.bf16.msra.mxu1 %v7312_v60  ;;  %v7245_v15 = vld [vmem:[#allocation16 + $0x30] sm:$0xf0] }
 0xc03   :  { %v7248_v45 = vor.u32 %v7915_v40, %v7245_v15 }
 0xc04   :  { %5402 = vmatpush.bf16.msra.mxu3 %v7352_v58 }
 0xc06   :  { %5389 = vmatpush.bf16.msra.mxu2 %v7348_v61 }
 0xc08   :  { %5403 = vmatpush.bf16.msra.mxu3 %v7320_v36 }
 0xc0a   :  { %5390 = vmatpush.bf16.msra.mxu2 %v7316_v10 }
 0xc65   :  { %v4836_v28 = vpop.f32.mrf.mxu0  ;;  %v4849_v51 = vpop.f32.mrf.mxu1 }
 0xc66   :  { %v4879_v56 = vadd.f32 %v4836_v28, %v3837_v12  ;;  %v4880_v19 = vadd.f32 %v4849_v51, %v3870_v14  ;;  %v7275_v12 = vld [vmem:[#allocation16 + $0x50] sm:$0xf]  ;;  %v7928_v28 = vld [vmem:[#allocation16 + $0x74] sm:$0xf0] }
 0xc67   :  { %v7927_v14 = vld [vmem:[#allocation16 + $0x6c] sm:$0xf0]  ;;  %v7284_v27 = vor.u32 %v7928_v28, %v7283_v17 }
 0xc68   :  { %v4883_v63 = vsub.f32 0.0, %v4879_v56  ;;  %v4888_v41 = vsub.f32 0.0, %v4880_v19  ;;  %v7276_v56 = vor.u32 %v7927_v14, %v7275_v12  ;;  %v7280_v19 = vor.u32 %v7923_v39, %v7277_v43 }
 0xc69   :  { %5391 = vmatpush.bf16.msra.mxu2 %v7284_v27 }
 0xc6a   :  { %v4884_v2 = vmul.f32 1.442695, %v4883_v63  ;;  %v4889_v57 = vmul.f32 1.442695, %v4888_v41  ;;  %v7919_v63 = vld [vmem:[#allocation16 + $0x2c] sm:$0xf0]  ;;  %v7288_v41 = vor.u32 %v7924_v25, %v7285_v22  ;;  %5365 = vmatpush.bf16.msra.mxu0 %v7276_v56  ;;  %5378 = vmatpush.bf16.msra.mxu1 %v7280_v19 }
 0xc6c   :  { %8263 = vpow2.f32 %v4884_v2  ;;  %v4862_v8 = vpop.f32.mrf.mxu2  ;;  %v4875_v18 = vpop.f32.mrf.mxu3  ;;  %v7253_v2 = vld [vmem:[#allocation16 + $0x38] sm:$0xf0]  ;;  %5404 = vmatpush.bf16.msra.mxu3 %v7288_v41 }
 0xc6d   :  { %8265 = vpow2.f32 %v4889_v57  ;;  %v4882_v13 = vadd.f32 %v4875_v18, %v3936_v6  ;;  %v4838_v42 = vpop.f32.mrf.mxu0  ;;  %v4851_v44 = vpop.f32.mrf.mxu1  ;;  %v4881_v11 = vadd.f32 %v4862_v8, %v3903_v20  ;;  %v7244_v57 = vor.u32 %v7919_v63, %v7243_v53 }
 0xc6e   :  { %v7252_v6 = vor.u32 %v7920_v7, %v7251_v35  ;;  %v7256_v54 = vor.u32 %v7916_v52, %v7253_v2  ;;  %5379 = vmatpush.bf16.msra.mxu1 %v7248_v45 }
 0xc6f   :  { %v4894_v16 = vsub.f32 0.0, %v4882_v13  ;;  %5366 = vmatpush.bf16.msra.mxu0 %v7244_v57 }
 0xc70   :  { %5392 = vmatpush.bf16.msra.mxu2 %v7252_v6  ;;  %5405 = vmatpush.bf16.msra.mxu3 %v7256_v54 }
 0xc71   :  { %v4895_v59 = vmul.f32 1.442695, %v4894_v16 }
 0xc72   :  { %v8264_v49 = vpop.eup %8263 }
 0xc73   :  { %v8266_v51 = vpop.eup %8265  ;;  %v4886_v24 = vadd.f32 1.0, %v8264_v49  ;;  %8267 = vpow2.f32 %v4895_v59 }
 0xc74   :  { %v4891_v1 = vadd.f32 1.0, %v8266_v51  ;;  %8269 = vtanh.f32 %v4881_v11  ;;  %v4864_v0 = vpop.f32.mrf.mxu2  ;;  %v4877_v30 = vpop.f32.mrf.mxu3 }
 0xc75   :  { %8271 = vrcp.f32 %v4886_v24 }
 0xc76   :  { %8273 = vrcp.f32 %v4891_v1 }
 0xc79   :  { %v8268_v21 = vpop.eup %8267 }
 0xc7a   :  { %v8270_v4 = vpop.eup %8269  ;;  %v4897_v33 = vadd.f32 1.0, %v8268_v21 }
 0xc7b   :  { %v8272_v8 = vpop.eup %8271 }
 0xc7c   :  { %v8274_v18 = vpop.eup %8273  ;;  %v4900_v46 = vmul.f32 %v8272_v8, %v8270_v4  ;;  %8275 = vrcp.f32 %v4897_v33 }
 0xc7d   :  { %v4899_v38 = vmul.f32 %v8274_v18, %v9562_v23  ;;  %v4969_v23 = vld [vmem:[%s9596_s10] sm:$0xff]  ;;  %s8484_s10 = smov [#allocation18]  }
 0xc7e   :  { %v4972_v55 = vperm.slane %v4969_v23, 1  ;;  %v4973_v20 = vperm.slane %v4969_v23, 2  ;;  %v4974_v61 = vperm.slane %v4969_v23, 3  ;;  %v4971_v58 = vperm.slane %v4969_v23, 0  ;;  %s5443_s25 = sshll.u32 %s8484_s10, 4  ;;  %s5444_s25 = int_to_ptr.vmem [resolvable:$true] %s5443_s25 }
 0xc7f   :  { %v4901_v47 = vadd.f32 %v4900_v46, %v4899_v38  ;;  %v4976_v39 = vperm.slane %v4969_v23, 5  ;;  %v4977_v17 = vperm.slane %v4969_v23, 6  ;;  %v4978_v28 = vperm.slane %v4969_v23, 7 }
 0xc80   :  { %v4975_v51 = vperm.slane %v4969_v23, 4 }
 0xc81   :  { %8277 = vtanh.f32 %v4901_v47 }
 0xc82   :  { %v8276_v13 = vpop.eup %8275 }
 0xc87   :  { %v8278_v42 = vpop.eup %8277 }
 0xc88   :  { %v4903_v44 = vmul.f32 %v8278_v42, %v8276_v13 }
 0xc8a   :  { %v4904_v48 = vpack.c.bf16 %v4903_v44, %v4903_v44 }
 0xc8c   :  { %5315 = vmatmul.bf16.vlgmr.msrb.gmra.mxu0 %v4904_v48  ;;  %5328 = vmatmul.bf16.vlgmr.msrb.gmra.mxu1 %v4904_v48 }
 0xc8d   :  { %5341 = vmatmul.bf16.vlgmr.msrb.gmra.mxu2 %v4904_v48  ;;  %5354 = vmatmul.bf16.vlgmr.msrb.gmra.mxu3 %v4904_v48 }
 0xc9c   :  { %5367 = vmatmul.bf16.vlgmr.msra.gmra.mxu0 %v4904_v48  ;;  %5380 = vmatmul.bf16.vlgmr.msra.gmra.mxu1 %v4904_v48 }
 0xc9d   :  { %5393 = vmatmul.bf16.vlgmr.msra.gmra.mxu2 %v4904_v48  ;;  %5406 = vmatmul.bf16.vlgmr.msra.gmra.mxu3 %v4904_v48 }
 0xd09   :  { %v5316_v62 = vpop.f32.mrf.mxu0  ;;  %v5329_v34 = vpop.f32.mrf.mxu1 }
 0xd0a   :  { %v5330_v26 = vadd.f32 %v5329_v34, %v4972_v55  ;;  %v5317_v37 = vadd.f32 %v5316_v62, %v4971_v58 }
 0xd0c   :  { %v5419_v31 = vrot.slane %v5330_v26, 6 }
 0xd0e   :  { %v5426_v9 = vsel %vm5425_vm1, %v5317_v37, %v5419_v31 }
 0xd10   :  { %v5342_v29 = vpop.f32.mrf.mxu2  ;;  %v5355_v50 = vpop.f32.mrf.mxu3 }
 0xd11   :  { %v5343_v16 = vadd.f32 %v5342_v29, %v4973_v20  ;;  %v5356_v3 = vadd.f32 %v5355_v50, %v4974_v61  ;;  %v5318_v60 = vpop.f32.mrf.mxu0  ;;  %v5331_v5 = vpop.f32.mrf.mxu1 }
 0xd13   :  { %v5420_v11 = vrot.slane %v5343_v16, 4  ;;  %v5421_v10 = vrot.slane %v5356_v3, 2 }
 0xd15   :  { %v5428_v32 = vsel %vm5427_vm2, %v5420_v11, %v5421_v10 }
 0xd16   :  { %v5430_v12 = vsel %vm5429_vm3, %v5426_v9, %v5428_v32 }
 0xd17   :  { %5436 = vst [vmem:[#allocation18] sm:$0xff] %v5430_v12 }
 0xd18   :  { %v5344_v59 = vpop.f32.mrf.mxu2  ;;  %v5357_v36 = vpop.f32.mrf.mxu3 }
 0xd19   :  { %v5368_v14 = vpop.f32.mrf.mxu0  ;;  %v5381_v49 = vpop.f32.mrf.mxu1 }
 0xd1a   :  { %v5382_v43 = vadd.f32 %v5381_v49, %v4976_v39  ;;  %v5369_v30 = vadd.f32 %v5368_v14, %v4975_v51 }
 0xd1c   :  { %v5422_v19 = vrot.slane %v5382_v43, 6 }
 0xd1e   :  { %v5431_v63 = vsel %vm5425_vm1, %v5369_v30, %v5422_v19 }
 0xd20   :  { %v5394_v24 = vpop.f32.mrf.mxu2  ;;  %v5407_v56 = vpop.f32.mrf.mxu3 }
 0xd21   :  { %v5395_v25 = vadd.f32 %v5394_v24, %v4977_v17  ;;  %v5408_v22 = vadd.f32 %v5407_v56, %v4978_v28  ;;  %v5370_v1 = vpop.f32.mrf.mxu0  ;;  %v5383_v0 = vpop.f32.mrf.mxu1 }
 0xd23   :  { %v5423_v27 = vrot.slane %v5395_v25, 4  ;;  %v5424_v53 = vrot.slane %v5408_v22, 2 }
 0xd25   :  { %v5432_v41 = vsel %vm5427_vm2, %v5423_v27, %v5424_v53 }
 0xd26   :  { %v5433_v40 = vsel %vm5429_vm3, %v5431_v63, %v5432_v41 }
 0xd27   :  { %5437 = vst [vmem:[#allocation18 + $0x8] sm:$0xff] %v5433_v40 }
 0xd28   :  { %v5396_v15 = vpop.f32.mrf.mxu2  ;;  %v5409_v35 = vpop.f32.mrf.mxu3  ;;  %5448 = dma.vmem_to_hbm [thread:$0]  %s5444_s25, 256, %s5446_s7, [#allocation9]  }
 0xd29   :  { %8469 = dma.done.wait [#allocation9], 256  }
 0xd2a   :  { %8470 = vsyncadd [#allocation9], 4294967040 }
 0xd2b   :  { %5453 = vsyncpa [#allocation8], 1 }
 0xd2c   :  { %5454 = vsyncpa [#allocation11], 1 }
 0xd2d   :  { %5455 = vsyncpa [#allocation14], 1 }
 0xd2e   :  { %5456 = vsyncpa [#allocation17], 1 }
 0xd2f   :  { %5457 = vsyncpa [#allocation9], 1 }

</bundles_post_ra>
